<compile_context>
chip_gen: v7x
topology: tpu7x:2x2x1
jax: 0.10.0
libtpu: 0.0.40
codegen_flags: <defaults>
</compile_context>

<pallas_src>
import functools

import numpy as np
import jax
import jax.numpy as jnp
from jax.experimental import pallas as pl
from jax.experimental.pallas import tpu as pltpu

EPS = 1e-5
H = W = 28        # input spatial size implied by the architecture (MNIST)
OFF = 64          # canvas guard rows at each end (>= max shift 2*W+2 = 58)


def _round_up(x, m):
    return (x + m - 1) // m * m


def _canvas_rows(n):
    return _round_up(OFF + n * H * W + OFF, 128)


# ----------------------------- in-kernel helpers -----------------------------

def _shift_cols(x, s, r_pad):
    """y[:, r] = x[:, (r + s) % r_pad] (static circular shift along lanes)."""
    k = s % r_pad
    if k == 0:
        return x
    return jnp.concatenate([x[:, k:], x[:, :k]], axis=1)


def _conv_patches(act, kh, kw, dil, off, r_pad):
    """Stack shifted canvas copies into (kh*kw*Cin, R), ordered (ki, kj, ci)."""
    pieces = []
    for ki in range(kh):
        for kj in range(kw):
            s = dil * (ki + off) * W + dil * (kj + off)
            pieces.append(_shift_cols(act, s, r_pad))
    if len(pieces) == 1:
        return pieces[0]
    return jnp.concatenate(pieces, axis=0)


# ----------------------------- fused network kernel -----------------------------

def _net_kernel(x_ref,
                w1_ref, s1_ref, b1_ref,
                w2_ref, s2_ref, b2_ref,
                w3_ref,
                w4_ref, s4_ref, b4_ref,
                w5_ref, s5_ref, b5_ref,
                w6_ref, s6_ref, b6_ref,
                mask6_ref,
                w7_ref, s7_ref, b7_ref,
                gap_ref, w8_ref,
                o_ref):
    r_pad = x_ref.shape[1]

    def conv(act_bf16, w_ref, kh, kw, dil, off):
        patches = _conv_patches(act_bf16, kh, kw, dil, off, r_pad)
        return jnp.dot(w_ref[...], patches, preferred_element_type=jnp.float32)

    def relu_affine(y, s_ref, b_ref):
        # conv -> ReLU -> BatchNorm(eval) folded to scale/shift; Dropout = id.
        return jnp.maximum(y, 0.0) * s_ref[...] + b_ref[...]

    # ---- stage 1: 28x28 canvas, dilation 1 ----
    a = x_ref[...]                                                     # (1, R) bf16
    a = relu_affine(conv(a, w1_ref, 3, 3, 1, 0), s1_ref, b1_ref)       # (16, R)
    a = relu_affine(conv(a.astype(jnp.bfloat16), w2_ref, 3, 3, 1, 0),
                    s2_ref, b2_ref)                                    # (32, R)
    a = conv(a.astype(jnp.bfloat16), w3_ref, 1, 1, 1, 0)               # (10, R)

    # ---- fused 2x2/2 maxpool: results stay at even canvas coordinates ----
    a = jnp.maximum(jnp.maximum(a, _shift_cols(a, 1, r_pad)),
                    jnp.maximum(_shift_cols(a, W, r_pad),
                                _shift_cols(a, W + 1, r_pad)))         # (10, R)

    # ---- stage 2: pooled features at even coords -> dilation-2 shifts ----
    a = relu_affine(conv(a.astype(jnp.bfloat16), w4_ref, 3, 3, 2, 0), s4_ref, b4_ref)
    a = relu_affine(conv(a.astype(jnp.bfloat16), w5_ref, 3, 3, 2, 0), s5_ref, b5_ref)
    a = relu_affine(conv(a.astype(jnp.bfloat16), w6_ref, 3, 3, 2, 0), s6_ref, b6_ref)
    # zero everything outside the valid 6x6 region => implements conv7's padding=1
    a = a * mask6_ref[...]
    a = relu_affine(conv(a.astype(jnp.bfloat16), w7_ref, 3, 3, 2, -1), s7_ref, b7_ref)

    # ---- GAP (MXU contraction, 1/36 folded into gap matrix) + 1x1 head ----
    pooled = jnp.dot(a, gap_ref[...], preferred_element_type=jnp.float32)      # (16, N)
    logits = jnp.dot(w8_ref[...], pooled, preferred_element_type=jnp.float32)  # (10, N)
    m = jnp.max(logits, axis=0, keepdims=True)
    z = logits - m
    lse = jnp.log(jnp.sum(jnp.exp(z), axis=0, keepdims=True))
    o_ref[...] = z - lse                                               # (10, N) log-probs


# ----------------------------- host-side packing -----------------------------

def _pack_conv_weight(w):
    # PyTorch (Cout, Cin, KH, KW) -> (Cout, KH*KW*Cin), ordered (ki, kj, ci).
    cout, cin, kh, kw = w.shape
    return jnp.transpose(w, (0, 2, 3, 1)).reshape(cout, kh * kw * cin)


def _fold_bn(bn):
    scale = bn["gamma"] / jnp.sqrt(bn["var"] + EPS)
    shift = bn["beta"] - bn["mean"] * scale
    return scale.astype(jnp.float32), shift.astype(jnp.float32)


@functools.lru_cache(maxsize=None)
def _index_helpers(n):
    """mask (1,R): 1 at valid 6x6 positions; gap (R,N): 1/36 at the same rows."""
    r_pad = _canvas_rows(n)
    k = np.arange(36)
    within = OFF + 56 * (k // 6) + 2 * (k % 6)          # even canvas coords
    mask = np.zeros((1, r_pad), np.float32)
    gap = np.zeros((r_pad, n), np.float32)
    for b in range(n):
        idx = b * H * W + within
        mask[0, idx] = 1.0
        gap[idx, b] = 1.0 / 36.0
    return mask, gap


def _to_canvas(x_nchw, r_pad):
    n = x_nchw.shape[0]
    flat = x_nchw.reshape(n * H * W)                     # Cin = 1
    flat = jnp.pad(flat, (OFF, r_pad - OFF - n * H * W))
    return flat.reshape(1, r_pad).astype(jnp.bfloat16)


@jax.jit
def net_forward(x_nchw, params):
    n = x_nchw.shape[0]
    r_pad = _canvas_rows(n)
    mask_np, gap_np = _index_helpers(n)

    def wbf(name):
        return _pack_conv_weight(params[name]).astype(jnp.bfloat16)

    def col(v):
        return v.reshape(-1, 1)

    s1, b1 = _fold_bn(params["bn1"]); s2, b2 = _fold_bn(params["bn2"])
    s4, b4 = _fold_bn(params["bn4"]); s5, b5 = _fold_bn(params["bn5"])
    s6, b6 = _fold_bn(params["bn6"]); s7, b7 = _fold_bn(params["bn7"])

    inputs = [
        _to_canvas(x_nchw, r_pad),
        wbf("w1"), col(s1), col(b1),
        wbf("w2"), col(s2), col(b2),
        wbf("w3"),
        wbf("w4"), col(s4), col(b4),
        wbf("w5"), col(s5), col(b5),
        wbf("w6"), col(s6), col(b6),
        jnp.asarray(mask_np),
        wbf("w7"), col(s7), col(b7),
        jnp.asarray(gap_np),
        _pack_conv_weight(params["w8"]).astype(jnp.float32),
    ]

    out_t = pl.pallas_call(
        _net_kernel,
        grid=(1,),
        in_specs=[pl.BlockSpec(a.shape, lambda i: (0, 0)) for a in inputs],
        out_specs=pl.BlockSpec((10, n), lambda i: (0, 0)),
        out_shape=jax.ShapeDtypeStruct((10, n), jnp.float32),
        compiler_params=pltpu.CompilerParams(
            dimension_semantics=("arbitrary",),
            vmem_limit_bytes=32 * 1024 * 1024),
    )(*inputs)
    return out_t.T                                       # (N, 10) log-probs


# ----------------------------- pure-JAX reference (test only) -----------------------------

@jax.jit
def _net_reference(x, params):
    f32 = jnp.float32

    def q(v):   # same bf16 operand rounding as the kernel, f32 accumulation
        return v.astype(jnp.bfloat16).astype(f32)

    def conv(a, w, pad):
        return jax.lax.conv_general_dilated(
            q(a), q(w), window_strides=(1, 1),
            padding=((pad, pad), (pad, pad)),
            dimension_numbers=("NCHW", "OIHW", "NCHW"),
            preferred_element_type=f32)

    def block(a, w, bn, pad):
        s, b = _fold_bn(bn)
        y = jnp.maximum(conv(a, w, pad), 0.0)
        return y * s.reshape(1, -1, 1, 1) + b.reshape(1, -1, 1, 1)

    a = block(x, params["w1"], params["bn1"], 0)
    a = block(a, params["w2"], params["bn2"], 0)
    a = conv(a, params["w3"], 0)
    a = jnp.maximum(jnp.maximum(a[:, :, 0::2, 0::2], a[:, :, 0::2, 1::2]),
                    jnp.maximum(a[:, :, 1::2, 0::2], a[:, :, 1::2, 1::2]))
    a = block(a, params["w4"], params["bn4"], 0)
    a = block(a, params["w5"], params["bn5"], 0)
    a = block(a, params["w6"], params["bn6"], 0)
    a = block(a, params["w7"], params["bn7"], 1)
    pooled = jnp.mean(a, axis=(2, 3))                    # (N, 16)
    logits = pooled @ params["w8"].reshape(10, 16).T
    return jax.nn.log_softmax(logits, axis=-1)


# ----------------------------- params / main -----------------------------

def init_params(key):
    shapes = {
        "w1": (16, 1, 3, 3), "w2": (32, 16, 3, 3), "w3": (10, 32, 1, 1),
        "w4": (16, 10, 3, 3), "w5": (16, 16, 3, 3), "w6": (16, 16, 3, 3),
        "w7": (16, 16, 3, 3), "w8": (10, 16, 1, 1),
    }
    params = {}
    keys = jax.random.split(key, len(shapes))
    for k, (name, shp) in zip(keys, sorted(shapes.items())):
        fan_in = shp[1] * shp[2] * shp[3]
        params[name] = (jax.random.normal(k, shp, jnp.float32)
                        * (1.0 / jnp.sqrt(fan_in)))
    # Non-trivial BN running stats so the fold is actually exercised.
    for i, (name, c) in enumerate([("bn1", 16), ("bn2", 32), ("bn4", 16),
                                   ("bn5", 16), ("bn6", 16), ("bn7", 16)]):
        k1, k2, k3, k4 = jax.random.split(jax.random.fold_in(key, 100 + i), 4)
        params[name] = {
            "gamma": 1.0 + 0.1 * jax.random.normal(k1, (c,), jnp.float32),
            "beta": 0.1 * jax.random.normal(k2, (c,), jnp.float32),
            "mean": 0.1 * jax.random.normal(k3, (c,), jnp.float32),
            "var": 1.0 + 0.1 * jax.random.uniform(k4, (c,), jnp.float32),
        }
    return params


if __name__ == "__main__":
    key = jax.random.PRNGKey(0)
    pkey, xkey = jax.random.split(key)
    params = init_params(pkey)
    x = jax.random.normal(xkey, (2, 1, 28, 28), jnp.float32)   # MNIST-style input

    out = jax.block_until_ready(net_forward(x, params))
    ref = jax.block_until_ready(_net_reference(x, params))

    assert out.shape == (2, 10), out.shape
    assert bool(jnp.all(jnp.isfinite(out)))
    # log_softmax rows exp-sum to 1
    assert bool(jnp.allclose(jnp.sum(jnp.exp(out), axis=-1), 1.0, atol=1e-4))
    # matches the pure-JAX reference (same bf16 operand rounding, f32 accum)
    err = float(jnp.max(jnp.abs(out - ref)))
    assert err < 5e-2, (err, out, ref)
    print("KERNEL_OK")
</pallas_src>

<mosaic_0001>
module attributes {stable_mosaic.version = 11 : i64} {
  func.func @_net_kernel(%arg0: i32, %arg1: memref<1x1792xbf16, #tpu.memory_space<vmem>>, %arg2: memref<16x9xbf16, #tpu.memory_space<vmem>>, %arg3: memref<16x1xf32, #tpu.memory_space<vmem>>, %arg4: memref<16x1xf32, #tpu.memory_space<vmem>>, %arg5: memref<32x144xbf16, #tpu.memory_space<vmem>>, %arg6: memref<32x1xf32, #tpu.memory_space<vmem>>, %arg7: memref<32x1xf32, #tpu.memory_space<vmem>>, %arg8: memref<10x32xbf16, #tpu.memory_space<vmem>>, %arg9: memref<16x90xbf16, #tpu.memory_space<vmem>>, %arg10: memref<16x1xf32, #tpu.memory_space<vmem>>, %arg11: memref<16x1xf32, #tpu.memory_space<vmem>>, %arg12: memref<16x144xbf16, #tpu.memory_space<vmem>>, %arg13: memref<16x1xf32, #tpu.memory_space<vmem>>, %arg14: memref<16x1xf32, #tpu.memory_space<vmem>>, %arg15: memref<16x144xbf16, #tpu.memory_space<vmem>>, %arg16: memref<16x1xf32, #tpu.memory_space<vmem>>, %arg17: memref<16x1xf32, #tpu.memory_space<vmem>>, %arg18: memref<1x1792xf32, #tpu.memory_space<vmem>>, %arg19: memref<16x144xbf16, #tpu.memory_space<vmem>>, %arg20: memref<16x1xf32, #tpu.memory_space<vmem>>, %arg21: memref<16x1xf32, #tpu.memory_space<vmem>>, %arg22: memref<1792x2xf32, #tpu.memory_space<vmem>>, %arg23: memref<10x16xf32, #tpu.memory_space<vmem>>, %arg24: memref<10x2xf32, #tpu.memory_space<vmem>>) attributes {dimension_semantics = [#tpu.dimension_semantics<arbitrary>], iteration_bounds = array<i64: 1>, scalar_prefetch = 0 : i64, scratch_operands = 0 : i64, tpu.core_type = #tpu.core_type<tc>, window_params = [{pipeline_mode = #tpu.pipeline_mode<synchronous>, transform_indices = @transform_0, window_bounds = array<i64: 1, 1792>}, {pipeline_mode = #tpu.pipeline_mode<synchronous>, transform_indices = @transform_1, window_bounds = array<i64: 16, 9>}, {pipeline_mode = #tpu.pipeline_mode<synchronous>, transform_indices = @transform_2, window_bounds = array<i64: 16, 1>}, {pipeline_mode = #tpu.pipeline_mode<synchronous>, transform_indices = @transform_3, window_bounds = array<i64: 16, 1>}, {pipeline_mode = #tpu.pipeline_mode<synchronous>, transform_indices = @transform_4, window_bounds = array<i64: 32, 144>}, {pipeline_mode = #tpu.pipeline_mode<synchronous>, transform_indices = @transform_5, window_bounds = array<i64: 32, 1>}, {pipeline_mode = #tpu.pipeline_mode<synchronous>, transform_indices = @transform_6, window_bounds = array<i64: 32, 1>}, {pipeline_mode = #tpu.pipeline_mode<synchronous>, transform_indices = @transform_7, window_bounds = array<i64: 10, 32>}, {pipeline_mode = #tpu.pipeline_mode<synchronous>, transform_indices = @transform_8, window_bounds = array<i64: 16, 90>}, {pipeline_mode = #tpu.pipeline_mode<synchronous>, transform_indices = @transform_9, window_bounds = array<i64: 16, 1>}, {pipeline_mode = #tpu.pipeline_mode<synchronous>, transform_indices = @transform_10, window_bounds = array<i64: 16, 1>}, {pipeline_mode = #tpu.pipeline_mode<synchronous>, transform_indices = @transform_11, window_bounds = array<i64: 16, 144>}, {pipeline_mode = #tpu.pipeline_mode<synchronous>, transform_indices = @transform_12, window_bounds = array<i64: 16, 1>}, {pipeline_mode = #tpu.pipeline_mode<synchronous>, transform_indices = @transform_13, window_bounds = array<i64: 16, 1>}, {pipeline_mode = #tpu.pipeline_mode<synchronous>, transform_indices = @transform_14, window_bounds = array<i64: 16, 144>}, {pipeline_mode = #tpu.pipeline_mode<synchronous>, transform_indices = @transform_15, window_bounds = array<i64: 16, 1>}, {pipeline_mode = #tpu.pipeline_mode<synchronous>, transform_indices = @transform_16, window_bounds = array<i64: 16, 1>}, {pipeline_mode = #tpu.pipeline_mode<synchronous>, transform_indices = @transform_17, window_bounds = array<i64: 1, 1792>}, {pipeline_mode = #tpu.pipeline_mode<synchronous>, transform_indices = @transform_18, window_bounds = array<i64: 16, 144>}, {pipeline_mode = #tpu.pipeline_mode<synchronous>, transform_indices = @transform_19, window_bounds = array<i64: 16, 1>}, {pipeline_mode = #tpu.pipeline_mode<synchronous>, transform_indices = @transform_20, window_bounds = array<i64: 16, 1>}, {pipeline_mode = #tpu.pipeline_mode<synchronous>, transform_indices = @transform_21, window_bounds = array<i64: 1792, 2>}, {pipeline_mode = #tpu.pipeline_mode<synchronous>, transform_indices = @transform_22, window_bounds = array<i64: 10, 16>}, {pipeline_mode = #tpu.pipeline_mode<synchronous>, transform_indices = @transform_23, window_bounds = array<i64: 10, 2>}]} {
    %c0 = arith.constant 0 : index
    %c0_0 = arith.constant 0 : index
    %0 = vector.load %arg1[%c0, %c0_0] : memref<1x1792xbf16, #tpu.memory_space<vmem>>, vector<1x1792xbf16>
    %1 = vector.extract_strided_slice %0 {offsets = [0, 1], sizes = [1, 1791], strides = [1, 1]} : vector<1x1792xbf16> to vector<1x1791xbf16>
    %2 = vector.extract_strided_slice %0 {offsets = [0, 0], sizes = [1, 1], strides = [1, 1]} : vector<1x1792xbf16> to vector<1x1xbf16>
    %3 = tpu.concatenate %1, %2 in 1 : vector<1x1791xbf16>, vector<1x1xbf16> -> vector<1x1792xbf16>
    %4 = vector.extract_strided_slice %0 {offsets = [0, 2], sizes = [1, 1790], strides = [1, 1]} : vector<1x1792xbf16> to vector<1x1790xbf16>
    %5 = vector.extract_strided_slice %0 {offsets = [0, 0], sizes = [1, 2], strides = [1, 1]} : vector<1x1792xbf16> to vector<1x2xbf16>
    %6 = tpu.concatenate %4, %5 in 1 : vector<1x1790xbf16>, vector<1x2xbf16> -> vector<1x1792xbf16>
    %7 = vector.extract_strided_slice %0 {offsets = [0, 28], sizes = [1, 1764], strides = [1, 1]} : vector<1x1792xbf16> to vector<1x1764xbf16>
    %8 = vector.extract_strided_slice %0 {offsets = [0, 0], sizes = [1, 28], strides = [1, 1]} : vector<1x1792xbf16> to vector<1x28xbf16>
    %9 = tpu.concatenate %7, %8 in 1 : vector<1x1764xbf16>, vector<1x28xbf16> -> vector<1x1792xbf16>
    %10 = vector.extract_strided_slice %0 {offsets = [0, 29], sizes = [1, 1763], strides = [1, 1]} : vector<1x1792xbf16> to vector<1x1763xbf16>
    %11 = vector.extract_strided_slice %0 {offsets = [0, 0], sizes = [1, 29], strides = [1, 1]} : vector<1x1792xbf16> to vector<1x29xbf16>
    %12 = tpu.concatenate %10, %11 in 1 : vector<1x1763xbf16>, vector<1x29xbf16> -> vector<1x1792xbf16>
    %13 = vector.extract_strided_slice %0 {offsets = [0, 30], sizes = [1, 1762], strides = [1, 1]} : vector<1x1792xbf16> to vector<1x1762xbf16>
    %14 = vector.extract_strided_slice %0 {offsets = [0, 0], sizes = [1, 30], strides = [1, 1]} : vector<1x1792xbf16> to vector<1x30xbf16>
    %15 = tpu.concatenate %13, %14 in 1 : vector<1x1762xbf16>, vector<1x30xbf16> -> vector<1x1792xbf16>
    %16 = vector.extract_strided_slice %0 {offsets = [0, 56], sizes = [1, 1736], strides = [1, 1]} : vector<1x1792xbf16> to vector<1x1736xbf16>
    %17 = vector.extract_strided_slice %0 {offsets = [0, 0], sizes = [1, 56], strides = [1, 1]} : vector<1x1792xbf16> to vector<1x56xbf16>
    %18 = tpu.concatenate %16, %17 in 1 : vector<1x1736xbf16>, vector<1x56xbf16> -> vector<1x1792xbf16>
    %19 = vector.extract_strided_slice %0 {offsets = [0, 57], sizes = [1, 1735], strides = [1, 1]} : vector<1x1792xbf16> to vector<1x1735xbf16>
    %20 = vector.extract_strided_slice %0 {offsets = [0, 0], sizes = [1, 57], strides = [1, 1]} : vector<1x1792xbf16> to vector<1x57xbf16>
    %21 = tpu.concatenate %19, %20 in 1 : vector<1x1735xbf16>, vector<1x57xbf16> -> vector<1x1792xbf16>
    %22 = vector.extract_strided_slice %0 {offsets = [0, 58], sizes = [1, 1734], strides = [1, 1]} : vector<1x1792xbf16> to vector<1x1734xbf16>
    %23 = vector.extract_strided_slice %0 {offsets = [0, 0], sizes = [1, 58], strides = [1, 1]} : vector<1x1792xbf16> to vector<1x58xbf16>
    %24 = tpu.concatenate %22, %23 in 1 : vector<1x1734xbf16>, vector<1x58xbf16> -> vector<1x1792xbf16>
    %25 = tpu.concatenate %0, %3, %6, %9, %12, %15, %18, %21, %24 in 0 : vector<1x1792xbf16>, vector<1x1792xbf16>, vector<1x1792xbf16>, vector<1x1792xbf16>, vector<1x1792xbf16>, vector<1x1792xbf16>, vector<1x1792xbf16>, vector<1x1792xbf16>, vector<1x1792xbf16> -> vector<9x1792xbf16>
    %c0_1 = arith.constant 0 : index
    %c0_2 = arith.constant 0 : index
    %26 = vector.load %arg2[%c0_1, %c0_2] : memref<16x9xbf16, #tpu.memory_space<vmem>>, vector<16x9xbf16>
    %cst = arith.constant dense<0.000000e+00> : vector<16x1792xf32>
    %27 = tpu.matmul %26, %25, %cst {dimension_numbers = #tpu.dot_dimension_numbers<[1], [0], [0], [1], [0, 0, 1, 1], [], []>} : vector<16x9xbf16>, vector<9x1792xbf16>, vector<16x1792xf32> -> vector<16x1792xf32>
    %cst_3 = arith.constant 0.000000e+00 : f32
    %28 = vector.broadcast %cst_3 : f32 to vector<16x1792xf32>
    %29 = arith.maximumf %27, %28 : vector<16x1792xf32>
    %c0_4 = arith.constant 0 : index
    %c0_5 = arith.constant 0 : index
    %30 = vector.load %arg3[%c0_4, %c0_5] : memref<16x1xf32, #tpu.memory_space<vmem>>, vector<16x1xf32>
    %31 = vector.broadcast %30 : vector<16x1xf32> to vector<16x1792xf32>
    %32 = arith.mulf %29, %31 : vector<16x1792xf32>
    %c0_6 = arith.constant 0 : index
    %c0_7 = arith.constant 0 : index
    %33 = vector.load %arg4[%c0_6, %c0_7] : memref<16x1xf32, #tpu.memory_space<vmem>>, vector<16x1xf32>
    %34 = vector.broadcast %33 : vector<16x1xf32> to vector<16x1792xf32>
    %35 = arith.addf %32, %34 : vector<16x1792xf32>
    %36 = arith.truncf %35 : vector<16x1792xf32> to vector<16x1792xbf16>
    %37 = vector.extract_strided_slice %36 {offsets = [0, 1], sizes = [16, 1791], strides = [1, 1]} : vector<16x1792xbf16> to vector<16x1791xbf16>
    %38 = vector.extract_strided_slice %36 {offsets = [0, 0], sizes = [16, 1], strides = [1, 1]} : vector<16x1792xbf16> to vector<16x1xbf16>
    %39 = tpu.concatenate %37, %38 in 1 : vector<16x1791xbf16>, vector<16x1xbf16> -> vector<16x1792xbf16>
    %40 = vector.extract_strided_slice %36 {offsets = [0, 2], sizes = [16, 1790], strides = [1, 1]} : vector<16x1792xbf16> to vector<16x1790xbf16>
    %41 = vector.extract_strided_slice %36 {offsets = [0, 0], sizes = [16, 2], strides = [1, 1]} : vector<16x1792xbf16> to vector<16x2xbf16>
    %42 = tpu.concatenate %40, %41 in 1 : vector<16x1790xbf16>, vector<16x2xbf16> -> vector<16x1792xbf16>
    %43 = vector.extract_strided_slice %36 {offsets = [0, 28], sizes = [16, 1764], strides = [1, 1]} : vector<16x1792xbf16> to vector<16x1764xbf16>
    %44 = vector.extract_strided_slice %36 {offsets = [0, 0], sizes = [16, 28], strides = [1, 1]} : vector<16x1792xbf16> to vector<16x28xbf16>
    %45 = tpu.concatenate %43, %44 in 1 : vector<16x1764xbf16>, vector<16x28xbf16> -> vector<16x1792xbf16>
    %46 = vector.extract_strided_slice %36 {offsets = [0, 29], sizes = [16, 1763], strides = [1, 1]} : vector<16x1792xbf16> to vector<16x1763xbf16>
    %47 = vector.extract_strided_slice %36 {offsets = [0, 0], sizes = [16, 29], strides = [1, 1]} : vector<16x1792xbf16> to vector<16x29xbf16>
    %48 = tpu.concatenate %46, %47 in 1 : vector<16x1763xbf16>, vector<16x29xbf16> -> vector<16x1792xbf16>
    %49 = vector.extract_strided_slice %36 {offsets = [0, 30], sizes = [16, 1762], strides = [1, 1]} : vector<16x1792xbf16> to vector<16x1762xbf16>
    %50 = vector.extract_strided_slice %36 {offsets = [0, 0], sizes = [16, 30], strides = [1, 1]} : vector<16x1792xbf16> to vector<16x30xbf16>
    %51 = tpu.concatenate %49, %50 in 1 : vector<16x1762xbf16>, vector<16x30xbf16> -> vector<16x1792xbf16>
    %52 = vector.extract_strided_slice %36 {offsets = [0, 56], sizes = [16, 1736], strides = [1, 1]} : vector<16x1792xbf16> to vector<16x1736xbf16>
    %53 = vector.extract_strided_slice %36 {offsets = [0, 0], sizes = [16, 56], strides = [1, 1]} : vector<16x1792xbf16> to vector<16x56xbf16>
    %54 = tpu.concatenate %52, %53 in 1 : vector<16x1736xbf16>, vector<16x56xbf16> -> vector<16x1792xbf16>
    %55 = vector.extract_strided_slice %36 {offsets = [0, 57], sizes = [16, 1735], strides = [1, 1]} : vector<16x1792xbf16> to vector<16x1735xbf16>
    %56 = vector.extract_strided_slice %36 {offsets = [0, 0], sizes = [16, 57], strides = [1, 1]} : vector<16x1792xbf16> to vector<16x57xbf16>
    %57 = tpu.concatenate %55, %56 in 1 : vector<16x1735xbf16>, vector<16x57xbf16> -> vector<16x1792xbf16>
    %58 = vector.extract_strided_slice %36 {offsets = [0, 58], sizes = [16, 1734], strides = [1, 1]} : vector<16x1792xbf16> to vector<16x1734xbf16>
    %59 = vector.extract_strided_slice %36 {offsets = [0, 0], sizes = [16, 58], strides = [1, 1]} : vector<16x1792xbf16> to vector<16x58xbf16>
    %60 = tpu.concatenate %58, %59 in 1 : vector<16x1734xbf16>, vector<16x58xbf16> -> vector<16x1792xbf16>
    %61 = tpu.concatenate %36, %39, %42, %45, %48, %51, %54, %57, %60 in 0 : vector<16x1792xbf16>, vector<16x1792xbf16>, vector<16x1792xbf16>, vector<16x1792xbf16>, vector<16x1792xbf16>, vector<16x1792xbf16>, vector<16x1792xbf16>, vector<16x1792xbf16>, vector<16x1792xbf16> -> vector<144x1792xbf16>
    %c0_8 = arith.constant 0 : index
    %c0_9 = arith.constant 0 : index
    %62 = vector.load %arg5[%c0_8, %c0_9] : memref<32x144xbf16, #tpu.memory_space<vmem>>, vector<32x144xbf16>
    %cst_10 = arith.constant dense<0.000000e+00> : vector<32x1792xf32>
    %63 = tpu.matmul %62, %61, %cst_10 {dimension_numbers = #tpu.dot_dimension_numbers<[1], [0], [0], [1], [0, 0, 1, 1], [], []>} : vector<32x144xbf16>, vector<144x1792xbf16>, vector<32x1792xf32> -> vector<32x1792xf32>
    %cst_11 = arith.constant 0.000000e+00 : f32
    %64 = vector.broadcast %cst_11 : f32 to vector<32x1792xf32>
    %65 = arith.maximumf %63, %64 : vector<32x1792xf32>
    %c0_12 = arith.constant 0 : index
    %c0_13 = arith.constant 0 : index
    %66 = vector.load %arg6[%c0_12, %c0_13] : memref<32x1xf32, #tpu.memory_space<vmem>>, vector<32x1xf32>
    %67 = vector.broadcast %66 : vector<32x1xf32> to vector<32x1792xf32>
    %68 = arith.mulf %65, %67 : vector<32x1792xf32>
    %c0_14 = arith.constant 0 : index
    %c0_15 = arith.constant 0 : index
    %69 = vector.load %arg7[%c0_14, %c0_15] : memref<32x1xf32, #tpu.memory_space<vmem>>, vector<32x1xf32>
    %70 = vector.broadcast %69 : vector<32x1xf32> to vector<32x1792xf32>
    %71 = arith.addf %68, %70 : vector<32x1792xf32>
    %72 = arith.truncf %71 : vector<32x1792xf32> to vector<32x1792xbf16>
    %c0_16 = arith.constant 0 : index
    %c0_17 = arith.constant 0 : index
    %73 = vector.load %arg8[%c0_16, %c0_17] : memref<10x32xbf16, #tpu.memory_space<vmem>>, vector<10x32xbf16>
    %cst_18 = arith.constant dense<0.000000e+00> : vector<10x1792xf32>
    %74 = tpu.matmul %73, %72, %cst_18 {dimension_numbers = #tpu.dot_dimension_numbers<[1], [0], [0], [1], [0, 0, 1, 1], [], []>} : vector<10x32xbf16>, vector<32x1792xbf16>, vector<10x1792xf32> -> vector<10x1792xf32>
    %75 = vector.extract_strided_slice %74 {offsets = [0, 1], sizes = [10, 1791], strides = [1, 1]} : vector<10x1792xf32> to vector<10x1791xf32>
    %76 = vector.extract_strided_slice %74 {offsets = [0, 0], sizes = [10, 1], strides = [1, 1]} : vector<10x1792xf32> to vector<10x1xf32>
    %77 = tpu.concatenate %75, %76 in 1 : vector<10x1791xf32>, vector<10x1xf32> -> vector<10x1792xf32>
    %78 = arith.maximumf %74, %77 : vector<10x1792xf32>
    %79 = vector.extract_strided_slice %74 {offsets = [0, 28], sizes = [10, 1764], strides = [1, 1]} : vector<10x1792xf32> to vector<10x1764xf32>
    %80 = vector.extract_strided_slice %74 {offsets = [0, 0], sizes = [10, 28], strides = [1, 1]} : vector<10x1792xf32> to vector<10x28xf32>
    %81 = tpu.concatenate %79, %80 in 1 : vector<10x1764xf32>, vector<10x28xf32> -> vector<10x1792xf32>
    %82 = vector.extract_strided_slice %74 {offsets = [0, 29], sizes = [10, 1763], strides = [1, 1]} : vector<10x1792xf32> to vector<10x1763xf32>
    %83 = vector.extract_strided_slice %74 {offsets = [0, 0], sizes = [10, 29], strides = [1, 1]} : vector<10x1792xf32> to vector<10x29xf32>
    %84 = tpu.concatenate %82, %83 in 1 : vector<10x1763xf32>, vector<10x29xf32> -> vector<10x1792xf32>
    %85 = arith.maximumf %81, %84 : vector<10x1792xf32>
    %86 = arith.maximumf %78, %85 : vector<10x1792xf32>
    %87 = arith.truncf %86 : vector<10x1792xf32> to vector<10x1792xbf16>
    %88 = vector.extract_strided_slice %87 {offsets = [0, 2], sizes = [10, 1790], strides = [1, 1]} : vector<10x1792xbf16> to vector<10x1790xbf16>
    %89 = vector.extract_strided_slice %87 {offsets = [0, 0], sizes = [10, 2], strides = [1, 1]} : vector<10x1792xbf16> to vector<10x2xbf16>
    %90 = tpu.concatenate %88, %89 in 1 : vector<10x1790xbf16>, vector<10x2xbf16> -> vector<10x1792xbf16>
    %91 = vector.extract_strided_slice %87 {offsets = [0, 4], sizes = [10, 1788], strides = [1, 1]} : vector<10x1792xbf16> to vector<10x1788xbf16>
    %92 = vector.extract_strided_slice %87 {offsets = [0, 0], sizes = [10, 4], strides = [1, 1]} : vector<10x1792xbf16> to vector<10x4xbf16>
    %93 = tpu.concatenate %91, %92 in 1 : vector<10x1788xbf16>, vector<10x4xbf16> -> vector<10x1792xbf16>
    %94 = vector.extract_strided_slice %87 {offsets = [0, 56], sizes = [10, 1736], strides = [1, 1]} : vector<10x1792xbf16> to vector<10x1736xbf16>
    %95 = vector.extract_strided_slice %87 {offsets = [0, 0], sizes = [10, 56], strides = [1, 1]} : vector<10x1792xbf16> to vector<10x56xbf16>
    %96 = tpu.concatenate %94, %95 in 1 : vector<10x1736xbf16>, vector<10x56xbf16> -> vector<10x1792xbf16>
    %97 = vector.extract_strided_slice %87 {offsets = [0, 58], sizes = [10, 1734], strides = [1, 1]} : vector<10x1792xbf16> to vector<10x1734xbf16>
    %98 = vector.extract_strided_slice %87 {offsets = [0, 0], sizes = [10, 58], strides = [1, 1]} : vector<10x1792xbf16> to vector<10x58xbf16>
    %99 = tpu.concatenate %97, %98 in 1 : vector<10x1734xbf16>, vector<10x58xbf16> -> vector<10x1792xbf16>
    %100 = vector.extract_strided_slice %87 {offsets = [0, 60], sizes = [10, 1732], strides = [1, 1]} : vector<10x1792xbf16> to vector<10x1732xbf16>
    %101 = vector.extract_strided_slice %87 {offsets = [0, 0], sizes = [10, 60], strides = [1, 1]} : vector<10x1792xbf16> to vector<10x60xbf16>
    %102 = tpu.concatenate %100, %101 in 1 : vector<10x1732xbf16>, vector<10x60xbf16> -> vector<10x1792xbf16>
    %103 = vector.extract_strided_slice %87 {offsets = [0, 112], sizes = [10, 1680], strides = [1, 1]} : vector<10x1792xbf16> to vector<10x1680xbf16>
    %104 = vector.extract_strided_slice %87 {offsets = [0, 0], sizes = [10, 112], strides = [1, 1]} : vector<10x1792xbf16> to vector<10x112xbf16>
    %105 = tpu.concatenate %103, %104 in 1 : vector<10x1680xbf16>, vector<10x112xbf16> -> vector<10x1792xbf16>
    %106 = vector.extract_strided_slice %87 {offsets = [0, 114], sizes = [10, 1678], strides = [1, 1]} : vector<10x1792xbf16> to vector<10x1678xbf16>
    %107 = vector.extract_strided_slice %87 {offsets = [0, 0], sizes = [10, 114], strides = [1, 1]} : vector<10x1792xbf16> to vector<10x114xbf16>
    %108 = tpu.concatenate %106, %107 in 1 : vector<10x1678xbf16>, vector<10x114xbf16> -> vector<10x1792xbf16>
    %109 = vector.extract_strided_slice %87 {offsets = [0, 116], sizes = [10, 1676], strides = [1, 1]} : vector<10x1792xbf16> to vector<10x1676xbf16>
    %110 = vector.extract_strided_slice %87 {offsets = [0, 0], sizes = [10, 116], strides = [1, 1]} : vector<10x1792xbf16> to vector<10x116xbf16>
    %111 = tpu.concatenate %109, %110 in 1 : vector<10x1676xbf16>, vector<10x116xbf16> -> vector<10x1792xbf16>
    %112 = tpu.concatenate %87, %90, %93, %96, %99, %102, %105, %108, %111 in 0 : vector<10x1792xbf16>, vector<10x1792xbf16>, vector<10x1792xbf16>, vector<10x1792xbf16>, vector<10x1792xbf16>, vector<10x1792xbf16>, vector<10x1792xbf16>, vector<10x1792xbf16>, vector<10x1792xbf16> -> vector<90x1792xbf16>
    %c0_19 = arith.constant 0 : index
    %c0_20 = arith.constant 0 : index
    %113 = vector.load %arg9[%c0_19, %c0_20] : memref<16x90xbf16, #tpu.memory_space<vmem>>, vector<16x90xbf16>
    %cst_21 = arith.constant dense<0.000000e+00> : vector<16x1792xf32>
    %114 = tpu.matmul %113, %112, %cst_21 {dimension_numbers = #tpu.dot_dimension_numbers<[1], [0], [0], [1], [0, 0, 1, 1], [], []>} : vector<16x90xbf16>, vector<90x1792xbf16>, vector<16x1792xf32> -> vector<16x1792xf32>
    %cst_22 = arith.constant 0.000000e+00 : f32
    %115 = vector.broadcast %cst_22 : f32 to vector<16x1792xf32>
    %116 = arith.maximumf %114, %115 : vector<16x1792xf32>
    %c0_23 = arith.constant 0 : index
    %c0_24 = arith.constant 0 : index
    %117 = vector.load %arg10[%c0_23, %c0_24] : memref<16x1xf32, #tpu.memory_space<vmem>>, vector<16x1xf32>
    %118 = vector.broadcast %117 : vector<16x1xf32> to vector<16x1792xf32>
    %119 = arith.mulf %116, %118 : vector<16x1792xf32>
    %c0_25 = arith.constant 0 : index
    %c0_26 = arith.constant 0 : index
    %120 = vector.load %arg11[%c0_25, %c0_26] : memref<16x1xf32, #tpu.memory_space<vmem>>, vector<16x1xf32>
    %121 = vector.broadcast %120 : vector<16x1xf32> to vector<16x1792xf32>
    %122 = arith.addf %119, %121 : vector<16x1792xf32>
    %123 = arith.truncf %122 : vector<16x1792xf32> to vector<16x1792xbf16>
    %124 = vector.extract_strided_slice %123 {offsets = [0, 2], sizes = [16, 1790], strides = [1, 1]} : vector<16x1792xbf16> to vector<16x1790xbf16>
    %125 = vector.extract_strided_slice %123 {offsets = [0, 0], sizes = [16, 2], strides = [1, 1]} : vector<16x1792xbf16> to vector<16x2xbf16>
    %126 = tpu.concatenate %124, %125 in 1 : vector<16x1790xbf16>, vector<16x2xbf16> -> vector<16x1792xbf16>
    %127 = vector.extract_strided_slice %123 {offsets = [0, 4], sizes = [16, 1788], strides = [1, 1]} : vector<16x1792xbf16> to vector<16x1788xbf16>
    %128 = vector.extract_strided_slice %123 {offsets = [0, 0], sizes = [16, 4], strides = [1, 1]} : vector<16x1792xbf16> to vector<16x4xbf16>
    %129 = tpu.concatenate %127, %128 in 1 : vector<16x1788xbf16>, vector<16x4xbf16> -> vector<16x1792xbf16>
    %130 = vector.extract_strided_slice %123 {offsets = [0, 56], sizes = [16, 1736], strides = [1, 1]} : vector<16x1792xbf16> to vector<16x1736xbf16>
    %131 = vector.extract_strided_slice %123 {offsets = [0, 0], sizes = [16, 56], strides = [1, 1]} : vector<16x1792xbf16> to vector<16x56xbf16>
    %132 = tpu.concatenate %130, %131 in 1 : vector<16x1736xbf16>, vector<16x56xbf16> -> vector<16x1792xbf16>
    %133 = vector.extract_strided_slice %123 {offsets = [0, 58], sizes = [16, 1734], strides = [1, 1]} : vector<16x1792xbf16> to vector<16x1734xbf16>
    %134 = vector.extract_strided_slice %123 {offsets = [0, 0], sizes = [16, 58], strides = [1, 1]} : vector<16x1792xbf16> to vector<16x58xbf16>
    %135 = tpu.concatenate %133, %134 in 1 : vector<16x1734xbf16>, vector<16x58xbf16> -> vector<16x1792xbf16>
    %136 = vector.extract_strided_slice %123 {offsets = [0, 60], sizes = [16, 1732], strides = [1, 1]} : vector<16x1792xbf16> to vector<16x1732xbf16>
    %137 = vector.extract_strided_slice %123 {offsets = [0, 0], sizes = [16, 60], strides = [1, 1]} : vector<16x1792xbf16> to vector<16x60xbf16>
    %138 = tpu.concatenate %136, %137 in 1 : vector<16x1732xbf16>, vector<16x60xbf16> -> vector<16x1792xbf16>
    %139 = vector.extract_strided_slice %123 {offsets = [0, 112], sizes = [16, 1680], strides = [1, 1]} : vector<16x1792xbf16> to vector<16x1680xbf16>
    %140 = vector.extract_strided_slice %123 {offsets = [0, 0], sizes = [16, 112], strides = [1, 1]} : vector<16x1792xbf16> to vector<16x112xbf16>
    %141 = tpu.concatenate %139, %140 in 1 : vector<16x1680xbf16>, vector<16x112xbf16> -> vector<16x1792xbf16>
    %142 = vector.extract_strided_slice %123 {offsets = [0, 114], sizes = [16, 1678], strides = [1, 1]} : vector<16x1792xbf16> to vector<16x1678xbf16>
    %143 = vector.extract_strided_slice %123 {offsets = [0, 0], sizes = [16, 114], strides = [1, 1]} : vector<16x1792xbf16> to vector<16x114xbf16>
    %144 = tpu.concatenate %142, %143 in 1 : vector<16x1678xbf16>, vector<16x114xbf16> -> vector<16x1792xbf16>
    %145 = vector.extract_strided_slice %123 {offsets = [0, 116], sizes = [16, 1676], strides = [1, 1]} : vector<16x1792xbf16> to vector<16x1676xbf16>
    %146 = vector.extract_strided_slice %123 {offsets = [0, 0], sizes = [16, 116], strides = [1, 1]} : vector<16x1792xbf16> to vector<16x116xbf16>
    %147 = tpu.concatenate %145, %146 in 1 : vector<16x1676xbf16>, vector<16x116xbf16> -> vector<16x1792xbf16>
    %148 = tpu.concatenate %123, %126, %129, %132, %135, %138, %141, %144, %147 in 0 : vector<16x1792xbf16>, vector<16x1792xbf16>, vector<16x1792xbf16>, vector<16x1792xbf16>, vector<16x1792xbf16>, vector<16x1792xbf16>, vector<16x1792xbf16>, vector<16x1792xbf16>, vector<16x1792xbf16> -> vector<144x1792xbf16>
    %c0_27 = arith.constant 0 : index
    %c0_28 = arith.constant 0 : index
    %149 = vector.load %arg12[%c0_27, %c0_28] : memref<16x144xbf16, #tpu.memory_space<vmem>>, vector<16x144xbf16>
    %cst_29 = arith.constant dense<0.000000e+00> : vector<16x1792xf32>
    %150 = tpu.matmul %149, %148, %cst_29 {dimension_numbers = #tpu.dot_dimension_numbers<[1], [0], [0], [1], [0, 0, 1, 1], [], []>} : vector<16x144xbf16>, vector<144x1792xbf16>, vector<16x1792xf32> -> vector<16x1792xf32>
    %cst_30 = arith.constant 0.000000e+00 : f32
    %151 = vector.broadcast %cst_30 : f32 to vector<16x1792xf32>
    %152 = arith.maximumf %150, %151 : vector<16x1792xf32>
    %c0_31 = arith.constant 0 : index
    %c0_32 = arith.constant 0 : index
    %153 = vector.load %arg13[%c0_31, %c0_32] : memref<16x1xf32, #tpu.memory_space<vmem>>, vector<16x1xf32>
    %154 = vector.broadcast %153 : vector<16x1xf32> to vector<16x1792xf32>
    %155 = arith.mulf %152, %154 : vector<16x1792xf32>
    %c0_33 = arith.constant 0 : index
    %c0_34 = arith.constant 0 : index
    %156 = vector.load %arg14[%c0_33, %c0_34] : memref<16x1xf32, #tpu.memory_space<vmem>>, vector<16x1xf32>
    %157 = vector.broadcast %156 : vector<16x1xf32> to vector<16x1792xf32>
    %158 = arith.addf %155, %157 : vector<16x1792xf32>
    %159 = arith.truncf %158 : vector<16x1792xf32> to vector<16x1792xbf16>
    %160 = vector.extract_strided_slice %159 {offsets = [0, 2], sizes = [16, 1790], strides = [1, 1]} : vector<16x1792xbf16> to vector<16x1790xbf16>
    %161 = vector.extract_strided_slice %159 {offsets = [0, 0], sizes = [16, 2], strides = [1, 1]} : vector<16x1792xbf16> to vector<16x2xbf16>
    %162 = tpu.concatenate %160, %161 in 1 : vector<16x1790xbf16>, vector<16x2xbf16> -> vector<16x1792xbf16>
    %163 = vector.extract_strided_slice %159 {offsets = [0, 4], sizes = [16, 1788], strides = [1, 1]} : vector<16x1792xbf16> to vector<16x1788xbf16>
    %164 = vector.extract_strided_slice %159 {offsets = [0, 0], sizes = [16, 4], strides = [1, 1]} : vector<16x1792xbf16> to vector<16x4xbf16>
    %165 = tpu.concatenate %163, %164 in 1 : vector<16x1788xbf16>, vector<16x4xbf16> -> vector<16x1792xbf16>
    %166 = vector.extract_strided_slice %159 {offsets = [0, 56], sizes = [16, 1736], strides = [1, 1]} : vector<16x1792xbf16> to vector<16x1736xbf16>
    %167 = vector.extract_strided_slice %159 {offsets = [0, 0], sizes = [16, 56], strides = [1, 1]} : vector<16x1792xbf16> to vector<16x56xbf16>
    %168 = tpu.concatenate %166, %167 in 1 : vector<16x1736xbf16>, vector<16x56xbf16> -> vector<16x1792xbf16>
    %169 = vector.extract_strided_slice %159 {offsets = [0, 58], sizes = [16, 1734], strides = [1, 1]} : vector<16x1792xbf16> to vector<16x1734xbf16>
    %170 = vector.extract_strided_slice %159 {offsets = [0, 0], sizes = [16, 58], strides = [1, 1]} : vector<16x1792xbf16> to vector<16x58xbf16>
    %171 = tpu.concatenate %169, %170 in 1 : vector<16x1734xbf16>, vector<16x58xbf16> -> vector<16x1792xbf16>
    %172 = vector.extract_strided_slice %159 {offsets = [0, 60], sizes = [16, 1732], strides = [1, 1]} : vector<16x1792xbf16> to vector<16x1732xbf16>
    %173 = vector.extract_strided_slice %159 {offsets = [0, 0], sizes = [16, 60], strides = [1, 1]} : vector<16x1792xbf16> to vector<16x60xbf16>
    %174 = tpu.concatenate %172, %173 in 1 : vector<16x1732xbf16>, vector<16x60xbf16> -> vector<16x1792xbf16>
    %175 = vector.extract_strided_slice %159 {offsets = [0, 112], sizes = [16, 1680], strides = [1, 1]} : vector<16x1792xbf16> to vector<16x1680xbf16>
    %176 = vector.extract_strided_slice %159 {offsets = [0, 0], sizes = [16, 112], strides = [1, 1]} : vector<16x1792xbf16> to vector<16x112xbf16>
    %177 = tpu.concatenate %175, %176 in 1 : vector<16x1680xbf16>, vector<16x112xbf16> -> vector<16x1792xbf16>
    %178 = vector.extract_strided_slice %159 {offsets = [0, 114], sizes = [16, 1678], strides = [1, 1]} : vector<16x1792xbf16> to vector<16x1678xbf16>
    %179 = vector.extract_strided_slice %159 {offsets = [0, 0], sizes = [16, 114], strides = [1, 1]} : vector<16x1792xbf16> to vector<16x114xbf16>
    %180 = tpu.concatenate %178, %179 in 1 : vector<16x1678xbf16>, vector<16x114xbf16> -> vector<16x1792xbf16>
    %181 = vector.extract_strided_slice %159 {offsets = [0, 116], sizes = [16, 1676], strides = [1, 1]} : vector<16x1792xbf16> to vector<16x1676xbf16>
    %182 = vector.extract_strided_slice %159 {offsets = [0, 0], sizes = [16, 116], strides = [1, 1]} : vector<16x1792xbf16> to vector<16x116xbf16>
    %183 = tpu.concatenate %181, %182 in 1 : vector<16x1676xbf16>, vector<16x116xbf16> -> vector<16x1792xbf16>
    %184 = tpu.concatenate %159, %162, %165, %168, %171, %174, %177, %180, %183 in 0 : vector<16x1792xbf16>, vector<16x1792xbf16>, vector<16x1792xbf16>, vector<16x1792xbf16>, vector<16x1792xbf16>, vector<16x1792xbf16>, vector<16x1792xbf16>, vector<16x1792xbf16>, vector<16x1792xbf16> -> vector<144x1792xbf16>
    %c0_35 = arith.constant 0 : index
    %c0_36 = arith.constant 0 : index
    %185 = vector.load %arg15[%c0_35, %c0_36] : memref<16x144xbf16, #tpu.memory_space<vmem>>, vector<16x144xbf16>
    %cst_37 = arith.constant dense<0.000000e+00> : vector<16x1792xf32>
    %186 = tpu.matmul %185, %184, %cst_37 {dimension_numbers = #tpu.dot_dimension_numbers<[1], [0], [0], [1], [0, 0, 1, 1], [], []>} : vector<16x144xbf16>, vector<144x1792xbf16>, vector<16x1792xf32> -> vector<16x1792xf32>
    %cst_38 = arith.constant 0.000000e+00 : f32
    %187 = vector.broadcast %cst_38 : f32 to vector<16x1792xf32>
    %188 = arith.maximumf %186, %187 : vector<16x1792xf32>
    %c0_39 = arith.constant 0 : index
    %c0_40 = arith.constant 0 : index
    %189 = vector.load %arg16[%c0_39, %c0_40] : memref<16x1xf32, #tpu.memory_space<vmem>>, vector<16x1xf32>
    %190 = vector.broadcast %189 : vector<16x1xf32> to vector<16x1792xf32>
    %191 = arith.mulf %188, %190 : vector<16x1792xf32>
    %c0_41 = arith.constant 0 : index
    %c0_42 = arith.constant 0 : index
    %192 = vector.load %arg17[%c0_41, %c0_42] : memref<16x1xf32, #tpu.memory_space<vmem>>, vector<16x1xf32>
    %193 = vector.broadcast %192 : vector<16x1xf32> to vector<16x1792xf32>
    %194 = arith.addf %191, %193 : vector<16x1792xf32>
    %c0_43 = arith.constant 0 : index
    %c0_44 = arith.constant 0 : index
    %195 = vector.load %arg18[%c0_43, %c0_44] : memref<1x1792xf32, #tpu.memory_space<vmem>>, vector<1x1792xf32>
    %196 = vector.broadcast %195 : vector<1x1792xf32> to vector<16x1792xf32>
    %197 = arith.mulf %194, %196 : vector<16x1792xf32>
    %198 = arith.truncf %197 : vector<16x1792xf32> to vector<16x1792xbf16>
    %199 = vector.extract_strided_slice %198 {offsets = [0, 1734], sizes = [16, 58], strides = [1, 1]} : vector<16x1792xbf16> to vector<16x58xbf16>
    %200 = vector.extract_strided_slice %198 {offsets = [0, 0], sizes = [16, 1734], strides = [1, 1]} : vector<16x1792xbf16> to vector<16x1734xbf16>
    %201 = tpu.concatenate %199, %200 in 1 : vector<16x58xbf16>, vector<16x1734xbf16> -> vector<16x1792xbf16>
    %202 = vector.extract_strided_slice %198 {offsets = [0, 1736], sizes = [16, 56], strides = [1, 1]} : vector<16x1792xbf16> to vector<16x56xbf16>
    %203 = vector.extract_strided_slice %198 {offsets = [0, 0], sizes = [16, 1736], strides = [1, 1]} : vector<16x1792xbf16> to vector<16x1736xbf16>
    %204 = tpu.concatenate %202, %203 in 1 : vector<16x56xbf16>, vector<16x1736xbf16> -> vector<16x1792xbf16>
    %205 = vector.extract_strided_slice %198 {offsets = [0, 1738], sizes = [16, 54], strides = [1, 1]} : vector<16x1792xbf16> to vector<16x54xbf16>
    %206 = vector.extract_strided_slice %198 {offsets = [0, 0], sizes = [16, 1738], strides = [1, 1]} : vector<16x1792xbf16> to vector<16x1738xbf16>
    %207 = tpu.concatenate %205, %206 in 1 : vector<16x54xbf16>, vector<16x1738xbf16> -> vector<16x1792xbf16>
    %208 = vector.extract_strided_slice %198 {offsets = [0, 1790], sizes = [16, 2], strides = [1, 1]} : vector<16x1792xbf16> to vector<16x2xbf16>
    %209 = vector.extract_strided_slice %198 {offsets = [0, 0], sizes = [16, 1790], strides = [1, 1]} : vector<16x1792xbf16> to vector<16x1790xbf16>
    %210 = tpu.concatenate %208, %209 in 1 : vector<16x2xbf16>, vector<16x1790xbf16> -> vector<16x1792xbf16>
    %211 = vector.extract_strided_slice %198 {offsets = [0, 2], sizes = [16, 1790], strides = [1, 1]} : vector<16x1792xbf16> to vector<16x1790xbf16>
    %212 = vector.extract_strided_slice %198 {offsets = [0, 0], sizes = [16, 2], strides = [1, 1]} : vector<16x1792xbf16> to vector<16x2xbf16>
    %213 = tpu.concatenate %211, %212 in 1 : vector<16x1790xbf16>, vector<16x2xbf16> -> vector<16x1792xbf16>
    %214 = vector.extract_strided_slice %198 {offsets = [0, 54], sizes = [16, 1738], strides = [1, 1]} : vector<16x1792xbf16> to vector<16x1738xbf16>
    %215 = vector.extract_strided_slice %198 {offsets = [0, 0], sizes = [16, 54], strides = [1, 1]} : vector<16x1792xbf16> to vector<16x54xbf16>
    %216 = tpu.concatenate %214, %215 in 1 : vector<16x1738xbf16>, vector<16x54xbf16> -> vector<16x1792xbf16>
    %217 = vector.extract_strided_slice %198 {offsets = [0, 56], sizes = [16, 1736], strides = [1, 1]} : vector<16x1792xbf16> to vector<16x1736xbf16>
    %218 = vector.extract_strided_slice %198 {offsets = [0, 0], sizes = [16, 56], strides = [1, 1]} : vector<16x1792xbf16> to vector<16x56xbf16>
    %219 = tpu.concatenate %217, %218 in 1 : vector<16x1736xbf16>, vector<16x56xbf16> -> vector<16x1792xbf16>
    %220 = vector.extract_strided_slice %198 {offsets = [0, 58], sizes = [16, 1734], strides = [1, 1]} : vector<16x1792xbf16> to vector<16x1734xbf16>
    %221 = vector.extract_strided_slice %198 {offsets = [0, 0], sizes = [16, 58], strides = [1, 1]} : vector<16x1792xbf16> to vector<16x58xbf16>
    %222 = tpu.concatenate %220, %221 in 1 : vector<16x1734xbf16>, vector<16x58xbf16> -> vector<16x1792xbf16>
    %223 = tpu.concatenate %201, %204, %207, %210, %198, %213, %216, %219, %222 in 0 : vector<16x1792xbf16>, vector<16x1792xbf16>, vector<16x1792xbf16>, vector<16x1792xbf16>, vector<16x1792xbf16>, vector<16x1792xbf16>, vector<16x1792xbf16>, vector<16x1792xbf16>, vector<16x1792xbf16> -> vector<144x1792xbf16>
    %c0_45 = arith.constant 0 : index
    %c0_46 = arith.constant 0 : index
    %224 = vector.load %arg19[%c0_45, %c0_46] : memref<16x144xbf16, #tpu.memory_space<vmem>>, vector<16x144xbf16>
    %cst_47 = arith.constant dense<0.000000e+00> : vector<16x1792xf32>
    %225 = tpu.matmul %224, %223, %cst_47 {dimension_numbers = #tpu.dot_dimension_numbers<[1], [0], [0], [1], [0, 0, 1, 1], [], []>} : vector<16x144xbf16>, vector<144x1792xbf16>, vector<16x1792xf32> -> vector<16x1792xf32>
    %cst_48 = arith.constant 0.000000e+00 : f32
    %226 = vector.broadcast %cst_48 : f32 to vector<16x1792xf32>
    %227 = arith.maximumf %225, %226 : vector<16x1792xf32>
    %c0_49 = arith.constant 0 : index
    %c0_50 = arith.constant 0 : index
    %228 = vector.load %arg20[%c0_49, %c0_50] : memref<16x1xf32, #tpu.memory_space<vmem>>, vector<16x1xf32>
    %229 = vector.broadcast %228 : vector<16x1xf32> to vector<16x1792xf32>
    %230 = arith.mulf %227, %229 : vector<16x1792xf32>
    %c0_51 = arith.constant 0 : index
    %c0_52 = arith.constant 0 : index
    %231 = vector.load %arg21[%c0_51, %c0_52] : memref<16x1xf32, #tpu.memory_space<vmem>>, vector<16x1xf32>
    %232 = vector.broadcast %231 : vector<16x1xf32> to vector<16x1792xf32>
    %233 = arith.addf %230, %232 : vector<16x1792xf32>
    %c0_53 = arith.constant 0 : index
    %c0_54 = arith.constant 0 : index
    %234 = vector.load %arg22[%c0_53, %c0_54] : memref<1792x2xf32, #tpu.memory_space<vmem>>, vector<1792x2xf32>
    %cst_55 = arith.constant dense<0.000000e+00> : vector<16x2xf32>
    %235 = tpu.matmul %233, %234, %cst_55 {dimension_numbers = #tpu.dot_dimension_numbers<[1], [0], [0], [1], [0, 0, 1, 1], [], []>} : vector<16x1792xf32>, vector<1792x2xf32>, vector<16x2xf32> -> vector<16x2xf32>
    %c0_56 = arith.constant 0 : index
    %c0_57 = arith.constant 0 : index
    %236 = vector.load %arg23[%c0_56, %c0_57] : memref<10x16xf32, #tpu.memory_space<vmem>>, vector<10x16xf32>
    %cst_58 = arith.constant dense<0.000000e+00> : vector<10x2xf32>
    %237 = tpu.matmul %236, %235, %cst_58 {dimension_numbers = #tpu.dot_dimension_numbers<[1], [0], [0], [1], [0, 0, 1, 1], [], []>} : vector<10x16xf32>, vector<16x2xf32>, vector<10x2xf32> -> vector<10x2xf32>
    %cst_59 = arith.constant dense<0xFF800000> : vector<2xf32>
    %238 = vector.multi_reduction <maximumf>, %237, %cst_59 [0] : vector<10x2xf32> to vector<2xf32>
    %239 = vector.shape_cast %238 : vector<2xf32> to vector<1x2xf32>
    %240 = vector.broadcast %239 : vector<1x2xf32> to vector<10x2xf32>
    %241 = arith.subf %237, %240 : vector<10x2xf32>
    %242 = math.exp %241 : vector<10x2xf32>
    %cst_60 = arith.constant dense<0.000000e+00> : vector<2xf32>
    %243 = vector.multi_reduction <add>, %242, %cst_60 [0] : vector<10x2xf32> to vector<2xf32>
    %244 = vector.shape_cast %243 : vector<2xf32> to vector<1x2xf32>
    %245 = math.log %244 : vector<1x2xf32>
    %246 = vector.broadcast %245 : vector<1x2xf32> to vector<10x2xf32>
    %247 = arith.subf %241, %246 : vector<10x2xf32>
    %c0_61 = arith.constant 0 : index
    %c0_62 = arith.constant 0 : index
    %248 = vector.load %arg24[%c0_61, %c0_62] : memref<10x2xf32, #tpu.memory_space<vmem>>, vector<10x2xf32>
    tpu.vector_store %arg24[%c0_61, %c0_62], %247 {strides = array<i32>} : memref<10x2xf32, #tpu.memory_space<vmem>>, vector<10x2xf32>,
    return
  }
  func.func @transform_0(%arg0: i32) -> (i32, i32) {
    %c0_i32 = arith.constant 0 : i32
    %c0_i32_0 = arith.constant 0 : i32
    %c0_i32_1 = arith.constant 0 : i32
    return %c0_i32, %c0_i32_0 : i32, i32
  }
  func.func @transform_1(%arg0: i32) -> (i32, i32) {
    %c0_i32 = arith.constant 0 : i32
    %c0_i32_0 = arith.constant 0 : i32
    %c0_i32_1 = arith.constant 0 : i32
    return %c0_i32, %c0_i32_0 : i32, i32
  }
  func.func @transform_2(%arg0: i32) -> (i32, i32) {
    %c0_i32 = arith.constant 0 : i32
    %c0_i32_0 = arith.constant 0 : i32
    %c0_i32_1 = arith.constant 0 : i32
    return %c0_i32, %c0_i32_0 : i32, i32
  }
  func.func @transform_3(%arg0: i32) -> (i32, i32) {
    %c0_i32 = arith.constant 0 : i32
    %c0_i32_0 = arith.constant 0 : i32
    %c0_i32_1 = arith.constant 0 : i32
    return %c0_i32, %c0_i32_0 : i32, i32
  }
  func.func @transform_4(%arg0: i32) -> (i32, i32) {
    %c0_i32 = arith.constant 0 : i32
    %c0_i32_0 = arith.constant 0 : i32
    %c0_i32_1 = arith.constant 0 : i32
    return %c0_i32, %c0_i32_0 : i32, i32
  }
  func.func @transform_5(%arg0: i32) -> (i32, i32) {
    %c0_i32 = arith.constant 0 : i32
    %c0_i32_0 = arith.constant 0 : i32
    %c0_i32_1 = arith.constant 0 : i32
    return %c0_i32, %c0_i32_0 : i32, i32
  }
  func.func @transform_6(%arg0: i32) -> (i32, i32) {
    %c0_i32 = arith.constant 0 : i32
    %c0_i32_0 = arith.constant 0 : i32
    %c0_i32_1 = arith.constant 0 : i32
    return %c0_i32, %c0_i32_0 : i32, i32
  }
  func.func @transform_7(%arg0: i32) -> (i32, i32) {
    %c0_i32 = arith.constant 0 : i32
    %c0_i32_0 = arith.constant 0 : i32
    %c0_i32_1 = arith.constant 0 : i32
    return %c0_i32, %c0_i32_0 : i32, i32
  }
  func.func @transform_8(%arg0: i32) -> (i32, i32) {
    %c0_i32 = arith.constant 0 : i32
    %c0_i32_0 = arith.constant 0 : i32
    %c0_i32_1 = arith.constant 0 : i32
    return %c0_i32, %c0_i32_0 : i32, i32
  }
  func.func @transform_9(%arg0: i32) -> (i32, i32) {
    %c0_i32 = arith.constant 0 : i32
    %c0_i32_0 = arith.constant 0 : i32
    %c0_i32_1 = arith.constant 0 : i32
    return %c0_i32, %c0_i32_0 : i32, i32
  }
  func.func @transform_10(%arg0: i32) -> (i32, i32) {
    %c0_i32 = arith.constant 0 : i32
    %c0_i32_0 = arith.constant 0 : i32
    %c0_i32_1 = arith.constant 0 : i32
    return %c0_i32, %c0_i32_0 : i32, i32
  }
  func.func @transform_11(%arg0: i32) -> (i32, i32) {
    %c0_i32 = arith.constant 0 : i32
    %c0_i32_0 = arith.constant 0 : i32
    %c0_i32_1 = arith.constant 0 : i32
    return %c0_i32, %c0_i32_0 : i32, i32
  }
  func.func @transform_12(%arg0: i32) -> (i32, i32) {
    %c0_i32 = arith.constant 0 : i32
    %c0_i32_0 = arith.constant 0 : i32
    %c0_i32_1 = arith.constant 0 : i32
    return %c0_i32, %c0_i32_0 : i32, i32
  }
  func.func @transform_13(%arg0: i32) -> (i32, i32) {
    %c0_i32 = arith.constant 0 : i32
    %c0_i32_0 = arith.constant 0 : i32
    %c0_i32_1 = arith.constant 0 : i32
    return %c0_i32, %c0_i32_0 : i32, i32
  }
  func.func @transform_14(%arg0: i32) -> (i32, i32) {
    %c0_i32 = arith.constant 0 : i32
    %c0_i32_0 = arith.constant 0 : i32
    %c0_i32_1 = arith.constant 0 : i32
    return %c0_i32, %c0_i32_0 : i32, i32
  }
  func.func @transform_15(%arg0: i32) -> (i32, i32) {
    %c0_i32 = arith.constant 0 : i32
    %c0_i32_0 = arith.constant 0 : i32
    %c0_i32_1 = arith.constant 0 : i32
    return %c0_i32, %c0_i32_0 : i32, i32
  }
  func.func @transform_16(%arg0: i32) -> (i32, i32) {
    %c0_i32 = arith.constant 0 : i32
    %c0_i32_0 = arith.constant 0 : i32
    %c0_i32_1 = arith.constant 0 : i32
    return %c0_i32, %c0_i32_0 : i32, i32
  }
  func.func @transform_17(%arg0: i32) -> (i32, i32) {
    %c0_i32 = arith.constant 0 : i32
    %c0_i32_0 = arith.constant 0 : i32
    %c0_i32_1 = arith.constant 0 : i32
    return %c0_i32, %c0_i32_0 : i32, i32
  }
  func.func @transform_18(%arg0: i32) -> (i32, i32) {
    %c0_i32 = arith.constant 0 : i32
    %c0_i32_0 = arith.constant 0 : i32
    %c0_i32_1 = arith.constant 0 : i32
    return %c0_i32, %c0_i32_0 : i32, i32
  }
  func.func @transform_19(%arg0: i32) -> (i32, i32) {
    %c0_i32 = arith.constant 0 : i32
    %c0_i32_0 = arith.constant 0 : i32
    %c0_i32_1 = arith.constant 0 : i32
    return %c0_i32, %c0_i32_0 : i32, i32
  }
  func.func @transform_20(%arg0: i32) -> (i32, i32) {
    %c0_i32 = arith.constant 0 : i32
    %c0_i32_0 = arith.constant 0 : i32
    %c0_i32_1 = arith.constant 0 : i32
    return %c0_i32, %c0_i32_0 : i32, i32
  }
  func.func @transform_21(%arg0: i32) -> (i32, i32) {
    %c0_i32 = arith.constant 0 : i32
    %c0_i32_0 = arith.constant 0 : i32
    %c0_i32_1 = arith.constant 0 : i32
    return %c0_i32, %c0_i32_0 : i32, i32
  }
  func.func @transform_22(%arg0: i32) -> (i32, i32) {
    %c0_i32 = arith.constant 0 : i32
    %c0_i32_0 = arith.constant 0 : i32
    %c0_i32_1 = arith.constant 0 : i32
    return %c0_i32, %c0_i32_0 : i32, i32
  }
  func.func @transform_23(%arg0: i32) -> (i32, i32) {
    %c0_i32 = arith.constant 0 : i32
    %c0_i32_0 = arith.constant 0 : i32
    %c0_i32_1 = arith.constant 0 : i32
    return %c0_i32, %c0_i32_0 : i32, i32
  }
}

</mosaic_0001>

<bundles_post_ra>
// kernel: net_forward.1
= control target key start
LH: loop header
LB: loop body
LE: loop exit
PB: predicated region body
PF: predicated region fallthrough
CT: control target
= control target key end

     0   :  { %v83_v0 = vlaneseq  ;;  %v9318_v1 = vmov 1966171168   ;;  %s9320_s26 = smov 127   ;;  %s9323_s27 = smov 99   ;;  %v15387_v26 = vmov 0   ;;  %vm15382_vm0 = vcmask 1031168   ;;  %s15348_s0 = inlined_call_operand.vmem [shape: bf16[1,1792], index: 0, kind: input, shape index: {}]   ;;  %s15349_s1 = inlined_call_operand.vmem [shape: bf16[16,9], index: 1, kind: input, shape index: {}]   ;;  %s15350_s2 = inlined_call_operand.vmem [shape: f32[16,1], index: 2, kind: input, shape index: {}]   ;;  %s15351_s3 = inlined_call_operand.vmem [shape: f32[16,1], index: 3, kind: input, shape index: {}]   ;;  %s15352_s4 = inlined_call_operand.vmem [shape: bf16[32,144], index: 4, kind: input, shape index: {}]   ;;  %s15353_s5 = inlined_call_operand.vmem [shape: f32[32,1], index: 5, kind: input, shape index: {}]   ;;  %s15354_s6 = inlined_call_operand.vmem [shape: f32[32,1], index: 6, kind: input, shape index: {}]   ;;  %s15355_s7 = inlined_call_operand.vmem [shape: bf16[10,32], index: 7, kind: input, shape index: {}]   ;;  %s15356_s8 = inlined_call_operand.vmem [shape: bf16[16,90], index: 8, kind: input, shape index: {}]   ;;  %s15357_s9 = inlined_call_operand.vmem [shape: f32[16,1], index: 9, kind: input, shape index: {}]   ;;  %s15358_s10 = inlined_call_operand.vmem [shape: f32[16,1], index: 10, kind: input, shape index: {}]   ;;  %s15359_s11 = inlined_call_operand.vmem [shape: bf16[16,144], index: 11, kind: input, shape index: {}]   ;;  %s15360_s12 = inlined_call_operand.vmem [shape: f32[16,1], index: 12, kind: input, shape index: {}]   ;;  %s15361_s13 = inlined_call_operand.vmem [shape: f32[16,1], index: 13, kind: input, shape index: {}]   ;;  %s15362_s14 = inlined_call_operand.vmem [shape: bf16[16,144], index: 14, kind: input, shape index: {}]   ;;  %s15363_s15 = inlined_call_operand.vmem [shape: f32[16,1], index: 15, kind: input, shape index: {}]   ;;  %s15364_s16 = inlined_call_operand.vmem [shape: f32[16,1], index: 16, kind: input, shape index: {}]   ;;  %s15365_s17 = inlined_call_operand.vmem [shape: f32[1,1792], index: 17, kind: input, shape index: {}]   ;;  %s15366_s18 = inlined_call_operand.vmem [shape: bf16[16,144], index: 18, kind: input, shape index: {}]   ;;  %s15367_s20 = inlined_call_operand.vmem [shape: f32[16,1], index: 20, kind: input, shape index: {}]   ;;  %s15368_s19 = inlined_call_operand.vmem [shape: f32[16,1], index: 19, kind: input, shape index: {}]   ;;  %s15369_s21 = inlined_call_operand.vmem [shape: f32[1792,2], index: 21, kind: input, shape index: {}]   ;;  %s15370_s22 = inlined_call_operand.vmem [shape: f32[10,16], index: 22, kind: input, shape index: {}]   ;;  %s15371_s23 = inlined_call_operand.vmem [shape: f32[10,2], index: 23, kind: output, shape index: {}]  }
   0x1   :  { %15398 = sst [smem:[#allocation3_spill]] %s15348_s0  ;;  %v81_v2 = vunpack.c.l.s4 %v9318_v1  ;;  %s9325_s28 = smov 72   ;;  %1235 = vmatprep.mubr.bf16.mxu1 %v15387_v26  ;;  %1321 = vmatprep.mubr.bf16.mxu0 %v15387_v26  ;;  %vm15383_vm1 = vcmask 1039360   ;;  %vm15381_vm2 = vcmask 818176   ;;  %vm15378_vm3 = vcmask 809984  }
   0x2   :  { %15399 = sst [smem:[#allocation4_spill]] %s15349_s1  ;;  %v9459_v3 = vshrl.u32 %v83_v0, 7  ;;  %s15406_s24 = sld [smem:[#allocation3_spill]]  ;;  %9080 = vset.pattern.permute.xlu1 %v15387_v26  ;;  %9079 = vset.pattern.permute.xlu0 %v15387_v26  ;;  %vm879_vm4 = vcmask 1040384   ;;  %vm880_vm5 = vsmask.f32 256 }
   0x3   :  { %15400 = sst [smem:[#allocation5_spill]] %s15350_s2  ;;  %v82_v4 = vunpack.c.0.s8 %v81_v2  ;;  %s9319_s1 = smov 100   ;;  %vm15379_vm6 = vcmask 801792   ;;  %vm953_vm7 = vcmask 1041408   ;;  %vm954_vm8 = vsmask.f32 1280  ;;  %vm9708_vm9 = vmand %vm879_vm4, %vm880_vm5 }
   0x4   :  { %15401 = sst [smem:[#allocation6_spill]] %s15351_s3  ;;  %s9321_s2 = smov 126   ;;  %vm433_vm10 = vcmask 588800   ;;  %vm479_vm11 = vcmask 580608   ;;  %vm15386_vm12 = vcmask 1042432   ;;  %vm9728_vm14 = vmand %vm953_vm7, %vm954_vm8  ;;  %vm15385_vm15 = vcmask 1043456  }
   0x5   :  { %15402 = sst [smem:[#allocation7_spill]] %s15352_s4  ;;  %v9468_v7 = vsub.s32 %v82_v4, %v9459_v3  ;;  %s9326_s29 = smov 70   ;;  %vm1028_vm13 = vsmask.f32 2304  ;;  %vm1102_vm8 = vsmask.f32 3328 }
   0x6   :  { %15403 = sst [smem:[#allocation8_spill]] %s15353_s5  ;;  %vm9754_vm5 = vmand %vm15386_vm12, %vm1028_vm13  ;;  %vm525_vm13 = vcmask 572416   ;;  %s15415_s4 = sld [smem:[#allocation4_spill]] }
   0x7   :  { %15404 = sst [smem:[#allocation9_spill]] %s15354_s6  ;;  %s9322_s6 = smov 98  }
   0x8   :  { %15405 = sst [smem:[#allocation10_spill]] %s15355_s7  ;;  %v75_v5 = vld [vmem:[%s15406_s24] sm:$0xff]  ;;  %v76_v6 = vld [vmem:[%s15406_s24 + $0x8] sm:$0x3f]  ;;  %s9324_s7 = smov 71  }
   0x9   :  { %v86_v8 = vrot.slane %v75_v5, %v9468_v7  ;;  %v135_v9 = vrot.slane %v76_v6, %v9468_v7  ;;  %v79_v17 = vcombine.high %v75_v5, %v75_v5  ;;  %v128_v20 = vcombine.high %v76_v6, %v76_v6  ;;  %s15430_s25 = sld [smem:[#allocation5_spill]]  ;;  %s15431_s30 = sld [smem:[#allocation6_spill]] }
   0xa   :  { %s15491_s0 = sld [smem:[#allocation7_spill]]  ;;  %s15504_s3 = sld [smem:[#allocation8_spill]] }
   0xb   :  { %v9473_v10 = vrot.slane %v86_v8, %v9468_v7  ;;  %v94_v11 = vcombine.high %v86_v8, %v86_v8  ;;  %v9476_v12 = vrot.slane %v135_v9, %v9468_v7  ;;  %v143_v15 = vcombine.high %v135_v9, %v135_v9  ;;  %s15506_s24 = sld [smem:[#allocation9_spill]]  ;;  %s9337_s5 = smov 54  }
   0xc   :  { %v93_v19 = vrot.slane %v79_v17, %v9468_v7  ;;  %v142_v22 = vrot.slane %v128_v20, %v9468_v7 }
   0xd   :  { %267 = vrot.lane.b32.xlu1 %v9473_v10, %s9319_s1  ;;  %175 = vrot.lane.b32.xlu0 %v9473_v10, %s9320_s26  ;;  %v9483_v13 = vrot.slane %v94_v11, %v9468_v7  ;;  %v9491_v14 = vcombine.high %v9473_v10, %v9473_v10  ;;  %v9502_v16 = vrot.slane %v143_v15, %v9468_v7 }
   0xe   :  { %v9542_v21 = vrot.slane %v93_v19, %v9468_v7  ;;  %v9546_v23 = vrot.slane %v142_v22, %v9468_v7  ;;  %v144_v24 = vcombine.high %v142_v22, %v142_v22  ;;  %v95_v27 = vcombine.high %v93_v19, %v93_v19 }
   0xf   :  { %v9534_v18 = vcombine.high %v9483_v13, %v9483_v13  ;;  %v9686_v45 = vcombine.high %v9476_v12, %v9476_v12 }
  0x10   :  { %v9557_v25 = vrot.slane %v144_v24, %v9468_v7  ;;  %v9589_v28 = vcombine.high %v9542_v21, %v9542_v21  ;;  %v9592_v29 = vrot.slane %v95_v27, %v9468_v7 }
  0x11   :  { %269 = vrot.lane.b32.xlu1 %v9483_v13, %s9319_s1  ;;  %177 = vrot.lane.b32.xlu0 %v9483_v13, %s9320_s26 }
  0x12   :  { %v9628_v30 = vcombine.high %v9592_v29, %v9592_v29 }
  0x15   :  { %271 = vrot.lane.b32.xlu1 %v9491_v14, %s9319_s1  ;;  %179 = vrot.lane.b32.xlu0 %v9491_v14, %s9320_s26 }
  0x19   :  { %223 = vrot.lane.b32.xlu1 %v9483_v13, %s9321_s2  ;;  %225 = vrot.lane.b32.xlu0 %v9491_v14, %s9321_s2 }
  0x1d   :  { %361 = vrot.lane.b32.xlu1 %v9483_v13, %s9322_s6  ;;  %221 = vrot.lane.b32.xlu0 %v9473_v10, %s9321_s2 }
  0x21   :  { %315 = vrot.lane.b32.xlu1 %v9483_v13, %s9323_s27  ;;  %363 = vrot.lane.b32.xlu0 %v9491_v14, %s9322_s6 }
  0x25   :  { %359 = vrot.lane.b32.xlu1 %v9473_v10, %s9322_s6  ;;  %317 = vrot.lane.b32.xlu0 %v9491_v14, %s9323_s27 }
  0x29   :  { %453 = vrot.lane.b32.xlu1 %v9483_v13, %s9324_s7  ;;  %313 = vrot.lane.b32.xlu0 %v9473_v10, %s9323_s27 }
  0x2d   :  { %407 = vrot.lane.b32.xlu1 %v9483_v13, %s9325_s28  ;;  %455 = vrot.lane.b32.xlu0 %v9491_v14, %s9324_s7 }
  0x31   :  { %451 = vrot.lane.b32.xlu1 %v9473_v10, %s9324_s7  ;;  %409 = vrot.lane.b32.xlu0 %v9491_v14, %s9325_s28 }
  0x35   :  { %499 = vrot.lane.b32.xlu1 %v9483_v13, %s9326_s29  ;;  %405 = vrot.lane.b32.xlu0 %v9473_v10, %s9325_s28 }
  0x39   :  { %501 = vrot.lane.b32.xlu0 %v9491_v14, %s9326_s29  ;;  %181 = vrot.lane.b32.xlu1 %v9534_v18, %s9320_s26 }
  0x3d   :  { %273 = vrot.lane.b32.xlu1 %v9534_v18, %s9319_s1  ;;  %183 = vrot.lane.b32.xlu0 %v9542_v21, %s9320_s26 }
  0x41   :  { %497 = vrot.lane.b32.xlu1 %v9473_v10, %s9326_s29  ;;  %275 = vrot.lane.b32.xlu0 %v9542_v21, %s9319_s1 }
  0x45   :  { %229 = vrot.lane.b32.xlu1 %v9542_v21, %s9321_s2  ;;  %227 = vrot.lane.b32.xlu0 %v9534_v18, %s9321_s2 }
  0x49   :  { %367 = vrot.lane.b32.xlu1 %v9542_v21, %s9322_s6  ;;  %365 = vrot.lane.b32.xlu0 %v9534_v18, %s9322_s6 }
  0x4d   :  { %321 = vrot.lane.b32.xlu1 %v9542_v21, %s9323_s27  ;;  %319 = vrot.lane.b32.xlu0 %v9534_v18, %s9323_s27 }
  0x51   :  { %459 = vrot.lane.b32.xlu1 %v9542_v21, %s9324_s7  ;;  %457 = vrot.lane.b32.xlu0 %v9534_v18, %s9324_s7 }
  0x55   :  { %413 = vrot.lane.b32.xlu1 %v9542_v21, %s9325_s28  ;;  %411 = vrot.lane.b32.xlu0 %v9534_v18, %s9325_s28 }
  0x59   :  { %505 = vrot.lane.b32.xlu1 %v9542_v21, %s9326_s29  ;;  %503 = vrot.lane.b32.xlu0 %v9534_v18, %s9326_s29 }
  0x5d   :  { %187 = vrot.lane.b32.xlu1 %v9589_v28, %s9320_s26  ;;  %185 = vrot.lane.b32.xlu0 %v9592_v29, %s9320_s26 }
  0x61   :  { %279 = vrot.lane.b32.xlu1 %v9589_v28, %s9319_s1  ;;  %277 = vrot.lane.b32.xlu0 %v9592_v29, %s9319_s1 }
  0x65   :  { %233 = vrot.lane.b32.xlu1 %v9589_v28, %s9321_s2  ;;  %231 = vrot.lane.b32.xlu0 %v9592_v29, %s9321_s2 }
  0x69   :  { %371 = vrot.lane.b32.xlu1 %v9589_v28, %s9322_s6  ;;  %369 = vrot.lane.b32.xlu0 %v9592_v29, %s9322_s6 }
  0x6d   :  { %325 = vrot.lane.b32.xlu1 %v9589_v28, %s9323_s27  ;;  %323 = vrot.lane.b32.xlu0 %v9592_v29, %s9323_s27 }
  0x71   :  { %463 = vrot.lane.b32.xlu1 %v9589_v28, %s9324_s7  ;;  %461 = vrot.lane.b32.xlu0 %v9592_v29, %s9324_s7 }
  0x75   :  { %417 = vrot.lane.b32.xlu1 %v9589_v28, %s9325_s28  ;;  %415 = vrot.lane.b32.xlu0 %v9592_v29, %s9325_s28 }
  0x79   :  { %509 = vrot.lane.b32.xlu1 %v9589_v28, %s9326_s29  ;;  %507 = vrot.lane.b32.xlu0 %v9592_v29, %s9326_s29 }
  0x7d   :  { %191 = vrot.lane.b32.xlu1 %v9476_v12, %s9320_s26  ;;  %189 = vrot.lane.b32.xlu0 %v9628_v30, %s9320_s26 }
  0x7f   :  { %v9634_v31 = vpop.permute.xlu1 %267  ;;  %v9636_v32 = vpop.permute.xlu0 %175 }
  0x81   :  { %283 = vrot.lane.b32.xlu1 %v9476_v12, %s9319_s1  ;;  %281 = vrot.lane.b32.xlu0 %v9628_v30, %s9319_s1 }
  0x83   :  { %v270_v33 = vpop.permute.xlu1 %269  ;;  %v178_v34 = vpop.permute.xlu0 %177 }
  0x84   :  { %v296_v60 = vsel %vm15381_vm2, %v9634_v31, %v270_v33  ;;  %v204_v61 = vsel %vm15383_vm1, %v9636_v32, %v178_v34 }
  0x85   :  { %237 = vrot.lane.b32.xlu1 %v9476_v12, %s9321_s2  ;;  %235 = vrot.lane.b32.xlu0 %v9628_v30, %s9321_s2  ;;  %v558_v9 = vshll.u32 %v204_v61, 16 }
  0x87   :  { %v9646_v35 = vpop.permute.xlu1 %271  ;;  %v9648_v36 = vpop.permute.xlu0 %179 }
  0x88   :  { %v205_v46 = vsel %vm15383_vm1, %v178_v34, %v9648_v36  ;;  %v297_v50 = vsel %vm15381_vm2, %v270_v33, %v9646_v35 }
  0x89   :  { %375 = vrot.lane.b32.xlu1 %v9476_v12, %s9322_s6  ;;  %373 = vrot.lane.b32.xlu0 %v9628_v30, %s9322_s6  ;;  %v561_v51 = vshll.u32 %v205_v46, 16  ;;  %v632_v55 = vshll.u32 %v297_v50, 16  ;;  %v882_v46 = vsel %vm9708_vm9, %v9473_v10, %v558_v9 }
  0x8b   :  { %v224_v37 = vpop.permute.xlu1 %223  ;;  %v9654_v38 = vpop.permute.xlu0 %225  ;;  %v883_v59 = vsel %vm9708_vm9, %v9483_v13, %v561_v51  ;;  %v634_v4 = vrot.slane %v632_v55, 7  ;;  %v628_v13 = vshll.u32 %v296_v60, 16 }
  0x8c   :  { %v251_v49 = vsel %vm15382_vm0, %v224_v37, %v9654_v38 }
  0x8d   :  { %329 = vrot.lane.b32.xlu1 %v9476_v12, %s9323_s27  ;;  %327 = vrot.lane.b32.xlu0 %v9628_v30, %s9323_s27  ;;  %v614_v52 = vrot.slane %v251_v49, 7  ;;  %v9328_v49 = vmov 65535   ;;  %v630_v51 = vrot.slane %v628_v13, 7 }
  0x8e   :  { %v1173_v50 = vsel %vm15385_vm15, 4294967295, %v9328_v49 }
  0x8f   :  { %v9660_v39 = vpop.permute.xlu1 %361  ;;  %v9662_v40 = vpop.permute.xlu0 %221  ;;  %v903_v62 = vsel %vm879_vm4, %v883_v59, %v614_v52 }
  0x90   :  { %v250_v5 = vsel %vm15382_vm0, %v9662_v40, %v224_v37  ;;  %v957_v11 = vsel %vm9728_vm14, %v903_v62, %v634_v4 }
  0x91   :  { %467 = vrot.lane.b32.xlu1 %v9476_v12, %s9324_s7  ;;  %465 = vrot.lane.b32.xlu0 %v9628_v30, %s9324_s7  ;;  %v613_v15 = vrot.slane %v250_v5, 7 }
  0x93   :  { %v9668_v41 = vpop.permute.xlu1 %315  ;;  %v9670_v42 = vpop.permute.xlu0 %363 }
  0x94   :  { %v389_v58 = vsel %vm15379_vm6, %v9660_v39, %v9670_v42 }
  0x95   :  { %421 = vrot.lane.b32.xlu1 %v9476_v12, %s9325_s28  ;;  %419 = vrot.lane.b32.xlu0 %v9628_v30, %s9325_s28  ;;  %v716_v6 = vshll.u32 %v389_v58, 16 }
  0x97   :  { %v9676_v43 = vpop.permute.xlu1 %359  ;;  %v9678_v44 = vpop.permute.xlu0 %317  ;;  %v718_v27 = vrot.slane %v716_v6, 6 }
  0x98   :  { %v343_v56 = vsel %vm15378_vm3, %v9668_v41, %v9678_v44  ;;  %v388_v37 = vsel %vm15379_vm6, %v9676_v43, %v9660_v39  ;;  %v899_v39 = vsel %vm879_vm4, %v882_v46, %v613_v15  ;;  %vm9780_vm6 = vmand %vm15385_vm15, %vm1102_vm8  ;;  %vm15384_vm8 = vcmask 72704  }
  0x99   :  { %513 = vrot.lane.b32.xlu1 %v9476_v12, %s9326_s29  ;;  %511 = vrot.lane.b32.xlu0 %v9628_v30, %s9326_s29  ;;  %v698_v0 = vrot.slane %v343_v56, 6  ;;  %v712_v59 = vshll.u32 %v388_v37, 16 }
  0x9b   :  { %v9690_v47 = vpop.permute.xlu1 %453  ;;  %v9692_v48 = vpop.permute.xlu0 %313  ;;  %v977_v17 = vsel %vm953_vm7, %v957_v11, %v698_v0  ;;  %v714_v13 = vrot.slane %v712_v59, 6 }
  0x9c   :  { %v342_v33 = vsel %vm15378_vm3, %v9692_v48, %v9668_v41  ;;  %v1031_v41 = vsel %vm9754_vm5, %v977_v17, %v718_v27  ;;  %vm15380_vm3 = vcmask 1044480  }
  0x9d   :  { %195 = vrot.lane.b32.xlu1 %v9686_v45, %s9320_s26  ;;  %193 = vrot.lane.b32.xlu0 %v9502_v16, %s9320_s26  ;;  %v697_v52 = vrot.slane %v342_v33, 6  ;;  %v9796_v5 = vsel %vm15380_vm3, %v1173_v50, 0  ;;  %vm15416_vm3 = vcmask 801792  }
  0x9f   :  { %v408_v53 = vpop.permute.xlu1 %407  ;;  %v9702_v54 = vpop.permute.xlu0 %455 }
  0xa0   :  { %v481_v8 = vsel %vm479_vm11, %v9690_v47, %v9702_v54 }
  0xa1   :  { %287 = vrot.lane.b32.xlu1 %v9686_v45, %s9319_s1  ;;  %285 = vrot.lane.b32.xlu0 %v9502_v16, %s9319_s1  ;;  %v800_v34 = vshll.u32 %v481_v8, 16 }
  0xa3   :  { %v9732_v1 = vpop.permute.xlu1 %451  ;;  %v9734_v2 = vpop.permute.xlu0 %409  ;;  %v802_v60 = vrot.slane %v800_v34, 5 }
  0xa4   :  { %v435_v7 = vsel %vm433_vm10, %v408_v53, %v9734_v2  ;;  %v480_v0 = vsel %vm479_vm11, %v9732_v1, %v9690_v47 }
  0xa5   :  { %241 = vrot.lane.b32.xlu1 %v9686_v45, %s9321_s2  ;;  %239 = vrot.lane.b32.xlu0 %v9502_v16, %s9321_s2  ;;  %v782_v19 = vrot.slane %v435_v7, 5  ;;  %v796_v15 = vshll.u32 %v480_v0, 16 }
  0xa7   :  { %v500_v20 = vpop.permute.xlu1 %499  ;;  %v9750_v22 = vpop.permute.xlu0 %405  ;;  %v1051_v58 = vsel %vm15386_vm12, %v1031_v41, %v782_v19  ;;  %v798_v37 = vrot.slane %v796_v15, 5 }
  0xa8   :  { %v434_v61 = vsel %vm433_vm10, %v9750_v22, %v408_v53  ;;  %v956_v53 = vsel %vm9728_vm14, %v899_v39, %v630_v51  ;;  %v1105_v6 = vsel %vm9780_vm6, %v1051_v58, %v802_v60  ;;  %v9845_v60 = vld [vmem:[%s15415_s4] sm:$0xff]  }
  0xa9   :  { %379 = vrot.lane.b32.xlu1 %v9686_v45, %s9322_s6  ;;  %377 = vrot.lane.b32.xlu0 %v9502_v16, %s9322_s6  ;;  %v973_v7 = vsel %vm953_vm7, %v956_v53, %v697_v52  ;;  %v781_v8 = vrot.slane %v434_v61, 5 }
  0xaa   :  { %v1030_v19 = vsel %vm9754_vm5, %v973_v7, %v714_v13 }
  0xab   :  { %v9775_v55 = vpop.permute.xlu0 %501  ;;  %v182_v56 = vpop.permute.xlu1 %181  ;;  %v1047_v34 = vsel %vm15386_vm12, %v1030_v19, %v781_v8 }
  0xac   :  { %v527_v62 = vsel %vm525_vm13, %v500_v20, %v9775_v55  ;;  %v1104_v49 = vsel %vm9780_vm6, %v1047_v34, %v798_v37  ;;  %v206_v58 = vsel %vm15383_vm1, %v9648_v36, %v182_v56 }
  0xad   :  { %v866_v4 = vrot.slane %v527_v62, 4  ;;  %333 = vrot.lane.b32.xlu1 %v9686_v45, %s9323_s27  ;;  %331 = vrot.lane.b32.xlu0 %v9502_v16, %s9323_s27  ;;  %v564_v53 = vshll.u32 %v206_v58, 16 }
  0xaf   :  { %v274_v47 = vpop.permute.xlu1 %273  ;;  %v9803_v9 = vpop.permute.xlu0 %183  ;;  %v1124_v11 = vsel %vm15385_vm15, %v1105_v6, %v866_v4  ;;  %v884_v34 = vsel %vm9708_vm9, %v9491_v14, %v564_v53 }
  0xb0   :  { %v1177_v17 = vand.u32 %v9796_v5, %v1124_v11  ;;  %v207_v59 = vsel %vm15383_vm1, %v182_v56, %v9803_v9  ;;  %v298_v36 = vsel %vm15381_vm2, %v9646_v35, %v274_v47 }
  0xb1   :  { %471 = vrot.lane.b32.xlu1 %v9686_v45, %s9324_s7  ;;  %469 = vrot.lane.b32.xlu0 %v9502_v16, %s9324_s7  ;;  %v567_v6 = vshll.u32 %v207_v59, 16  ;;  %v636_v8 = vshll.u32 %v298_v36, 16 }
  0xb2   :  { %1203 = vmatprep.subr.bf16.mxu1 %v1177_v17 }
  0xb3   :  { %v9813_v27 = vpop.permute.xlu1 %497  ;;  %v9815_v33 = vpop.permute.xlu0 %275  ;;  %v885_v37 = vsel %vm9708_vm9, %v9534_v18, %v567_v6 }
  0xb4   :  { %v526_v46 = vsel %vm525_vm13, %v9813_v27, %v500_v20  ;;  %v9836_v20 = vcombine.high %v9502_v16, %v9502_v16  ;;  %v299_v56 = vsel %vm15381_vm2, %v274_v47, %v9815_v33  ;;  %vm15417_vm2 = vmmov %vm15416_vm3 }
  0xb5   :  { %v865_v41 = vrot.slane %v526_v46, 4  ;;  %425 = vrot.lane.b32.xlu1 %v9686_v45, %s9325_s28  ;;  %423 = vrot.lane.b32.xlu0 %v9502_v16, %s9325_s28  ;;  %v640_v11 = vshll.u32 %v299_v56, 16 }
  0xb7   :  { %v9826_v50 = vpop.permute.xlu1 %229  ;;  %v228_v51 = vpop.permute.xlu0 %227  ;;  %v1121_v39 = vsel %vm15385_vm15, %v1104_v49, %v865_v41  ;;  %v642_v58 = vrot.slane %v640_v11, 7 }
  0xb8   :  { %v1175_v52 = vand.u32 %v9796_v5, %v1121_v39  ;;  %v252_v61 = vsel %vm15382_vm0, %v9654_v38, %v228_v51  ;;  %v253_v62 = vsel %vm15382_vm0, %v228_v51, %v9826_v50  ;;  %vm15418_vm0 = vcmask 809984  }
  0xb9   :  { %517 = vrot.lane.b32.xlu1 %v9686_v45, %s9326_s29  ;;  %515 = vrot.lane.b32.xlu0 %v9502_v16, %s9326_s29  ;;  %v615_v38 = vrot.slane %v252_v61, 7  ;;  %v616_v7 = vrot.slane %v253_v62, 7  ;;  %vm15419_vm1 = vmmov %vm15418_vm0 }
  0xba   :  { %1204 = vmatpush1.bf16.msra.mxu1 %v1175_v52  ;;  %v638_v52 = vrot.slane %v636_v8, 7 }
  0xbb   :  { %v9851_v0 = vpop.permute.xlu1 %367  ;;  %v366_v4 = vpop.permute.xlu0 %365 }
  0xbc   :  { %v390_v47 = vsel %vm15416_vm3, %v9670_v42, %v366_v4  ;;  %v391_v15 = vsel %vm15417_vm2, %v366_v4, %v9851_v0  ;;  %v907_v42 = vsel %vm879_vm4, %v884_v34, %v615_v38  ;;  %vm15422_vm2 = vcmask 1031168  }
  0xbd   :  { %199 = vrot.lane.b32.xlu1 %v9546_v23, %s9320_s26  ;;  %197 = vrot.lane.b32.xlu0 %v9836_v20, %s9320_s26  ;;  %v720_v46 = vshll.u32 %v390_v47, 16  ;;  %v724_v41 = vshll.u32 %v391_v15, 16  ;;  %v958_v61 = vsel %vm9728_vm14, %v907_v42, %v638_v52  ;;  %vm15423_vm3 = vmmov %vm15422_vm2 }
  0xbe   :  { %8476 = vmatmul.mubr.msk.bf16.vlgmr.msra.gmra.mrb[0].mxu1 %vm15384_vm8, %v9845_v60 }
  0xbf   :  { %v9863_v13 = vpop.permute.xlu1 %321  ;;  %v320_v35 = vpop.permute.xlu0 %319  ;;  %1278 = vmatprep.mubr.bf16.mxu1 %v15387_v26  ;;  %v722_v4 = vrot.slane %v720_v46, 6  ;;  %v726_v36 = vrot.slane %v724_v41, 6 }
  0xc0   :  { %v344_v17 = vsel %vm15418_vm0, %v9678_v44, %v320_v35  ;;  %v345_v19 = vsel %vm15419_vm1, %v320_v35, %v9863_v13  ;;  %v911_v44 = vsel %vm879_vm4, %v885_v37, %v616_v7  ;;  %vm15420_vm0 = vcmask 1039360  }
  0xc1   :  { %291 = vrot.lane.b32.xlu1 %v9546_v23, %s9319_s1  ;;  %289 = vrot.lane.b32.xlu0 %v9836_v20, %s9319_s1  ;;  %v699_v49 = vrot.slane %v344_v17, 6  ;;  %v700_v51 = vrot.slane %v345_v19, 6  ;;  %v959_v62 = vsel %vm9728_vm14, %v911_v44, %v642_v58  ;;  %vm15421_vm1 = vmmov %vm15420_vm0 }
  0xc3   :  { %v9886_v39 = vpop.permute.xlu1 %459  ;;  %v458_v14 = vpop.permute.xlu0 %457  ;;  %v981_v56 = vsel %vm953_vm7, %v958_v61, %v699_v49 }
  0xc4   :  { %v482_v18 = vsel %vm479_vm11, %v9702_v54, %v458_v14  ;;  %v483_v59 = vsel %vm479_vm11, %v458_v14, %v9886_v39  ;;  %v985_v54 = vsel %vm953_vm7, %v959_v62, %v700_v51  ;;  %v1032_v15 = vsel %vm9754_vm5, %v981_v56, %v722_v4 }
  0xc5   :  { %243 = vrot.lane.b32.xlu1 %v9836_v20, %s9321_s2  ;;  %201 = vrot.lane.b32.xlu0 %v9557_v25, %s9320_s26  ;;  %v804_v38 = vshll.u32 %v482_v18, 16  ;;  %v808_v7 = vshll.u32 %v483_v59, 16  ;;  %v1033_v17 = vsel %vm9754_vm5, %v985_v54, %v726_v36 }
  0xc7   :  { %v9902_v53 = vpop.permute.xlu1 %413  ;;  %v412_v6 = vpop.permute.xlu0 %411  ;;  %v806_v42 = vrot.slane %v804_v38, 5  ;;  %v810_v44 = vrot.slane %v808_v7, 5 }
  0xc8   :  { %v436_v8 = vsel %vm433_vm10, %v9734_v2, %v412_v6  ;;  %v437_v11 = vsel %vm433_vm10, %v412_v6, %v9902_v53 }
  0xc9   :  { %v783_v35 = vrot.slane %v436_v8, 5  ;;  %v784_v47 = vrot.slane %v437_v11, 5  ;;  %293 = vrot.lane.b32.xlu1 %v9557_v25, %s9319_s1  ;;  %245 = vrot.lane.b32.xlu0 %v9546_v23, %s9321_s2 }
  0xcb   :  { %v1055_v19 = vsel %vm15386_vm12, %v1032_v15, %v783_v35  ;;  %v1059_v2 = vsel %vm15386_vm12, %v1033_v17, %v784_v47  ;;  %v9918_v34 = vpop.permute.xlu1 %505  ;;  %v504_v37 = vpop.permute.xlu0 %503 }
  0xcc   :  { %v528_v46 = vsel %vm525_vm13, %v9775_v55, %v504_v37  ;;  %v529_v41 = vsel %vm525_vm13, %v504_v37, %v9918_v34  ;;  %v1106_v14 = vsel %vm9780_vm6, %v1055_v19, %v806_v42  ;;  %v1107_v52 = vsel %vm9780_vm6, %v1059_v2, %v810_v44 }
  0xcd   :  { %v867_v49 = vrot.slane %v528_v46, 4  ;;  %v868_v51 = vrot.slane %v529_v41, 4  ;;  %381 = vrot.lane.b32.xlu1 %v9836_v20, %s9322_s6  ;;  %247 = vrot.lane.b32.xlu0 %v9557_v25, %s9321_s2 }
  0xcf   :  { %v1127_v58 = vsel %vm15385_vm15, %v1106_v14, %v867_v49  ;;  %v9933_v55 = vpop.permute.xlu1 %187  ;;  %v186_v18 = vpop.permute.xlu0 %185  ;;  %v1130_v59 = vsel %vm15385_vm15, %v1107_v52, %v868_v51 }
  0xd0   :  { %v1181_v61 = vand.u32 %v9796_v5, %v1130_v59  ;;  %v1179_v62 = vand.u32 %v9796_v5, %v1127_v58  ;;  %v208_v6 = vsel %vm15420_vm0, %v9803_v9, %v186_v18  ;;  %v209_v38 = vsel %vm15421_vm1, %v186_v18, %v9933_v55 }
  0xd1   :  { %335 = vrot.lane.b32.xlu1 %v9836_v20, %s9323_s27  ;;  %383 = vrot.lane.b32.xlu0 %v9546_v23, %s9322_s6  ;;  %v570_v17 = vshll.u32 %v208_v6, 16  ;;  %v573_v9 = vshll.u32 %v209_v38, 16  ;;  %vm15428_vm0 = vcmask 809984  }
  0xd2   :  { %1246 = vmatprep.subr.bf16.mxu1 %v1181_v61  ;;  %vm15429_vm1 = vmmov %vm15428_vm0 }
  0xd3   :  { %1247 = vmatpush1.bf16.msra.mxu1 %v1179_v62  ;;  %v9942_v4 = vpop.permute.xlu1 %279  ;;  %v278_v36 = vpop.permute.xlu0 %277  ;;  %v886_v51 = vsel %vm9708_vm9, %v9542_v21, %v570_v17  ;;  %v887_v14 = vsel %vm9708_vm9, %v9592_v29, %v573_v9 }
  0xd5   :  { %385 = vrot.lane.b32.xlu1 %v9557_v25, %s9322_s6  ;;  %337 = vrot.lane.b32.xlu0 %v9546_v23, %s9323_s27 }
  0xd6   :  { %8477 = vmatmul.mubr.msk.bf16.vlgmr.msra.gmra.mrb[4].mxu1 %vm15384_vm8, %v9845_v60  ;;  %vm15424_vm8 = vcmask 818176  }
  0xd7   :  { %v9950_v56 = vpop.permute.xlu1 %233  ;;  %v232_v54 = vpop.permute.xlu0 %231  ;;  %1364 = vmatprep.mubr.bf16.mxu1 %v15387_v26  ;;  %v300_v47 = vsel %vm15424_vm8, %v9815_v33, %v278_v36  ;;  %vm15425_vm15 = vmmov %vm15424_vm8  ;;  %vm15426_vm8 = vcmask 801792  }
  0xd8   :  { %v254_v7 = vsel %vm15422_vm2, %v9826_v50, %v232_v54  ;;  %v255_v8 = vsel %vm15423_vm3, %v232_v54, %v9950_v56  ;;  %v301_v15 = vsel %vm15425_vm15, %v278_v36, %v9942_v4  ;;  %v644_v2 = vshll.u32 %v300_v47, 16  ;;  %vm15427_vm15 = vmmov %vm15426_vm8 }
  0xd9   :  { %473 = vrot.lane.b32.xlu1 %v9836_v20, %s9324_s7  ;;  %339 = vrot.lane.b32.xlu0 %v9557_v25, %s9323_s27  ;;  %v617_v50 = vrot.slane %v254_v7, 7  ;;  %v618_v19 = vrot.slane %v255_v8, 7  ;;  %v648_v37 = vshll.u32 %v301_v15, 16  ;;  %vm15432_vm2 = vcmask 1043456  }
  0xda   :  { %v646_v62 = vrot.slane %v644_v2, 7  ;;  %vm15433_vm3 = vmmov %vm15432_vm2 }
  0xdb   :  { %v9965_v11 = vpop.permute.xlu1 %371  ;;  %v370_v35 = vpop.permute.xlu0 %369  ;;  %v650_v36 = vrot.slane %v648_v37, 7 }
  0xdc   :  { %v392_v33 = vsel %vm15426_vm8, %v9851_v0, %v370_v35  ;;  %v393_v46 = vsel %vm15427_vm15, %v370_v35, %v9965_v11  ;;  %v915_v0 = vsel %vm879_vm4, %v886_v51, %v617_v50  ;;  %vm15434_vm8 = vcmask 72704  }
  0xdd   :  { %427 = vrot.lane.b32.xlu1 %v9836_v20, %s9325_s28  ;;  %475 = vrot.lane.b32.xlu0 %v9546_v23, %s9324_s7  ;;  %v728_v52 = vshll.u32 %v392_v33, 16  ;;  %v732_v58 = vshll.u32 %v393_v46, 16  ;;  %v960_v6 = vsel %vm9728_vm14, %v915_v0, %v646_v62  ;;  %v1532_v46 = vld [vmem:[%s15430_s25] sm:$0xff]  ;;  %vm15435_vm15 = vcmask 1039360  }
  0xdf   :  { %v9975_v42 = vpop.permute.xlu1 %325  ;;  %v324_v44 = vpop.permute.xlu0 %323  ;;  %v730_v7 = vrot.slane %v728_v52, 6  ;;  %v734_v8 = vrot.slane %v732_v58, 6 }
  0xe0   :  { %v346_v41 = vsel %vm15428_vm0, %v9863_v13, %v324_v44  ;;  %v347_v49 = vsel %vm15429_vm1, %v324_v44, %v9975_v42  ;;  %v919_v13 = vsel %vm879_vm4, %v887_v14, %v618_v19  ;;  %vm15436_vm0 = vmmov %vm15435_vm15  ;;  %vm15437_vm1 = vcmask 1031168  }
  0xe1   :  { %477 = vrot.lane.b32.xlu1 %v9557_v25, %s9324_s7  ;;  %429 = vrot.lane.b32.xlu0 %v9546_v23, %s9325_s28  ;;  %v701_v18 = vrot.slane %v346_v41, 6  ;;  %v702_v59 = vrot.slane %v347_v49, 6  ;;  %v961_v38 = vsel %vm9728_vm14, %v919_v13, %v650_v36  ;;  %v1572_v36 = vld [vmem:[%s15431_s30] sm:$0xff] }
  0xe3   :  { %v9997_v61 = vpop.permute.xlu1 %463  ;;  %v462_v21 = vpop.permute.xlu0 %461  ;;  %v989_v35 = vsel %vm953_vm7, %v960_v6, %v701_v18 }
  0xe4   :  { %v484_v29 = vsel %vm479_vm11, %v9886_v39, %v462_v21  ;;  %v485_v54 = vsel %vm479_vm11, %v462_v21, %v9997_v61  ;;  %v993_v39 = vsel %vm953_vm7, %v961_v38, %v702_v59  ;;  %v1034_v33 = vsel %vm9754_vm5, %v989_v35, %v730_v7 }
  0xe5   :  { %519 = vrot.lane.b32.xlu1 %v9836_v20, %s9326_s29  ;;  %431 = vrot.lane.b32.xlu0 %v9557_v25, %s9325_s28  ;;  %v812_v17 = vshll.u32 %v484_v29, 16  ;;  %v816_v9 = vshll.u32 %v485_v54, 16  ;;  %v1035_v44 = vsel %vm9754_vm5, %v993_v39, %v734_v8 }
  0xe7   :  { %v10013_v47 = vpop.permute.xlu1 %417  ;;  %v416_v15 = vpop.permute.xlu0 %415  ;;  %v814_v0 = vrot.slane %v812_v17, 5  ;;  %v818_v13 = vrot.slane %v816_v9, 5 }
  0xe8   :  { %v438_v50 = vsel %vm433_vm10, %v9902_v53, %v416_v15  ;;  %v439_v19 = vsel %vm433_vm10, %v416_v15, %v10013_v47  ;;  %v1533_v53 = vld [vmem:[%s15430_s25 + $0x8] sm:$0xff]  ;;  %s9333_s25 = smov 12  }
  0xe9   :  { %v785_v2 = vrot.slane %v438_v50, 5  ;;  %v786_v37 = vrot.slane %v439_v19, 5  ;;  %523 = vrot.lane.b32.xlu1 %v9557_v25, %s9326_s29  ;;  %521 = vrot.lane.b32.xlu0 %v9546_v23, %s9326_s29 }
  0xeb   :  { %v10033_v41 = vpop.permute.xlu1 %509  ;;  %v508_v49 = vpop.permute.xlu0 %507  ;;  %v1067_v51 = vsel %vm15386_vm12, %v1035_v44, %v786_v37  ;;  %v1063_v14 = vsel %vm15386_vm12, %v1034_v33, %v785_v2 }
  0xec   :  { %v530_v52 = vsel %vm525_vm13, %v9918_v34, %v508_v49  ;;  %v531_v58 = vsel %vm525_vm13, %v508_v49, %v10033_v41  ;;  %v1109_v21 = vsel %vm9780_vm6, %v1067_v51, %v818_v13  ;;  %v1108_v62 = vsel %vm9780_vm6, %v1063_v14, %v814_v0  ;;  %v1573_v34 = vld [vmem:[%s15431_s30 + $0x8] sm:$0xff]  ;;  %s15545_s30 = sld [smem:[#allocation10_spill]] }
  0xed   :  { %v869_v18 = vrot.slane %v530_v52, 4  ;;  %v870_v59 = vrot.slane %v531_v58, 4  ;;  %1541 = vperm.xlu1 %9080, %v1533_v53   ;;  %1536 = vperm.xlu0 %9079, %v1532_v46  }
  0xef   :  { %v10051_v29 = vpop.permute.xlu1 %191  ;;  %v190_v54 = vpop.permute.xlu0 %189  ;;  %v1136_v6 = vsel %vm15432_vm2, %v1109_v21, %v870_v59  ;;  %v1133_v38 = vsel %vm15433_vm3, %v1108_v62, %v869_v18  ;;  %vm15438_vm2 = vmmov %vm15437_vm1  ;;  %vm15439_vm3 = vcmask 818176  }
  0xf0   :  { %v1185_v7 = vand.u32 %v9796_v5, %v1136_v6  ;;  %v1183_v8 = vand.u32 %v9796_v5, %v1133_v38  ;;  %v210_v9 = vsel %vm15435_vm15, %v9933_v55, %v190_v54  ;;  %v211_v50 = vsel %vm15436_vm0, %v190_v54, %v10051_v29 }
  0xf1   :  { %1576 = vperm.xlu1 %9080, %v1572_v36   ;;  %1581 = vperm.xlu0 %9079, %v1573_v34   ;;  %v576_v46 = vshll.u32 %v210_v9, 16  ;;  %v579_v55 = vshll.u32 %v211_v50, 16  ;;  %vm15441_vm15 = vcmask 801792  }
  0xf2   :  { %1289 = vmatprep.subr.bf16.mxu0 %v1185_v7  ;;  %vm15442_vm0 = vmmov %vm15441_vm15 }
  0xf3   :  { %v10057_v35 = vpop.permute.xlu1 %283  ;;  %1290 = vmatpush1.bf16.msra.mxu0 %v1183_v8  ;;  %v282_v39 = vpop.permute.xlu0 %281  ;;  %v888_v59 = vsel %vm9708_vm9, %v9589_v28, %v576_v46  ;;  %v889_v21 = vsel %vm9708_vm9, %v9628_v30, %v579_v55 }
  0xf4   :  { %v302_v33 = vsel %vm15439_vm3, %v9942_v4, %v282_v39 }
  0xf5   :  { %v652_v14 = vshll.u32 %v302_v33, 16 }
  0xf6   :  { %8478 = vmatmul.mubr.msk.bf16.vlgmr.msra.gmra.mrb[0].mxu0 %vm15434_vm8, %v9845_v60  ;;  %vm15440_vm8 = vmmov %vm15439_vm3  ;;  %vm15445_vm3 = vcmask 1043456  }
  0xf7   :  { %v10061_v15 = vpop.permute.xlu1 %237  ;;  %v236_v17 = vpop.permute.xlu0 %235  ;;  %1407 = vmatprep.mubr.bf16.mxu0 %v15387_v26  ;;  %v303_v53 = vsel %vm15440_vm8, %v282_v39, %v10057_v35  ;;  %v654_v7 = vrot.slane %v652_v14, 7  ;;  %vm15446_vm8 = vmmov %vm15445_vm3 }
  0xf8   :  { %v256_v19 = vsel %vm15437_vm1, %v9950_v56, %v236_v17  ;;  %v257_v2 = vsel %vm15438_vm2, %v236_v17, %v10061_v15  ;;  %v656_v0 = vshll.u32 %v303_v53, 16  ;;  %vm15443_vm1 = vcmask 809984  }
  0xf9   :  { %v619_v49 = vrot.slane %v256_v19, 7  ;;  %v620_v51 = vrot.slane %v257_v2, 7  ;;  %vm15444_vm2 = vmmov %vm15443_vm1 }
  0xfa   :  { %v658_v8 = vrot.slane %v656_v0, 7 }
  0xfb   :  { %v10072_v37 = vpop.permute.xlu1 %375  ;;  %v374_v44 = vpop.permute.xlu0 %373  ;;  %v923_v62 = vsel %vm879_vm4, %v888_v59, %v619_v49 }
  0xfc   :  { %v394_v52 = vsel %vm15441_vm15, %v9965_v11, %v374_v44  ;;  %v395_v58 = vsel %vm15442_vm0, %v374_v44, %v10072_v37  ;;  %v927_v11 = vsel %vm879_vm4, %v889_v21, %v620_v51  ;;  %v962_v30 = vsel %vm9728_vm14, %v923_v62, %v654_v7 }
  0xfd   :  { %v736_v36 = vshll.u32 %v394_v52, 16  ;;  %v740_v34 = vshll.u32 %v395_v58, 16  ;;  %v963_v17 = vsel %vm9728_vm14, %v927_v11, %v658_v8  ;;  %vm15447_vm15 = vcmask 72704  }
  0xfe   :  { %vm15448_vm0 = vcmask 1039360  }
  0xff   :  { %v10078_v13 = vpop.permute.xlu1 %329  ;;  %v328_v56 = vpop.permute.xlu0 %327  ;;  %v738_v9 = vrot.slane %v736_v36, 6  ;;  %v742_v50 = vrot.slane %v740_v34, 6 }
 0x100   :  { %v348_v4 = vsel %vm15443_vm1, %v9975_v42, %v328_v56  ;;  %v349_v18 = vsel %vm15444_vm2, %v328_v56, %v10078_v13  ;;  %vm15449_vm1 = vmmov %vm15448_vm0  ;;  %vm15450_vm2 = vcmask 1031168  }
 0x101   :  { %v703_v54 = vrot.slane %v348_v4, 6  ;;  %v704_v6 = vrot.slane %v349_v18, 6 }
 0x103   :  { %v10096_v42 = vpop.permute.xlu1 %467  ;;  %v466_v38 = vpop.permute.xlu0 %465  ;;  %v997_v19 = vsel %vm953_vm7, %v962_v30, %v703_v54  ;;  %v1001_v2 = vsel %vm953_vm7, %v963_v17, %v704_v6 }
 0x104   :  { %v486_v28 = vsel %vm479_vm11, %v9997_v61, %v466_v38  ;;  %v487_v39 = vsel %vm479_vm11, %v466_v38, %v10096_v42  ;;  %v1036_v14 = vsel %vm9754_vm5, %v997_v19, %v738_v9  ;;  %v1037_v0 = vsel %vm9754_vm5, %v1001_v2, %v742_v50 }
 0x105   :  { %v820_v53 = vshll.u32 %v486_v28, 16  ;;  %v824_v61 = vshll.u32 %v487_v39, 16 }
 0x107   :  { %v10108_v44 = vpop.permute.xlu1 %421  ;;  %v420_v33 = vpop.permute.xlu0 %419  ;;  %v822_v18 = vrot.slane %v820_v53, 5 }
 0x108   :  { %v440_v46 = vsel %vm433_vm10, %v10013_v47, %v420_v33  ;;  %v441_v55 = vsel %vm433_vm10, %v420_v33, %v10108_v44  ;;  %v826_v47 = vrot.slane %v824_v61, 5 }
 0x109   :  { %v787_v49 = vrot.slane %v440_v46, 5  ;;  %v788_v51 = vrot.slane %v441_v55, 5 }
 0x10b   :  { %v1071_v56 = vsel %vm15386_vm12, %v1036_v14, %v787_v49  ;;  %v1075_v52 = vsel %vm15386_vm12, %v1037_v0, %v788_v51  ;;  %v10120_v58 = vpop.permute.xlu1 %513  ;;  %v512_v4 = vpop.permute.xlu0 %511 }
 0x10c   :  { %v532_v59 = vsel %vm525_vm13, %v10033_v41, %v512_v4  ;;  %v533_v21 = vsel %vm525_vm13, %v512_v4, %v10120_v58  ;;  %v1110_v36 = vsel %vm9780_vm6, %v1071_v56, %v822_v18  ;;  %v1111_v34 = vsel %vm9780_vm6, %v1075_v52, %v826_v47 }
 0x10d   :  { %v871_v62 = vrot.slane %v532_v59, 4  ;;  %v872_v11 = vrot.slane %v533_v21, 4 }
 0x10f   :  { %v1139_v54 = vsel %vm15445_vm3, %v1110_v36, %v871_v62  ;;  %v10131_v6 = vpop.permute.xlu1 %195  ;;  %v194_v38 = vpop.permute.xlu0 %193  ;;  %v1142_v7 = vsel %vm15446_vm8, %v1111_v34, %v872_v11  ;;  %vm15451_vm3 = vmmov %vm15450_vm2  ;;  %vm15452_vm8 = vcmask 818176  }
 0x110   :  { %v1189_v41 = vand.u32 %v9796_v5, %v1142_v7  ;;  %v1187_v8 = vand.u32 %v9796_v5, %v1139_v54  ;;  %v212_v9 = vsel %vm15448_vm0, %v10051_v29, %v194_v38  ;;  %v213_v50 = vsel %vm15449_vm1, %v194_v38, %v10131_v6 }
 0x111   :  { %v582_v55 = vshll.u32 %v212_v9, 16  ;;  %v585_v29 = vshll.u32 %v213_v50, 16  ;;  %vm15454_vm0 = vcmask 801792  }
 0x112   :  { %1332 = vmatprep.subr.bf16.mxu1 %v1189_v41  ;;  %vm15455_vm1 = vmmov %vm15454_vm0 }
 0x113   :  { %v10136_v28 = vpop.permute.xlu1 %287  ;;  %1333 = vmatpush1.bf16.msra.mxu1 %v1187_v8  ;;  %v286_v39 = vpop.permute.xlu0 %285  ;;  %v890_v47 = vsel %vm9708_vm9, %v9476_v12, %v582_v55  ;;  %v891_v59 = vsel %vm9708_vm9, %v9502_v16, %v585_v29 }
 0x114   :  { %v304_v61 = vsel %vm15452_vm8, %v10057_v35, %v286_v39 }
 0x115   :  { %v660_v14 = vshll.u32 %v304_v61, 16 }
 0x116   :  { %8479 = vmatmul.mubr.msk.bf16.vlgmr.msra.gmra.mrb[8].mxu1 %vm15447_vm15, %v9845_v60  ;;  %vm15453_vm15 = vmmov %vm15452_vm8  ;;  %vm15458_vm8 = vcmask 1043456  }
 0x117   :  { %v10140_v30 = vpop.permute.xlu1 %241  ;;  %v240_v17 = vpop.permute.xlu0 %239  ;;  %1450 = vmatprep.mubr.bf16.mxu1 %v15387_v26  ;;  %v305_v46 = vsel %vm15453_vm15, %v286_v39, %v10136_v28  ;;  %v662_v38 = vrot.slane %v660_v14, 7  ;;  %vm15459_vm15 = vmmov %vm15458_vm8 }
 0x118   :  { %v258_v19 = vsel %vm15450_vm2, %v10061_v15, %v240_v17  ;;  %v259_v2 = vsel %vm15451_vm3, %v240_v17, %v10140_v30  ;;  %v664_v0 = vshll.u32 %v305_v46, 16  ;;  %vm15456_vm2 = vcmask 809984  }
 0x119   :  { %v621_v49 = vrot.slane %v258_v19, 7  ;;  %v622_v51 = vrot.slane %v259_v2, 7  ;;  %vm15457_vm3 = vmmov %vm15456_vm2 }
 0x11a   :  { %v666_v7 = vrot.slane %v664_v0, 7 }
 0x11b   :  { %v10151_v33 = vpop.permute.xlu1 %379  ;;  %v378_v53 = vpop.permute.xlu0 %377  ;;  %v931_v21 = vsel %vm879_vm4, %v890_v47, %v621_v49 }
 0x11c   :  { %v396_v52 = vsel %vm15454_vm0, %v10072_v37, %v378_v53  ;;  %v397_v4 = vsel %vm15455_vm1, %v378_v53, %v10151_v33  ;;  %v935_v37 = vsel %vm879_vm4, %v891_v59, %v622_v51  ;;  %v964_v16 = vsel %vm9728_vm14, %v931_v21, %v662_v38 }
 0x11d   :  { %v744_v62 = vshll.u32 %v396_v52, 16  ;;  %v748_v11 = vshll.u32 %v397_v4, 16  ;;  %v965_v8 = vsel %vm9728_vm14, %v935_v37, %v666_v7  ;;  %vm15460_vm0 = vcmask 72704  }
 0x11e   :  { %vm15461_vm1 = vcmask 1039360  }
 0x11f   :  { %v10157_v56 = vpop.permute.xlu1 %333  ;;  %v332_v15 = vpop.permute.xlu0 %331  ;;  %v746_v39 = vrot.slane %v744_v62, 6  ;;  %v750_v17 = vrot.slane %v748_v11, 6 }
 0x120   :  { %v350_v35 = vsel %vm15456_vm2, %v10078_v13, %v332_v15  ;;  %v351_v18 = vsel %vm15457_vm3, %v332_v15, %v10157_v56  ;;  %vm15462_vm2 = vmmov %vm15461_vm1  ;;  %vm15463_vm3 = vcmask 818176  }
 0x121   :  { %v705_v36 = vrot.slane %v350_v35, 6  ;;  %v706_v34 = vrot.slane %v351_v18, 6 }
 0x123   :  { %v10175_v13 = vpop.permute.xlu1 %471  ;;  %v470_v54 = vpop.permute.xlu0 %469  ;;  %v1005_v9 = vsel %vm953_vm7, %v964_v16, %v705_v36  ;;  %v1009_v50 = vsel %vm953_vm7, %v965_v8, %v706_v34 }
 0x124   :  { %v488_v12 = vsel %vm479_vm11, %v10096_v42, %v470_v54  ;;  %v489_v41 = vsel %vm479_vm11, %v470_v54, %v10175_v13  ;;  %v1038_v49 = vsel %vm9754_vm5, %v1005_v9, %v746_v39  ;;  %v1039_v51 = vsel %vm9754_vm5, %v1009_v50, %v750_v17 }
 0x125   :  { %v828_v53 = vshll.u32 %v488_v12, 16  ;;  %v832_v42 = vshll.u32 %v489_v41, 16 }
 0x127   :  { %v10187_v19 = vpop.permute.xlu1 %425  ;;  %v424_v2 = vpop.permute.xlu0 %423  ;;  %v830_v4 = vrot.slane %v828_v53, 5 }
 0x128   :  { %v442_v61 = vsel %vm433_vm10, %v10108_v44, %v424_v2  ;;  %v443_v46 = vsel %vm433_vm10, %v424_v2, %v10187_v19  ;;  %v834_v44 = vrot.slane %v832_v42, 5 }
 0x129   :  { %v789_v55 = vrot.slane %v442_v61, 5  ;;  %v790_v29 = vrot.slane %v443_v46, 5 }
 0x12b   :  { %v1079_v14 = vsel %vm15386_vm12, %v1038_v49, %v789_v55  ;;  %v1083_v0 = vsel %vm15386_vm12, %v1039_v51, %v790_v29  ;;  %v10199_v15 = vpop.permute.xlu1 %517  ;;  %v516_v52 = vpop.permute.xlu0 %515  ;;  %vm15467_vm12 = vmmov %vm15463_vm3 }
 0x12c   :  { %v534_v35 = vsel %vm525_vm13, %v10120_v58, %v516_v52  ;;  %v535_v18 = vsel %vm525_vm13, %v516_v52, %v10199_v15  ;;  %v1112_v21 = vsel %vm9780_vm6, %v1079_v14, %v830_v4  ;;  %v1113_v37 = vsel %vm9780_vm6, %v1083_v0, %v834_v44 }
 0x12d   :  { %v873_v47 = vrot.slane %v534_v35, 4  ;;  %v874_v59 = vrot.slane %v535_v18, 4 }
 0x12f   :  { %v1145_v62 = vsel %vm15458_vm8, %v1112_v21, %v873_v47  ;;  %v200_v11 = vpop.permute.xlu1 %199  ;;  %v198_v36 = vpop.permute.xlu0 %197  ;;  %v1148_v34 = vsel %vm15459_vm15, %v1113_v37, %v874_v59  ;;  %vm15464_vm8 = vmmov %vm15463_vm3  ;;  %vm15465_vm15 = vcmask 1031168  }
 0x130   :  { %v1193_v54 = vand.u32 %v9796_v5, %v1148_v34  ;;  %v1191_v58 = vand.u32 %v9796_v5, %v1145_v62  ;;  %v214_v9 = vsel %vm15461_vm1, %v10131_v6, %v198_v36  ;;  %v215_v50 = vsel %vm15462_vm2, %v198_v36, %v200_v11 }
 0x131   :  { %v588_v46 = vshll.u32 %v214_v9, 16  ;;  %v591_v49 = vshll.u32 %v215_v50, 16 }
 0x132   :  { %1375 = vmatprep.subr.bf16.mxu0 %v1193_v54 }
 0x133   :  { %v292_v38 = vpop.permute.xlu1 %291  ;;  %1376 = vmatpush1.bf16.msra.mxu0 %v1191_v58  ;;  %v290_v7 = vpop.permute.xlu0 %289  ;;  %v892_v18 = vsel %vm9708_vm9, %v9686_v45, %v588_v46  ;;  %v893_v59 = vsel %vm9708_vm9, %v9836_v20, %v591_v49 }
 0x134   :  { %v306_v2 = vsel %vm15463_vm3, %v10136_v28, %v290_v7  ;;  %v307_v53 = vsel %vm15464_vm8, %v290_v7, %v292_v38 }
 0x135   :  { %v668_v51 = vshll.u32 %v306_v2, 16  ;;  %v672_v6 = vshll.u32 %v307_v53, 16 }
 0x136   :  { %8480 = vmatmul.mubr.msk.bf16.vlgmr.msra.gmra.mrb[4].mxu0 %vm15460_vm0, %v9845_v60  ;;  %vm15466_vm0 = vmmov %vm15461_vm1 }
 0x137   :  { %v244_v12 = vpop.permute.xlu1 %243  ;;  %v202_v41 = vpop.permute.xlu0 %201  ;;  %1493 = vmatprep.mubr.bf16.mxu0 %v15387_v26  ;;  %vm15468_vm1 = vmmov %vm15465_vm15  ;;  %v670_v21 = vrot.slane %v668_v51, 7 }
 0x138   :  { %v260_v55 = vsel %vm15465_vm15, %v10140_v30, %v244_v12  ;;  %v216_v29 = vsel %vm15466_vm0, %v200_v11, %v202_v41  ;;  %vm15469_vm2 = vmmov %vm15468_vm1  ;;  %v674_v11 = vrot.slane %v672_v6, 7 }
 0x139   :  { %v623_v52 = vrot.slane %v260_v55, 7  ;;  %v594_v4 = vshll.u32 %v216_v29, 16  ;;  %vm15470_vm3 = vmmov %vm15466_vm0 }
 0x13a   :  { %v220_v30 = vsel %vm15470_vm3, %v202_v41, %v9636_v32  ;;  %vm15473_vm15 = vmmov %vm15468_vm1 }
 0x13b   :  { %v294_v16 = vpop.permute.xlu1 %293  ;;  %v246_v8 = vpop.permute.xlu0 %245  ;;  %v939_v32 = vsel %vm879_vm4, %v892_v18, %v623_v52  ;;  %v596_v54 = vshll.u32 %v220_v30, 16  ;;  %v894_v20 = vsel %vm9708_vm9, %v9546_v23, %v594_v4 }
 0x13c   :  { %v308_v14 = vsel %vm15467_vm12, %v292_v38, %v294_v16  ;;  %v261_v0 = vsel %vm15468_vm1, %v244_v12, %v246_v8  ;;  %vm15471_vm12 = vmmov %vm15464_vm8  ;;  %vm15472_vm8 = vcmask 801792   ;;  %v966_v49 = vsel %vm9728_vm14, %v939_v32, %v670_v21 }
 0x13d   :  { %v676_v47 = vshll.u32 %v308_v14, 16  ;;  %v312_v37 = vsel %vm15471_vm12, %v294_v16, %v9634_v31  ;;  %v624_v62 = vrot.slane %v261_v0, 7  ;;  %vm15474_vm0 = vmmov %vm15472_vm8  ;;  %v895_v29 = vsel %vm9708_vm9, %v9557_v25, %v596_v54 }
 0x13e   :  { %v679_v12 = vshll.u32 %v312_v37, 16  ;;  %vm15475_vm1 = vmmov %vm15474_vm0  ;;  %vm15481_vm9 = vcmask 1042432  }
 0x13f   :  { %v382_v39 = vpop.permute.xlu1 %381  ;;  %v248_v17 = vpop.permute.xlu0 %247  ;;  %v678_v7 = vrot.slane %v676_v47, 7 }
 0x140   :  { %v262_v28 = vsel %vm15469_vm2, %v246_v8, %v248_v17  ;;  %v398_v36 = vsel %vm15472_vm8, %v10151_v33, %v382_v39  ;;  %v266_v45 = vsel %vm15473_vm15, %v248_v17, %v9662_v40  ;;  %vm15476_vm2 = vcmask 809984   ;;  %vm15479_vm8 = vmmov %vm15474_vm0 }
 0x141   :  { %v625_v34 = vrot.slane %v262_v28, 7  ;;  %v943_v40 = vsel %vm879_vm4, %v893_v59, %v624_v62  ;;  %v752_v16 = vshll.u32 %v398_v36, 16  ;;  %v626_v8 = vrot.slane %v266_v45, 7  ;;  %vm15477_vm3 = vmmov %vm15476_vm2 }
 0x142   :  { %vm15478_vm12 = vmmov %vm15476_vm2  ;;  %v681_v51 = vrot.slane %v679_v12, 7 }
 0x143   :  { %v336_v42 = vpop.permute.xlu1 %335  ;;  %v384_v61 = vpop.permute.xlu0 %383  ;;  %v947_v9 = vsel %vm879_vm4, %v894_v20, %v625_v34  ;;  %vm15480_vm15 = vmmov %vm15476_vm2  ;;  %v951_v0 = vsel %vm879_vm4, %v895_v29, %v626_v8 }
 0x144   :  { %v399_v58 = vsel %vm15474_vm0, %v382_v39, %v384_v61  ;;  %v352_v23 = vsel %vm15478_vm12, %v10157_v56, %v336_v42  ;;  %v967_v56 = vsel %vm9728_vm14, %v943_v40, %v674_v11  ;;  %v968_v6 = vsel %vm9728_vm14, %v947_v9, %v678_v7  ;;  %vm15483_vm0 = vmmov %vm15481_vm9 }
 0x145   :  { %v756_v39 = vshll.u32 %v399_v58, 16  ;;  %v969_v11 = vsel %vm9728_vm14, %v951_v0, %v681_v51  ;;  %vm15482_vm14 = vmmov %vm15481_vm9 }
 0x147   :  { %v386_v44 = vpop.permute.xlu1 %385  ;;  %v338_v35 = vpop.permute.xlu0 %337  ;;  %v758_v52 = vrot.slane %v756_v39, 6 }
 0x148   :  { %v400_v41 = vsel %vm15475_vm1, %v384_v61, %v386_v44  ;;  %v353_v33 = vsel %vm15476_vm2, %v336_v42, %v338_v35  ;;  %v404_v50 = vsel %vm15479_vm8, %v386_v44, %v9676_v43  ;;  %v707_v43 = vrot.slane %v352_v23, 6  ;;  %vm15484_vm1 = vmmov %vm15483_vm0 }
 0x149   :  { %v760_v2 = vshll.u32 %v400_v41, 16  ;;  %v708_v53 = vrot.slane %v353_v33, 6  ;;  %v763_v14 = vshll.u32 %v404_v50, 16 }
 0x14a   :  { %v1013_v37 = vsel %vm953_vm7, %v966_v49, %v707_v43 }
 0x14b   :  { %v474_v38 = vpop.permute.xlu1 %473  ;;  %v340_v31 = vpop.permute.xlu0 %339  ;;  %v762_v57 = vrot.slane %v760_v2, 6  ;;  %v1017_v25 = vsel %vm953_vm7, %v967_v56, %v708_v53  ;;  %v765_v62 = vrot.slane %v763_v14, 6 }
 0x14c   :  { %v354_v17 = vsel %vm15477_vm3, %v338_v35, %v340_v31  ;;  %v358_v61 = vsel %vm15480_vm15, %v340_v31, %v9692_v48  ;;  %v754_v48 = vrot.slane %v752_v16, 6  ;;  %v490_v30 = vsel %vm479_vm11, %v10175_v13, %v474_v38 }
 0x14d   :  { %v709_v42 = vrot.slane %v354_v17, 6  ;;  %v710_v4 = vrot.slane %v358_v61, 6  ;;  %v836_v32 = vshll.u32 %v490_v30, 16  ;;  %v1041_v54 = vsel %vm9754_vm5, %v1017_v25, %v758_v52 }
 0x14e   :  { %v1040_v41 = vsel %vm9754_vm5, %v1013_v37, %v754_v48  ;;  %vm2126_vm15 = vcmask 130048  }
 0x14f   :  { %v428_v46 = vpop.permute.xlu1 %427  ;;  %v476_v55 = vpop.permute.xlu0 %475  ;;  %v1021_v47 = vsel %vm953_vm7, %v968_v6, %v709_v42  ;;  %v1025_v36 = vsel %vm953_vm7, %v969_v11, %v710_v4  ;;  %v838_v39 = vrot.slane %v836_v32, 5 }
 0x150   :  { %v444_v28 = vsel %vm433_vm10, %v10187_v19, %v428_v46  ;;  %v491_v44 = vsel %vm479_vm11, %v474_v38, %v476_v55  ;;  %v1042_v38 = vsel %vm9754_vm5, %v1021_v47, %v762_v57  ;;  %v1043_v33 = vsel %vm9754_vm5, %v1025_v36, %v765_v62 }
 0x151   :  { %v791_v45 = vrot.slane %v444_v28, 5  ;;  %v840_v34 = vshll.u32 %v491_v44, 16  ;;  %vm15485_vm5 = vcmask 1043456  }
 0x152   :  { %vm15486_vm2 = vmmov %vm15485_vm5 }
 0x153   :  { %v478_v35 = vpop.permute.xlu1 %477  ;;  %v430_v18 = vpop.permute.xlu0 %429  ;;  %v1087_v8 = vsel %vm15481_vm9, %v1040_v41, %v791_v45  ;;  %v842_v17 = vrot.slane %v840_v34, 5  ;;  %vm15487_vm3 = vmmov %vm15486_vm2  ;;  %vm15492_vm9 = vcmask 1039360  }
 0x154   :  { %v492_v59 = vsel %vm479_vm11, %v476_v55, %v478_v35  ;;  %v445_v21 = vsel %vm433_vm10, %v428_v46, %v430_v18  ;;  %v496_v19 = vsel %vm479_vm11, %v478_v35, %v9732_v1  ;;  %v1114_v29 = vsel %vm9780_vm6, %v1087_v8, %v838_v39  ;;  %vm15488_vm12 = vmmov %vm15486_vm2 }
 0x155   :  { %v844_v13 = vshll.u32 %v492_v59, 16  ;;  %v792_v20 = vrot.slane %v445_v21, 5  ;;  %v847_v63 = vshll.u32 %v496_v19, 16 }
 0x157   :  { %v520_v58 = vpop.permute.xlu1 %519  ;;  %v432_v31 = vpop.permute.xlu0 %431  ;;  %v846_v9 = vrot.slane %v844_v13, 5  ;;  %v849_v61 = vrot.slane %v847_v63, 5 }
 0x158   :  { %v536_v7 = vsel %vm525_vm13, %v10199_v15, %v520_v58  ;;  %v446_v1 = vsel %vm433_vm10, %v430_v18, %v432_v31  ;;  %v450_v12 = vsel %vm433_vm10, %v432_v31, %v9750_v22  ;;  %v1091_v15 = vsel %vm15482_vm14, %v1041_v54, %v792_v20  ;;  %vm15493_vm14 = vmmov %vm15492_vm9 }
 0x159   :  { %v793_v40 = vrot.slane %v446_v1, 5  ;;  %v794_v16 = vrot.slane %v450_v12, 5  ;;  %v875_v23 = vrot.slane %v536_v7, 4  ;;  %v1115_v14 = vsel %vm9780_vm6, %v1091_v15, %v842_v17 }
 0x15b   :  { %v1095_v50 = vsel %vm15483_vm0, %v1042_v38, %v793_v40  ;;  %v1099_v22 = vsel %vm15484_vm1, %v1043_v33, %v794_v16  ;;  %v524_v2 = vpop.permute.xlu1 %523  ;;  %v522_v53 = vpop.permute.xlu0 %521  ;;  %v1151_v51 = vsel %vm15485_vm5, %v1114_v29, %v875_v23  ;;  %vm15494_vm0 = vcmask 1031168  }
 0x15c   :  { %v542_v24 = vsel %vm525_vm13, %v524_v2, %v9813_v27  ;;  %v537_v46 = vsel %vm525_vm13, %v520_v58, %v522_v53  ;;  %v538_v55 = vsel %vm525_vm13, %v522_v53, %v524_v2  ;;  %v1116_v43 = vsel %vm9780_vm6, %v1095_v50, %v846_v9  ;;  %vm15495_vm1 = vmmov %vm15494_vm0 }
 0x15d   :  { %v878_v49 = vrot.slane %v542_v24, 4  ;;  %v876_v56 = vrot.slane %v537_v46, 4  ;;  %v877_v42 = vrot.slane %v538_v55, 4  ;;  %v1117_v27 = vsel %vm9780_vm6, %v1099_v22, %v849_v61 }
 0x15e   :  { %v1195_v25 = vand.u32 %v9796_v5, %v1151_v51  ;;  %vm15489_vm6 = vcmask 72704   ;;  %vm15496_vm5 = vcmask 818176  }
 0x15f   :  { %v1157_v6 = vsel %vm15486_vm2, %v1116_v43, %v877_v42  ;;  %v1154_v48 = vsel %vm15487_vm3, %v1115_v14, %v876_v56  ;;  %v1160_v0 = vsel %vm15488_vm12, %v1117_v27, %v878_v49  ;;  %vm15490_vm8 = vmmov %vm15489_vm6  ;;  %vm15498_vm3 = vcmask 809984  }
 0x160   :  { %v1197_v52 = vand.u32 %v9796_v5, %v1154_v48  ;;  %v1201_v4 = vand.u32 %v9796_v5, %v1160_v0  ;;  %v1199_v57 = vand.u32 %v9796_v5, %v1157_v6  ;;  %vm15497_vm2 = vmmov %vm15496_vm5 }
 0x161   :  { %vm15499_vm12 = vmmov %vm15498_vm3 }
 0x162   :  { %1418 = vmatprep.subr.bf16.mxu1 %v1197_v52  ;;  %1461 = vmatprep.subr.bf16.mxu0 %v1201_v4 }
 0x163   :  { %1419 = vmatpush1.bf16.msra.mxu1 %v1195_v25  ;;  %1462 = vmatpush1.bf16.msra.mxu0 %v1199_v57 }
 0x166   :  { %8481 = vmatmul.mubr.msk.bf16.vlgmr.msra.gmra.mrb[12].mxu1 %vm15489_vm6, %v9845_v60  ;;  %8482 = vmatmul.mubr.msk.bf16.vlgmr.msra.gmra.mrb[8].mxu0 %vm15490_vm8, %v9845_v60  ;;  %vm15500_vm6 = vcmask 801792  }
 0x167   :  { %vm15501_vm8 = vmmov %vm15500_vm6 }
 0x16c   :  { %v10324_v10 = vpop.permute.xlu1 %1541  ;;  %v10326_v28 = vpop.permute.xlu0 %1536 }
 0x170   :  { %v10328_v5 = vpop.permute.xlu1 %1576  ;;  %v10331_v11 = vpop.permute.xlu0 %1581 }
 0x191   :  { %v1237_v44 = vpop.f32.mrb[0].mxu1 }
 0x192   :  { %v1504_v35 = vmax.f32 %v1237_v44, 0.0  ;;  %v1239_v18 = vpop.f32.mrb[1].mxu1 }
 0x193   :  { %v1505_v30 = vmax.f32 %v1239_v18, 0.0  ;;  %v1241_v47 = vpop.f32.mrb[2].mxu1 }
 0x194   :  { %v1518_v59 = vmax.f32 %v1241_v47, 0.0  ;;  %v1243_v21 = vpop.f32.mrb[3].mxu1  ;;  %v1544_v37 = vmul.f32 %v10326_v28, %v1504_v35 }
 0x195   :  { %v1519_v62 = vmax.f32 %v1243_v21, 0.0  ;;  %v1545_v60 = vmul.f32 %v10326_v28, %v1505_v30 }
 0x196   :  { %v1558_v19 = vmul.f32 %v10324_v10, %v1518_v59  ;;  %v1584_v36 = vadd.f32 %v10328_v5, %v1544_v37 }
 0x197   :  { %v1559_v45 = vmul.f32 %v10324_v10, %v1519_v62  ;;  %v1585_v34 = vadd.f32 %v10328_v5, %v1545_v60 }
 0x198   :  { %v1598_v13 = vadd.f32 %v10331_v11, %v1558_v19 }
 0x199   :  { %v1599_v32 = vadd.f32 %v10331_v11, %v1559_v45 }
 0x19a   :  { %v1612_v54 = vpack.c.bf16 %v1598_v13, %v1584_v36 }
 0x19b   :  { %v10340_v20 = vpack.c.bf16 %v1599_v32, %v1585_v34 }
 0x19c   :  { %1640 = vrot.lane.b32.xlu1 %v1612_v54, %s9320_s26  ;;  %1698 = vrot.lane.b32.xlu0 %v1612_v54, %s9321_s2 }
 0x19d   :  { %2133 = vmatprep.subr.bf16.mxu1 %v10340_v20 }
 0x19e   :  { %2134 = vmatpush1.bf16.msra.mxu1 %v1612_v54 }
 0x1a0   :  { %1756 = vrot.lane.b32.xlu1 %v1612_v54, %s9319_s1 }
 0x1a9   :  { %v1280_v58 = vpop.f32.mrb[4].mxu1 }
 0x1aa   :  { %v1506_v38 = vmax.f32 %v1280_v58, 0.0  ;;  %v1282_v31 = vpop.f32.mrb[5].mxu1 }
 0x1ab   :  { %v1507_v63 = vmax.f32 %v1282_v31, 0.0  ;;  %v1284_v7 = vpop.f32.mrb[6].mxu1 }
 0x1ac   :  { %v1520_v1 = vmax.f32 %v1284_v7, 0.0  ;;  %v1286_v12 = vpop.f32.mrb[7].mxu1  ;;  %v1546_v41 = vmul.f32 %v10326_v28, %v1506_v38 }
 0x1ad   :  { %v1547_v33 = vmul.f32 %v10326_v28, %v1507_v63  ;;  %v1521_v40 = vmax.f32 %v1286_v12, 0.0 }
 0x1ae   :  { %v1560_v16 = vmul.f32 %v10324_v10, %v1520_v1  ;;  %v1586_v8 = vadd.f32 %v10328_v5, %v1546_v41 }
 0x1af   :  { %v1561_v17 = vmul.f32 %v10324_v10, %v1521_v40  ;;  %v1587_v9 = vadd.f32 %v10328_v5, %v1547_v33 }
 0x1b0   :  { %v1600_v23 = vadd.f32 %v10331_v11, %v1560_v16 }
 0x1b1   :  { %v1601_v39 = vadd.f32 %v10331_v11, %v1561_v17 }
 0x1b2   :  { %v10354_v15 = vpack.c.bf16 %v1600_v23, %v1586_v8  ;;  %v10478_v23 = vld [vmem:[%s15491_s0 + $0x4] ss:$8 sps:$4 sm:$0xff]  }
 0x1b3   :  { %v10356_v50 = vpack.c.bf16 %v1601_v39, %v1587_v9  ;;  %8487 = vmatprep.mubr.msk.bf16.mxu1 %vm2126_vm15, %v10478_v23  ;;  %8489 = vmatprep.mubr.msk.bf16.mxu0 %vm2126_vm15, %v10478_v23 }
 0x1b5   :  { %2186 = vmatprep.subr.bf16.mxu0 %v10356_v50 }
 0x1b6   :  { %2187 = vmatpush1.bf16.msra.mxu0 %v10354_v15 }
 0x1c9   :  { %v1323_v22 = vpop.f32.mrb[0].mxu0 }
 0x1ca   :  { %v1508_v2 = vmax.f32 %v1323_v22, 0.0  ;;  %v1325_v53 = vpop.f32.mrb[1].mxu0 }
 0x1cb   :  { %v1509_v61 = vmax.f32 %v1325_v53, 0.0  ;;  %v1327_v24 = vpop.f32.mrb[2].mxu0 }
 0x1cc   :  { %v1548_v46 = vmul.f32 %v10326_v28, %v1508_v2  ;;  %v1522_v55 = vmax.f32 %v1327_v24, 0.0  ;;  %v1329_v29 = vpop.f32.mrb[3].mxu0 }
 0x1cd   :  { %v1549_v49 = vmul.f32 %v10326_v28, %v1509_v61  ;;  %v1523_v56 = vmax.f32 %v1329_v29, 0.0 }
 0x1ce   :  { %v1562_v42 = vmul.f32 %v10324_v10, %v1522_v55  ;;  %v1588_v43 = vadd.f32 %v10328_v5, %v1548_v46 }
 0x1cf   :  { %v1563_v51 = vmul.f32 %v10324_v10, %v1523_v56  ;;  %v1589_v27 = vadd.f32 %v10328_v5, %v1549_v49 }
 0x1d0   :  { %v1602_v14 = vadd.f32 %v10331_v11, %v1562_v42 }
 0x1d1   :  { %v1603_v6 = vadd.f32 %v10331_v11, %v1563_v51 }
 0x1d2   :  { %v10368_v48 = vpack.c.bf16 %v1602_v14, %v1588_v43 }
 0x1d3   :  { %v10370_v0 = vpack.c.bf16 %v1603_v6, %v1589_v27 }
 0x1d4   :  { %1648 = vrot.lane.b32.xlu0 %v10368_v48, %s9320_s26  ;;  %1706 = vrot.lane.b32.xlu1 %v10368_v48, %s9321_s2 }
 0x1d8   :  { %1814 = vrot.lane.b32.xlu0 %v1612_v54, %s9323_s27  ;;  %1872 = vrot.lane.b32.xlu1 %v1612_v54, %s9322_s6 }
 0x1dc   :  { %1764 = vrot.lane.b32.xlu0 %v10368_v48, %s9319_s1  ;;  %1822 = vrot.lane.b32.xlu1 %v10368_v48, %s9323_s27 }
 0x1e0   :  { %1930 = vrot.lane.b32.xlu0 %v1612_v54, %s9325_s28  ;;  %1988 = vrot.lane.b32.xlu1 %v1612_v54, %s9324_s7 }
 0x1e4   :  { %1880 = vrot.lane.b32.xlu0 %v10368_v48, %s9322_s6  ;;  %1938 = vrot.lane.b32.xlu1 %v10368_v48, %s9325_s28 }
 0x1e8   :  { %2046 = vrot.lane.b32.xlu0 %v1612_v54, %s9326_s29  ;;  %1642 = vrot.lane.b32.xlu1 %v10340_v20, %s9320_s26 }
 0x1e9   :  { %v1366_v52 = vpop.f32.mrb[8].mxu1 }
 0x1ea   :  { %v1510_v4 = vmax.f32 %v1366_v52, 0.0  ;;  %v1368_v57 = vpop.f32.mrb[9].mxu1 }
 0x1eb   :  { %v1511_v25 = vmax.f32 %v1368_v57, 0.0  ;;  %v1370_v44 = vpop.f32.mrb[10].mxu1 }
 0x1ec   :  { %v1550_v35 = vmul.f32 %v10326_v28, %v1510_v4  ;;  %v1524_v18 = vmax.f32 %v1370_v44, 0.0  ;;  %v1372_v30 = vpop.f32.mrb[11].mxu1  ;;  %1996 = vrot.lane.b32.xlu0 %v10368_v48, %s9324_s7  ;;  %1758 = vrot.lane.b32.xlu1 %v10340_v20, %s9319_s1 }
 0x1ed   :  { %v1551_v47 = vmul.f32 %v10326_v28, %v1511_v25  ;;  %v1525_v59 = vmax.f32 %v1372_v30, 0.0 }
 0x1ee   :  { %v1564_v21 = vmul.f32 %v10324_v10, %v1524_v18  ;;  %v1590_v62 = vadd.f32 %v10328_v5, %v1550_v35 }
 0x1ef   :  { %v1565_v37 = vmul.f32 %v10324_v10, %v1525_v59  ;;  %v1591_v19 = vadd.f32 %v10328_v5, %v1551_v47 }
 0x1f0   :  { %v1604_v60 = vadd.f32 %v10331_v11, %v1564_v21  ;;  %2054 = vrot.lane.b32.xlu0 %v10368_v48, %s9326_s29  ;;  %1874 = vrot.lane.b32.xlu1 %v10340_v20, %s9322_s6 }
 0x1f1   :  { %v1605_v36 = vadd.f32 %v10331_v11, %v1565_v37 }
 0x1f2   :  { %v10407_v45 = vpack.c.bf16 %v1604_v60, %v1590_v62 }
 0x1f3   :  { %v10409_v34 = vpack.c.bf16 %v1605_v36, %v1591_v19 }
 0x1f4   :  { %1700 = vrot.lane.b32.xlu0 %v10340_v20, %s9321_s2  ;;  %1990 = vrot.lane.b32.xlu1 %v10340_v20, %s9324_s7 }
 0x1f8   :  { %1816 = vrot.lane.b32.xlu0 %v10340_v20, %s9323_s27  ;;  %1650 = vrot.lane.b32.xlu1 %v10370_v0, %s9320_s26 }
 0x1fc   :  { %1932 = vrot.lane.b32.xlu0 %v10340_v20, %s9325_s28  ;;  %1708 = vrot.lane.b32.xlu1 %v10370_v0, %s9321_s2 }
 0x200   :  { %2048 = vrot.lane.b32.xlu0 %v10340_v20, %s9326_s29  ;;  %1766 = vrot.lane.b32.xlu1 %v10370_v0, %s9319_s1 }
 0x204   :  { %1644 = vrot.lane.b32.xlu0 %v10354_v15, %s9320_s26  ;;  %1824 = vrot.lane.b32.xlu1 %v10370_v0, %s9323_s27 }
 0x208   :  { %1760 = vrot.lane.b32.xlu0 %v10354_v15, %s9319_s1  ;;  %1882 = vrot.lane.b32.xlu1 %v10370_v0, %s9322_s6 }
 0x209   :  { %v1409_v13 = vpop.f32.mrb[4].mxu0 }
 0x20a   :  { %v1512_v32 = vmax.f32 %v1409_v13, 0.0  ;;  %v1411_v54 = vpop.f32.mrb[5].mxu0 }
 0x20b   :  { %v1513_v58 = vmax.f32 %v1411_v54, 0.0  ;;  %v1413_v20 = vpop.f32.mrb[6].mxu0 }
 0x20c   :  { %v1552_v38 = vmul.f32 %v10326_v28, %v1512_v32  ;;  %v1526_v31 = vmax.f32 %v1413_v20, 0.0  ;;  %v1415_v63 = vpop.f32.mrb[7].mxu0  ;;  %1876 = vrot.lane.b32.xlu0 %v10354_v15, %s9322_s6  ;;  %1940 = vrot.lane.b32.xlu1 %v10370_v0, %s9325_s28 }
 0x20d   :  { %v1553_v7 = vmul.f32 %v10326_v28, %v1513_v58  ;;  %v1527_v1 = vmax.f32 %v1415_v63, 0.0 }
 0x20e   :  { %v1566_v12 = vmul.f32 %v10324_v10, %v1526_v31  ;;  %v1592_v33 = vadd.f32 %v10328_v5, %v1552_v38  ;;  %v10504_v39 = vpop.permute.xlu1 %1640  ;;  %v10534_v19 = vpop.permute.xlu0 %1698 }
 0x20f   :  { %v1567_v41 = vmul.f32 %v10324_v10, %v1527_v1  ;;  %v1593_v16 = vadd.f32 %v10328_v5, %v1553_v7 }
 0x210   :  { %v1606_v40 = vadd.f32 %v10331_v11, %v1566_v12  ;;  %1992 = vrot.lane.b32.xlu0 %v10354_v15, %s9324_s7  ;;  %1998 = vrot.lane.b32.xlu1 %v10370_v0, %s9324_s7 }
 0x211   :  { %v1607_v8 = vadd.f32 %v10331_v11, %v1567_v41 }
 0x212   :  { %v10451_v17 = vpack.c.bf16 %v1606_v40, %v1592_v33  ;;  %v10536_v36 = vpop.permute.xlu1 %1756 }
 0x213   :  { %v10453_v9 = vpack.c.bf16 %v1607_v8, %v1593_v16 }
 0x214   :  { %1656 = vrot.lane.b32.xlu0 %v10451_v17, %s9320_s26  ;;  %2056 = vrot.lane.b32.xlu1 %v10370_v0, %s9326_s29 }
 0x218   :  { %1714 = vrot.lane.b32.xlu0 %v10451_v17, %s9321_s2  ;;  %1702 = vrot.lane.b32.xlu1 %v10354_v15, %s9321_s2 }
 0x21c   :  { %1772 = vrot.lane.b32.xlu0 %v10451_v17, %s9319_s1  ;;  %1818 = vrot.lane.b32.xlu1 %v10354_v15, %s9323_s27 }
 0x220   :  { %1830 = vrot.lane.b32.xlu0 %v10451_v17, %s9323_s27  ;;  %1934 = vrot.lane.b32.xlu1 %v10354_v15, %s9325_s28 }
 0x224   :  { %1888 = vrot.lane.b32.xlu0 %v10451_v17, %s9322_s6  ;;  %2050 = vrot.lane.b32.xlu1 %v10354_v15, %s9326_s29 }
 0x228   :  { %1946 = vrot.lane.b32.xlu0 %v10451_v17, %s9325_s28  ;;  %1646 = vrot.lane.b32.xlu1 %v10356_v50, %s9320_s26 }
 0x22c   :  { %2004 = vrot.lane.b32.xlu0 %v10451_v17, %s9324_s7  ;;  %1762 = vrot.lane.b32.xlu1 %v10356_v50, %s9319_s1 }
 0x230   :  { %2062 = vrot.lane.b32.xlu0 %v10451_v17, %s9326_s29  ;;  %1878 = vrot.lane.b32.xlu1 %v10356_v50, %s9322_s6 }
 0x234   :  { %1704 = vrot.lane.b32.xlu0 %v10356_v50, %s9321_s2  ;;  %1994 = vrot.lane.b32.xlu1 %v10356_v50, %s9324_s7 }
 0x238   :  { %1820 = vrot.lane.b32.xlu0 %v10356_v50, %s9323_s27  ;;  %2052 = vrot.lane.b32.xlu1 %v10356_v50, %s9326_s29 }
 0x239   :  { %v1452_v15 = vpop.f32.mrb[12].mxu1  ;;  %v1495_v22 = vpop.f32.mrb[8].mxu0 }
 0x23a   :  { %v1514_v2 = vmax.f32 %v1452_v15, 0.0  ;;  %v1516_v53 = vmax.f32 %v1495_v22, 0.0  ;;  %v1454_v61 = vpop.f32.mrb[13].mxu1  ;;  %v1497_v24 = vpop.f32.mrb[9].mxu0 }
 0x23b   :  { %v1515_v46 = vmax.f32 %v1454_v61, 0.0  ;;  %v1517_v55 = vmax.f32 %v1497_v24, 0.0  ;;  %v1456_v29 = vpop.f32.mrb[14].mxu1  ;;  %v1499_v49 = vpop.f32.mrb[10].mxu0 }
 0x23c   :  { %v1554_v56 = vmul.f32 %v10326_v28, %v1514_v2  ;;  %v1556_v42 = vmul.f32 %v10326_v28, %v1516_v53  ;;  %v1528_v51 = vmax.f32 %v1456_v29, 0.0  ;;  %v1530_v43 = vmax.f32 %v1499_v49, 0.0  ;;  %v1458_v14 = vpop.f32.mrb[15].mxu1  ;;  %v1501_v27 = vpop.f32.mrb[11].mxu0  ;;  %1936 = vrot.lane.b32.xlu0 %v10356_v50, %s9325_s28  ;;  %1658 = vrot.lane.b32.xlu1 %v10453_v9, %s9320_s26 }
 0x23d   :  { %v1555_v6 = vmul.f32 %v10326_v28, %v1515_v46  ;;  %v1557_v52 = vmul.f32 %v10326_v28, %v1517_v55  ;;  %v1529_v4 = vmax.f32 %v1458_v14, 0.0  ;;  %v1531_v57 = vmax.f32 %v1501_v27, 0.0 }
 0x23e   :  { %v1568_v25 = vmul.f32 %v10324_v10, %v1528_v51  ;;  %v1570_v44 = vmul.f32 %v10324_v10, %v1530_v43  ;;  %v1594_v35 = vadd.f32 %v10328_v5, %v1554_v56  ;;  %v1596_v50 = vadd.f32 %v10328_v5, %v1556_v42 }
 0x23f   :  { %v1569_v18 = vmul.f32 %v10324_v10, %v1529_v4  ;;  %v1571_v30 = vmul.f32 %v10324_v10, %v1531_v57  ;;  %v1595_v28 = vadd.f32 %v10328_v5, %v1555_v6  ;;  %v1597_v21 = vadd.f32 %v10328_v5, %v1557_v52 }
 0x240   :  { %v1608_v47 = vadd.f32 %v10331_v11, %v1568_v25  ;;  %v1610_v59 = vadd.f32 %v10331_v11, %v1570_v44  ;;  %1652 = vrot.lane.b32.xlu0 %v10407_v45, %s9320_s26  ;;  %1716 = vrot.lane.b32.xlu1 %v10453_v9, %s9321_s2 }
 0x241   :  { %v1609_v37 = vadd.f32 %v10331_v11, %v1569_v18  ;;  %v1611_v10 = vadd.f32 %v10331_v11, %v1571_v30 }
 0x242   :  { %v10530_v62 = vpack.c.bf16 %v1608_v47, %v1594_v35  ;;  %v10532_v60 = vpack.c.bf16 %v1610_v59, %v1596_v50 }
 0x243   :  { %v10538_v13 = vpack.c.bf16 %v1609_v37, %v1595_v28  ;;  %v10540_v32 = vpack.c.bf16 %v1611_v10, %v1597_v21 }
 0x244   :  { %1710 = vrot.lane.b32.xlu0 %v10407_v45, %s9321_s2  ;;  %1654 = vrot.lane.b32.xlu1 %v10409_v34, %s9320_s26 }
 0x246   :  { %v10546_v5 = vpop.permute.xlu0 %1648  ;;  %v10548_v11 = vpop.permute.xlu1 %1706 }
 0x248   :  { %1768 = vrot.lane.b32.xlu0 %v10407_v45, %s9319_s1  ;;  %1712 = vrot.lane.b32.xlu1 %v10409_v34, %s9321_s2 }
 0x24a   :  { %v10554_v54 = vpop.permute.xlu0 %1814  ;;  %v10556_v58 = vpop.permute.xlu1 %1872 }
 0x24c   :  { %1826 = vrot.lane.b32.xlu0 %v10407_v45, %s9323_s27  ;;  %1770 = vrot.lane.b32.xlu1 %v10409_v34, %s9319_s1 }
 0x24e   :  { %v10562_v20 = vpop.permute.xlu0 %1764  ;;  %v10564_v38 = vpop.permute.xlu1 %1822 }
 0x250   :  { %1884 = vrot.lane.b32.xlu0 %v10407_v45, %s9322_s6  ;;  %1828 = vrot.lane.b32.xlu1 %v10409_v34, %s9323_s27 }
 0x252   :  { %v10570_v31 = vpop.permute.xlu0 %1930  ;;  %v10572_v63 = vpop.permute.xlu1 %1988 }
 0x254   :  { %1942 = vrot.lane.b32.xlu0 %v10407_v45, %s9325_s28  ;;  %1886 = vrot.lane.b32.xlu1 %v10409_v34, %s9322_s6 }
 0x256   :  { %v10578_v7 = vpop.permute.xlu0 %1880  ;;  %v10580_v1 = vpop.permute.xlu1 %1938 }
 0x258   :  { %2000 = vrot.lane.b32.xlu0 %v10407_v45, %s9324_s7  ;;  %1944 = vrot.lane.b32.xlu1 %v10409_v34, %s9325_s28 }
 0x25a   :  { %v10586_v12 = vpop.permute.xlu0 %2046  ;;  %v1643_v41 = vpop.permute.xlu1 %1642 }
 0x25b   :  { %v1668_v42 = vsel %vm15493_vm14, %v10504_v39, %v1643_v41  ;;  %vm15502_vm14 = vmmov %vm15492_vm9 }
 0x25c   :  { %2058 = vrot.lane.b32.xlu0 %v10407_v45, %s9326_s29  ;;  %2002 = vrot.lane.b32.xlu1 %v10409_v34, %s9324_s7 }
 0x25e   :  { %v10592_v33 = vpop.permute.xlu0 %1996  ;;  %v1759_v40 = vpop.permute.xlu1 %1758 }
 0x25f   :  { %v1784_v59 = vsel %vm15497_vm2, %v10536_v36, %v1759_v40 }
 0x260   :  { %1664 = vrot.lane.b32.xlu0 %v10532_v60, %s9320_s26  ;;  %2060 = vrot.lane.b32.xlu1 %v10409_v34, %s9326_s29 }
 0x262   :  { %v10598_v16 = vpop.permute.xlu0 %2054  ;;  %v10600_v8 = vpop.permute.xlu1 %1874 }
 0x264   :  { %1660 = vrot.lane.b32.xlu0 %v10530_v62, %s9320_s26  ;;  %1774 = vrot.lane.b32.xlu1 %v10453_v9, %s9319_s1 }
 0x266   :  { %v1701_v15 = vpop.permute.xlu0 %1700  ;;  %v10606_v22 = vpop.permute.xlu1 %1990 }
 0x267   :  { %v1726_v18 = vsel %vm15495_vm1, %v10534_v19, %v1701_v15  ;;  %vm15503_vm1 = vmmov %vm15494_vm0 }
 0x268   :  { %1718 = vrot.lane.b32.xlu0 %v10530_v62, %s9321_s2  ;;  %1662 = vrot.lane.b32.xlu1 %v10538_v13, %s9320_s26 }
 0x26a   :  { %v1817_v2 = vpop.permute.xlu0 %1816  ;;  %v10612_v53 = vpop.permute.xlu1 %1650 }
 0x26b   :  { %v1842_v10 = vsel %vm15499_vm12, %v10554_v54, %v1817_v2  ;;  %vm15507_vm12 = vmmov %vm15498_vm3 }
 0x26c   :  { %1722 = vrot.lane.b32.xlu0 %v10532_v60, %s9321_s2  ;;  %1720 = vrot.lane.b32.xlu1 %v10538_v13, %s9321_s2 }
 0x26e   :  { %v10618_v61 = vpop.permute.xlu0 %1932  ;;  %v10620_v24 = vpop.permute.xlu1 %1708 }
 0x270   :  { %1776 = vrot.lane.b32.xlu0 %v10530_v62, %s9319_s1  ;;  %1778 = vrot.lane.b32.xlu1 %v10538_v13, %s9319_s1 }
 0x272   :  { %v10626_v46 = vpop.permute.xlu0 %2048  ;;  %v10628_v55 = vpop.permute.xlu1 %1766 }
 0x274   :  { %1780 = vrot.lane.b32.xlu0 %v10532_v60, %s9319_s1  ;;  %1832 = vrot.lane.b32.xlu1 %v10453_v9, %s9323_s27 }
 0x276   :  { %v1645_v29 = vpop.permute.xlu0 %1644  ;;  %v10634_v49 = vpop.permute.xlu1 %1824 }
 0x277   :  { %v1669_v56 = vsel %vm15492_vm9, %v1643_v41, %v1645_v29 }
 0x278   :  { %1834 = vrot.lane.b32.xlu0 %v10530_v62, %s9323_s27  ;;  %1836 = vrot.lane.b32.xlu1 %v10538_v13, %s9323_s27 }
 0x279   :  { %2135 = vmatprep.subr.bf16.mxu1 %v1669_v56 }
 0x27a   :  { %2136 = vmatpush1.bf16.msra.mxu1 %v1668_v42  ;;  %v10643_v51 = vpop.permute.xlu0 %1760  ;;  %v10645_v43 = vpop.permute.xlu1 %1882 }
 0x27b   :  { %v1785_v47 = vsel %vm15496_vm5, %v1759_v40, %v10643_v51  ;;  %vm15505_vm5 = vmmov %vm15497_vm2 }
 0x27c   :  { %1838 = vrot.lane.b32.xlu0 %v10532_v60, %s9323_s27  ;;  %1890 = vrot.lane.b32.xlu1 %v10453_v9, %s9322_s6 }
 0x27e   :  { %v10651_v14 = vpop.permute.xlu0 %1876  ;;  %v10653_v27 = vpop.permute.xlu1 %1940 }
 0x280   :  { %1892 = vrot.lane.b32.xlu0 %v10530_v62, %s9322_s6  ;;  %1894 = vrot.lane.b32.xlu1 %v10538_v13, %s9322_s6 }
 0x282   :  { %v10659_v6 = vpop.permute.xlu0 %1992  ;;  %v10661_v52 = vpop.permute.xlu1 %1998 }
 0x284   :  { %1896 = vrot.lane.b32.xlu0 %v10532_v60, %s9322_s6  ;;  %1948 = vrot.lane.b32.xlu1 %v10453_v9, %s9325_s28 }
 0x286   :  { %v10667_v4 = vpop.permute.xlu0 %1656  ;;  %v10669_v57 = vpop.permute.xlu1 %2056 }
 0x288   :  { %1950 = vrot.lane.b32.xlu0 %v10530_v62, %s9325_s28  ;;  %1952 = vrot.lane.b32.xlu1 %v10538_v13, %s9325_s28 }
 0x28a   :  { %v10675_v25 = vpop.permute.xlu0 %1714  ;;  %v10677_v44 = vpop.permute.xlu1 %1702 }
 0x28b   :  { %v1727_v35 = vsel %vm15494_vm0, %v1701_v15, %v10677_v44  ;;  %v1901_v15 = vsel %vm15500_vm6, %v10600_v8, %v10651_v14 }
 0x28c   :  { %1954 = vrot.lane.b32.xlu0 %v10532_v60, %s9325_s28  ;;  %2006 = vrot.lane.b32.xlu1 %v10453_v9, %s9324_s7 }
 0x28d   :  { %2137 = vmatprep.subr.bf16.mxu1 %v1727_v35 }
 0x28e   :  { %2138 = vmatpush1.bf16.msra.mxu1 %v1726_v18  ;;  %v10687_v30 = vpop.permute.xlu0 %1772  ;;  %v10689_v50 = vpop.permute.xlu1 %1818 }
 0x28f   :  { %2139 = vmatprep.subr.bf16.mxu1 %v1785_v47  ;;  %v1843_v37 = vsel %vm15498_vm3, %v1817_v2, %v10689_v50  ;;  %v1900_v2 = vsel %vm15501_vm8, %v10556_v58, %v10600_v8  ;;  %v1958_v8 = vsel %vm433_vm10, %v10570_v31, %v10618_v61  ;;  %vm15508_vm8 = vmmov %vm15492_vm9 }
 0x290   :  { %2008 = vrot.lane.b32.xlu0 %v10530_v62, %s9324_s7  ;;  %2010 = vrot.lane.b32.xlu1 %v10538_v13, %s9324_s7 }
 0x292   :  { %2140 = vmatpush1.bf16.msra.mxu1 %v1784_v59  ;;  %v10699_v28 = vpop.permute.xlu0 %1830  ;;  %v10701_v21 = vpop.permute.xlu1 %1934 }
 0x293   :  { %2141 = vmatprep.subr.bf16.mxu1 %v1843_v37  ;;  %v1959_v35 = vsel %vm433_vm10, %v10618_v61, %v10701_v21  ;;  %v2016_v61 = vsel %vm479_vm11, %v10572_v63, %v10606_v22 }
 0x294   :  { %2012 = vrot.lane.b32.xlu0 %v10532_v60, %s9324_s7  ;;  %2064 = vrot.lane.b32.xlu1 %v10453_v9, %s9326_s29 }
 0x296   :  { %2142 = vmatpush1.bf16.msra.mxu1 %v1842_v10  ;;  %v10711_v41 = vpop.permute.xlu0 %1888  ;;  %v10713_v40 = vpop.permute.xlu1 %2050 }
 0x297   :  { %2143 = vmatprep.subr.bf16.mxu1 %v1901_v15 }
 0x298   :  { %2066 = vrot.lane.b32.xlu0 %v10530_v62, %s9326_s29  ;;  %2068 = vrot.lane.b32.xlu1 %v10538_v13, %s9326_s29 }
 0x29a   :  { %2144 = vmatpush1.bf16.msra.mxu1 %v1900_v2  ;;  %v10725_v56 = vpop.permute.xlu0 %1946  ;;  %v1647_v42 = vpop.permute.xlu1 %1646  ;;  %v2075_v2 = vsel %vm525_vm13, %v10626_v46, %v10713_v40 }
 0x29b   :  { %2145 = vmatprep.subr.bf16.mxu1 %v1959_v35  ;;  %v1671_v18 = vsel %vm15492_vm9, %v1647_v42, %v10546_v5  ;;  %v1670_v47 = vsel %vm15502_vm14, %v1645_v29, %v1647_v42  ;;  %v2017_v29 = vsel %vm479_vm11, %v10606_v22, %v10659_v6  ;;  %v2074_v42 = vsel %vm525_vm13, %v10586_v12, %v10626_v46  ;;  %v10767_v22 = vld [vmem:[%s15491_s0] ss:$8 sps:$4 sm:$0xff]   ;;  %v10779_v46 = vld [vmem:[%s15491_s0 + $0x14] ss:$8 sps:$4 sm:$0xff]   ;;  %vm15509_vm9 = vmmov %vm15500_vm6 }
 0x29c   :  { %2070 = vrot.lane.b32.xlu0 %v10532_v60, %s9326_s29  ;;  %1666 = vrot.lane.b32.xlu1 %v10540_v32, %s9320_s26  ;;  %vm15510_vm14 = vmmov %vm15508_vm8 }
 0x29d   :  { %2188 = vmatprep.subr.bf16.mxu0 %v1671_v18 }
 0x29e   :  { %2146 = vmatpush1.bf16.msra.mxu1 %v1958_v8  ;;  %2189 = vmatpush1.bf16.msra.mxu0 %v1670_v47  ;;  %v10740_v59 = vpop.permute.xlu0 %2004  ;;  %v1763_v37 = vpop.permute.xlu1 %1762 }
 0x29f   :  { %2147 = vmatprep.subr.bf16.mxu1 %v2017_v29  ;;  %v1787_v29 = vsel %vm15505_vm5, %v1763_v37, %v10562_v20  ;;  %vm15512_vm5 = vmmov %vm15497_vm2 }
 0x2a0   :  { %1724 = vrot.lane.b32.xlu0 %v10540_v32, %s9321_s2  ;;  %1782 = vrot.lane.b32.xlu1 %v10540_v32, %s9319_s1 }
 0x2a2   :  { %2148 = vmatpush1.bf16.msra.mxu1 %v2016_v61  ;;  %v10752_v10 = vpop.permute.xlu0 %2062  ;;  %v1879_v15 = vpop.permute.xlu1 %1878 }
 0x2a3   :  { %2149 = vmatprep.subr.bf16.mxu1 %v2075_v2  ;;  %v1786_v2 = vsel %vm15497_vm2, %v10643_v51, %v1763_v37  ;;  %v2641_v37 = vld [vmem:[%s15506_s24 + $0x8] sm:$0xff] }
 0x2a4   :  { %1840 = vrot.lane.b32.xlu0 %v10540_v32, %s9323_s27  ;;  %1898 = vrot.lane.b32.xlu1 %v10540_v32, %s9322_s6  ;;  %s9332_s6 = smov 14  }
 0x2a6   :  { %2150 = vmatpush1.bf16.msra.mxu1 %v2074_v42  ;;  %v1705_v35 = vpop.permute.xlu0 %1704  ;;  %v10769_v18 = vpop.permute.xlu1 %1994  ;;  %v2640_v42 = vld [vmem:[%s15506_s24] sm:$0xff] }
 0x2a7   :  { %2239 = vmatprep.subr.bf16.mxu1 %v10370_v0  ;;  %v1729_v47 = vsel %vm15494_vm0, %v1705_v35, %v10548_v11  ;;  %v1728_v8 = vsel %vm15503_vm1, %v10677_v44, %v1705_v35  ;;  %v2560_v0 = vld [vmem:[%s15504_s3] sm:$0xff]  ;;  %v10809_v35 = vld [vmem:[%s15491_s0 + $0x10] ss:$8 sps:$4 sm:$0xff]   ;;  %vm15511_vm1 = vmmov %vm15494_vm0 }
 0x2a8   :  { %1956 = vrot.lane.b32.xlu0 %v10540_v32, %s9325_s28  ;;  %2014 = vrot.lane.b32.xlu1 %v10540_v32, %s9324_s7 }
 0x2a9   :  { %2166 = vmatmul.mubr.bf16.vlgmr.msra.gmra.mrb[16].mxu1 %v10767_v22  ;;  %2190 = vmatprep.subr.bf16.mxu0 %v1729_v47 }
 0x2aa   :  { %2191 = vmatpush1.bf16.msra.mxu0 %v1728_v8  ;;  %2240 = vmatpush1.bf16.msra.mxu1 %v10368_v48  ;;  %v1821_v44 = vpop.permute.xlu0 %1820  ;;  %v10792_v61 = vpop.permute.xlu1 %2052  ;;  %v2561_v48 = vld [vmem:[%s15504_s3 + $0x8] sm:$0xff] }
 0x2ab   :  { %2192 = vmatprep.subr.bf16.mxu0 %v1787_v29  ;;  %8488 = vmatprep.mubr.msk.bf16.mxu1 %vm2126_vm15, %v10779_v46  ;;  %v1845_v8 = vsel %vm15498_vm3, %v1821_v44, %v10564_v38  ;;  %v1844_v51 = vsel %vm15507_vm12, %v10689_v50, %v1821_v44  ;;  %v2562_v29 = vld [vmem:[%s15504_s3 + $0x10] sm:$0xff]  ;;  %v1902_v44 = vsel %vm15509_vm9, %v10651_v14, %v1879_v15  ;;  %vm15513_vm12 = vmmov %vm15498_vm3 }
 0x2ac   :  { %2072 = vrot.lane.b32.xlu0 %v10540_v32, %s9326_s29  ;;  %2566 = vperm.xlu1 %9080, %v2560_v0   ;;  %vm15515_vm9 = vmmov %vm15510_vm14 }
 0x2ae   :  { %2193 = vmatpush1.bf16.msra.mxu0 %v1786_v2  ;;  %v1937_v47 = vpop.permute.xlu0 %1936  ;;  %v10813_v0 = vpop.permute.xlu1 %1658 }
 0x2af   :  { %2194 = vmatprep.subr.bf16.mxu0 %v1845_v8  ;;  %v1672_v8 = vsel %vm15510_vm14, %v10546_v5, %v10612_v53  ;;  %vm15516_vm14 = vmmov %vm15515_vm9 }
 0x2b0   :  { %2571 = vperm.xlu0 %9079, %v2561_v48   ;;  %2646 = vperm.xlu1 %9080, %v2640_v42   ;;  %v1903_v48 = vsel %vm15500_vm6, %v1879_v15, %v10578_v7  ;;  %v1730_v15 = vsel %vm15511_vm1, %v10548_v11, %v10620_v24  ;;  %v2018_v11 = vsel %vm479_vm11, %v10659_v6, %v10769_v18  ;;  %vm15517_vm1 = vmmov %vm15494_vm0 }
 0x2b1   :  { %2176 = vmatmul.mubr.bf16.gmra.mrb[20].mxu1 %v10809_v35  ;;  %v2076_v6 = vsel %vm525_vm13, %v10713_v40, %v10792_v61 }
 0x2b2   :  { %2195 = vmatpush1.bf16.msra.mxu0 %v1844_v51  ;;  %v10824_v2 = vpop.permute.xlu0 %1652  ;;  %v10828_v42 = vpop.permute.xlu1 %1716  ;;  %8491 = vmatprep.mubr.msk.bf16.mxu1 %vm2126_vm15, %v10478_v23  ;;  %v2563_v51 = vld [vmem:[%s15504_s3 + $0x18] sm:$0xff] }
 0x2b3   :  { %2196 = vmatprep.subr.bf16.mxu0 %v1903_v48  ;;  %v1673_v50 = vsel %vm15508_vm8, %v10612_v53, %v10824_v2  ;;  %v2642_v48 = vld [vmem:[%s15506_s24 + $0x10] sm:$0xff]  ;;  %v1960_v53 = vsel %vm433_vm10, %v10701_v21, %v1937_v47  ;;  %vm15514_vm8 = vmmov %vm15500_vm6 }
 0x2b4   :  { %2651 = vperm.xlu0 %9079, %v2641_v37   ;;  %2576 = vperm.xlu1 %9080, %v2562_v29   ;;  %v1961_v29 = vsel %vm433_vm10, %v1937_v47, %v10580_v1  ;;  %v1904_v40 = vsel %vm15514_vm8, %v10578_v7, %v10645_v43  ;;  %v1962_v7 = vsel %vm433_vm10, %v10580_v1, %v10653_v27  ;;  %vm15520_vm8 = vmmov %vm15515_vm9 }
 0x2b5   :  { %2241 = vmatprep.subr.bf16.mxu1 %v1673_v50  ;;  %v2643_v50 = vld [vmem:[%s15506_s24 + $0x18] sm:$0xff]  ;;  %v2020_v1 = vsel %vm479_vm11, %v10592_v33, %v10661_v52 }
 0x2b6   :  { %2197 = vmatpush1.bf16.msra.mxu0 %v1902_v44  ;;  %2242 = vmatpush1.bf16.msra.mxu1 %v1672_v8  ;;  %v10846_v37 = vpop.permute.xlu0 %1710  ;;  %v1655_v14 = vpop.permute.xlu1 %1654  ;;  %v2019_v8 = vsel %vm479_vm11, %v10769_v18, %v10592_v33  ;;  %v2078_v33 = vsel %vm525_vm13, %v10598_v16, %v10669_v57 }
 0x2b7   :  { %2198 = vmatprep.subr.bf16.mxu0 %v1961_v29  ;;  %v1731_v5 = vsel %vm15494_vm0, %v10620_v24, %v10846_v37  ;;  %v1788_v24 = vsel %vm15497_vm2, %v10562_v20, %v10628_v55  ;;  %v1846_v20 = vsel %vm15513_vm12, %v10564_v38, %v10634_v49  ;;  %vm15519_vm12 = vmmov %vm15498_vm3 }
 0x2b8   :  { %2581 = vperm.xlu0 %9079, %v2563_v51   ;;  %2656 = vperm.xlu1 %9080, %v2642_v48   ;;  %v2077_v48 = vsel %vm525_vm13, %v10792_v61, %v10598_v16 }
 0x2b9   :  { %2243 = vmatprep.subr.bf16.mxu1 %v1731_v5 }
 0x2ba   :  { %2199 = vmatpush1.bf16.msra.mxu0 %v1960_v53  ;;  %2244 = vmatpush1.bf16.msra.mxu1 %v1730_v15  ;;  %v1769_v44 = vpop.permute.xlu0 %1768  ;;  %v1713_v51 = vpop.permute.xlu1 %1712 }
 0x2bb   :  { %2200 = vmatprep.subr.bf16.mxu0 %v2019_v8  ;;  %v1789_v21 = vsel %vm15512_vm5, %v10628_v55, %v1769_v44  ;;  %v1733_v15 = vsel %vm15494_vm0, %v1713_v51, %v10675_v25  ;;  %vm15518_vm5 = vmmov %vm15497_vm2 }
 0x2bc   :  { %2661 = vperm.xlu0 %9079, %v2643_v50   ;;  %2245 = vmatprep.subr.bf16.mxu1 %v1789_v21 }
 0x2be   :  { %2201 = vmatpush1.bf16.msra.mxu0 %v2018_v11  ;;  %2246 = vmatpush1.bf16.msra.mxu1 %v1788_v24  ;;  %v1827_v47 = vpop.permute.xlu0 %1826  ;;  %v1771_v29 = vpop.permute.xlu1 %1770 }
 0x2bf   :  { %2202 = vmatprep.subr.bf16.mxu0 %v2077_v48  ;;  %v1847_v5 = vsel %vm15498_vm3, %v10634_v49, %v1827_v47  ;;  %v1675_v49 = vsel %vm15515_vm9, %v1655_v14, %v10667_v4  ;;  %vm15521_vm9 = vmmov %vm15500_vm6 }
 0x2c0   :  { %2247 = vmatprep.subr.bf16.mxu1 %v1847_v5 }
 0x2c2   :  { %2203 = vmatpush1.bf16.msra.mxu0 %v2076_v6  ;;  %2248 = vmatpush1.bf16.msra.mxu1 %v1846_v20  ;;  %v1885_v55 = vpop.permute.xlu0 %1884  ;;  %v1829_v18 = vpop.permute.xlu1 %1828 }
 0x2c3   :  { %2292 = vmatprep.subr.bf16.mxu0 %v10409_v34  ;;  %v1905_v53 = vsel %vm15500_vm6, %v10645_v43, %v1885_v55  ;;  %v1848_v48 = vsel %vm15519_vm12, %v1827_v47, %v1829_v18 }
 0x2c4   :  { %2249 = vmatprep.subr.bf16.mxu1 %v1905_v53 }
 0x2c5   :  { %2219 = vmatmul.mubr.bf16.vlgmr.msra.gmra.mrb[12].mxu0 %v10767_v22 }
 0x2c6   :  { %2250 = vmatpush1.bf16.msra.mxu1 %v1904_v40  ;;  %2293 = vmatpush1.bf16.msra.mxu0 %v10407_v45  ;;  %v1943_v38 = vpop.permute.xlu0 %1942  ;;  %v1887_v61 = vpop.permute.xlu1 %1886  ;;  %v1674_v45 = vsel %vm15516_vm14, %v10824_v2, %v1655_v14  ;;  %v1791_v14 = vsel %vm15518_vm5, %v1771_v29, %v10687_v30  ;;  %vm15522_vm14 = vmmov %vm15520_vm8 }
 0x2c7   :  { %2294 = vmatprep.subr.bf16.mxu0 %v1675_v49  ;;  %v1963_v34 = vsel %vm433_vm10, %v10653_v27, %v1943_v38  ;;  %8490 = vmatprep.mubr.msk.bf16.mxu0 %vm2126_vm15, %v10779_v46  ;;  %v1732_v27 = vsel %vm15517_vm1, %v10846_v37, %v1713_v51  ;;  %v1849_v51 = vsel %vm15498_vm3, %v1829_v18, %v10699_v28  ;;  %vm15523_vm1 = vmmov %vm15494_vm0 }
 0x2c8   :  { %2251 = vmatprep.subr.bf16.mxu1 %v1963_v34  ;;  %v1676_v47 = vsel %vm15522_vm14, %v10667_v4, %v10813_v0  ;;  %v1734_v4 = vsel %vm15523_vm1, %v10675_v25, %v10828_v42  ;;  %vm15524_vm5 = vmmov %vm15497_vm2  ;;  %vm15531_vm1 = vcmask 801792  }
 0x2c9   :  { %vm15525_vm3 = vmmov %vm15520_vm8 }
 0x2ca   :  { %2252 = vmatpush1.bf16.msra.mxu1 %v1962_v7  ;;  %2295 = vmatpush1.bf16.msra.mxu0 %v1674_v45  ;;  %v2001_v43 = vpop.permute.xlu0 %2000  ;;  %v1945_v50 = vpop.permute.xlu1 %1944  ;;  %vm15529_vm14 = vmmov %vm15494_vm0 }
 0x2cb   :  { %2296 = vmatprep.subr.bf16.mxu0 %v1733_v15  ;;  %v2021_v8 = vsel %vm479_vm11, %v10661_v52, %v2001_v43  ;;  %v1790_v52 = vsel %vm15497_vm2, %v1769_v44, %v1771_v29  ;;  %v1965_v5 = vsel %vm433_vm10, %v1945_v50, %v10725_v56 }
 0x2cc   :  { %2253 = vmatprep.subr.bf16.mxu1 %v2021_v8 }
 0x2cd   :  { %2229 = vmatmul.mubr.bf16.gmra.mrb[16].mxu0 %v10809_v35 }
 0x2ce   :  { %2254 = vmatpush1.bf16.msra.mxu1 %v2020_v1  ;;  %2297 = vmatpush1.bf16.msra.mxu0 %v1732_v27  ;;  %v2059_v2 = vpop.permute.xlu0 %2058  ;;  %v2003_v21 = vpop.permute.xlu1 %2002 }
 0x2cf   :  { %2298 = vmatprep.subr.bf16.mxu0 %v1791_v14  ;;  %v2079_v11 = vsel %vm525_vm13, %v10669_v57, %v2059_v2  ;;  %8493 = vmatprep.mubr.msk.bf16.mxu0 %vm2126_vm15, %v10478_v23  ;;  %v1907_v57 = vsel %vm15500_vm6, %v1887_v61, %v10711_v41  ;;  %v2023_v18 = vsel %vm479_vm11, %v2003_v21, %v10740_v59  ;;  %vm15526_vm6 = vmmov %vm15519_vm12 }
 0x2d0   :  { %2255 = vmatprep.subr.bf16.mxu1 %v2079_v11  ;;  %v2022_v40 = vsel %vm479_vm11, %v2001_v43, %v2003_v21 }
 0x2d2   :  { %2256 = vmatpush1.bf16.msra.mxu1 %v2078_v33  ;;  %2299 = vmatpush1.bf16.msra.mxu0 %v1790_v52  ;;  %v10922_v37 = vpop.permute.xlu0 %1664  ;;  %v2061_v24 = vpop.permute.xlu1 %2060 }
 0x2d3   :  { %2300 = vmatprep.subr.bf16.mxu0 %v1849_v51  ;;  %2345 = vmatprep.subr.bf16.mxu1 %v10453_v9  ;;  %v1906_v9 = vsel %vm15521_vm9, %v1885_v55, %v1887_v61  ;;  %v1964_v55 = vsel %vm433_vm10, %v1943_v38, %v1945_v50  ;;  %v2081_v49 = vsel %vm525_vm13, %v2061_v24, %v10752_v10  ;;  %vm15528_vm9 = vmmov %vm15494_vm0 }
 0x2d4   :  { %v2080_v34 = vsel %vm525_vm13, %v2059_v2, %v2061_v24 }
 0x2d5   :  { %2272 = vmatmul.mubr.bf16.vlgmr.msra.gmra.mrb[24].mxu1 %v10767_v22 }
 0x2d6   :  { %2301 = vmatpush1.bf16.msra.mxu0 %v1848_v48  ;;  %2346 = vmatpush1.bf16.msra.mxu1 %v10451_v17  ;;  %v1661_v16 = vpop.permute.xlu0 %1660  ;;  %v1775_v44 = vpop.permute.xlu1 %1774 }
 0x2d7   :  { %2302 = vmatprep.subr.bf16.mxu0 %v1907_v57  ;;  %v1677_v29 = vsel %vm15520_vm8, %v10813_v0, %v1661_v16  ;;  %8492 = vmatprep.mubr.msk.bf16.mxu1 %vm2126_vm15, %v10779_v46  ;;  %v1792_v61 = vsel %vm15497_vm2, %v10687_v30, %v1775_v44  ;;  %vm15527_vm8 = vmmov %vm15525_vm3 }
 0x2d8   :  { %2347 = vmatprep.subr.bf16.mxu1 %v1677_v29 }
 0x2da   :  { %2303 = vmatpush1.bf16.msra.mxu0 %v1906_v9  ;;  %2348 = vmatpush1.bf16.msra.mxu1 %v1676_v47  ;;  %v1719_v17 = vpop.permute.xlu0 %1718  ;;  %v1663_v6 = vpop.permute.xlu1 %1662 }
 0x2db   :  { %2304 = vmatprep.subr.bf16.mxu0 %v1965_v5  ;;  %v1735_v20 = vsel %vm15494_vm0, %v10828_v42, %v1719_v17  ;;  %v1679_v15 = vsel %vm15525_vm3, %v1663_v6, %v10922_v37  ;;  %vm15530_vm0 = vmmov %vm15497_vm2 }
 0x2dc   :  { %2349 = vmatprep.subr.bf16.mxu1 %v1735_v20  ;;  %vm15533_vm2 = vmmov %vm15530_vm0 }
 0x2dd   :  { %2282 = vmatmul.mubr.bf16.gmra.mrb[28].mxu1 %v10809_v35  ;;  %vm15534_vm3 = vmmov %vm15526_vm6 }
 0x2de   :  { %2305 = vmatpush1.bf16.msra.mxu0 %v1964_v55  ;;  %2350 = vmatpush1.bf16.msra.mxu1 %v1734_v4  ;;  %v10949_v0 = vpop.permute.xlu0 %1722  ;;  %v1721_v53 = vpop.permute.xlu1 %1720 }
 0x2df   :  { %2306 = vmatprep.subr.bf16.mxu0 %v2023_v18  ;;  %8495 = vmatprep.mubr.msk.bf16.mxu1 %vm2126_vm15, %v10478_v23  ;;  %v1737_v1 = vsel %vm15528_vm9, %v1721_v53, %v10949_v0  ;;  %v1736_v2 = vsel %vm15529_vm14, %v1719_v17, %v1721_v53  ;;  %vm15538_vm9 = vcmask 1039360  }
 0x2e0   :  { %vm15539_vm14 = vmmov %vm15538_vm9 }
 0x2e2   :  { %2307 = vmatpush1.bf16.msra.mxu0 %v2022_v40  ;;  %v1777_v38 = vpop.permute.xlu0 %1776  ;;  %v1779_v25 = vpop.permute.xlu1 %1778 }
 0x2e3   :  { %2308 = vmatprep.subr.bf16.mxu0 %v2081_v49  ;;  %v1793_v42 = vsel %vm15524_vm5, %v1775_v44, %v1777_v38  ;;  %vm15532_vm5 = vmmov %vm15531_vm1  ;;  %v1794_v52 = vsel %vm15533_vm2, %v1777_v38, %v1779_v25 }
 0x2e4   :  { %2351 = vmatprep.subr.bf16.mxu1 %v1793_v42 }
 0x2e5   :  { %2352 = vmatpush1.bf16.msra.mxu1 %v1792_v61 }
 0x2e6   :  { %2309 = vmatpush1.bf16.msra.mxu0 %v2080_v34  ;;  %v10962_v7 = vpop.permute.xlu0 %1780  ;;  %v1833_v45 = vpop.permute.xlu1 %1832 }
 0x2e7   :  { %2398 = vmatprep.subr.bf16.mxu0 %v10538_v13  ;;  %v1850_v8 = vsel %vm15526_vm6, %v10699_v28, %v1833_v45  ;;  %v1678_v13 = vsel %vm15527_vm8, %v1661_v16, %v1663_v6  ;;  %v1795_v28 = vsel %vm15530_vm0, %v1779_v25, %v10962_v7  ;;  %vm15536_vm6 = vmmov %vm15531_vm1  ;;  %vm15540_vm0 = vcmask 1031168  }
 0x2e8   :  { %vm15537_vm8 = vmmov %vm15531_vm1 }
 0x2e9   :  { %2325 = vmatmul.mubr.bf16.vlgmr.msra.gmra.mrb[20].mxu0 %v10767_v22 }
 0x2ea   :  { %2399 = vmatpush1.bf16.msra.mxu0 %v10530_v62  ;;  %v1835_v43 = vpop.permute.xlu0 %1834  ;;  %v1837_v50 = vpop.permute.xlu1 %1836  ;;  %8494 = vmatprep.mubr.msk.bf16.mxu0 %vm2126_vm15, %v10779_v46 }
 0x2eb   :  { %2400 = vmatprep.subr.bf16.mxu0 %v1679_v15  ;;  %v1851_v30 = vsel %vm15519_vm12, %v1833_v45, %v1835_v43  ;;  %vm15535_vm12 = vmmov %vm15534_vm3 }
 0x2ec   :  { %2353 = vmatprep.subr.bf16.mxu1 %v1851_v30  ;;  %v1852_v16 = vsel %vm15535_vm12, %v1835_v43, %v1837_v50  ;;  %vm15543_vm12 = vmmov %vm15534_vm3 }
 0x2ed   :  { %2354 = vmatpush1.bf16.msra.mxu1 %v1850_v8 }
 0x2ee   :  { %2401 = vmatpush1.bf16.msra.mxu0 %v1678_v13  ;;  %v10975_v62 = vpop.permute.xlu0 %1838  ;;  %v1891_v27 = vpop.permute.xlu1 %1890 }
 0x2ef   :  { %2402 = vmatprep.subr.bf16.mxu0 %v1737_v1  ;;  %v1908_v33 = vsel %vm15532_vm5, %v10711_v41, %v1891_v27  ;;  %v1853_v24 = vsel %vm15534_vm3, %v1837_v50, %v10975_v62  ;;  %vm15542_vm5 = vmmov %vm15533_vm2 }
 0x2f1   :  { %2335 = vmatmul.mubr.bf16.gmra.mrb[24].mxu0 %v10809_v35 }
 0x2f2   :  { %2403 = vmatpush1.bf16.msra.mxu0 %v1736_v2  ;;  %v1893_v14 = vpop.permute.xlu0 %1892  ;;  %v1895_v21 = vpop.permute.xlu1 %1894  ;;  %8497 = vmatprep.mubr.msk.bf16.mxu0 %vm2126_vm15, %v10478_v23 }
 0x2f3   :  { %2404 = vmatprep.subr.bf16.mxu0 %v1795_v28  ;;  %v1909_v11 = vsel %vm15531_vm1, %v1891_v27, %v1893_v14  ;;  %v1910_v47 = vsel %vm15537_vm8, %v1893_v14, %v1895_v21  ;;  %vm15541_vm1 = vmmov %vm15540_vm0 }
 0x2f4   :  { %2355 = vmatprep.subr.bf16.mxu1 %v1909_v11  ;;  %vm15544_vm8 = vmmov %vm15536_vm6 }
 0x2f5   :  { %2356 = vmatpush1.bf16.msra.mxu1 %v1908_v33 }
 0x2f6   :  { %2405 = vmatpush1.bf16.msra.mxu0 %v1794_v52  ;;  %v10989_v51 = vpop.permute.xlu0 %1896  ;;  %v1949_v48 = vpop.permute.xlu1 %1948 }
 0x2f7   :  { %2406 = vmatprep.subr.bf16.mxu0 %v1853_v24  ;;  %v1911_v44 = vsel %vm15536_vm6, %v1895_v21, %v10989_v51  ;;  %v1966_v9 = vsel %vm433_vm10, %v10725_v56, %v1949_v48 }
 0x2fa   :  { %2407 = vmatpush1.bf16.msra.mxu0 %v1852_v16  ;;  %v1951_v57 = vpop.permute.xlu0 %1950  ;;  %v1953_v29 = vpop.permute.xlu1 %1952 }
 0x2fb   :  { %2408 = vmatprep.subr.bf16.mxu0 %v1911_v44  ;;  %v1967_v41 = vsel %vm433_vm10, %v1949_v48, %v1951_v57  ;;  %v1968_v20 = vsel %vm433_vm10, %v1951_v57, %v1953_v29 }
 0x2fc   :  { %2357 = vmatprep.subr.bf16.mxu1 %v1967_v41 }
 0x2fd   :  { %2358 = vmatpush1.bf16.msra.mxu1 %v1966_v9 }
 0x2fe   :  { %2409 = vmatpush1.bf16.msra.mxu0 %v1910_v47  ;;  %v11000_v17 = vpop.permute.xlu0 %1954  ;;  %v2007_v5 = vpop.permute.xlu1 %2006 }
 0x2ff   :  { %v1969_v6 = vsel %vm433_vm10, %v1953_v29, %v11000_v17  ;;  %v2024_v56 = vsel %vm479_vm11, %v10740_v59, %v2007_v5 }
 0x300   :  { %2410 = vmatprep.subr.bf16.mxu0 %v1969_v6 }
 0x302   :  { %2411 = vmatpush1.bf16.msra.mxu0 %v1968_v20  ;;  %v2009_v55 = vpop.permute.xlu0 %2008  ;;  %v2011_v4 = vpop.permute.xlu1 %2010 }
 0x303   :  { %v2025_v18 = vsel %vm479_vm11, %v2007_v5, %v2009_v55  ;;  %v2026_v49 = vsel %vm479_vm11, %v2009_v55, %v2011_v4 }
 0x304   :  { %2359 = vmatprep.subr.bf16.mxu1 %v2025_v18 }
 0x305   :  { %2360 = vmatpush1.bf16.msra.mxu1 %v2024_v56 }
 0x306   :  { %v11008_v53 = vpop.permute.xlu0 %2012  ;;  %v2065_v40 = vpop.permute.xlu1 %2064 }
 0x307   :  { %v2027_v38 = vsel %vm479_vm11, %v2011_v4, %v11008_v53  ;;  %v2082_v34 = vsel %vm525_vm13, %v10752_v10, %v2065_v40 }
 0x308   :  { %2412 = vmatprep.subr.bf16.mxu0 %v2027_v38 }
 0x309   :  { %2413 = vmatpush1.bf16.msra.mxu0 %v2026_v49 }
 0x30a   :  { %v2067_v25 = vpop.permute.xlu0 %2066  ;;  %v2069_v42 = vpop.permute.xlu1 %2068 }
 0x30b   :  { %v2083_v61 = vsel %vm525_vm13, %v2065_v40, %v2067_v25  ;;  %v2084_v15 = vsel %vm525_vm13, %v2067_v25, %v2069_v42 }
 0x30c   :  { %2361 = vmatprep.subr.bf16.mxu1 %v2083_v61 }
 0x30d   :  { %2362 = vmatpush1.bf16.msra.mxu1 %v2082_v34 }
 0x30e   :  { %v2071_v59 = vpop.permute.xlu0 %2070  ;;  %v1667_v45 = vpop.permute.xlu1 %1666  ;;  %2451 = vmatprep.subr.bf16.mxu1 %v10540_v32 }
 0x30f   :  { %v2085_v43 = vsel %vm525_vm13, %v2069_v42, %v2071_v59  ;;  %v1696_v50 = vsel %vm15538_vm9, %v1667_v45, %v10504_v39  ;;  %v1680_v32 = vsel %vm15539_vm14, %v10922_v37, %v1667_v45  ;;  %vm15546_vm9 = vmmov %vm15534_vm3 }
 0x310   :  { %2378 = vmatmul.mubr.bf16.vlgmr.msra.gmra.mrb[32].mxu1 %v10767_v22  ;;  %2414 = vmatprep.subr.bf16.mxu0 %v2085_v43  ;;  %vm15547_vm14 = vmmov %vm15533_vm2 }
 0x311   :  { %2415 = vmatpush1.bf16.msra.mxu0 %v2084_v15  ;;  %2452 = vmatpush1.bf16.msra.mxu1 %v10532_v60 }
 0x312   :  { %v1725_v30 = vpop.permute.xlu0 %1724  ;;  %2453 = vmatprep.subr.bf16.mxu1 %v1696_v50  ;;  %8496 = vmatprep.mubr.msk.bf16.mxu1 %vm2126_vm15, %v10779_v46  ;;  %v1783_v60 = vpop.permute.xlu1 %1782 }
 0x313   :  { %v1754_v10 = vsel %vm15540_vm0, %v1725_v30, %v10534_v19  ;;  %v1738_v39 = vsel %vm15541_vm1, %v10949_v0, %v1725_v30  ;;  %v1812_v8 = vsel %vm15542_vm5, %v1783_v60, %v10536_v36  ;;  %v1796_v19 = vsel %vm15533_vm2, %v10962_v7, %v1783_v60  ;;  %vm15550_vm5 = vmmov %vm15533_vm2 }
 0x314   :  { %2431 = vmatmul.mubr.bf16.vlgmr.msra.gmra.mrb[28].mxu0 %v10767_v22  ;;  %vm15548_vm0 = vcmask 1039360   ;;  %vm15551_vm2 = vmmov %vm15534_vm3 }
 0x315   :  { %2454 = vmatpush1.bf16.msra.mxu1 %v1680_v32  ;;  %8498 = vmatprep.mubr.msk.bf16.mxu0 %vm2126_vm15, %v10779_v46  ;;  %vm15549_vm1 = vmmov %vm15548_vm0 }
 0x316   :  { %2455 = vmatprep.subr.bf16.mxu1 %v1754_v10  ;;  %v1841_v37 = vpop.permute.xlu0 %1840  ;;  %v1899_v0 = vpop.permute.xlu1 %1898 }
 0x317   :  { %v1870_v13 = vsel %vm15534_vm3, %v1841_v37, %v10554_v54  ;;  %v1854_v36 = vsel %vm15543_vm12, %v10975_v62, %v1841_v37  ;;  %v1912_v7 = vsel %vm15544_vm8, %v10989_v51, %v1899_v0  ;;  %vm15552_vm3 = vmmov %vm15548_vm0 }
 0x318   :  { %2388 = vmatmul.mubr.bf16.gmra.mrb[36].mxu1 %v10809_v35  ;;  %vm15553_vm12 = vmmov %vm15551_vm2 }
 0x319   :  { %2456 = vmatpush1.bf16.msra.mxu1 %v1738_v39  ;;  %8499 = vmatprep.mubr.msk.bf16.mxu1 %vm2126_vm15, %v10478_v23  ;;  %v1928_v23 = vsel %vm15536_vm6, %v1899_v0, %v10556_v58  ;;  %v11102_v39 = vld [vmem:[%s15545_s30] sm:$0x1f]   ;;  %vm15554_vm6 = vmmov %vm15548_vm0  ;;  %s9335_s30 = smov 58  }
 0x31a   :  { %2457 = vmatprep.subr.bf16.mxu1 %v1812_v8  ;;  %v1957_v1 = vpop.permute.xlu0 %1956  ;;  %v2015_v27 = vpop.permute.xlu1 %2014  ;;  %vm15555_vm8 = vmmov %vm15550_vm5 }
 0x31b   :  { %v1986_v54 = vsel %vm433_vm10, %v1957_v1, %v10570_v31  ;;  %v1970_v2 = vsel %vm433_vm10, %v11000_v17, %v1957_v1  ;;  %v2044_v62 = vsel %vm479_vm11, %v2015_v27, %v10572_v63  ;;  %v2028_v58 = vsel %vm479_vm11, %v11008_v53, %v2015_v27 }
 0x31c   :  { %2441 = vmatmul.mubr.bf16.gmra.mrb[32].mxu0 %v10809_v35  ;;  %vm2755_vm11 = vcmask 261120  }
 0x31d   :  { %2458 = vmatpush1.bf16.msra.mxu1 %v1796_v19  ;;  %2791 = vmatprep.mubr.bf16.mxu0 %v15387_v26 }
 0x31e   :  { %2459 = vmatprep.subr.bf16.mxu1 %v1870_v13  ;;  %v2073_v14 = vpop.permute.xlu0 %2072 }
 0x31f   :  { %v2102_v28 = vsel %vm525_vm13, %v2073_v14, %v10586_v12  ;;  %v2086_v31 = vsel %vm525_vm13, %v2071_v59, %v2073_v14 }
 0x321   :  { %2460 = vmatpush1.bf16.msra.mxu1 %v1854_v36 }
 0x322   :  { %2461 = vmatprep.subr.bf16.mxu1 %v1928_v23 }
 0x325   :  { %2462 = vmatpush1.bf16.msra.mxu1 %v1912_v7 }
 0x326   :  { %2463 = vmatprep.subr.bf16.mxu1 %v1986_v54 }
 0x329   :  { %2464 = vmatpush1.bf16.msra.mxu1 %v1970_v2 }
 0x32a   :  { %2465 = vmatprep.subr.bf16.mxu1 %v2044_v62 }
 0x32b   :  { %v11067_v63 = vpop.permute.xlu1 %2566 }
 0x32d   :  { %2466 = vmatpush1.bf16.msra.mxu1 %v2028_v58 }
 0x32e   :  { %2467 = vmatprep.subr.bf16.mxu1 %v2102_v28 }
 0x32f   :  { %v11069_v21 = vpop.permute.xlu0 %2571  ;;  %v11071_v33 = vpop.permute.xlu1 %2646 }
 0x331   :  { %2468 = vmatpush1.bf16.msra.mxu1 %v2086_v31 }
 0x333   :  { %v11073_v51 = vpop.permute.xlu0 %2651  ;;  %v11079_v41 = vpop.permute.xlu1 %2576 }
 0x334   :  { %2484 = vmatmul.mubr.bf16.vlgmr.msra.gmra.mrb[40].mxu1 %v10767_v22 }
 0x335   :  { %8500 = vmatprep.mubr.msk.bf16.mxu1 %vm2126_vm15, %v10779_v46 }
 0x337   :  { %v11083_v17 = vpop.permute.xlu0 %2581  ;;  %v11090_v59 = vpop.permute.xlu1 %2656 }
 0x33b   :  { %v11092_v45 = vpop.permute.xlu0 %2661 }
 0x33c   :  { %2494 = vmatmul.mubr.bf16.gmra.mrb[44].mxu1 %v10809_v35 }
 0x33d   :  { %2963 = vmatprep.mubr.bf16.mxu1 %v15387_v26 }
 0x37c   :  { %v2167_v11 = vpop.f32.mrb[16].mxu1 }
 0x37d   :  { %v2504_v12 = vmax.f32 %v2167_v11, 0.0  ;;  %v2169_v52 = vpop.f32.mrb[17].mxu1 }
 0x37e   :  { %v2505_v24 = vmax.f32 %v2169_v52, 0.0  ;;  %v2171_v22 = vpop.f32.mrb[18].mxu1 }
 0x37f   :  { %v2584_v48 = vmul.f32 %v11067_v63, %v2504_v12  ;;  %v2518_v46 = vmax.f32 %v2171_v22, 0.0  ;;  %v2173_v16 = vpop.f32.mrb[19].mxu1 }
 0x380   :  { %v2585_v35 = vmul.f32 %v11067_v63, %v2505_v24  ;;  %v2519_v57 = vmax.f32 %v2173_v16, 0.0 }
 0x381   :  { %v2598_v44 = vmul.f32 %v11069_v21, %v2518_v46  ;;  %v2664_v9 = vadd.f32 %v11071_v33, %v2584_v48 }
 0x382   :  { %v2599_v29 = vmul.f32 %v11069_v21, %v2519_v57  ;;  %v2665_v5 = vadd.f32 %v11071_v33, %v2585_v35 }
 0x383   :  { %v2678_v47 = vadd.f32 %v11073_v51, %v2598_v44 }
 0x384   :  { %v2679_v6 = vadd.f32 %v11073_v51, %v2599_v29  ;;  %v2177_v20 = vpop.f32.mrb[20].mxu1 }
 0x385   :  { %v2720_v55 = vpack.c.bf16 %v2678_v47, %v2664_v9  ;;  %v2532_v4 = vmax.f32 %v2177_v20, 0.0  ;;  %v2179_v18 = vpop.f32.mrb[21].mxu1 }
 0x386   :  { %v2533_v56 = vmax.f32 %v2179_v18, 0.0  ;;  %v2181_v53 = vpop.f32.mrb[22].mxu1  ;;  %v2721_v40 = vpack.c.bf16 %v2679_v6, %v2665_v5 }
 0x387   :  { %v2612_v38 = vmul.f32 %v11079_v41, %v2532_v4  ;;  %v2546_v49 = vmax.f32 %v2181_v53, 0.0  ;;  %v2183_v25 = vpop.f32.mrb[23].mxu1 }
 0x388   :  { %v2613_v42 = vmul.f32 %v11079_v41, %v2533_v56  ;;  %v2547_v61 = vmax.f32 %v2183_v25, 0.0  ;;  %2759 = vmatprep.subr.bf16.mxu0 %v2721_v40 }
 0x389   :  { %v2626_v34 = vmul.f32 %v11083_v17, %v2546_v49  ;;  %2760 = vmatpush1.bf16.msra.mxu0 %v2720_v55  ;;  %v2692_v15 = vadd.f32 %v11090_v59, %v2612_v38 }
 0x38a   :  { %v2627_v43 = vmul.f32 %v11083_v17, %v2547_v61  ;;  %v2693_v30 = vadd.f32 %v11090_v59, %v2613_v42 }
 0x38b   :  { %v2706_v50 = vadd.f32 %v11092_v45, %v2626_v34 }
 0x38c   :  { %v2707_v32 = vadd.f32 %v11092_v45, %v2627_v43 }
 0x38d   :  { %v2734_v10 = vpack.c.bf16 %v2706_v50, %v2692_v15 }
 0x38e   :  { %v2735_v60 = vpack.c.bf16 %v2707_v32, %v2693_v30 }
 0x390   :  { %2761 = vmatprep.subr.bf16.mxu0 %v2735_v60 }
 0x391   :  { %2762 = vmatpush1.bf16.msra.mxu0 %v2734_v10 }
 0x394   :  { %8502 = vmatmul.mubr.msk.bf16.vlgmr.msra.gmra.mrb[36].mxu0 %vm2755_vm11, %v11102_v39 }
 0x395   :  { %2834 = vmatprep.mubr.bf16.mxu0 %v15387_v26 }
 0x398   :  { %v2220_v8 = vpop.f32.mrb[12].mxu0 }
 0x399   :  { %v2506_v37 = vmax.f32 %v2220_v8, 0.0  ;;  %v2222_v19 = vpop.f32.mrb[13].mxu0 }
 0x39a   :  { %v2507_v13 = vmax.f32 %v2222_v19, 0.0  ;;  %v2224_v0 = vpop.f32.mrb[14].mxu0 }
 0x39b   :  { %v2586_v36 = vmul.f32 %v11067_v63, %v2506_v37  ;;  %v2520_v23 = vmax.f32 %v2224_v0, 0.0  ;;  %v2226_v1 = vpop.f32.mrb[15].mxu0 }
 0x39c   :  { %v2587_v7 = vmul.f32 %v11067_v63, %v2507_v13  ;;  %v2521_v54 = vmax.f32 %v2226_v1, 0.0 }
 0x39d   :  { %v2600_v27 = vmul.f32 %v11069_v21, %v2520_v23  ;;  %v2666_v62 = vadd.f32 %v11071_v33, %v2586_v36 }
 0x39e   :  { %v2601_v2 = vmul.f32 %v11069_v21, %v2521_v54  ;;  %v2667_v58 = vadd.f32 %v11071_v33, %v2587_v7 }
 0x39f   :  { %v2680_v14 = vadd.f32 %v11073_v51, %v2600_v27 }
 0x3a0   :  { %v2681_v28 = vadd.f32 %v11073_v51, %v2601_v2  ;;  %v2230_v31 = vpop.f32.mrb[16].mxu0 }
 0x3a1   :  { %v2722_v11 = vpack.c.bf16 %v2680_v14, %v2666_v62  ;;  %v2534_v12 = vmax.f32 %v2230_v31, 0.0  ;;  %v2232_v52 = vpop.f32.mrb[17].mxu0 }
 0x3a2   :  { %v2535_v24 = vmax.f32 %v2232_v52, 0.0  ;;  %v2234_v22 = vpop.f32.mrb[18].mxu0  ;;  %v2723_v48 = vpack.c.bf16 %v2681_v28, %v2667_v58 }
 0x3a3   :  { %v2614_v46 = vmul.f32 %v11079_v41, %v2534_v12  ;;  %v2548_v16 = vmax.f32 %v2234_v22, 0.0  ;;  %v2236_v35 = vpop.f32.mrb[19].mxu0 }
 0x3a4   :  { %v2615_v57 = vmul.f32 %v11079_v41, %v2535_v24  ;;  %v2549_v44 = vmax.f32 %v2236_v35, 0.0  ;;  %2802 = vmatprep.subr.bf16.mxu0 %v2723_v48 }
 0x3a5   :  { %v2628_v29 = vmul.f32 %v11083_v17, %v2548_v16  ;;  %2803 = vmatpush1.bf16.msra.mxu0 %v2722_v11  ;;  %v2694_v47 = vadd.f32 %v11090_v59, %v2614_v46 }
 0x3a6   :  { %v2629_v9 = vmul.f32 %v11083_v17, %v2549_v44  ;;  %v2695_v6 = vadd.f32 %v11090_v59, %v2615_v57 }
 0x3a7   :  { %v2708_v5 = vadd.f32 %v11092_v45, %v2628_v29 }
 0x3a8   :  { %v2709_v20 = vadd.f32 %v11092_v45, %v2629_v9  ;;  %v2273_v55 = vpop.f32.mrb[24].mxu1 }
 0x3a9   :  { %v2736_v4 = vpack.c.bf16 %v2708_v5, %v2694_v47  ;;  %v2508_v18 = vmax.f32 %v2273_v55, 0.0  ;;  %v2275_v56 = vpop.f32.mrb[25].mxu1 }
 0x3aa   :  { %v2509_v53 = vmax.f32 %v2275_v56, 0.0  ;;  %v2277_v40 = vpop.f32.mrb[26].mxu1  ;;  %v2737_v38 = vpack.c.bf16 %v2709_v20, %v2695_v6 }
 0x3ab   :  { %v2588_v49 = vmul.f32 %v11067_v63, %v2508_v18  ;;  %v2522_v25 = vmax.f32 %v2277_v40, 0.0  ;;  %v2279_v42 = vpop.f32.mrb[27].mxu1 }
 0x3ac   :  { %v2589_v61 = vmul.f32 %v11067_v63, %v2509_v53  ;;  %v2523_v34 = vmax.f32 %v2279_v42, 0.0  ;;  %2804 = vmatprep.subr.bf16.mxu0 %v2737_v38 }
 0x3ad   :  { %v2602_v43 = vmul.f32 %v11069_v21, %v2522_v25  ;;  %2805 = vmatpush1.bf16.msra.mxu0 %v2736_v4  ;;  %v2668_v50 = vadd.f32 %v11071_v33, %v2588_v49 }
 0x3ae   :  { %v2603_v15 = vmul.f32 %v11069_v21, %v2523_v34  ;;  %v2669_v32 = vadd.f32 %v11071_v33, %v2589_v61 }
 0x3af   :  { %v2682_v30 = vadd.f32 %v11073_v51, %v2602_v43 }
 0x3b0   :  { %v2683_v10 = vadd.f32 %v11073_v51, %v2603_v15  ;;  %v2283_v60 = vpop.f32.mrb[28].mxu1  ;;  %8503 = vmatmul.mubr.msk.bf16.vlgmr.msra.gmra.mrb[40].mxu0 %vm2755_vm11, %v11102_v39 }
 0x3b1   :  { %v2724_v8 = vpack.c.bf16 %v2682_v30, %v2668_v50  ;;  %v2536_v37 = vmax.f32 %v2283_v60, 0.0  ;;  %v2285_v19 = vpop.f32.mrb[29].mxu1  ;;  %2877 = vmatprep.mubr.bf16.mxu0 %v15387_v26 }
 0x3b2   :  { %v2537_v13 = vmax.f32 %v2285_v19, 0.0  ;;  %v2287_v0 = vpop.f32.mrb[30].mxu1  ;;  %v2725_v36 = vpack.c.bf16 %v2683_v10, %v2669_v32 }
 0x3b3   :  { %v2616_v23 = vmul.f32 %v11079_v41, %v2536_v37  ;;  %v2550_v1 = vmax.f32 %v2287_v0, 0.0  ;;  %v2289_v7 = vpop.f32.mrb[31].mxu1 }
 0x3b4   :  { %v2617_v54 = vmul.f32 %v11079_v41, %v2537_v13  ;;  %v2551_v27 = vmax.f32 %v2289_v7, 0.0  ;;  %2845 = vmatprep.subr.bf16.mxu0 %v2725_v36 }
 0x3b5   :  { %v2630_v2 = vmul.f32 %v11083_v17, %v2550_v1  ;;  %2846 = vmatpush1.bf16.msra.mxu0 %v2724_v8  ;;  %v2696_v14 = vadd.f32 %v11090_v59, %v2616_v23 }
 0x3b6   :  { %v2631_v62 = vmul.f32 %v11083_v17, %v2551_v27  ;;  %v2697_v28 = vadd.f32 %v11090_v59, %v2617_v54 }
 0x3b7   :  { %v2710_v58 = vadd.f32 %v11092_v45, %v2630_v2 }
 0x3b8   :  { %v2711_v31 = vadd.f32 %v11092_v45, %v2631_v62 }
 0x3b9   :  { %v2738_v11 = vpack.c.bf16 %v2710_v58, %v2696_v14 }
 0x3ba   :  { %v2739_v12 = vpack.c.bf16 %v2711_v31, %v2697_v28 }
 0x3bc   :  { %v2326_v52 = vpop.f32.mrb[20].mxu0  ;;  %2847 = vmatprep.subr.bf16.mxu0 %v2739_v12 }
 0x3bd   :  { %v2510_v24 = vmax.f32 %v2326_v52, 0.0  ;;  %v2328_v22 = vpop.f32.mrb[21].mxu0  ;;  %2848 = vmatpush1.bf16.msra.mxu0 %v2738_v11 }
 0x3be   :  { %v2511_v48 = vmax.f32 %v2328_v22, 0.0  ;;  %v2330_v46 = vpop.f32.mrb[22].mxu0 }
 0x3bf   :  { %v2590_v16 = vmul.f32 %v11067_v63, %v2510_v24  ;;  %v2524_v35 = vmax.f32 %v2330_v46, 0.0  ;;  %v2332_v57 = vpop.f32.mrb[23].mxu0 }
 0x3c0   :  { %v2591_v44 = vmul.f32 %v11067_v63, %v2511_v48  ;;  %v2525_v29 = vmax.f32 %v2332_v57, 0.0  ;;  %8504 = vmatmul.mubr.msk.bf16.vlgmr.msra.gmra.mrb[44].mxu0 %vm2755_vm11, %v11102_v39 }
 0x3c1   :  { %v2604_v9 = vmul.f32 %v11069_v21, %v2524_v35  ;;  %2920 = vmatprep.mubr.bf16.mxu0 %v15387_v26  ;;  %v2670_v5 = vadd.f32 %v11071_v33, %v2590_v16 }
 0x3c2   :  { %v2605_v47 = vmul.f32 %v11069_v21, %v2525_v29  ;;  %v2671_v20 = vadd.f32 %v11071_v33, %v2591_v44 }
 0x3c3   :  { %v2684_v6 = vadd.f32 %v11073_v51, %v2604_v9 }
 0x3c4   :  { %v2685_v55 = vadd.f32 %v11073_v51, %v2605_v47  ;;  %v2336_v4 = vpop.f32.mrb[24].mxu0 }
 0x3c5   :  { %v2726_v18 = vpack.c.bf16 %v2684_v6, %v2670_v5  ;;  %v2538_v56 = vmax.f32 %v2336_v4, 0.0  ;;  %v2338_v53 = vpop.f32.mrb[25].mxu0 }
 0x3c6   :  { %v2539_v40 = vmax.f32 %v2338_v53, 0.0  ;;  %v2340_v38 = vpop.f32.mrb[26].mxu0  ;;  %v2727_v49 = vpack.c.bf16 %v2685_v55, %v2671_v20 }
 0x3c7   :  { %v2618_v25 = vmul.f32 %v11079_v41, %v2538_v56  ;;  %v2552_v42 = vmax.f32 %v2340_v38, 0.0  ;;  %v2342_v61 = vpop.f32.mrb[27].mxu0 }
 0x3c8   :  { %v2619_v34 = vmul.f32 %v11079_v41, %v2539_v40  ;;  %v2553_v43 = vmax.f32 %v2342_v61, 0.0  ;;  %2888 = vmatprep.subr.bf16.mxu0 %v2727_v49 }
 0x3c9   :  { %v2632_v15 = vmul.f32 %v11083_v17, %v2552_v42  ;;  %2889 = vmatpush1.bf16.msra.mxu0 %v2726_v18  ;;  %v2698_v30 = vadd.f32 %v11090_v59, %v2618_v25 }
 0x3ca   :  { %v2633_v50 = vmul.f32 %v11083_v17, %v2553_v43  ;;  %v2699_v10 = vadd.f32 %v11090_v59, %v2619_v34 }
 0x3cb   :  { %v2712_v32 = vadd.f32 %v11092_v45, %v2632_v15 }
 0x3cc   :  { %v2713_v60 = vadd.f32 %v11092_v45, %v2633_v50 }
 0x3cd   :  { %v2740_v8 = vpack.c.bf16 %v2712_v32, %v2698_v30 }
 0x3ce   :  { %v2741_v37 = vpack.c.bf16 %v2713_v60, %v2699_v10 }
 0x3d0   :  { %2890 = vmatprep.subr.bf16.mxu0 %v2741_v37 }
 0x3d1   :  { %2891 = vmatpush1.bf16.msra.mxu0 %v2740_v8 }
 0x3d4   :  { %8505 = vmatmul.mubr.msk.bf16.vlgmr.msra.gmra.mrb[48].mxu0 %vm2755_vm11, %v11102_v39 }
 0x3d5   :  { %3006 = vmatprep.mubr.bf16.mxu0 %v15387_v26 }
 0x3e3   :  { %v2379_v19 = vpop.f32.mrb[32].mxu1 }
 0x3e4   :  { %v2512_v13 = vmax.f32 %v2379_v19, 0.0  ;;  %v2381_v0 = vpop.f32.mrb[33].mxu1 }
 0x3e5   :  { %v2513_v36 = vmax.f32 %v2381_v0, 0.0  ;;  %v2383_v23 = vpop.f32.mrb[34].mxu1 }
 0x3e6   :  { %v2592_v1 = vmul.f32 %v11067_v63, %v2512_v13  ;;  %v2526_v7 = vmax.f32 %v2383_v23, 0.0  ;;  %v2385_v54 = vpop.f32.mrb[35].mxu1 }
 0x3e7   :  { %v2593_v27 = vmul.f32 %v11067_v63, %v2513_v36  ;;  %v2527_v2 = vmax.f32 %v2385_v54, 0.0  ;;  %v2432_v62 = vpop.f32.mrb[28].mxu0 }
 0x3e8   :  { %v2606_v14 = vmul.f32 %v11069_v21, %v2526_v7  ;;  %v2514_v58 = vmax.f32 %v2432_v62, 0.0  ;;  %v2434_v28 = vpop.f32.mrb[29].mxu0  ;;  %v2672_v52 = vadd.f32 %v11071_v33, %v2592_v1 }
 0x3e9   :  { %v2607_v31 = vmul.f32 %v11069_v21, %v2527_v2  ;;  %v2515_v11 = vmax.f32 %v2434_v28, 0.0  ;;  %v2436_v12 = vpop.f32.mrb[30].mxu0  ;;  %v2673_v16 = vadd.f32 %v11071_v33, %v2593_v27 }
 0x3ea   :  { %v2686_v24 = vadd.f32 %v11073_v51, %v2606_v14  ;;  %v2594_v22 = vmul.f32 %v11067_v63, %v2514_v58  ;;  %v2528_v48 = vmax.f32 %v2436_v12, 0.0  ;;  %v2438_v46 = vpop.f32.mrb[31].mxu0 }
 0x3eb   :  { %v2687_v35 = vadd.f32 %v11073_v51, %v2607_v31  ;;  %v2595_v57 = vmul.f32 %v11067_v63, %v2515_v11  ;;  %v2529_v44 = vmax.f32 %v2438_v46, 0.0  ;;  %v2389_v29 = vpop.f32.mrb[36].mxu1 }
 0x3ec   :  { %v2728_v9 = vpack.c.bf16 %v2686_v24, %v2672_v52  ;;  %v2608_v47 = vmul.f32 %v11069_v21, %v2528_v48  ;;  %v2540_v5 = vmax.f32 %v2389_v29, 0.0  ;;  %v2391_v6 = vpop.f32.mrb[37].mxu1  ;;  %v2674_v56 = vadd.f32 %v11071_v33, %v2594_v22 }
 0x3ed   :  { %v2609_v20 = vmul.f32 %v11069_v21, %v2529_v44  ;;  %v2541_v55 = vmax.f32 %v2391_v6, 0.0  ;;  %v2393_v4 = vpop.f32.mrb[38].mxu1  ;;  %v2729_v18 = vpack.c.bf16 %v2687_v35, %v2673_v16  ;;  %v2675_v25 = vadd.f32 %v11071_v33, %v2595_v57 }
 0x3ee   :  { %v2688_v53 = vadd.f32 %v11073_v51, %v2608_v47  ;;  %v2620_v40 = vmul.f32 %v11079_v41, %v2540_v5  ;;  %v2554_v38 = vmax.f32 %v2393_v4, 0.0  ;;  %v2395_v49 = vpop.f32.mrb[39].mxu1 }
 0x3ef   :  { %v2689_v42 = vadd.f32 %v11073_v51, %v2609_v20  ;;  %v2621_v61 = vmul.f32 %v11079_v41, %v2541_v55  ;;  %v2555_v34 = vmax.f32 %v2395_v49, 0.0  ;;  %v2442_v43 = vpop.f32.mrb[32].mxu0  ;;  %2931 = vmatprep.subr.bf16.mxu1 %v2729_v18 }
 0x3f0   :  { %v2730_v15 = vpack.c.bf16 %v2688_v53, %v2674_v56  ;;  %v2634_v50 = vmul.f32 %v11083_v17, %v2554_v38  ;;  %v2542_v30 = vmax.f32 %v2442_v43, 0.0  ;;  %v2444_v32 = vpop.f32.mrb[33].mxu0  ;;  %2932 = vmatpush1.bf16.msra.mxu1 %v2728_v9  ;;  %v2700_v19 = vadd.f32 %v11090_v59, %v2620_v40 }
 0x3f1   :  { %v2635_v10 = vmul.f32 %v11083_v17, %v2555_v34  ;;  %v2543_v60 = vmax.f32 %v2444_v32, 0.0  ;;  %v2446_v8 = vpop.f32.mrb[34].mxu0  ;;  %v2731_v37 = vpack.c.bf16 %v2689_v42, %v2675_v25  ;;  %v2701_v1 = vadd.f32 %v11090_v59, %v2621_v61 }
 0x3f2   :  { %v2714_v13 = vadd.f32 %v11092_v45, %v2634_v50  ;;  %v2622_v0 = vmul.f32 %v11079_v41, %v2542_v30  ;;  %v2556_v36 = vmax.f32 %v2446_v8, 0.0  ;;  %v2448_v23 = vpop.f32.mrb[35].mxu0 }
 0x3f3   :  { %v2715_v7 = vadd.f32 %v11092_v45, %v2635_v10  ;;  %v2623_v54 = vmul.f32 %v11079_v41, %v2543_v60  ;;  %v2557_v27 = vmax.f32 %v2448_v23, 0.0  ;;  %2974 = vmatprep.subr.bf16.mxu0 %v2731_v37 }
 0x3f4   :  { %v2742_v2 = vpack.c.bf16 %v2714_v13, %v2700_v19  ;;  %v2636_v62 = vmul.f32 %v11083_v17, %v2556_v36  ;;  %2975 = vmatpush1.bf16.msra.mxu0 %v2730_v15  ;;  %v2702_v28 = vadd.f32 %v11090_v59, %v2622_v0 }
 0x3f5   :  { %v2637_v14 = vmul.f32 %v11083_v17, %v2557_v27  ;;  %v2743_v58 = vpack.c.bf16 %v2715_v7, %v2701_v1  ;;  %v2703_v11 = vadd.f32 %v11090_v59, %v2623_v54 }
 0x3f6   :  { %v2716_v31 = vadd.f32 %v11092_v45, %v2636_v62 }
 0x3f7   :  { %v2717_v12 = vadd.f32 %v11092_v45, %v2637_v14  ;;  %2933 = vmatprep.subr.bf16.mxu1 %v2743_v58 }
 0x3f8   :  { %v2744_v52 = vpack.c.bf16 %v2716_v31, %v2702_v28  ;;  %2934 = vmatpush1.bf16.msra.mxu1 %v2742_v2 }
 0x3f9   :  { %v2745_v24 = vpack.c.bf16 %v2717_v12, %v2703_v11 }
 0x3fb   :  { %8506 = vmatmul.mubr.msk.bf16.vlgmr.msra.gmra.mrb[48].mxu1 %vm2755_vm11, %v11102_v39  ;;  %2976 = vmatprep.subr.bf16.mxu0 %v2745_v24 }
 0x3fc   :  { %2977 = vmatpush1.bf16.msra.mxu0 %v2744_v52  ;;  %3049 = vmatprep.mubr.bf16.mxu1 %v15387_v26 }
 0x3ff   :  { %8507 = vmatmul.mubr.msk.bf16.vlgmr.msra.gmra.mrb[52].mxu0 %vm2755_vm11, %v11102_v39 }
 0x400   :  { %4374 = vmatprep.mubr.bf16.mxu0 %v15387_v26 }
 0x407   :  { %v2485_v22 = vpop.f32.mrb[40].mxu1 }
 0x408   :  { %v2516_v48 = vmax.f32 %v2485_v22, 0.0  ;;  %v2487_v46 = vpop.f32.mrb[41].mxu1 }
 0x409   :  { %v2517_v16 = vmax.f32 %v2487_v46, 0.0  ;;  %v2489_v35 = vpop.f32.mrb[42].mxu1 }
 0x40a   :  { %v2596_v57 = vmul.f32 %v11067_v63, %v2516_v48  ;;  %v2530_v44 = vmax.f32 %v2489_v35, 0.0  ;;  %v2491_v29 = vpop.f32.mrb[43].mxu1 }
 0x40b   :  { %v2597_v9 = vmul.f32 %v11067_v63, %v2517_v16  ;;  %v2531_v47 = vmax.f32 %v2491_v29, 0.0 }
 0x40c   :  { %v2610_v5 = vmul.f32 %v11069_v21, %v2530_v44  ;;  %v2676_v20 = vadd.f32 %v11071_v33, %v2596_v57 }
 0x40d   :  { %v2611_v6 = vmul.f32 %v11069_v21, %v2531_v47  ;;  %v2677_v4 = vadd.f32 %v11071_v33, %v2597_v9 }
 0x40e   :  { %v2690_v55 = vadd.f32 %v11073_v51, %v2610_v5 }
 0x40f   :  { %v2691_v18 = vadd.f32 %v11073_v51, %v2611_v6  ;;  %v2495_v56 = vpop.f32.mrb[44].mxu1 }
 0x410   :  { %v2732_v53 = vpack.c.bf16 %v2690_v55, %v2676_v20  ;;  %v2544_v40 = vmax.f32 %v2495_v56, 0.0  ;;  %v2497_v38 = vpop.f32.mrb[45].mxu1 }
 0x411   :  { %v2545_v49 = vmax.f32 %v2497_v38, 0.0  ;;  %v2499_v25 = vpop.f32.mrb[46].mxu1  ;;  %v2733_v63 = vpack.c.bf16 %v2691_v18, %v2677_v4 }
 0x412   :  { %v2624_v42 = vmul.f32 %v11079_v41, %v2544_v40  ;;  %v2558_v61 = vmax.f32 %v2499_v25, 0.0  ;;  %v2501_v34 = vpop.f32.mrb[47].mxu1 }
 0x413   :  { %v2625_v21 = vmul.f32 %v11079_v41, %v2545_v49  ;;  %v2559_v43 = vmax.f32 %v2501_v34, 0.0  ;;  %3017 = vmatprep.subr.bf16.mxu1 %v2733_v63 }
 0x414   :  { %v2638_v15 = vmul.f32 %v11083_v17, %v2558_v61  ;;  %3018 = vmatpush1.bf16.msra.mxu1 %v2732_v53  ;;  %v2704_v51 = vadd.f32 %v11090_v59, %v2624_v42 }
 0x415   :  { %v2639_v33 = vmul.f32 %v11083_v17, %v2559_v43  ;;  %v2705_v30 = vadd.f32 %v11090_v59, %v2625_v21 }
 0x416   :  { %v2718_v50 = vadd.f32 %v11092_v45, %v2638_v15 }
 0x417   :  { %v2719_v32 = vadd.f32 %v11092_v45, %v2639_v33 }
 0x418   :  { %v2746_v10 = vpack.c.bf16 %v2718_v50, %v2704_v51 }
 0x419   :  { %v2747_v60 = vpack.c.bf16 %v2719_v32, %v2705_v30 }
 0x41b   :  { %3019 = vmatprep.subr.bf16.mxu1 %v2747_v60 }
 0x41c   :  { %3020 = vmatpush1.bf16.msra.mxu1 %v2746_v10 }
 0x41f   :  { %8508 = vmatmul.mubr.msk.bf16.vlgmr.msra.gmra.mrb[52].mxu1 %vm2755_vm11, %v11102_v39  ;;  %vm15556_vm11 = vmmov %vm15550_vm5 }
 0x420   :  { %4417 = vmatprep.mubr.bf16.mxu1 %v15387_v26 }
 0x467   :  { %v11221_v41 = vpop.f32.mrb[36].mxu0 }
 0x468   :  { %v11223_v17 = vpop.f32.mrb[37].mxu0 }
 0x469   :  { %v11225_v8 = vpop.f32.mrb[38].mxu0 }
 0x46a   :  { %v9091_v59 = vpack.i.bf16 %v11225_v8, %v11221_v41  ;;  %v11229_v37 = vpop.f32.mrb[39].mxu0 }
 0x46c   :  { %9082 = vrot.lane.b32.xlu0 %v9091_v59, %s9320_s26  ;;  %9087 = vrot.lane.b32.xlu1 %v9091_v59, %s9319_s1 }
 0x470   :  { %9092 = vrot.lane.b32.xlu0 %v9091_v59, %s9323_s27 }
 0x483   :  { %v11234_v45 = vpop.f32.mrb[40].mxu0 }
 0x484   :  { %v9106_v39 = vpack.i.bf16 %v11234_v45, %v11223_v17  ;;  %v11238_v19 = vpop.f32.mrb[41].mxu0 }
 0x485   :  { %v9121_v13 = vpack.i.bf16 %v11229_v37, %v11238_v19  ;;  %v11242_v0 = vpop.f32.mrb[42].mxu0 }
 0x486   :  { %9102 = vrot.lane.b32.xlu0 %v9106_v39, %s9319_s1  ;;  %9097 = vrot.lane.b32.xlu1 %v9106_v39, %s9320_s26  ;;  %v11246_v36 = vpop.f32.mrb[43].mxu0 }
 0x487   :  { %v9136_v23 = vpack.i.bf16 %v11246_v36, %v11242_v0 }
 0x48a   :  { %9107 = vrot.lane.b32.xlu1 %v9106_v39, %s9323_s27  ;;  %9112 = vrot.lane.b32.xlu0 %v9121_v13, %s9320_s26 }
 0x48e   :  { %9117 = vrot.lane.b32.xlu1 %v9121_v13, %s9319_s1  ;;  %9122 = vrot.lane.b32.xlu0 %v9121_v13, %s9323_s27 }
 0x492   :  { %9132 = vrot.lane.b32.xlu0 %v9136_v23, %s9319_s1  ;;  %9127 = vrot.lane.b32.xlu1 %v9136_v23, %s9320_s26 }
 0x493   :  { %v11256_v1 = vpop.f32.mrb[44].mxu0 }
 0x494   :  { %v11258_v7 = vpop.f32.mrb[45].mxu0 }
 0x495   :  { %v9151_v54 = vpack.i.bf16 %v11258_v7, %v11256_v1  ;;  %v11262_v27 = vpop.f32.mrb[46].mxu0 }
 0x496   :  { %9137 = vrot.lane.b32.xlu1 %v9136_v23, %s9323_s27  ;;  %v11265_v2 = vpop.f32.mrb[47].mxu0 }
 0x497   :  { %v9166_v62 = vpack.i.bf16 %v11265_v2, %v11262_v27 }
 0x499   :  { %9157 = vrot.lane.b32.xlu0 %v9166_v62, %s9320_s26 }
 0x49a   :  { %9142 = vrot.lane.b32.xlu1 %v9151_v54, %s9320_s26 }
 0x49d   :  { %9162 = vrot.lane.b32.xlu0 %v9166_v62, %s9319_s1 }
 0x49e   :  { %9147 = vrot.lane.b32.xlu1 %v9151_v54, %s9319_s1 }
 0x4a1   :  { %9167 = vrot.lane.b32.xlu0 %v9166_v62, %s9323_s27 }
 0x4a2   :  { %9152 = vrot.lane.b32.xlu1 %v9151_v54, %s9323_s27 }
 0x4a7   :  { %v11275_v14 = vpop.f32.mrb[48].mxu0 }
 0x4a8   :  { %v11277_v58 = vpop.f32.mrb[49].mxu0 }
 0x4a9   :  { %v9181_v28 = vpack.i.bf16 %v11277_v58, %v11275_v14  ;;  %v11281_v31 = vpop.f32.mrb[50].mxu0 }
 0x4aa   :  { %v11283_v11 = vpop.f32.mrb[51].mxu0 }
 0x4ab   :  { %v9196_v12 = vpack.i.bf16 %v11283_v11, %v11281_v31  ;;  %9172 = vrot.lane.b32.xlu1 %v9181_v28, %s9320_s26 }
 0x4ad   :  { %9187 = vrot.lane.b32.xlu0 %v9196_v12, %s9320_s26 }
 0x4af   :  { %9177 = vrot.lane.b32.xlu1 %v9181_v28, %s9319_s1 }
 0x4b1   :  { %9192 = vrot.lane.b32.xlu0 %v9196_v12, %s9319_s1 }
 0x4b3   :  { %9182 = vrot.lane.b32.xlu1 %v9181_v28, %s9323_s27 }
 0x4b5   :  { %9197 = vrot.lane.b32.xlu0 %v9196_v12, %s9323_s27 }
 0x4ce   :  { %v11293_v52 = vpop.f32.mrb[48].mxu1 }
 0x4cf   :  { %v11295_v24 = vpop.f32.mrb[49].mxu1 }
 0x4d0   :  { %v9211_v22 = vpack.i.bf16 %v11295_v24, %v11293_v52  ;;  %v11299_v48 = vpop.f32.mrb[50].mxu1 }
 0x4d1   :  { %v11301_v46 = vpop.f32.mrb[51].mxu1 }
 0x4d2   :  { %v9241_v16 = vpack.i.bf16 %v11301_v46, %v11299_v48  ;;  %9202 = vrot.lane.b32.xlu1 %v9211_v22, %s9320_s26  ;;  %v11306_v35 = vpop.f32.mrb[52].mxu0 }
 0x4d3   :  { %v11308_v57 = vpop.f32.mrb[53].mxu0 }
 0x4d4   :  { %9232 = vrot.lane.b32.xlu0 %v9241_v16, %s9320_s26  ;;  %v9226_v44 = vpack.i.bf16 %v11308_v57, %v11306_v35  ;;  %v11313_v29 = vpop.f32.mrb[54].mxu0 }
 0x4d5   :  { %v11315_v9 = vpop.f32.mrb[55].mxu0 }
 0x4d6   :  { %9207 = vrot.lane.b32.xlu1 %v9211_v22, %s9319_s1  ;;  %v9256_v47 = vpack.i.bf16 %v11315_v9, %v11313_v29 }
 0x4d8   :  { %9237 = vrot.lane.b32.xlu0 %v9241_v16, %s9319_s1 }
 0x4da   :  { %9212 = vrot.lane.b32.xlu1 %v9211_v22, %s9323_s27 }
 0x4dc   :  { %9242 = vrot.lane.b32.xlu0 %v9241_v16, %s9323_s27 }
 0x4de   :  { %9217 = vrot.lane.b32.xlu1 %v9226_v44, %s9320_s26  ;;  %v11329_v5 = vpop.permute.xlu0 %9082  ;;  %v11333_v20 = vpop.permute.xlu1 %9087 }
 0x4df   :  { %v15394_v15 = vunpack.i.l.bf16 %v11329_v5  ;;  %v15390_v33 = vunpack.i.l.bf16 %v11333_v20  ;;  %v15393_v51 = vunpack.i.h.bf16 %v11329_v5  ;;  %v15389_v50 = vunpack.i.h.bf16 %v11333_v20 }
 0x4e0   :  { %9247 = vrot.lane.b32.xlu0 %v9256_v47, %s9320_s26 }
 0x4e2   :  { %9222 = vrot.lane.b32.xlu1 %v9226_v44, %s9319_s1  ;;  %v11337_v4 = vpop.permute.xlu0 %9092 }
 0x4e3   :  { %v15391_v34 = vunpack.i.l.bf16 %v11337_v4  ;;  %v15392_v30 = vunpack.i.h.bf16 %v11337_v4 }
 0x4e4   :  { %9252 = vrot.lane.b32.xlu0 %v9256_v47, %s9319_s1 }
 0x4e6   :  { %9227 = vrot.lane.b32.xlu1 %v9226_v44, %s9323_s27 }
 0x4e8   :  { %9257 = vrot.lane.b32.xlu0 %v9256_v47, %s9323_s27 }
 0x4f2   :  { %v11331_v6 = vpop.f32.mrb[52].mxu1 }
 0x4f3   :  { %v11335_v55 = vpop.f32.mrb[53].mxu1 }
 0x4f4   :  { %v9271_v18 = vpack.i.bf16 %v11335_v55, %v11331_v6  ;;  %v11341_v56 = vpop.f32.mrb[54].mxu1 }
 0x4f5   :  { %v11343_v53 = vpop.f32.mrb[55].mxu1 }
 0x4f6   :  { %v9286_v40 = vpack.i.bf16 %v11343_v53, %v11341_v56  ;;  %9262 = vrot.lane.b32.xlu1 %v9271_v18, %s9320_s26 }
 0x4f8   :  { %v9103_v38 = vpop.permute.xlu0 %9102  ;;  %v9098_v49 = vpop.permute.xlu1 %9097  ;;  %9277 = vrot.lane.b32.xlu0 %v9286_v40, %s9320_s26  ;;  %s9330_s26 = smov 68  }
 0x4f9   :  { %v9104_v25 = vunpack.i.l.bf16 %v9103_v38  ;;  %v9099_v63 = vunpack.i.l.bf16 %v9098_v49  ;;  %v9100_v60 = vunpack.i.h.bf16 %v9098_v49  ;;  %v9105_v22 = vunpack.i.h.bf16 %v9103_v38 }
 0x4fa   :  { %9267 = vrot.lane.b32.xlu1 %v9271_v18, %s9319_s1 }
 0x4fb   :  { %v3286_v10 = vsel %vm15547_vm14, %v15390_v33, %v9104_v25  ;;  %v3144_v59 = vsel %vm15548_vm0, %v15394_v15, %v9099_v63  ;;  %v3145_v49 = vsel %vm15552_vm3, %v9099_v63, %v9100_v60  ;;  %vm15558_vm14 = vmmov %vm15548_vm0 }
 0x4fc   :  { %v9108_v42 = vpop.permute.xlu1 %9107  ;;  %v11350_v61 = vpop.permute.xlu0 %9112  ;;  %9282 = vrot.lane.b32.xlu0 %v9286_v40, %s9319_s1  ;;  %s9329_s1 = smov 124   ;;  %vm15561_vm3 = vmmov %vm15551_vm2 }
 0x4fd   :  { %v9109_v21 = vunpack.i.l.bf16 %v9108_v42  ;;  %v9115_v43 = vunpack.i.h.bf16 %v11350_v61  ;;  %v9110_v39 = vunpack.i.h.bf16 %v9108_v42  ;;  %v9114_v62 = vunpack.i.l.bf16 %v11350_v61 }
 0x4fe   :  { %9272 = vrot.lane.b32.xlu1 %v9271_v18, %s9323_s27  ;;  %v3202_v42 = vmax.f32 %v11221_v41, %v3144_v59 }
 0x4ff   :  { %v3400_v32 = vsel %vm15546_vm9, %v15391_v34, %v9109_v21  ;;  %v3157_v54 = vsel %vm15549_vm1, %v15393_v51, %v9115_v43  ;;  %v3146_v33 = vsel %vm15554_vm6, %v9100_v60, %v9114_v62  ;;  %vm15557_vm9 = vmmov %vm15551_vm2  ;;  %v3203_v60 = vmax.f32 %v11223_v17, %v3145_v49 }
 0x500   :  { %v11370_v13 = vpop.permute.xlu1 %9117  ;;  %v11372_v23 = vpop.permute.xlu0 %9122  ;;  %9287 = vrot.lane.b32.xlu0 %v9286_v40, %s9323_s27  ;;  %v3458_v16 = vmax.f32 %v3286_v10, %v3400_v32  ;;  %v3216_v26 = vmax.f32 %v11225_v8, %v3157_v54  ;;  %v3287_v8 = vsel %vm15555_vm8, %v9104_v25, %v9105_v22  ;;  %v3204_v25 = vmax.f32 %v11234_v45, %v3146_v33  ;;  %vm15559_vm1 = vmmov %vm15550_vm5  ;;  %s9331_s27 = smov 16  }
 0x501   :  { %v9120_v28 = vunpack.i.h.bf16 %v11370_v13  ;;  %v9125_v12 = vunpack.i.h.bf16 %v11372_v23  ;;  %v9119_v47 = vunpack.i.l.bf16 %v11370_v13  ;;  %v9124_v40 = vunpack.i.l.bf16 %v11372_v23  ;;  %vm15563_vm6 = vmmov %vm15548_vm0 }
 0x502   :  { %v3486_v51 = vmax.f32 %v3202_v42, %v3458_v16  ;;  %vm15564_vm8 = vmmov %vm15548_vm0 }
 0x503   :  { %v3299_v44 = vsel %vm15550_vm5, %v15389_v50, %v9120_v28  ;;  %v3413_v18 = vsel %vm15551_vm2, %v15392_v30, %v9125_v12  ;;  %v3401_v50 = vsel %vm15553_vm12, %v9109_v21, %v9110_v39  ;;  %v3288_v59 = vsel %vm15556_vm11, %v9105_v22, %v9119_v47  ;;  %vm15560_vm5 = vmmov %vm15559_vm1 }
 0x504   :  { %v3472_v38 = vmax.f32 %v3299_v44, %v3413_v18  ;;  %v11392_v32 = vpop.permute.xlu0 %9132  ;;  %v9128_v10 = vpop.permute.xlu1 %9127  ;;  %v3402_v21 = vsel %vm15557_vm9, %v9110_v39, %v9124_v40  ;;  %v3459_v18 = vmax.f32 %v3287_v8, %v3401_v50  ;;  %vm15562_vm12 = vmmov %vm15548_vm0 }
 0x505   :  { %v9130_v34 = vunpack.i.h.bf16 %v9128_v10  ;;  %v9129_v30 = vunpack.i.l.bf16 %v9128_v10  ;;  %v9135_v63 = vunpack.i.h.bf16 %v11392_v32  ;;  %v9134_v41 = vunpack.i.l.bf16 %v11392_v32  ;;  %vm15565_vm11 = vmmov %vm15559_vm1 }
 0x506   :  { %v3500_v15 = vmax.f32 %v3216_v26, %v3472_v38  ;;  %v3460_v10 = vmax.f32 %v3288_v59, %v3402_v21  ;;  %vm15566_vm9 = vmmov %vm15548_vm0 }
 0x507   :  { %v3158_v26 = vsel %vm15558_vm14, %v9115_v43, %v9129_v30  ;;  %v3159_v16 = vsel %vm15548_vm0, %v9129_v30, %v9130_v34  ;;  %v3300_v22 = vsel %vm15559_vm1, %v9120_v28, %v9134_v41  ;;  %v3301_v39 = vsel %vm15560_vm5, %v9134_v41, %v9135_v63  ;;  %vm15567_vm14 = vmmov %vm15559_vm1 }
 0x508   :  { %v11408_v54 = vpack.c.bf16 %v3500_v15, %v3486_v51  ;;  %v9138_v44 = vpop.permute.xlu1 %9137  ;;  %v3217_v17 = vmax.f32 %v11229_v37, %v3158_v26  ;;  %v3218_v45 = vmax.f32 %v11242_v0, %v3159_v16  ;;  %v3487_v41 = vmax.f32 %v3203_v60, %v3459_v18  ;;  %vm15568_vm0 = vmmov %vm15559_vm1 }
 0x509   :  { %v9140_v42 = vunpack.i.h.bf16 %v9138_v44  ;;  %v9139_v38 = vunpack.i.l.bf16 %v9138_v44  ;;  %v3488_v8 = vmax.f32 %v3204_v25, %v3460_v10  ;;  %vm15569_vm1 = vmmov %vm15568_vm0 }
 0x50a   :  { %3542 = vrot.lane.b32.xlu1 %v11408_v54, %s9321_s2  ;;  %3586 = vrot.lane.b32.xlu0 %v11408_v54, %s9329_s1  ;;  %vm15570_vm5 = vmmov %vm15551_vm2 }
 0x50b   :  { %v3414_v43 = vsel %vm15551_vm2, %v9125_v12, %v9139_v38  ;;  %v3415_v15 = vsel %vm15561_vm3, %v9139_v38, %v9140_v42  ;;  %v11425_v33 = vpop.permute.xlu0 %9157  ;;  %vm15571_vm3 = vmmov %vm15551_vm2 }
 0x50c   :  { %v3473_v51 = vmax.f32 %v3300_v22, %v3414_v43  ;;  %v3474_v50 = vmax.f32 %v3301_v39, %v3415_v15  ;;  %v9160_v30 = vunpack.i.h.bf16 %v11425_v33  ;;  %v9159_v28 = vunpack.i.l.bf16 %v11425_v33  ;;  %v11429_v49 = vpop.permute.xlu1 %9142 }
 0x50d   :  { %v9144_v0 = vunpack.i.l.bf16 %v11429_v49  ;;  %v9145_v18 = vunpack.i.h.bf16 %v11429_v49 }
 0x50e   :  { %v3501_v59 = vmax.f32 %v3217_v17, %v3473_v51  ;;  %v3502_v37 = vmax.f32 %v3218_v45, %v3474_v50  ;;  %3632 = vrot.lane.b32.xlu1 %v11408_v54, %s9325_s28  ;;  %3676 = vrot.lane.b32.xlu0 %v11408_v54, %s9326_s29  ;;  %v3160_v16 = vsel %vm15562_vm12, %v9130_v34, %v9159_v28  ;;  %vm15572_vm12 = vmmov %vm15551_vm2 }
 0x50f   :  { %v11436_v12 = vpop.permute.xlu0 %9162  ;;  %v3161_v60 = vsel %vm15563_vm6, %v9159_v28, %v9160_v30  ;;  %v3219_v34 = vmax.f32 %v11246_v36, %v3160_v16  ;;  %v3147_v45 = vsel %vm15564_vm8, %v9114_v62, %v9144_v0  ;;  %vm15573_vm8 = vmmov %vm15568_vm0 }
 0x510   :  { %v11438_v21 = vpack.c.bf16 %v3501_v59, %v3487_v41  ;;  %v11440_v26 = vpack.c.bf16 %v3502_v37, %v3488_v8  ;;  %v11446_v44 = vpop.permute.xlu1 %9147  ;;  %v9165_v25 = vunpack.i.h.bf16 %v11436_v12  ;;  %v9164_v10 = vunpack.i.l.bf16 %v11436_v12 }
 0x511   :  { %v9150_v38 = vunpack.i.h.bf16 %v11446_v44  ;;  %v9149_v22 = vunpack.i.l.bf16 %v11446_v44  ;;  %v3220_v39 = vmax.f32 %v11262_v27, %v3161_v60  ;;  %v3148_v27 = vsel %vm15566_vm9, %v9144_v0, %v9145_v18  ;;  %vm15575_vm9 = vmmov %vm15563_vm6 }
 0x512   :  { %3720 = vrot.lane.b32.xlu1 %v11408_v54, %s9330_s26  ;;  %3766 = vrot.lane.b32.xlu0 %v11408_v54, %s9331_s27  ;;  %v3303_v43 = vsel %vm15565_vm11, %v9164_v10, %v9165_v25  ;;  %v3302_v61 = vsel %vm15568_vm0, %v9135_v63, %v9164_v10  ;;  %v3206_v63 = vmax.f32 %v11256_v1, %v3148_v27  ;;  %vm15574_vm11 = vmmov %vm15568_vm0 }
 0x513   :  { %v11459_v17 = vpop.permute.xlu0 %9167  ;;  %v3290_v50 = vsel %vm15567_vm14, %v9149_v22, %v9150_v38  ;;  %v3289_v62 = vsel %vm15569_vm1, %v9119_v47, %v9149_v22  ;;  %v3205_v47 = vmax.f32 %v11238_v19, %v3147_v45  ;;  %vm15576_vm14 = vmmov %vm15563_vm6 }
 0x514   :  { %v9170_v15 = vunpack.i.h.bf16 %v11459_v17  ;;  %v9169_v36 = vunpack.i.l.bf16 %v11459_v17  ;;  %v9153_v51 = vpop.permute.xlu1 %9152  ;;  %vm15577_vm0 = vmmov %vm15563_vm6 }
 0x515   :  { %v9155_v28 = vunpack.i.h.bf16 %v9153_v51  ;;  %v9154_v49 = vunpack.i.l.bf16 %v9153_v51 }
 0x516   :  { %v3416_v41 = vsel %vm15570_vm5, %v9140_v42, %v9169_v36  ;;  %v3417_v8 = vsel %vm15551_vm2, %v9169_v36, %v9170_v15  ;;  %3811 = vrot.lane.b32.xlu1 %v11408_v54, %s9332_s6  ;;  %3857 = vrot.lane.b32.xlu0 %v11408_v54, %s9333_s25  ;;  %vm15578_vm5 = vmmov %vm15551_vm2 }
 0x517   :  { %v3475_v59 = vmax.f32 %v3302_v61, %v3416_v41  ;;  %v3476_v37 = vmax.f32 %v3303_v43, %v3417_v8  ;;  %v3403_v32 = vsel %vm15571_vm3, %v9124_v40, %v9154_v49  ;;  %v3404_v13 = vsel %vm15572_vm12, %v9154_v49, %v9155_v28  ;;  %vm15579_vm3 = vmmov %vm15569_vm1 }
 0x518   :  { %v3461_v42 = vmax.f32 %v3289_v62, %v3403_v32  ;;  %v3462_v0 = vmax.f32 %v3290_v50, %v3404_v13  ;;  %vm15580_vm12 = vmmov %vm15551_vm2 }
 0x519   :  { %v3503_v16 = vmax.f32 %v3219_v34, %v3475_v59  ;;  %v3504_v60 = vmax.f32 %v3220_v39, %v3476_v37 }
 0x51a   :  { %v3489_v44 = vmax.f32 %v3205_v47, %v3461_v42  ;;  %v3490_v10 = vmax.f32 %v3206_v63, %v3462_v0  ;;  %3544 = vrot.lane.b32.xlu1 %v11438_v21, %s9321_s2  ;;  %3588 = vrot.lane.b32.xlu0 %v11438_v21, %s9329_s1 }
 0x51c   :  { %v11495_v23 = vpack.c.bf16 %v3503_v16, %v3489_v44  ;;  %v11497_v40 = vpack.c.bf16 %v3504_v60, %v3490_v10 }
 0x51d   :  { %v11499_v22 = vpop.permute.xlu1 %9172 }
 0x51e   :  { %3634 = vrot.lane.b32.xlu1 %v11438_v21, %s9325_s28  ;;  %3678 = vrot.lane.b32.xlu0 %v11438_v21, %s9326_s29  ;;  %v9174_v1 = vunpack.i.l.bf16 %v11499_v22  ;;  %v9175_v43 = vunpack.i.h.bf16 %v11499_v22 }
 0x51f   :  { %v11505_v19 = vpop.permute.xlu0 %9187 }
 0x520   :  { %v9190_v36 = vunpack.i.h.bf16 %v11505_v19  ;;  %v9189_v51 = vunpack.i.l.bf16 %v11505_v19  ;;  %v3149_v49 = vsel %vm15563_vm6, %v9145_v18, %v9174_v1  ;;  %v3150_v18 = vsel %vm15575_vm9, %v9174_v1, %v9175_v43  ;;  %vm15581_vm6 = vmmov %vm15551_vm2 }
 0x521   :  { %v11508_v34 = vpop.permute.xlu1 %9177  ;;  %v3207_v0 = vmax.f32 %v11258_v7, %v3149_v49  ;;  %v3208_v44 = vmax.f32 %v11275_v14, %v3150_v18  ;;  %vm15584_vm9 = vmmov %vm15569_vm1 }
 0x522   :  { %v9180_v39 = vunpack.i.h.bf16 %v11508_v34  ;;  %v9179_v45 = vunpack.i.l.bf16 %v11508_v34  ;;  %3722 = vrot.lane.b32.xlu1 %v11438_v21, %s9330_s26  ;;  %3768 = vrot.lane.b32.xlu0 %v11438_v21, %s9331_s27  ;;  %v3162_v32 = vsel %vm15576_vm14, %v9160_v30, %v9189_v51  ;;  %vm15585_vm14 = vmmov %vm15577_vm0 }
 0x523   :  { %v11519_v27 = vpop.permute.xlu0 %9192  ;;  %v3221_v7 = vmax.f32 %v11265_v2, %v3162_v32 }
 0x524   :  { %v9195_v50 = vunpack.i.h.bf16 %v11519_v27  ;;  %v9194_v61 = vunpack.i.l.bf16 %v11519_v27  ;;  %v3291_v41 = vsel %vm15573_vm8, %v9150_v38, %v9179_v45  ;;  %v3292_v8 = vsel %vm15574_vm11, %v9179_v45, %v9180_v39  ;;  %vm15582_vm8 = vmmov %vm15577_vm0 }
 0x525   :  { %v11524_v62 = vpop.permute.xlu1 %9182  ;;  %v3163_v38 = vsel %vm15577_vm0, %v9189_v51, %v9190_v36  ;;  %vm15583_vm11 = vmmov %vm15577_vm0 }
 0x526   :  { %v9185_v59 = vunpack.i.h.bf16 %v11524_v62  ;;  %v9184_v37 = vunpack.i.l.bf16 %v11524_v62  ;;  %3813 = vrot.lane.b32.xlu1 %v11438_v21, %s9332_s6  ;;  %v3305_v13 = vsel %vm15569_vm1, %v9194_v61, %v9195_v50  ;;  %3546 = vrot.lane.b32.xlu0 %v11440_v26, %s9321_s2  ;;  %v3304_v10 = vsel %vm15579_vm3, %v9165_v25, %v9194_v61  ;;  %vm15587_vm3 = vmmov %vm15551_vm2 }
 0x527   :  { %v11548_v47 = vpop.permute.xlu0 %9197  ;;  %v3222_v45 = vmax.f32 %v11281_v31, %v3163_v38 }
 0x528   :  { %v3405_v63 = vsel %vm15578_vm5, %v9155_v28, %v9184_v37  ;;  %v3406_v33 = vsel %vm15551_vm2, %v9184_v37, %v9185_v59  ;;  %v9200_v30 = vunpack.i.h.bf16 %v11548_v47  ;;  %v9199_v42 = vunpack.i.l.bf16 %v11548_v47  ;;  %vm15586_vm5 = vmmov %vm15569_vm1 }
 0x529   :  { %v3463_v16 = vmax.f32 %v3291_v41, %v3405_v63  ;;  %v3464_v60 = vmax.f32 %v3292_v8, %v3406_v33 }
 0x52a   :  { %v3418_v28 = vsel %vm15580_vm12, %v9170_v15, %v9199_v42  ;;  %v3419_v1 = vsel %vm15581_vm6, %v9199_v42, %v9200_v30  ;;  %3859 = vrot.lane.b32.xlu1 %v11438_v21, %s9333_s25  ;;  %3636 = vrot.lane.b32.xlu0 %v11440_v26, %s9325_s28  ;;  %vm15588_vm12 = vmmov %vm15569_vm1 }
 0x52b   :  { %v3477_v14 = vmax.f32 %v3304_v10, %v3418_v28  ;;  %v3478_v51 = vmax.f32 %v3305_v13, %v3419_v1  ;;  %v3491_v12 = vmax.f32 %v3207_v0, %v3463_v16  ;;  %v3492_v25 = vmax.f32 %v3208_v44, %v3464_v60  ;;  %vm15589_vm6 = vmmov %vm15551_vm2 }
 0x52d   :  { %v3505_v17 = vmax.f32 %v3221_v7, %v3477_v14  ;;  %v3506_v15 = vmax.f32 %v3222_v45, %v3478_v51 }
 0x52e   :  { %3590 = vrot.lane.b32.xlu1 %v11440_v26, %s9329_s1  ;;  %3724 = vrot.lane.b32.xlu0 %v11440_v26, %s9330_s26 }
 0x52f   :  { %v11575_v49 = vpack.c.bf16 %v3505_v17, %v3491_v12  ;;  %v11577_v61 = vpack.c.bf16 %v3506_v15, %v3492_v25 }
 0x532   :  { %3680 = vrot.lane.b32.xlu1 %v11440_v26, %s9326_s29  ;;  %3815 = vrot.lane.b32.xlu0 %v11440_v26, %s9332_s6 }
 0x536   :  { %3770 = vrot.lane.b32.xlu1 %v11440_v26, %s9331_s27  ;;  %3861 = vrot.lane.b32.xlu0 %v11440_v26, %s9333_s25 }
 0x53a   :  { %3592 = vrot.lane.b32.xlu1 %v11495_v23, %s9329_s1  ;;  %3548 = vrot.lane.b32.xlu0 %v11495_v23, %s9321_s2 }
 0x53e   :  { %3638 = vrot.lane.b32.xlu1 %v11495_v23, %s9325_s28  ;;  %3594 = vrot.lane.b32.xlu0 %v11497_v40, %s9329_s1 }
 0x542   :  { %3682 = vrot.lane.b32.xlu1 %v11495_v23, %s9326_s29  ;;  %3640 = vrot.lane.b32.xlu0 %v11497_v40, %s9325_s28 }
 0x544   :  { %v11601_v2 = vpop.permute.xlu1 %9202 }
 0x545   :  { %v9204_v41 = vunpack.i.l.bf16 %v11601_v2  ;;  %v9205_v37 = vunpack.i.h.bf16 %v11601_v2 }
 0x546   :  { %3726 = vrot.lane.b32.xlu1 %v11495_v23, %s9330_s26  ;;  %v11605_v31 = vpop.permute.xlu0 %9232  ;;  %3684 = vrot.lane.b32.xlu0 %v11497_v40, %s9326_s29 }
 0x547   :  { %v9235_v32 = vunpack.i.h.bf16 %v11605_v31  ;;  %v9234_v38 = vunpack.i.l.bf16 %v11605_v31  ;;  %v3151_v42 = vsel %vm15582_vm8, %v9175_v43, %v9204_v41  ;;  %v3152_v60 = vsel %vm15583_vm11, %v9204_v41, %v9205_v37  ;;  %vm15590_vm8 = vmmov %vm15551_vm2 }
 0x548   :  { %v11610_v8 = vpop.permute.xlu1 %9207  ;;  %v3209_v14 = vmax.f32 %v11277_v58, %v3151_v42  ;;  %v3210_v17 = vmax.f32 %v11293_v52, %v3152_v60  ;;  %vm15591_vm11 = vmmov %vm15577_vm0 }
 0x549   :  { %v9210_v18 = vunpack.i.h.bf16 %v11610_v8  ;;  %v9209_v13 = vunpack.i.l.bf16 %v11610_v8  ;;  %v3164_v22 = vsel %vm15585_vm14, %v9190_v36, %v9234_v38  ;;  %v3165_v43 = vsel %vm15577_vm0, %v9234_v38, %v9235_v32  ;;  %vm15593_vm14 = vmmov %vm15569_vm1 }
 0x54a   :  { %3772 = vrot.lane.b32.xlu1 %v11495_v23, %s9331_s27  ;;  %v11619_v63 = vpop.permute.xlu0 %9237  ;;  %3728 = vrot.lane.b32.xlu0 %v11497_v40, %s9330_s26  ;;  %v3223_v2 = vmax.f32 %v11283_v11, %v3164_v22  ;;  %v3224_v58 = vmax.f32 %v11299_v48, %v3165_v43 }
 0x54b   :  { %v9240_v33 = vunpack.i.h.bf16 %v11619_v63  ;;  %v9239_v0 = vunpack.i.l.bf16 %v11619_v63  ;;  %v3294_v44 = vsel %vm15584_vm9, %v9209_v13, %v9210_v18  ;;  %v3293_v1 = vsel %vm15569_vm1, %v9180_v39, %v9209_v13  ;;  %vm15592_vm9 = vmmov %vm15577_vm0 }
 0x54c   :  { %v11628_v16 = vpop.permute.xlu1 %9212  ;;  %vm15594_vm1 = vmmov %vm15577_vm0 }
 0x54d   :  { %v9215_v10 = vunpack.i.h.bf16 %v11628_v16  ;;  %v9214_v28 = vunpack.i.l.bf16 %v11628_v16  ;;  %v3307_v7 = vsel %vm15586_vm5, %v9239_v0, %v9240_v33  ;;  %v3306_v62 = vsel %vm15588_vm12, %v9195_v50, %v9239_v0  ;;  %vm15596_vm12 = vmmov %vm15587_vm3 }
 0x54e   :  { %3817 = vrot.lane.b32.xlu1 %v11495_v23, %s9332_s6  ;;  %v11650_v45 = vpop.permute.xlu0 %9242  ;;  %3774 = vrot.lane.b32.xlu0 %v11497_v40, %s9331_s27 }
 0x54f   :  { %v3407_v19 = vsel %vm15551_vm2, %v9185_v59, %v9214_v28  ;;  %v3408_v36 = vsel %vm15587_vm3, %v9214_v28, %v9215_v10  ;;  %v9245_v34 = vunpack.i.h.bf16 %v11650_v45  ;;  %v9244_v39 = vunpack.i.l.bf16 %v11650_v45  ;;  %vm15595_vm2 = vmmov %vm15586_vm5 }
 0x550   :  { %v3465_v51 = vmax.f32 %v3293_v1, %v3407_v19  ;;  %v3466_v12 = vmax.f32 %v3294_v44, %v3408_v36  ;;  %v11661_v25 = vpop.permute.xlu1 %9217 }
 0x551   :  { %v3420_v59 = vsel %vm15589_vm6, %v9200_v30, %v9244_v39  ;;  %v3421_v15 = vsel %vm15590_vm8, %v9244_v39, %v9245_v34  ;;  %v9219_v27 = vunpack.i.l.bf16 %v11661_v25  ;;  %v9220_v11 = vunpack.i.h.bf16 %v11661_v25  ;;  %vm15597_vm6 = vmmov %vm15595_vm2 }
 0x552   :  { %v3479_v41 = vmax.f32 %v3306_v62, %v3420_v59  ;;  %v3480_v38 = vmax.f32 %v3307_v7, %v3421_v15  ;;  %3863 = vrot.lane.b32.xlu1 %v11495_v23, %s9333_s25  ;;  %v11675_v52 = vpop.permute.xlu0 %9247  ;;  %3819 = vrot.lane.b32.xlu0 %v11497_v40, %s9332_s6  ;;  %v3493_v50 = vmax.f32 %v3209_v14, %v3465_v51  ;;  %vm15598_vm8 = vmmov %vm15587_vm3 }
 0x553   :  { %v3494_v47 = vmax.f32 %v3210_v17, %v3466_v12  ;;  %v9250_v48 = vunpack.i.h.bf16 %v11675_v52  ;;  %v9249_v44 = vunpack.i.l.bf16 %v11675_v52  ;;  %v3153_v1 = vsel %vm15591_vm11, %v9205_v37, %v9219_v27  ;;  %vm15599_vm11 = vmmov %vm15587_vm3 }
 0x554   :  { %v3507_v30 = vmax.f32 %v3223_v2, %v3479_v41  ;;  %v3508_v13 = vmax.f32 %v3224_v58, %v3480_v38  ;;  %v11680_v42 = vpop.permute.xlu1 %9222  ;;  %v3154_v19 = vsel %vm15592_vm9, %v9219_v27, %v9220_v11  ;;  %v3211_v59 = vmax.f32 %v11295_v24, %v3153_v1  ;;  %vm15601_vm9 = vmmov %vm15577_vm0 }
 0x555   :  { %v9225_v0 = vunpack.i.h.bf16 %v11680_v42  ;;  %v9224_v28 = vunpack.i.l.bf16 %v11680_v42  ;;  %v3166_v37 = vsel %vm15577_vm0, %v9235_v32, %v9249_v44  ;;  %v3167_v51 = vsel %vm15594_vm1, %v9249_v44, %v9250_v48  ;;  %vm15604_vm1 = vmmov %vm15577_vm0 }
 0x556   :  { %v11685_v16 = vpack.c.bf16 %v3507_v30, %v3493_v50  ;;  %v11687_v60 = vpack.c.bf16 %v3508_v13, %v3494_v47  ;;  %3550 = vrot.lane.b32.xlu1 %v11497_v40, %s9321_s2  ;;  %v11693_v22 = vpop.permute.xlu0 %9252  ;;  %3865 = vrot.lane.b32.xlu0 %v11497_v40, %s9333_s25  ;;  %v3212_v58 = vmax.f32 %v11306_v35, %v3154_v19  ;;  %v15600_v19 = vunpack.i.l.bf16 %v11329_v5 }
 0x557   :  { %v9255_v43 = vunpack.i.h.bf16 %v11693_v22  ;;  %v9254_v7 = vunpack.i.l.bf16 %v11693_v22  ;;  %v3296_v36 = vsel %vm15593_vm14, %v9224_v28, %v9225_v0  ;;  %v3295_v12 = vsel %vm15586_vm5, %v9210_v18, %v9224_v28  ;;  %vm15602_vm14 = vmmov %vm15577_vm0 }
 0x558   :  { %v11700_v45 = vpop.permute.xlu1 %9227  ;;  %v3225_v27 = vmax.f32 %v11301_v46, %v3166_v37  ;;  %v3226_v50 = vmax.f32 %v11313_v29, %v3167_v51  ;;  %vm15605_vm5 = vmmov %vm15577_vm0 }
 0x559   :  { %v9230_v39 = vunpack.i.h.bf16 %v11700_v45  ;;  %v9229_v14 = vunpack.i.l.bf16 %v11700_v45  ;;  %v3309_v17 = vsel %vm15595_vm2, %v9254_v7, %v9255_v43  ;;  %vm15606_vm2 = vmmov %vm15577_vm0 }
 0x55a   :  { %3552 = vrot.lane.b32.xlu1 %v11575_v49, %s9321_s2  ;;  %v11724_v62 = vpop.permute.xlu0 %9257  ;;  %3554 = vrot.lane.b32.xlu0 %v11577_v61, %s9321_s2 }
 0x55b   :  { %v3409_v31 = vsel %vm15587_vm3, %v9215_v10, %v9229_v14  ;;  %v3410_v32 = vsel %vm15596_vm12, %v9229_v14, %v9230_v39  ;;  %v9260_v8 = vunpack.i.h.bf16 %v11724_v62  ;;  %v9259_v18 = vunpack.i.l.bf16 %v11724_v62  ;;  %vm15608_vm12 = vmmov %vm15587_vm3 }
 0x55c   :  { %v3467_v15 = vmax.f32 %v3295_v12, %v3409_v31  ;;  %v3468_v2 = vmax.f32 %v3296_v36, %v3410_v32  ;;  %v3308_v10 = vsel %vm15597_vm6, %v9240_v33, %v9254_v7  ;;  %v15603_v12 = vunpack.i.h.bf16 %v11329_v5  ;;  %vm15609_vm6 = vmmov %vm15587_vm3 }
 0x55d   :  { %v3422_v41 = vsel %vm15598_vm8, %v9245_v34, %v9259_v18  ;;  %v3423_v38 = vsel %vm15599_vm11, %v9259_v18, %v9260_v8  ;;  %vm15611_vm8 = vcmask 818176  }
 0x55e   :  { %v3481_v47 = vmax.f32 %v3308_v10, %v3422_v41  ;;  %v3482_v24 = vmax.f32 %v3309_v17, %v3423_v38  ;;  %3596 = vrot.lane.b32.xlu1 %v11575_v49, %s9329_s1  ;;  %3598 = vrot.lane.b32.xlu0 %v11577_v61, %s9329_s1  ;;  %v3495_v35 = vmax.f32 %v3211_v59, %v3467_v15  ;;  %vm15612_vm11 = vmmov %vm15611_vm8 }
 0x55f   :  { %v3496_v63 = vmax.f32 %v3212_v58, %v3468_v2 }
 0x560   :  { %v3509_v33 = vmax.f32 %v3225_v27, %v3481_v47  ;;  %v3510_v34 = vmax.f32 %v3226_v50, %v3482_v24  ;;  %v15607_v27 = vunpack.i.l.bf16 %v11337_v4  ;;  %v15610_v47 = vunpack.i.l.bf16 %v11333_v20 }
 0x562   :  { %v11749_v30 = vpack.c.bf16 %v3509_v33, %v3495_v35  ;;  %v11751_v13 = vpack.c.bf16 %v3510_v34, %v3496_v63  ;;  %3642 = vrot.lane.b32.xlu1 %v11575_v49, %s9325_s28  ;;  %3644 = vrot.lane.b32.xlu0 %v11577_v61, %s9325_s28  ;;  %v15614_v34 = vunpack.i.h.bf16 %v11337_v4 }
 0x566   :  { %3686 = vrot.lane.b32.xlu1 %v11575_v49, %s9326_s29  ;;  %3688 = vrot.lane.b32.xlu0 %v11577_v61, %s9326_s29 }
 0x568   :  { %v9263_v46 = vpop.permute.xlu1 %9262 }
 0x569   :  { %v9265_v29 = vunpack.i.h.bf16 %v9263_v46  ;;  %v9264_v44 = vunpack.i.l.bf16 %v9263_v46 }
 0x56a   :  { %3730 = vrot.lane.b32.xlu1 %v11575_v49, %s9330_s26  ;;  %v9278_v28 = vpop.permute.xlu0 %9277  ;;  %3732 = vrot.lane.b32.xlu0 %v11577_v61, %s9330_s26 }
 0x56b   :  { %v9280_v1 = vunpack.i.h.bf16 %v9278_v28  ;;  %v3200_v36 = vsel %vm15601_vm9, %v9265_v29, %v15600_v19  ;;  %v9279_v14 = vunpack.i.l.bf16 %v9278_v28  ;;  %v3155_v37 = vsel %vm15602_vm14, %v9220_v11, %v9264_v44  ;;  %vm15613_vm9 = vmmov %vm15611_vm8 }
 0x56c   :  { %v9268_v7 = vpop.permute.xlu1 %9267  ;;  %v3215_v31 = vmax.f32 %v11335_v55, %v3200_v36  ;;  %v3156_v32 = vsel %vm15604_vm1, %v9264_v44, %v9265_v29  ;;  %v3213_v11 = vmax.f32 %v11308_v57, %v3155_v37  ;;  %vm15615_vm14 = vmmov %vm15587_vm3  ;;  %v15616_v29 = vunpack.i.h.bf16 %v11333_v20 }
 0x56d   :  { %v3201_v17 = vsel %vm15577_vm0, %v9280_v1, %v15603_v12  ;;  %v9270_v18 = vunpack.i.h.bf16 %v9268_v7  ;;  %v9269_v59 = vunpack.i.l.bf16 %v9268_v7  ;;  %v3168_v15 = vsel %vm15605_vm5, %v9250_v48, %v9279_v14  ;;  %vm15617_vm0 = vmmov %vm15611_vm8 }
 0x56e   :  { %3776 = vrot.lane.b32.xlu1 %v11575_v49, %s9331_s27  ;;  %v9283_v51 = vpop.permute.xlu0 %9282  ;;  %3778 = vrot.lane.b32.xlu0 %v11577_v61, %s9331_s27  ;;  %v3229_v58 = vmax.f32 %v11343_v53, %v3201_v17  ;;  %v3169_v10 = vsel %vm15606_vm2, %v9279_v14, %v9280_v1  ;;  %v3227_v50 = vmax.f32 %v11315_v9, %v3168_v15  ;;  %vm15618_vm1 = vmmov %vm15617_vm0 }
 0x56f   :  { %v9285_v41 = vunpack.i.h.bf16 %v9283_v51  ;;  %v9284_v38 = vunpack.i.l.bf16 %v9283_v51  ;;  %v3342_v24 = vsel %vm15611_vm8, %v9270_v18, %v15610_v47  ;;  %v3297_v35 = vsel %vm15612_vm11, %v9225_v0, %v9269_v59  ;;  %vm15619_vm5 = vmmov %vm15587_vm3 }
 0x570   :  { %v9273_v25 = vpop.permute.xlu1 %9272  ;;  %v3298_v45 = vsel %vm15613_vm9, %v9269_v59, %v9270_v18  ;;  %vm15620_vm2 = vmmov %vm15617_vm0  ;;  %v3214_v22 = vmax.f32 %v11331_v6, %v3156_v32  ;;  %vm3614_vm8 = vcmask 1014784   ;;  %vm15623_vm11 = vcmask 1044480  }
 0x571   :  { %v9275_v2 = vunpack.i.h.bf16 %v9273_v25  ;;  %v9274_v5 = vunpack.i.l.bf16 %v9273_v25  ;;  %v3343_v9 = vsel %vm15617_vm0, %v9285_v41, %v15616_v29  ;;  %v3310_v44 = vsel %vm15618_vm1, %v9255_v43, %v9284_v38  ;;  %vm15624_vm9 = vmmov %vm15623_vm11 }
 0x572   :  { %3821 = vrot.lane.b32.xlu1 %v11575_v49, %s9332_s6  ;;  %v9288_v55 = vpop.permute.xlu0 %9287  ;;  %3823 = vrot.lane.b32.xlu0 %v11577_v61, %s9332_s6  ;;  %v3311_v4 = vsel %vm15620_vm2, %v9284_v38, %v9285_v41  ;;  %v3228_v43 = vmax.f32 %v11341_v56, %v3169_v10  ;;  %vm4092_vm0 = vcmask 1046528   ;;  %vm15396_vm1 = vcmask 113664  }
 0x573   :  { %v3456_v57 = vsel %vm15587_vm3, %v9275_v2, %v15607_v27  ;;  %v3411_v52 = vsel %vm15608_vm12, %v9230_v39, %v9274_v5  ;;  %v3412_v48 = vsel %vm15609_vm6, %v9274_v5, %v9275_v2  ;;  %v9290_v53 = vunpack.i.h.bf16 %v9288_v55 }
 0x574   :  { %v9289_v63 = vunpack.i.l.bf16 %v9288_v55  ;;  %v3469_v39 = vmax.f32 %v3297_v35, %v3411_v52  ;;  %v3471_v33 = vmax.f32 %v3342_v24, %v3456_v57  ;;  %v3470_v42 = vmax.f32 %v3298_v45, %v3412_v48 }
 0x575   :  { %v3457_v46 = vsel %vm15615_vm14, %v9290_v53, %v15614_v34  ;;  %vm15621_vm12 = vcmask 1031168   ;;  %vm3748_vm14 = vcmask 556032  }
 0x576   :  { %v3424_v0 = vsel %vm15619_vm5, %v9260_v8, %v9289_v63  ;;  %3867 = vrot.lane.b32.xlu1 %v11575_v49, %s9333_s25  ;;  %v3425_v28 = vsel %vm15587_vm3, %v9289_v63, %v9290_v53  ;;  %v3485_v20 = vmax.f32 %v3343_v9, %v3457_v46  ;;  %3869 = vrot.lane.b32.xlu0 %v11577_v61, %s9333_s25  ;;  %vm15622_vm6 = vmmov %vm15621_vm12  ;;  %vm15625_vm5 = vcmask 1043456  }
 0x577   :  { %v3483_v1 = vmax.f32 %v3310_v44, %v3424_v0  ;;  %v3484_v7 = vmax.f32 %v3311_v4, %v3425_v28  ;;  %v3497_v62 = vmax.f32 %v3213_v11, %v3469_v39  ;;  %v3499_v19 = vmax.f32 %v3215_v31, %v3471_v33  ;;  %vm15626_vm2 = vmmov %vm15625_vm5 }
 0x578   :  { %v3513_v36 = vmax.f32 %v3229_v58, %v3485_v20  ;;  %v3498_v14 = vmax.f32 %v3214_v22, %v3470_v42  ;;  %vm4205_vm3 = vcmask 1045504  }
 0x579   :  { %v3511_v8 = vmax.f32 %v3227_v50, %v3483_v1  ;;  %v3512_v37 = vmax.f32 %v3228_v43, %v3484_v7 }
 0x57a   :  { %3556 = vrot.lane.b32.xlu1 %v11685_v16, %s9321_s2  ;;  %v11829_v12 = vpack.c.bf16 %v3513_v36, %v3499_v19  ;;  %3558 = vrot.lane.b32.xlu0 %v11687_v60, %s9321_s2 }
 0x57b   :  { %v11827_v51 = vpack.c.bf16 %v3511_v8, %v3497_v62  ;;  %v11833_v6 = vpack.c.bf16 %v3512_v37, %v3498_v14 }
 0x57c   :  { %v11835_v56 = vpop.permute.xlu1 %3542  ;;  %v11837_v17 = vpop.permute.xlu0 %3586 }
 0x57e   :  { %3600 = vrot.lane.b32.xlu1 %v11685_v16, %s9329_s1  ;;  %3602 = vrot.lane.b32.xlu0 %v11687_v60, %s9329_s1 }
 0x580   :  { %v11843_v31 = vpop.permute.xlu1 %3632  ;;  %v11845_v32 = vpop.permute.xlu0 %3676 }
 0x582   :  { %3646 = vrot.lane.b32.xlu1 %v11685_v16, %s9325_s28  ;;  %3648 = vrot.lane.b32.xlu0 %v11687_v60, %s9325_s28 }
 0x584   :  { %v11851_v18 = vpop.permute.xlu1 %3720  ;;  %v11853_v59 = vpop.permute.xlu0 %3766 }
 0x586   :  { %3690 = vrot.lane.b32.xlu1 %v11685_v16, %s9326_s29  ;;  %3692 = vrot.lane.b32.xlu0 %v11687_v60, %s9326_s29 }
 0x588   :  { %v11859_v25 = vpop.permute.xlu1 %3811  ;;  %v11861_v11 = vpop.permute.xlu0 %3857 }
 0x58a   :  { %3734 = vrot.lane.b32.xlu1 %v11685_v16, %s9330_s26  ;;  %3736 = vrot.lane.b32.xlu0 %v11687_v60, %s9330_s26 }
 0x58c   :  { %v3545_v15 = vpop.permute.xlu1 %3544  ;;  %v3589_v2 = vpop.permute.xlu0 %3588 }
 0x58d   :  { %v3570_v38 = vsel %vm15621_vm12, %v11835_v56, %v3545_v15  ;;  %v3615_v24 = vsel %vm3614_vm8, %v11837_v17, %v3589_v2  ;;  %vm15627_vm12 = vcmask 1042432  }
 0x58e   :  { %3780 = vrot.lane.b32.xlu1 %v11685_v16, %s9331_s27  ;;  %3782 = vrot.lane.b32.xlu0 %v11687_v60, %s9331_s27  ;;  %v3904_v57 = vrot.slane %v3570_v38, 3  ;;  %v3919_v39 = vrot.slane %v3615_v24, 6 }
 0x590   :  { %v3635_v5 = vpop.permute.xlu1 %3634  ;;  %v3679_v58 = vpop.permute.xlu0 %3678  ;;  %v4010_v35 = vsel %vm15624_vm9, %v11408_v54, %v3904_v57  ;;  %v4065_v20 = vsel %vm953_vm7, %v3904_v57, %v3919_v39 }
 0x591   :  { %v3660_v63 = vsel %vm433_vm10, %v11843_v31, %v3635_v5  ;;  %v3704_v29 = vsel %vm525_vm13, %v11845_v32, %v3679_v58 }
 0x592   :  { %3825 = vrot.lane.b32.xlu1 %v11685_v16, %s9332_s6  ;;  %3827 = vrot.lane.b32.xlu0 %v11687_v60, %s9332_s6  ;;  %v3934_v54 = vrot.slane %v3660_v63, 1  ;;  %v3949_v22 = vrot.slane %v3704_v29, 4 }
 0x594   :  { %v3723_v10 = vpop.permute.xlu1 %3722  ;;  %v3769_v41 = vpop.permute.xlu0 %3768  ;;  %v4094_v62 = vsel %vm4092_vm0, %v4065_v20, %v3934_v54  ;;  %v4136_v38 = vsel %vm15626_vm2, %v3934_v54, %v3949_v22  ;;  %vm4297_vm2 = vcmask 736256   ;;  %v15630_v20 = vmov 0  }
 0x595   :  { %v3749_v44 = vsel %vm3748_vm14, %v11851_v18, %v3723_v10  ;;  %v3795_v8 = vsel %vm2126_vm15, %v11853_v59, %v3769_v41 }
 0x596   :  { %3871 = vrot.lane.b32.xlu1 %v11685_v16, %s9333_s25  ;;  %3873 = vrot.lane.b32.xlu0 %v11687_v60, %s9333_s25  ;;  %v3964_v19 = vrot.slane %v3749_v44, 7 }
 0x598   :  { %v3814_v55 = vpop.permute.xlu1 %3813  ;;  %v11881_v27 = vpop.permute.xlu0 %3546 }
 0x599   :  { %v3571_v52 = vsel %vm15622_vm6, %v3545_v15, %v11881_v27  ;;  %v3840_v57 = vsel %vm15396_vm1, %v11859_v25, %v3814_v55  ;;  %vm15395_vm6 = vcmask 97280  }
 0x59a   :  { %3560 = vrot.lane.b32.xlu1 %v11749_v30, %s9321_s2  ;;  %v3905_v48 = vrot.slane %v3571_v52, 3  ;;  %3562 = vrot.lane.b32.xlu0 %v11751_v13, %s9321_s2  ;;  %v4178_v52 = vsel %vm879_vm4, %v3949_v22, %v3964_v19  ;;  %v3994_v63 = vrot.slane %v3840_v57, 5 }
 0x59c   :  { %v11889_v53 = vpop.permute.xlu1 %3859  ;;  %v11891_v50 = vpop.permute.xlu0 %3636  ;;  %v4014_v47 = vsel %vm15623_vm11, %v11438_v21, %v3905_v48  ;;  %vm15628_vm11 = vmmov %vm15627_vm12 }
 0x59d   :  { %4342 = vmatprep.subr.bf16.mxu0 %v4014_v47  ;;  %v3661_v21 = vsel %vm433_vm10, %v3635_v5, %v11891_v50  ;;  %v3979_v5 = vrot.slane %v3795_v8, 2 }
 0x59e   :  { %3604 = vrot.lane.b32.xlu1 %v11749_v30, %s9329_s1  ;;  %3606 = vrot.lane.b32.xlu0 %v11751_v13, %s9329_s1  ;;  %v3935_v9 = vrot.slane %v3661_v21, 1 }
 0x59f   :  { %4343 = vmatpush1.bf16.msra.mxu0 %v4010_v35  ;;  %v4249_v54 = vsel %vm15628_vm11, %v3979_v5, %v3994_v63 }
 0x5a0   :  { %v11907_v45 = vpop.permute.xlu1 %3590  ;;  %v11911_v34 = vpop.permute.xlu0 %3724 }
 0x5a1   :  { %v3616_v33 = vsel %vm3614_vm8, %v3589_v2, %v11907_v45  ;;  %v3750_v43 = vsel %vm3748_vm14, %v3723_v10, %v11911_v34 }
 0x5a2   :  { %v3920_v46 = vrot.slane %v3616_v33, 6  ;;  %3650 = vrot.lane.b32.xlu1 %v11749_v30, %s9325_s28  ;;  %3652 = vrot.lane.b32.xlu0 %v11751_v13, %s9325_s28  ;;  %v3965_v37 = vrot.slane %v3750_v43, 7 }
 0x5a4   :  { %v11921_v42 = vpop.permute.xlu1 %3680  ;;  %v4067_v0 = vsel %vm953_vm7, %v3905_v48, %v3920_v46  ;;  %v11926_v28 = vpop.permute.xlu0 %3815  ;;  %v3886_v46 = vsel %vm15395_vm6, %v11861_v11, %v11889_v53 }
 0x5a5   :  { %v3705_v4 = vsel %vm525_vm13, %v3679_v58, %v11921_v42  ;;  %v4097_v1 = vsel %vm4092_vm0, %v4067_v0, %v3935_v9  ;;  %v3841_v58 = vsel %vm15396_vm1, %v3814_v55, %v11926_v28  ;;  %v4207_v55 = vsel %vm4205_vm3, %v4178_v52, %v3979_v5 }
 0x5a6   :  { %v3950_v7 = vrot.slane %v3705_v4, 4  ;;  %3694 = vrot.lane.b32.xlu1 %v11749_v30, %s9326_s29  ;;  %4344 = vmatprep.subr.bf16.mxu0 %v4097_v1  ;;  %v3995_v24 = vrot.slane %v3841_v58, 5  ;;  %v11986_v4 = vld [vmem:[%s15356_s8] sm:$0xff]  }
 0x5a7   :  { %3696 = vrot.lane.b32.xlu0 %v11751_v13, %s9326_s29  ;;  %4345 = vmatpush1.bf16.msra.mxu0 %v4094_v62 }
 0x5a8   :  { %v11939_v36 = vpop.permute.xlu1 %3770  ;;  %v4139_v14 = vsel %vm15625_vm5, %v3935_v9, %v3950_v7  ;;  %v11944_v2 = vpop.permute.xlu0 %3861  ;;  %vm15629_vm5 = vmmov %vm15624_vm9 }
 0x5a9   :  { %v3796_v15 = vsel %vm2126_vm15, %v3769_v41, %v11939_v36  ;;  %4346 = vmatprep.subr.bf16.mxu0 %v4139_v14  ;;  %v4180_v41 = vsel %vm879_vm4, %v3950_v7, %v3965_v37  ;;  %v3887_v29 = vsel %vm15395_vm6, %v11889_v53, %v11944_v2  ;;  %v4302_v0 = vsel %vm15629_vm5, %v3886_v46, 0 }
 0x5aa   :  { %v3980_v10 = vrot.slane %v3796_v15, 2  ;;  %3738 = vrot.lane.b32.xlu1 %v11749_v30, %s9330_s26 }
 0x5ab   :  { %3740 = vrot.lane.b32.xlu0 %v11751_v13, %s9330_s26  ;;  %4347 = vmatpush1.bf16.msra.mxu0 %v4136_v38 }
 0x5ac   :  { %v3593_v48 = vpop.permute.xlu1 %3592  ;;  %v4210_v47 = vsel %vm4205_vm3, %v4180_v41, %v3980_v10  ;;  %v3549_v35 = vpop.permute.xlu0 %3548  ;;  %v4252_v21 = vsel %vm15627_vm12, %v3980_v10, %v3995_v24  ;;  %vm15631_vm12 = vcmask 1031168  }
 0x5ad   :  { %4348 = vmatprep.subr.bf16.mxu0 %v4210_v47  ;;  %v3572_v14 = vsel %vm15631_vm12, %v11881_v27, %v3549_v35  ;;  %v3617_v15 = vsel %vm3614_vm8, %v11907_v45, %v3593_v48  ;;  %vm15632_vm11 = vmmov %vm15631_vm12 }
 0x5ae   :  { %3784 = vrot.lane.b32.xlu1 %v11749_v30, %s9331_s27  ;;  %v3906_v10 = vrot.slane %v3572_v14, 3  ;;  %v3921_v47 = vrot.slane %v3617_v15, 6 }
 0x5af   :  { %3786 = vrot.lane.b32.xlu0 %v11751_v13, %s9331_s27  ;;  %4349 = vmatpush1.bf16.msra.mxu0 %v4207_v55 }
 0x5b0   :  { %v3639_v39 = vpop.permute.xlu1 %3638  ;;  %4350 = vmatprep.subr.bf16.mxu0 %v4252_v21  ;;  %v11964_v33 = vpop.permute.xlu0 %3594 }
 0x5b1   :  { %v3618_v37 = vsel %vm3614_vm8, %v3593_v48, %v11964_v33  ;;  %v3662_v27 = vsel %vm433_vm10, %v11891_v50, %v3639_v39 }
 0x5b2   :  { %3829 = vrot.lane.b32.xlu1 %v11749_v30, %s9332_s6  ;;  %v3922_v41 = vrot.slane %v3618_v37, 6  ;;  %v3936_v45 = vrot.slane %v3662_v27, 1 }
 0x5b3   :  { %3831 = vrot.lane.b32.xlu0 %v11751_v13, %s9332_s6  ;;  %4351 = vmatpush1.bf16.msra.mxu0 %v4249_v54 }
 0x5b4   :  { %v3683_v9 = vpop.permute.xlu1 %3682  ;;  %8510 = vmatprep.subr.msk.bf16.mxu0 %vm15624_vm9, %v3887_v29  ;;  %v11978_v44 = vpop.permute.xlu0 %3640  ;;  %vm15633_vm9 = vmmov %vm15629_vm5 }
 0x5b5   :  { %v3663_v5 = vsel %vm433_vm10, %v3639_v39, %v11978_v44  ;;  %v3706_v55 = vsel %vm525_vm13, %v11921_v42, %v3683_v9  ;;  %vm15634_vm5 = vmmov %vm15632_vm11 }
 0x5b6   :  { %3875 = vrot.lane.b32.xlu1 %v11749_v30, %s9333_s25  ;;  %v3937_v24 = vrot.slane %v3663_v5, 1  ;;  %vm15635_vm12 = vmmov %vm15633_vm9  ;;  %v3951_v37 = vrot.slane %v3706_v55, 4 }
 0x5b7   :  { %3877 = vrot.lane.b32.xlu0 %v11751_v13, %s9333_s25  ;;  %4353 = vmatpush1.bf16.msra.mxu0 %v4302_v0  ;;  %v4018_v54 = vsel %vm15635_vm12, %v11440_v26, %v3906_v10  ;;  %v4069_v26 = vsel %vm953_vm7, %v3906_v10, %v3921_v47  ;;  %vm15638_vm12 = vcmask 1043456  }
 0x5b8   :  { %v3727_v53 = vpop.permute.xlu1 %3726  ;;  %v11990_v1 = vpop.permute.xlu0 %3684  ;;  %v4100_v5 = vsel %vm4092_vm0, %v4069_v26, %v3936_v45 }
 0x5b9   :  { %v3707_v48 = vsel %vm525_vm13, %v3683_v9, %v11990_v1  ;;  %v3751_v27 = vsel %vm3748_vm14, %v11911_v34, %v3727_v53 }
 0x5ba   :  { %8511 = vmatmul.mubr.msk.bf16.vlgmr.msra.gmra.mrb[56].mxu0 %vm4297_vm2, %v11986_v4  ;;  %3564 = vrot.lane.b32.xlu1 %v11827_v51, %s9321_s2  ;;  %v3952_v42 = vrot.slane %v3707_v48, 4 }
 0x5bb   :  { %3608 = vrot.lane.b32.xlu0 %v11827_v51, %s9329_s1  ;;  %4460 = vmatprep.mubr.bf16.mxu0 %v15630_v20 }
 0x5bc   :  { %v3773_v22 = vpop.permute.xlu1 %3772  ;;  %v11999_v43 = vpop.permute.xlu0 %3728 }
 0x5bd   :  { %v3752_v29 = vsel %vm3748_vm14, %v3727_v53, %v11999_v43  ;;  %v3797_v10 = vsel %vm2126_vm15, %v11939_v36, %v3773_v22  ;;  %v3966_v53 = vrot.slane %v3751_v27, 7 }
 0x5be   :  { %3654 = vrot.lane.b32.xlu1 %v11827_v51, %s9325_s28 }
 0x5bf   :  { %3698 = vrot.lane.b32.xlu0 %v11827_v51, %s9326_s29 }
 0x5c0   :  { %v12005_v7 = vpop.permute.xlu1 %3817  ;;  %v12007_v62 = vpop.permute.xlu0 %3774 }
 0x5c1   :  { %v12059_v9 = vsel %vm2126_vm15, %v3773_v22, %v12007_v62 }
 0x5c2   :  { %3742 = vrot.lane.b32.xlu1 %v11827_v51, %s9330_s26  ;;  %v3982_v47 = vrot.slane %v12059_v9, 2 }
 0x5c3   :  { %3788 = vrot.lane.b32.xlu0 %v11827_v51, %s9331_s27 }
 0x5c4   :  { %v12013_v19 = vpop.permute.xlu1 %3863  ;;  %v12015_v8 = vpop.permute.xlu0 %3819 }
 0x5c6   :  { %3568 = vrot.lane.b32.xlu1 %v11829_v12, %s9321_s2 }
 0x5c7   :  { %3566 = vrot.lane.b32.xlu0 %v11833_v6, %s9321_s2 }
 0x5c8   :  { %v3551_v58 = vpop.permute.xlu1 %3550  ;;  %v12032_v57 = vpop.permute.xlu0 %3865 }
 0x5c9   :  { %v3573_v38 = vsel %vm15632_vm11, %v3549_v35, %v3551_v58  ;;  %vm15636_vm11 = vmmov %vm15634_vm5 }
 0x5ca   :  { %v3907_v52 = vrot.slane %v3573_v38, 3  ;;  %3610 = vrot.lane.b32.xlu1 %v11833_v6, %s9329_s1  ;;  %v3967_v38 = vrot.slane %v3752_v29, 7 }
 0x5cb   :  { %3612 = vrot.lane.b32.xlu0 %v11829_v12, %s9329_s1 }
 0x5cc   :  { %v3553_v63 = vpop.permute.xlu1 %3552  ;;  %v4022_v50 = vsel %vm15633_vm9, %v11495_v23, %v3907_v52  ;;  %v4071_v35 = vsel %vm953_vm7, %v3907_v52, %v3922_v41  ;;  %v12046_v39 = vpop.permute.xlu0 %3554 }
 0x5cd   :  { %v3574_v21 = vsel %vm15634_vm5, %v3551_v58, %v3553_v63  ;;  %4385 = vmatprep.subr.bf16.mxu1 %v4022_v50  ;;  %v4103_v46 = vsel %vm4092_vm0, %v4071_v35, %v3937_v24  ;;  %v3575_v23 = vsel %vm15636_vm11, %v3553_v63, %v12046_v39  ;;  %vm15637_vm5 = vmmov %vm15633_vm9  ;;  %v3981_v63 = vrot.slane %v3797_v10, 2 }
 0x5ce   :  { %v3908_v0 = vrot.slane %v3574_v21, 3  ;;  %4386 = vmatpush1.bf16.msra.mxu1 %v4018_v54  ;;  %3658 = vrot.lane.b32.xlu1 %v11829_v12, %s9325_s28  ;;  %v3909_v14 = vrot.slane %v3575_v23, 3  ;;  %vm15639_vm11 = vmmov %vm15638_vm12  ;;  %v3842_v21 = vsel %vm15396_vm1, %v11926_v28, %v12005_v7 }
 0x5cf   :  { %3656 = vrot.lane.b32.xlu0 %v11833_v6, %s9325_s28  ;;  %4387 = vmatprep.subr.bf16.mxu1 %v4103_v46  ;;  %v4142_v55 = vsel %vm15639_vm11, %v3936_v45, %v3951_v37  ;;  %v3996_v26 = vrot.slane %v3842_v21, 5 }
 0x5d0   :  { %v3597_v15 = vpop.permute.xlu1 %3596  ;;  %v4026_v58 = vsel %vm15633_vm9, %v11497_v40, %v3908_v0  ;;  %v12071_v52 = vpop.permute.xlu0 %3598  ;;  %v4030_v48 = vsel %vm15637_vm5, %v11575_v49, %v3909_v14  ;;  %v3843_v49 = vsel %vm15396_vm1, %v12005_v7, %v12015_v8  ;;  %v4182_v7 = vsel %vm879_vm4, %v3951_v37, %v3966_v53  ;;  %vm15641_vm5 = vmmov %vm15639_vm11 }
 0x5d1   :  { %v3619_v41 = vsel %vm3614_vm8, %v11964_v33, %v3597_v15  ;;  %v3620_v40 = vsel %vm3614_vm8, %v3597_v15, %v12071_v52  ;;  %4428 = vmatprep.subr.bf16.mxu0 %v4030_v48  ;;  %v4145_v33 = vsel %vm15638_vm12, %v3937_v24, %v3952_v42  ;;  %v4184_v24 = vsel %vm879_vm4, %v3952_v42, %v3967_v38  ;;  %vm15642_vm12 = vmmov %vm15641_vm5 }
 0x5d2   :  { %4388 = vmatpush1.bf16.msra.mxu1 %v4100_v5  ;;  %v3923_v34 = vrot.slane %v3619_v41, 6  ;;  %4429 = vmatpush1.bf16.msra.mxu0 %v4026_v58  ;;  %v3924_v36 = vrot.slane %v3620_v40, 6  ;;  %v4216_v29 = vsel %vm4205_vm3, %v4184_v24, %v3982_v47  ;;  %v3997_v23 = vrot.slane %v3843_v49, 5 }
 0x5d3   :  { %3702 = vrot.lane.b32.xlu0 %v11829_v12, %s9326_s29  ;;  %3700 = vrot.lane.b32.xlu1 %v11833_v6, %s9326_s29  ;;  %vm15640_vm9 = vcmask 1042432  }
 0x5d4   :  { %4389 = vmatprep.subr.bf16.mxu1 %v4145_v33  ;;  %v3643_v22 = vpop.permute.xlu1 %3642  ;;  %v12090_v35 = vpop.permute.xlu0 %3644  ;;  %v4075_v28 = vsel %vm953_vm7, %v3909_v14, %v3924_v36  ;;  %v4258_v37 = vsel %vm15640_vm9, %v3982_v47, %v3997_v23  ;;  %vm15643_vm11 = vmmov %vm15640_vm9  ;;  %v3888_v47 = vsel %vm15395_vm6, %v11944_v2, %v12013_v19  ;;  %vm15644_vm9 = vcmask 1044480  }
 0x5d5   :  { %v3664_v50 = vsel %vm433_vm10, %v11978_v44, %v3643_v22  ;;  %v3665_v46 = vsel %vm433_vm10, %v3643_v22, %v12090_v35  ;;  %v4073_v44 = vsel %vm953_vm7, %v3908_v0, %v3923_v34  ;;  %v4213_v0 = vsel %vm4205_vm3, %v4182_v7, %v3981_v63  ;;  %v4672_v7 = vld [vmem:[%s15357_s9 + $0x8] sm:$0xff] }
 0x5d6   :  { %v3938_v54 = vrot.slane %v3664_v50, 1  ;;  %4390 = vmatpush1.bf16.msra.mxu1 %v4142_v55  ;;  %v3939_v9 = vrot.slane %v3665_v46, 1  ;;  %v4255_v34 = vsel %vm15643_vm11, %v3981_v63, %v3996_v26 }
 0x5d7   :  { %3744 = vrot.lane.b32.xlu0 %v11833_v6, %s9330_s26  ;;  %4391 = vmatprep.subr.bf16.mxu1 %v4216_v29 }
 0x5d8   :  { %3746 = vrot.lane.b32.xlu1 %v11829_v12, %s9330_s26  ;;  %v3687_v45 = vpop.permute.xlu1 %3686  ;;  %v4106_v42 = vsel %vm4092_vm0, %v4073_v44, %v3938_v54  ;;  %v12110_v5 = vpop.permute.xlu0 %3688  ;;  %v4109_v58 = vsel %vm4092_vm0, %v4075_v28, %v3939_v9 }
 0x5d9   :  { %v3708_v15 = vsel %vm525_vm13, %v11990_v1, %v3687_v45  ;;  %v3709_v38 = vsel %vm525_vm13, %v3687_v45, %v12110_v5  ;;  %4430 = vmatprep.subr.bf16.mxu0 %v4109_v58 }
 0x5da   :  { %v3953_v27 = vrot.slane %v3708_v15, 4  ;;  %4392 = vmatpush1.bf16.msra.mxu1 %v4213_v0  ;;  %v3954_v14 = vrot.slane %v3709_v38, 4  ;;  %4431 = vmatpush1.bf16.msra.mxu0 %v4106_v42  ;;  %v4671_v15 = vld [vmem:[%s15357_s9] sm:$0xff]  ;;  %v4712_v38 = vld [vmem:[%s15358_s10 + $0x8] sm:$0xff]  ;;  %s9336_s9 = smov 2  }
 0x5db   :  { %3792 = vrot.lane.b32.xlu0 %v11829_v12, %s9331_s27  ;;  %4393 = vmatprep.subr.bf16.mxu1 %v4258_v37 }
 0x5dc   :  { %3790 = vrot.lane.b32.xlu1 %v11833_v6, %s9331_s27  ;;  %v3731_v1 = vpop.permute.xlu1 %3730  ;;  %v4148_v41 = vsel %vm15641_vm5, %v3938_v54, %v3953_v27  ;;  %v12124_v10 = vpop.permute.xlu0 %3732  ;;  %v4151_v40 = vsel %vm15642_vm12, %v3939_v9, %v3954_v14  ;;  %vm15645_vm5 = vmmov %vm15644_vm9 }
 0x5dd   :  { %v3753_v48 = vsel %vm3748_vm14, %v11999_v43, %v3731_v1  ;;  %v3754_v33 = vsel %vm3748_vm14, %v3731_v1, %v12124_v10  ;;  %4432 = vmatprep.subr.bf16.mxu0 %v4151_v40  ;;  %v3889_v43 = vsel %vm15395_vm6, %v12013_v19, %v12032_v57  ;;  %v4308_v63 = vsel %vm15645_vm5, %v3888_v47, 0  ;;  %vm15646_vm12 = vmmov %vm15643_vm11  ;;  %v4711_v1 = vld [vmem:[%s15358_s10] sm:$0xff]  ;;  %s9338_s10 = smov 74  }
 0x5de   :  { %4394 = vmatpush1.bf16.msra.mxu1 %v4255_v34  ;;  %v3968_v53 = vrot.slane %v3753_v48, 7  ;;  %4433 = vmatpush1.bf16.msra.mxu0 %v4148_v41  ;;  %v3969_v49 = vrot.slane %v3754_v33, 7 }
 0x5df   :  { %3835 = vrot.lane.b32.xlu0 %v11833_v6, %s9332_s6  ;;  %8512 = vmatprep.subr.msk.bf16.mxu1 %vm15644_vm9, %v3889_v43  ;;  %vm15647_vm9 = vmmov %vm15645_vm5  ;;  %vm15648_vm5 = vcmask 1031168  }
 0x5e0   :  { %3833 = vrot.lane.b32.xlu1 %v11827_v51, %s9332_s6  ;;  %v3777_v2 = vpop.permute.xlu1 %3776  ;;  %v12143_v22 = vpop.permute.xlu0 %3778  ;;  %v4186_v24 = vsel %vm879_vm4, %v3953_v27, %v3968_v53 }
 0x5e1   :  { %v3799_v36 = vsel %vm2126_vm15, %v12007_v62, %v3777_v2  ;;  %v3800_v55 = vsel %vm2126_vm15, %v3777_v2, %v12143_v22  ;;  %v4188_v62 = vsel %vm879_vm4, %v3954_v14, %v3969_v49 }
 0x5e2   :  { %v3983_v50 = vrot.slane %v3799_v36, 2  ;;  %4396 = vmatpush1.bf16.msra.mxu1 %v4308_v63  ;;  %v3984_v19 = vrot.slane %v3800_v55, 2 }
 0x5e3   :  { %3879 = vrot.lane.b32.xlu0 %v11827_v51, %s9333_s25 }
 0x5e4   :  { %3837 = vrot.lane.b32.xlu1 %v11829_v12, %s9332_s6  ;;  %v3822_v21 = vpop.permute.xlu1 %3821  ;;  %v4219_v54 = vsel %vm4205_vm3, %v4186_v24, %v3983_v50  ;;  %v12157_v29 = vpop.permute.xlu0 %3823  ;;  %v4222_v23 = vsel %vm4205_vm3, %v4188_v62, %v3984_v19 }
 0x5e5   :  { %v3844_v46 = vsel %vm15396_vm1, %v12015_v8, %v3822_v21  ;;  %8513 = vmatmul.mubr.msk.bf16.vlgmr.msra.gmra.mrb[56].mxu1 %vm4297_vm2, %v11986_v4  ;;  %v3845_v44 = vsel %vm15396_vm1, %v3822_v21, %v12157_v29  ;;  %4434 = vmatprep.subr.bf16.mxu0 %v4222_v23 }
 0x5e6   :  { %v3998_v9 = vrot.slane %v3844_v46, 5  ;;  %4503 = vmatprep.mubr.bf16.mxu1 %v15630_v20  ;;  %v3999_v45 = vrot.slane %v3845_v44, 5  ;;  %4435 = vmatpush1.bf16.msra.mxu0 %v4219_v54 }
 0x5e7   :  { %3883 = vrot.lane.b32.xlu0 %v11829_v12, %s9333_s25 }
 0x5e8   :  { %3881 = vrot.lane.b32.xlu1 %v11833_v6, %s9333_s25  ;;  %v3868_v8 = vpop.permute.xlu1 %3867  ;;  %v4261_v28 = vsel %vm15646_vm12, %v3983_v50, %v3998_v9  ;;  %v12173_v42 = vpop.permute.xlu0 %3869  ;;  %v4264_v26 = vsel %vm15643_vm11, %v3984_v19, %v3999_v45  ;;  %vm15649_vm12 = vmmov %vm15648_vm5 }
 0x5e9   :  { %4436 = vmatprep.subr.bf16.mxu0 %v4264_v26  ;;  %v3891_v58 = vsel %vm15395_vm6, %v3868_v8, %v12173_v42  ;;  %v3890_v0 = vsel %vm15395_vm6, %v12032_v57, %v3868_v8  ;;  %vm15650_vm11 = vmmov %vm15647_vm9 }
 0x5ea   :  { %4437 = vmatpush1.bf16.msra.mxu0 %v4261_v28  ;;  %v4314_v48 = vsel %vm15650_vm11, %v3890_v0, 0 }
 0x5eb   :  { %4680 = vperm.xlu0 %9079, %v4672_v7   ;;  %8514 = vmatprep.subr.msk.bf16.mxu0 %vm15647_vm9, %v3891_v58 }
 0x5ec   :  { %4675 = vperm.xlu1 %9080, %v4671_v15   ;;  %v3557_v27 = vpop.permute.xlu1 %3556  ;;  %v12189_v37 = vpop.permute.xlu0 %3558 }
 0x5ed   :  { %v3576_v14 = vsel %vm15648_vm5, %v12046_v39, %v3557_v27  ;;  %v3577_v41 = vsel %vm15649_vm12, %v3557_v27, %v12189_v37  ;;  %vm15651_vm5 = vmmov %vm15647_vm9  ;;  %vm15652_vm12 = vcmask 1043456  }
 0x5ee   :  { %v3910_v57 = vrot.slane %v3576_v14, 3  ;;  %v3911_v40 = vrot.slane %v3577_v41, 3  ;;  %4439 = vmatpush1.bf16.msra.mxu0 %v4314_v48  ;;  %vm15653_vm11 = vmmov %vm15652_vm12 }
 0x5ef   :  { %4720 = vperm.xlu0 %9079, %v4712_v38  }
 0x5f0   :  { %4715 = vperm.xlu1 %9080, %v4711_v1   ;;  %v3601_v34 = vpop.permute.xlu1 %3600  ;;  %v4034_v39 = vsel %vm15647_vm9, %v11577_v61, %v3910_v57  ;;  %v12201_v33 = vpop.permute.xlu0 %3602  ;;  %v4038_v53 = vsel %vm15651_vm5, %v11685_v16, %v3911_v40  ;;  %vm15654_vm9 = vcmask 1042432  }
 0x5f1   :  { %v3621_v47 = vsel %vm3614_vm8, %v12071_v52, %v3601_v34  ;;  %v3622_v43 = vsel %vm3614_vm8, %v3601_v34, %v12201_v33  ;;  %8515 = vmatmul.mubr.msk.bf16.vlgmr.msra.gmra.mrb[60].mxu0 %vm4297_vm2, %v11986_v4  ;;  %4471 = vmatprep.subr.bf16.mxu1 %v4038_v53  ;;  %vm15655_vm5 = vmmov %vm15654_vm9 }
 0x5f2   :  { %v3925_v49 = vrot.slane %v3621_v47, 6  ;;  %4472 = vmatpush1.bf16.msra.mxu1 %v4034_v39  ;;  %4546 = vmatprep.mubr.bf16.mxu0 %v15630_v20  ;;  %v3926_v61 = vrot.slane %v3622_v43, 6 }
 0x5f4   :  { %v3647_v2 = vpop.permute.xlu1 %3646  ;;  %v12212_v36 = vpop.permute.xlu0 %3648  ;;  %v4077_v55 = vsel %vm953_vm7, %v3910_v57, %v3925_v49  ;;  %v4079_v24 = vsel %vm953_vm7, %v3911_v40, %v3926_v61 }
 0x5f5   :  { %v3666_v52 = vsel %vm433_vm10, %v12090_v35, %v3647_v2  ;;  %v3667_v16 = vsel %vm433_vm10, %v3647_v2, %v12212_v36 }
 0x5f6   :  { %v3940_v63 = vrot.slane %v3666_v52, 1  ;;  %v3941_v50 = vrot.slane %v3667_v16, 1 }
 0x5f8   :  { %v3691_v19 = vpop.permute.xlu1 %3690  ;;  %v4112_v21 = vsel %vm4092_vm0, %v4077_v55, %v3940_v63  ;;  %v12221_v54 = vpop.permute.xlu0 %3692  ;;  %v4115_v35 = vsel %vm4092_vm0, %v4079_v24, %v3941_v50 }
 0x5f9   :  { %v3710_v62 = vsel %vm525_vm13, %v12110_v5, %v3691_v19  ;;  %v3711_v23 = vsel %vm525_vm13, %v3691_v19, %v12221_v54  ;;  %4473 = vmatprep.subr.bf16.mxu1 %v4115_v35 }
 0x5fa   :  { %v3955_v46 = vrot.slane %v3710_v62, 4  ;;  %v3956_v9 = vrot.slane %v3711_v23, 4  ;;  %4474 = vmatpush1.bf16.msra.mxu1 %v4112_v21 }
 0x5fc   :  { %v3735_v44 = vpop.permute.xlu1 %3734  ;;  %v4154_v45 = vsel %vm15652_vm12, %v3940_v63, %v3955_v46  ;;  %v12229_v28 = vpop.permute.xlu0 %3736  ;;  %v4157_v5 = vsel %vm15653_vm11, %v3941_v50, %v3956_v9  ;;  %vm15656_vm12 = vcmask 1044480   ;;  %vm15657_vm11 = vcmask 1031168  }
 0x5fd   :  { %v3755_v8 = vsel %vm3748_vm14, %v12124_v10, %v3735_v44  ;;  %v3756_v7 = vsel %vm3748_vm14, %v3735_v44, %v12229_v28  ;;  %4475 = vmatprep.subr.bf16.mxu1 %v4157_v5 }
 0x5fe   :  { %v3970_v26 = vrot.slane %v3755_v8, 7  ;;  %4476 = vmatpush1.bf16.msra.mxu1 %v4154_v45  ;;  %v3971_v15 = vrot.slane %v3756_v7, 7 }
 0x600   :  { %v3781_v58 = vpop.permute.xlu1 %3780  ;;  %v12236_v27 = vpop.permute.xlu0 %3782  ;;  %v4190_v1 = vsel %vm879_vm4, %v3955_v46, %v3970_v26  ;;  %v4192_v41 = vsel %vm879_vm4, %v3956_v9, %v3971_v15 }
 0x601   :  { %v3801_v0 = vsel %vm2126_vm15, %v12143_v22, %v3781_v58  ;;  %v3802_v10 = vsel %vm2126_vm15, %v3781_v58, %v12236_v27 }
 0x602   :  { %v3985_v38 = vrot.slane %v3801_v0, 2  ;;  %v3986_v14 = vrot.slane %v3802_v10, 2 }
 0x604   :  { %v3826_v57 = vpop.permute.xlu1 %3825  ;;  %v4225_v48 = vsel %vm4205_vm3, %v4190_v1, %v3985_v38  ;;  %v12245_v34 = vpop.permute.xlu0 %3827  ;;  %v4228_v22 = vsel %vm4205_vm3, %v4192_v41, %v3986_v14 }
 0x605   :  { %v3846_v40 = vsel %vm15396_vm1, %v12157_v29, %v3826_v57  ;;  %v3847_v47 = vsel %vm15396_vm1, %v3826_v57, %v12245_v34  ;;  %4477 = vmatprep.subr.bf16.mxu1 %v4228_v22 }
 0x606   :  { %v4000_v39 = vrot.slane %v3846_v40, 5  ;;  %v4001_v53 = vrot.slane %v3847_v47, 5  ;;  %4478 = vmatpush1.bf16.msra.mxu1 %v4225_v48 }
 0x608   :  { %v3872_v43 = vpop.permute.xlu1 %3871  ;;  %v4267_v49 = vsel %vm15654_vm9, %v3985_v38, %v4000_v39  ;;  %v12251_v61 = vpop.permute.xlu0 %3873  ;;  %v4270_v2 = vsel %vm15655_vm5, %v3986_v14, %v4001_v53  ;;  %vm15658_vm9 = vmmov %vm15657_vm11 }
 0x609   :  { %4479 = vmatprep.subr.bf16.mxu1 %v4270_v2  ;;  %v3893_v29 = vsel %vm15395_vm6, %v3872_v43, %v12251_v61  ;;  %v3892_v52 = vsel %vm15395_vm6, %v12173_v42, %v3872_v43  ;;  %vm15659_vm5 = vmmov %vm15656_vm12 }
 0x60a   :  { %4480 = vmatpush1.bf16.msra.mxu1 %v4267_v49  ;;  %v4320_v24 = vsel %vm15659_vm5, %v3892_v52, 0  ;;  %vm15660_vm6 = vmmov %vm15659_vm5 }
 0x60b   :  { %8516 = vmatprep.subr.msk.bf16.mxu1 %vm15656_vm12, %v3893_v29  ;;  %vm15661_vm12 = vmmov %vm15659_vm5 }
 0x60c   :  { %v3561_v63 = vpop.permute.xlu1 %3560  ;;  %v12261_v50 = vpop.permute.xlu0 %3562 }
 0x60d   :  { %v3578_v16 = vsel %vm15657_vm11, %v12189_v37, %v3561_v63  ;;  %v3579_v19 = vsel %vm15658_vm9, %v3561_v63, %v12261_v50  ;;  %vm15664_vm9 = vcmask 1042432  }
 0x60e   :  { %v3912_v55 = vrot.slane %v3578_v16, 3  ;;  %v3913_v21 = vrot.slane %v3579_v19, 3  ;;  %4482 = vmatpush1.bf16.msra.mxu1 %v4320_v24  ;;  %vm15665_vm5 = vmmov %vm15664_vm9 }
 0x610   :  { %v3605_v62 = vpop.permute.xlu1 %3604  ;;  %v4042_v42 = vsel %vm15660_vm6, %v11687_v60, %v3912_v55  ;;  %v12270_v46 = vpop.permute.xlu0 %3606  ;;  %v4046_v37 = vsel %vm15661_vm12, %v11749_v30, %v3913_v21  ;;  %vm15662_vm6 = vcmask 1043456   ;;  %vm15666_vm12 = vcmask 97280  }
 0x611   :  { %v3623_v35 = vsel %vm3614_vm8, %v12201_v33, %v3605_v62  ;;  %v3624_v23 = vsel %vm3614_vm8, %v3605_v62, %v12270_v46  ;;  %8517 = vmatmul.mubr.msk.bf16.vlgmr.msra.gmra.mrb[60].mxu1 %vm4297_vm2, %v11986_v4  ;;  %4514 = vmatprep.subr.bf16.mxu0 %v4046_v37  ;;  %vm15663_vm11 = vmmov %vm15662_vm6 }
 0x612   :  { %v3927_v9 = vrot.slane %v3623_v35, 6  ;;  %4515 = vmatpush1.bf16.msra.mxu0 %v4042_v42  ;;  %4589 = vmatprep.mubr.bf16.mxu1 %v15630_v20  ;;  %v3928_v60 = vrot.slane %v3624_v23, 6 }
 0x614   :  { %v3651_v44 = vpop.permute.xlu1 %3650  ;;  %v12281_v45 = vpop.permute.xlu0 %3652  ;;  %v4081_v7 = vsel %vm953_vm7, %v3912_v55, %v3927_v9  ;;  %v4083_v15 = vsel %vm953_vm7, %v3913_v21, %v3928_v60 }
 0x615   :  { %v3668_v33 = vsel %vm433_vm10, %v12212_v36, %v3651_v44  ;;  %v3669_v30 = vsel %vm433_vm10, %v3651_v44, %v12281_v45 }
 0x616   :  { %v3942_v8 = vrot.slane %v3668_v33, 1  ;;  %v3943_v5 = vrot.slane %v3669_v30, 1 }
 0x618   :  { %v3695_v26 = vpop.permute.xlu1 %3694  ;;  %v4118_v58 = vsel %vm4092_vm0, %v4081_v7, %v3942_v8  ;;  %v4121_v36 = vsel %vm4092_vm0, %v4083_v15, %v3943_v5 }
 0x619   :  { %v3712_v0 = vsel %vm525_vm13, %v12221_v54, %v3695_v26  ;;  %v12290_v38 = vpop.permute.xlu0 %3696  ;;  %4516 = vmatprep.subr.bf16.mxu0 %v4121_v36 }
 0x61a   :  { %v3957_v10 = vrot.slane %v3712_v0, 4  ;;  %v3713_v14 = vsel %vm525_vm13, %v3695_v26, %v12290_v38  ;;  %4517 = vmatpush1.bf16.msra.mxu0 %v4118_v58 }
 0x61b   :  { %v3958_v1 = vrot.slane %v3713_v14, 4 }
 0x61c   :  { %v3739_v57 = vpop.permute.xlu1 %3738  ;;  %v4160_v41 = vsel %vm15662_vm6, %v3942_v8, %v3957_v10  ;;  %vm15667_vm6 = vmmov %vm15666_vm12 }
 0x61d   :  { %v3757_v48 = vsel %vm3748_vm14, %v12229_v28, %v3739_v57  ;;  %v12298_v40 = vpop.permute.xlu0 %3740  ;;  %v4163_v54 = vsel %vm15663_vm11, %v3943_v5, %v3958_v1  ;;  %vm15668_vm11 = vcmask 1044480  }
 0x61e   :  { %v3758_v22 = vsel %vm3748_vm14, %v3739_v57, %v12298_v40  ;;  %4518 = vmatprep.subr.bf16.mxu0 %v4163_v54  ;;  %v3972_v39 = vrot.slane %v3757_v48, 7 }
 0x61f   :  { %4519 = vmatpush1.bf16.msra.mxu0 %v4160_v41  ;;  %v3973_v47 = vrot.slane %v3758_v22, 7 }
 0x620   :  { %v3785_v53 = vpop.permute.xlu1 %3784  ;;  %v4194_v52 = vsel %vm879_vm4, %v3957_v10, %v3972_v39 }
 0x621   :  { %v3803_v43 = vsel %vm2126_vm15, %v12236_v27, %v3785_v53  ;;  %v12305_v49 = vpop.permute.xlu0 %3786  ;;  %v4196_v16 = vsel %vm879_vm4, %v3958_v1, %v3973_v47 }
 0x622   :  { %v3987_v2 = vrot.slane %v3803_v43, 2  ;;  %v3804_v28 = vsel %vm2126_vm15, %v3785_v53, %v12305_v49 }
 0x623   :  { %v3988_v29 = vrot.slane %v3804_v28, 2 }
 0x624   :  { %v3830_v63 = vpop.permute.xlu1 %3829  ;;  %v4231_v55 = vsel %vm4205_vm3, %v4194_v52, %v3987_v2 }
 0x625   :  { %v3848_v19 = vsel %vm15396_vm1, %v12245_v34, %v3830_v63  ;;  %v12314_v24 = vpop.permute.xlu0 %3831  ;;  %v4234_v27 = vsel %vm4205_vm3, %v4196_v16, %v3988_v29 }
 0x626   :  { %v4002_v21 = vrot.slane %v3848_v19, 5  ;;  %v3849_v62 = vsel %vm15396_vm1, %v3830_v63, %v12314_v24  ;;  %4520 = vmatprep.subr.bf16.mxu0 %v4234_v27  ;;  %vm15669_vm1 = vmmov %vm15668_vm11 }
 0x627   :  { %v4003_v42 = vrot.slane %v3849_v62, 5  ;;  %4521 = vmatpush1.bf16.msra.mxu0 %v4231_v55 }
 0x628   :  { %v3876_v35 = vpop.permute.xlu1 %3875  ;;  %v4273_v37 = vsel %vm15664_vm9, %v3987_v2, %v4002_v21  ;;  %vm15670_vm9 = vcmask 1031168  }
 0x629   :  { %v12320_v23 = vpop.permute.xlu0 %3877  ;;  %v4276_v9 = vsel %vm15665_vm5, %v3988_v29, %v4003_v42  ;;  %v3894_v60 = vsel %vm15667_vm6, %v12251_v61, %v3876_v35  ;;  %vm15671_vm5 = vmmov %vm15670_vm9 }
 0x62a   :  { %4522 = vmatprep.subr.bf16.mxu0 %v4276_v9  ;;  %v3895_v34 = vsel %vm15666_vm12, %v3876_v35, %v12320_v23  ;;  %v4326_v8 = vsel %vm15669_vm1, %v3894_v60, 0  ;;  %vm15672_vm1 = vmmov %vm15671_vm5 }
 0x62b   :  { %4523 = vmatpush1.bf16.msra.mxu0 %v4273_v37  ;;  %vm15673_vm12 = vmmov %vm15672_vm1 }
 0x62c   :  { %8518 = vmatprep.subr.msk.bf16.mxu0 %vm15668_vm11, %v3895_v34  ;;  %v3565_v44 = vpop.permute.xlu1 %3564  ;;  %vm15674_vm6 = vmmov %vm15668_vm11 }
 0x62d   :  { %v3609_v33 = vpop.permute.xlu0 %3608  ;;  %v3580_v61 = vsel %vm15670_vm9, %v12261_v50, %v3565_v44  ;;  %vm15675_vm11 = vmmov %vm15674_vm6 }
 0x62e   :  { %v3914_v36 = vrot.slane %v3580_v61, 3  ;;  %v3625_v50 = vsel %vm3614_vm8, %v12270_v46, %v3609_v33  ;;  %vm15676_vm9 = vmmov %vm15674_vm6 }
 0x62f   :  { %4525 = vmatpush1.bf16.msra.mxu0 %v4326_v8  ;;  %v3929_v29 = vrot.slane %v3625_v50, 6 }
 0x630   :  { %v3655_v30 = vpop.permute.xlu1 %3654 }
 0x631   :  { %v3699_v5 = vpop.permute.xlu0 %3698  ;;  %v3670_v46 = vsel %vm433_vm10, %v12281_v45, %v3655_v30  ;;  %v4085_v37 = vsel %vm953_vm7, %v3914_v36, %v3929_v29 }
 0x632   :  { %8519 = vmatmul.mubr.msk.bf16.vlgmr.msra.gmra.mrb[64].mxu0 %vm4297_vm2, %v11986_v4  ;;  %v3944_v52 = vrot.slane %v3670_v46, 1  ;;  %v3714_v27 = vsel %vm525_vm13, %v12290_v38, %v3699_v5 }
 0x633   :  { %4632 = vmatprep.mubr.bf16.mxu0 %v15630_v20 }
 0x634   :  { %v12332_v7 = vpop.permute.xlu1 %3742  ;;  %v4124_v38 = vsel %vm4092_vm0, %v4085_v37, %v3944_v52 }
 0x635   :  { %v12334_v26 = vpop.permute.xlu0 %3788 }
 0x638   :  { %v3569_v15 = vpop.permute.xlu1 %3568 }
 0x639   :  { %v3567_v58 = vpop.permute.xlu0 %3566  ;;  %v3585_v0 = vsel %vm15671_vm5, %v3569_v15, %v11835_v56  ;;  %vm15677_vm5 = vmmov %vm15674_vm6 }
 0x63a   :  { %v3581_v10 = vsel %vm15672_vm1, %v3565_v44, %v3567_v58  ;;  %v3582_v14 = vsel %vm15673_vm12, %v3567_v58, %v3569_v15  ;;  %v3917_v1 = vrot.slane %v3585_v0, 3  ;;  %v3959_v44 = vrot.slane %v3714_v27, 4 }
 0x63b   :  { %v3915_v57 = vrot.slane %v3581_v10, 3  ;;  %v3916_v20 = vrot.slane %v3582_v14, 3  ;;  %v3759_v58 = vsel %vm3748_vm14, %v12298_v40, %v12332_v7 }
 0x63c   :  { %v3611_v41 = vpop.permute.xlu1 %3610  ;;  %v4062_v48 = vsel %vm15674_vm6, %v11829_v12, %v3917_v1  ;;  %v4050_v12 = vsel %vm15677_vm5, %v11751_v13, %v3914_v36  ;;  %vm15682_vm6 = vcmask 113664  }
 0x63d   :  { %v3613_v54 = vpop.permute.xlu0 %3612  ;;  %v3626_v22 = vsel %vm3614_vm8, %v3609_v33, %v3611_v41  ;;  %v4054_v56 = vsel %vm15675_vm11, %v11827_v51, %v3915_v57  ;;  %4600 = vmatprep.subr.bf16.mxu0 %v4062_v48  ;;  %v4058_v39 = vsel %vm15676_vm9, %v11833_v6, %v3916_v20  ;;  %vm15683_vm11 = vmmov %vm15682_vm6 }
 0x63e   :  { %v3631_v47 = vsel %vm3614_vm8, %v3613_v54, %v11837_v17  ;;  %v3627_v53 = vsel %vm3614_vm8, %v3611_v41, %v3613_v54  ;;  %4557 = vmatprep.subr.bf16.mxu1 %v4054_v56  ;;  %4601 = vmatpush1.bf16.msra.mxu0 %v4058_v39  ;;  %v3930_v51 = vrot.slane %v3626_v22, 6  ;;  %vm15686_vm5 = vmmov %vm15682_vm6 }
 0x63f   :  { %v3932_v43 = vrot.slane %v3631_v47, 6  ;;  %4558 = vmatpush1.bf16.msra.mxu1 %v4050_v12  ;;  %v3931_v2 = vrot.slane %v3627_v53, 6 }
 0x640   :  { %v3659_v28 = vpop.permute.xlu1 %3658  ;;  %v4087_v21 = vsel %vm953_vm7, %v3915_v57, %v3930_v51 }
 0x641   :  { %v3657_v6 = vpop.permute.xlu0 %3656  ;;  %v3675_v17 = vsel %vm433_vm10, %v3659_v28, %v11843_v31  ;;  %v4091_v45 = vsel %vm953_vm7, %v3917_v1, %v3932_v43  ;;  %v4089_v42 = vsel %vm953_vm7, %v3916_v20, %v3931_v2  ;;  %vm15678_vm7 = vcmask 1043456  }
 0x642   :  { %v3671_v63 = vsel %vm433_vm10, %v3655_v30, %v3657_v6  ;;  %v3672_v16 = vsel %vm433_vm10, %v3657_v6, %v3659_v28  ;;  %v3947_v13 = vrot.slane %v3675_v17, 1  ;;  %v3805_v20 = vsel %vm2126_vm15, %v12305_v49, %v12334_v26 }
 0x643   :  { %v3945_v55 = vrot.slane %v3671_v63, 1  ;;  %v3946_v19 = vrot.slane %v3672_v16, 1  ;;  %v3989_v39 = vrot.slane %v3805_v20, 2 }
 0x644   :  { %v4133_v62 = vsel %vm4092_vm0, %v4091_v45, %v3947_v13 }
 0x645   :  { %v3703_v31 = vpop.permute.xlu0 %3702  ;;  %v4127_v35 = vsel %vm4092_vm0, %v4087_v21, %v3945_v55  ;;  %4602 = vmatprep.subr.bf16.mxu0 %v4133_v62  ;;  %v4130_v9 = vsel %vm4092_vm0, %v4089_v42, %v3946_v19  ;;  %v3701_v60 = vpop.permute.xlu1 %3700  ;;  %vm15679_vm0 = vmmov %vm15678_vm7 }
 0x646   :  { %v3719_v34 = vsel %vm525_vm13, %v3703_v31, %v11845_v32  ;;  %4559 = vmatprep.subr.bf16.mxu1 %v4127_v35  ;;  %4603 = vmatpush1.bf16.msra.mxu0 %v4130_v9  ;;  %v3715_v8 = vsel %vm525_vm13, %v3699_v5, %v3701_v60  ;;  %v3716_v30 = vsel %vm525_vm13, %v3701_v60, %v3703_v31  ;;  %vm15680_vm1 = vmmov %vm15679_vm0 }
 0x647   :  { %v3962_v33 = vrot.slane %v3719_v34, 4  ;;  %4560 = vmatpush1.bf16.msra.mxu1 %v4124_v38  ;;  %v3960_v61 = vrot.slane %v3715_v8, 4  ;;  %v3961_v15 = vrot.slane %v3716_v30, 4  ;;  %vm15681_vm12 = vmmov %vm15679_vm0 }
 0x648   :  { %v4166_v40 = vsel %vm15681_vm12, %v3944_v52, %v3959_v44 }
 0x649   :  { %v3745_v0 = vpop.permute.xlu0 %3744  ;;  %v4175_v32 = vsel %vm15678_vm7, %v3947_v13, %v3962_v33  ;;  %v4169_v14 = vsel %vm15679_vm0, %v3945_v55, %v3960_v61  ;;  %v4172_v5 = vsel %vm15680_vm1, %v3946_v19, %v3961_v15  ;;  %vm15687_vm7 = vmmov %vm15686_vm5 }
 0x64a   :  { %v3760_v36 = vsel %vm3748_vm14, %v12332_v7, %v3745_v0  ;;  %v3747_v10 = vpop.permute.xlu1 %3746  ;;  %4604 = vmatprep.subr.bf16.mxu0 %v4175_v32  ;;  %4561 = vmatprep.subr.bf16.mxu1 %v4169_v14  ;;  %v3974_v7 = vrot.slane %v3759_v58, 7 }
 0x64b   :  { %v3761_v1 = vsel %vm3748_vm14, %v3745_v0, %v3747_v10  ;;  %v3765_v57 = vsel %vm3748_vm14, %v3747_v10, %v11851_v18  ;;  %4605 = vmatpush1.bf16.msra.mxu0 %v4172_v5  ;;  %4562 = vmatpush1.bf16.msra.mxu1 %v4166_v40  ;;  %v3975_v48 = vrot.slane %v3760_v36, 7 }
 0x64c   :  { %v3977_v41 = vrot.slane %v3765_v57, 7  ;;  %v3976_v50 = vrot.slane %v3761_v1, 7  ;;  %v4198_v43 = vsel %vm879_vm4, %v3959_v44, %v3974_v7 }
 0x64d   :  { %v3793_v54 = vpop.permute.xlu0 %3792  ;;  %v4200_v2 = vsel %vm879_vm4, %v3960_v61, %v3975_v48  ;;  %v4237_v63 = vsel %vm4205_vm3, %v4198_v43, %v3989_v39 }
 0x64e   :  { %v3810_v22 = vsel %vm2126_vm15, %v3793_v54, %v11853_v59  ;;  %v3791_v56 = vpop.permute.xlu1 %3790  ;;  %v4204_v49 = vsel %vm879_vm4, %v3962_v33, %v3977_v41  ;;  %v4202_v59 = vsel %vm879_vm4, %v3961_v15, %v3976_v50  ;;  %vm15684_vm4 = vcmask 1042432  }
 0x64f   :  { %v3992_v18 = vrot.slane %v3810_v22, 2  ;;  %v3806_v47 = vsel %vm2126_vm15, %v12334_v26, %v3791_v56  ;;  %v3807_v53 = vsel %vm2126_vm15, %v3791_v56, %v3793_v54  ;;  %vm15685_vm9 = vmmov %vm15684_vm4 }
 0x650   :  { %v3990_v12 = vrot.slane %v3806_v47, 2  ;;  %v3991_v46 = vrot.slane %v3807_v53, 2  ;;  %vm15689_vm0 = vmmov %vm15684_vm4 }
 0x651   :  { %v3836_v51 = vpop.permute.xlu0 %3835  ;;  %v4246_v28 = vsel %vm4205_vm3, %v4204_v49, %v3992_v18  ;;  %vm15690_vm1 = vmmov %vm15689_vm0 }
 0x652   :  { %v3834_v29 = vpop.permute.xlu1 %3833  ;;  %v4240_v6 = vsel %vm4205_vm3, %v4200_v2, %v3990_v12  ;;  %4606 = vmatprep.subr.bf16.mxu0 %v4246_v28  ;;  %v4243_v26 = vsel %vm4205_vm3, %v4202_v59, %v3991_v46  ;;  %vm15688_vm3 = vcmask 97280  }
 0x653   :  { %v3850_v17 = vsel %vm15682_vm6, %v12314_v24, %v3834_v29  ;;  %v3851_v52 = vsel %vm15683_vm11, %v3834_v29, %v3836_v51  ;;  %4563 = vmatprep.subr.bf16.mxu1 %v4240_v6  ;;  %4607 = vmatpush1.bf16.msra.mxu0 %v4243_v26  ;;  %vm15691_vm12 = vmmov %vm15688_vm3 }
 0x654   :  { %v4004_v16 = vrot.slane %v3850_v17, 5  ;;  %v4005_v13 = vrot.slane %v3851_v52, 5  ;;  %4564 = vmatpush1.bf16.msra.mxu1 %v4237_v63  ;;  %vm15692_vm6 = vmmov %vm15688_vm3 }
 0x655   :  { %v3880_v55 = vpop.permute.xlu0 %3879  ;;  %vm15693_vm11 = vmmov %vm15688_vm3 }
 0x656   :  { %v3838_v19 = vpop.permute.xlu1 %3837  ;;  %v4282_v45 = vsel %vm15684_vm4, %v3990_v12, %v4005_v13  ;;  %v4279_v27 = vsel %vm15685_vm9, %v3989_v39, %v4004_v16  ;;  %v3896_v31 = vsel %vm15688_vm3, %v12320_v23, %v3880_v55  ;;  %vm15694_vm4 = vcmask 1044480  }
 0x657   :  { %v3852_v21 = vsel %vm15686_vm5, %v3836_v51, %v3838_v19  ;;  %v3856_v24 = vsel %vm15687_vm7, %v3838_v19, %v11859_v25  ;;  %4565 = vmatprep.subr.bf16.mxu1 %v4282_v45  ;;  %vm15695_vm9 = vmmov %vm15694_vm4 }
 0x658   :  { %v4006_v62 = vrot.slane %v3852_v21, 5  ;;  %v4007_v42 = vrot.slane %v3856_v24, 5  ;;  %4566 = vmatpush1.bf16.msra.mxu1 %v4279_v27  ;;  %v4332_v44 = vsel %vm15695_vm9, %v3896_v31, 0  ;;  %vm15696_vm5 = vmmov %vm15694_vm4 }
 0x659   :  { %v3884_v35 = vpop.permute.xlu0 %3883  ;;  %vm15697_vm7 = vmmov %vm15694_vm4 }
 0x65a   :  { %v3882_v37 = vpop.permute.xlu1 %3881  ;;  %v4288_v9 = vsel %vm15689_vm0, %v3992_v18, %v4007_v42  ;;  %v4285_v34 = vsel %vm15690_vm1, %v3991_v46, %v4006_v62  ;;  %v3902_v60 = vsel %vm15691_vm12, %v3884_v35, %v11861_v11  ;;  %vm15700_vm0 = vcmask 113664   ;;  %vm15702_vm12 = vmmov %vm15692_vm6 }
 0x65b   :  { %4608 = vmatprep.subr.bf16.mxu0 %v4288_v9  ;;  %v3897_v38 = vsel %vm15692_vm6, %v3880_v55, %v3882_v37  ;;  %v3898_v25 = vsel %vm15693_vm11, %v3882_v37, %v3884_v35  ;;  %vm15701_vm1 = vmmov %vm15700_vm0 }
 0x65c   :  { %8520 = vmatprep.subr.msk.bf16.mxu1 %vm15694_vm4, %v3897_v38  ;;  %4609 = vmatpush1.bf16.msra.mxu0 %v4285_v34  ;;  %v4338_v23 = vsel %vm15697_vm7, %v3898_v25, 0  ;;  %vm15707_vm7 = vmmov %vm15700_vm0 }
 0x65d   :  { %4568 = vmatpush1.bf16.msra.mxu1 %v4332_v44  ;;  %8522 = vmatprep.subr.msk.bf16.mxu0 %vm15696_vm5, %v3902_v60  ;;  %v12493_v60 = vld [vmem:[%s15359_s11 + $0x4] ss:$8 sps:$4 sm:$0xff]  }
 0x660   :  { %8521 = vmatmul.mubr.msk.bf16.vlgmr.msra.gmra.mrb[64].mxu1 %vm4297_vm2, %v11986_v4  ;;  %4611 = vmatpush1.bf16.msra.mxu0 %v4338_v23 }
 0x661   :  { %8526 = vmatprep.mubr.msk.bf16.mxu1 %vm2126_vm15, %v12493_v60 }
 0x663   :  { %8523 = vmatmul.mubr.msk.bf16.vlgmr.msra.gmra.mrb[68].mxu0 %vm4297_vm2, %v11986_v4  ;;  %vm15698_vm2 = vcmask 1031168  }
 0x664   :  { %8527 = vmatprep.mubr.msk.bf16.mxu0 %vm2126_vm15, %v12493_v60  ;;  %vm15699_vm3 = vmmov %vm15698_vm2 }
 0x665   :  { %vm15703_vm11 = vmmov %vm15698_vm2 }
 0x666   :  { %vm15704_vm4 = vmmov %vm15698_vm2 }
 0x667   :  { %vm15705_vm9 = vmmov %vm15698_vm2 }
 0x668   :  { %vm15706_vm5 = vmmov %vm15698_vm2 }
 0x66a   :  { %v12428_v11 = vpop.permute.xlu0 %4680 }
 0x66b   :  { %v12430_v33 = vpop.permute.xlu1 %4675 }
 0x66e   :  { %v12435_v1 = vpop.permute.xlu0 %4720 }
 0x66f   :  { %v12437_v4 = vpop.permute.xlu1 %4715 }
 0x68d   :  { %v4376_v8 = vpop.f32.mrb[56].mxu0 }
 0x68e   :  { %v4643_v30 = vmax.f32 %v4376_v8, 0.0  ;;  %v4378_v61 = vpop.f32.mrb[57].mxu0 }
 0x68f   :  { %v4644_v15 = vmax.f32 %v4378_v61, 0.0  ;;  %v4380_v58 = vpop.f32.mrb[58].mxu0 }
 0x690   :  { %v4683_v0 = vmul.f32 %v12430_v33, %v4643_v30  ;;  %v4657_v32 = vmax.f32 %v4380_v58, 0.0  ;;  %v4382_v36 = vpop.f32.mrb[59].mxu0 }
 0x691   :  { %v4684_v10 = vmul.f32 %v12430_v33, %v4644_v15  ;;  %v4658_v14 = vmax.f32 %v4382_v36, 0.0 }
 0x692   :  { %v4697_v5 = vmul.f32 %v12428_v11, %v4657_v32  ;;  %v4723_v40 = vadd.f32 %v12437_v4, %v4683_v0 }
 0x693   :  { %v4698_v57 = vmul.f32 %v12428_v11, %v4658_v14  ;;  %v4724_v7 = vadd.f32 %v12437_v4, %v4684_v10 }
 0x694   :  { %v4737_v20 = vadd.f32 %v12435_v1, %v4697_v5 }
 0x695   :  { %v4738_v41 = vadd.f32 %v12435_v1, %v4698_v57 }
 0x696   :  { %v4751_v48 = vpack.c.bf16 %v4737_v20, %v4723_v40 }
 0x697   :  { %v4752_v50 = vpack.c.bf16 %v4738_v41, %v4724_v7 }
 0x698   :  { %4837 = vrot.lane.b32.xlu0 %v4751_v48, %s9329_s1  ;;  %4779 = vrot.lane.b32.xlu1 %v4751_v48, %s9321_s2 }
 0x699   :  { %5257 = vmatprep.subr.bf16.mxu1 %v4752_v50 }
 0x69a   :  { %5258 = vmatpush1.bf16.msra.mxu1 %v4751_v48 }
 0x69c   :  { %4953 = vrot.lane.b32.xlu0 %v4751_v48, %s9326_s29  ;;  %4895 = vrot.lane.b32.xlu1 %v4751_v48, %s9325_s28 }
 0x6a0   :  { %5069 = vrot.lane.b32.xlu0 %v4751_v48, %s9331_s27  ;;  %5011 = vrot.lane.b32.xlu1 %v4751_v48, %s9330_s26 }
 0x6a4   :  { %5185 = vrot.lane.b32.xlu0 %v4751_v48, %s9333_s25  ;;  %5127 = vrot.lane.b32.xlu1 %v4751_v48, %s9332_s6 }
 0x6a8   :  { %4839 = vrot.lane.b32.xlu0 %v4752_v50, %s9329_s1  ;;  %4781 = vrot.lane.b32.xlu1 %v4752_v50, %s9321_s2 }
 0x6ac   :  { %4955 = vrot.lane.b32.xlu0 %v4752_v50, %s9326_s29  ;;  %4897 = vrot.lane.b32.xlu1 %v4752_v50, %s9325_s28 }
 0x6b0   :  { %5071 = vrot.lane.b32.xlu0 %v4752_v50, %s9331_s27  ;;  %5013 = vrot.lane.b32.xlu1 %v4752_v50, %s9330_s26 }
 0x6b4   :  { %5187 = vrot.lane.b32.xlu0 %v4752_v50, %s9333_s25  ;;  %5129 = vrot.lane.b32.xlu1 %v4752_v50, %s9332_s6 }
 0x6b8   :  { %v4419_v54 = vpop.f32.mrb[56].mxu1 }
 0x6b9   :  { %v4645_v22 = vmax.f32 %v4419_v54, 0.0  ;;  %v4421_v56 = vpop.f32.mrb[57].mxu1 }
 0x6ba   :  { %v4646_v39 = vmax.f32 %v4421_v56, 0.0  ;;  %v4423_v18 = vpop.f32.mrb[58].mxu1 }
 0x6bb   :  { %v4685_v47 = vmul.f32 %v12430_v33, %v4645_v22  ;;  %v4659_v53 = vmax.f32 %v4423_v18, 0.0  ;;  %v4425_v12 = vpop.f32.mrb[59].mxu1 }
 0x6bc   :  { %v4686_v46 = vmul.f32 %v12430_v33, %v4646_v39  ;;  %v4660_v49 = vmax.f32 %v4425_v12, 0.0 }
 0x6bd   :  { %v4699_v43 = vmul.f32 %v12428_v11, %v4659_v53  ;;  %v4725_v2 = vadd.f32 %v12437_v4, %v4685_v47 }
 0x6be   :  { %v4700_v51 = vmul.f32 %v12428_v11, %v4660_v49  ;;  %v4726_v59 = vadd.f32 %v12437_v4, %v4686_v46 }
 0x6bf   :  { %v4739_v28 = vadd.f32 %v12435_v1, %v4699_v43 }
 0x6c0   :  { %v4740_v29 = vadd.f32 %v12435_v1, %v4700_v51 }
 0x6c1   :  { %v4753_v6 = vpack.c.bf16 %v4739_v28, %v4725_v2 }
 0x6c2   :  { %v4754_v26 = vpack.c.bf16 %v4740_v29, %v4726_v59 }
 0x6c3   :  { %4783 = vrot.lane.b32.xlu0 %v4753_v6, %s9321_s2  ;;  %4841 = vrot.lane.b32.xlu1 %v4753_v6, %s9329_s1 }
 0x6c4   :  { %5300 = vmatprep.subr.bf16.mxu0 %v4754_v26  ;;  %v4462_v17 = vpop.f32.mrb[60].mxu0 }
 0x6c5   :  { %5301 = vmatpush1.bf16.msra.mxu0 %v4753_v6  ;;  %v4647_v52 = vmax.f32 %v4462_v17, 0.0  ;;  %v4464_v63 = vpop.f32.mrb[61].mxu0 }
 0x6c6   :  { %v4648_v16 = vmax.f32 %v4464_v63, 0.0  ;;  %v4466_v13 = vpop.f32.mrb[62].mxu0 }
 0x6c7   :  { %4899 = vrot.lane.b32.xlu0 %v4753_v6, %s9325_s28  ;;  %4957 = vrot.lane.b32.xlu1 %v4753_v6, %s9326_s29  ;;  %v4687_v55 = vmul.f32 %v12430_v33, %v4647_v52  ;;  %v4661_v19 = vmax.f32 %v4466_v13, 0.0  ;;  %v4468_v45 = vpop.f32.mrb[63].mxu0 }
 0x6c8   :  { %v4688_v27 = vmul.f32 %v12430_v33, %v4648_v16  ;;  %v4662_v21 = vmax.f32 %v4468_v45, 0.0 }
 0x6c9   :  { %v4701_v24 = vmul.f32 %v12428_v11, %v4661_v19  ;;  %v4727_v42 = vadd.f32 %v12437_v4, %v4687_v55 }
 0x6ca   :  { %v4702_v62 = vmul.f32 %v12428_v11, %v4662_v21  ;;  %v4728_v35 = vadd.f32 %v12437_v4, %v4688_v27 }
 0x6cb   :  { %5015 = vrot.lane.b32.xlu0 %v4753_v6, %s9330_s26  ;;  %5073 = vrot.lane.b32.xlu1 %v4753_v6, %s9331_s27  ;;  %v4741_v31 = vadd.f32 %v12435_v1, %v4701_v24 }
 0x6cc   :  { %v4742_v37 = vadd.f32 %v12435_v1, %v4702_v62 }
 0x6cd   :  { %v12482_v9 = vpack.c.bf16 %v4741_v31, %v4727_v42 }
 0x6ce   :  { %v12484_v34 = vpack.c.bf16 %v4742_v37, %v4728_v35 }
 0x6cf   :  { %5131 = vrot.lane.b32.xlu0 %v4753_v6, %s9332_s6  ;;  %5189 = vrot.lane.b32.xlu1 %v4753_v6, %s9333_s25 }
 0x6d3   :  { %4785 = vrot.lane.b32.xlu0 %v4754_v26, %s9321_s2  ;;  %4843 = vrot.lane.b32.xlu1 %v4754_v26, %s9329_s1 }
 0x6d7   :  { %4901 = vrot.lane.b32.xlu0 %v4754_v26, %s9325_s28  ;;  %4959 = vrot.lane.b32.xlu1 %v4754_v26, %s9326_s29 }
 0x6db   :  { %5017 = vrot.lane.b32.xlu0 %v4754_v26, %s9330_s26  ;;  %5075 = vrot.lane.b32.xlu1 %v4754_v26, %s9331_s27 }
 0x6df   :  { %5133 = vrot.lane.b32.xlu0 %v4754_v26, %s9332_s6  ;;  %5191 = vrot.lane.b32.xlu1 %v4754_v26, %s9333_s25 }
 0x6e3   :  { %4845 = vrot.lane.b32.xlu0 %v12482_v9, %s9329_s1  ;;  %4787 = vrot.lane.b32.xlu1 %v12482_v9, %s9321_s2 }
 0x6e4   :  { %v4505_v38 = vpop.f32.mrb[60].mxu1 }
 0x6e5   :  { %v4649_v25 = vmax.f32 %v4505_v38, 0.0  ;;  %v4507_v44 = vpop.f32.mrb[61].mxu1 }
 0x6e6   :  { %v4650_v23 = vmax.f32 %v4507_v44, 0.0  ;;  %v4509_v8 = vpop.f32.mrb[62].mxu1 }
 0x6e7   :  { %4961 = vrot.lane.b32.xlu0 %v12482_v9, %s9326_s29  ;;  %4903 = vrot.lane.b32.xlu1 %v12482_v9, %s9325_s28  ;;  %v4689_v30 = vmul.f32 %v12430_v33, %v4649_v25  ;;  %v4663_v61 = vmax.f32 %v4509_v8, 0.0  ;;  %v4511_v15 = vpop.f32.mrb[63].mxu1 }
 0x6e8   :  { %v4690_v58 = vmul.f32 %v12430_v33, %v4650_v23  ;;  %v4664_v0 = vmax.f32 %v4511_v15, 0.0 }
 0x6e9   :  { %v4703_v32 = vmul.f32 %v12428_v11, %v4663_v61  ;;  %v4729_v10 = vadd.f32 %v12437_v4, %v4689_v30 }
 0x6ea   :  { %v4704_v36 = vmul.f32 %v12428_v11, %v4664_v0  ;;  %v4730_v5 = vadd.f32 %v12437_v4, %v4690_v58 }
 0x6eb   :  { %5077 = vrot.lane.b32.xlu0 %v12482_v9, %s9331_s27  ;;  %5019 = vrot.lane.b32.xlu1 %v12482_v9, %s9330_s26  ;;  %v4743_v14 = vadd.f32 %v12435_v1, %v4703_v32 }
 0x6ec   :  { %v4744_v57 = vadd.f32 %v12435_v1, %v4704_v36 }
 0x6ed   :  { %v12525_v40 = vpack.c.bf16 %v4743_v14, %v4729_v10 }
 0x6ee   :  { %v12527_v20 = vpack.c.bf16 %v4744_v57, %v4730_v5 }
 0x6ef   :  { %5193 = vrot.lane.b32.xlu0 %v12482_v9, %s9333_s25  ;;  %5135 = vrot.lane.b32.xlu1 %v12482_v9, %s9332_s6 }
 0x6f3   :  { %4791 = vrot.lane.b32.xlu0 %v12525_v40, %s9321_s2  ;;  %4789 = vrot.lane.b32.xlu1 %v12484_v34, %s9321_s2 }
 0x6f7   :  { %4849 = vrot.lane.b32.xlu0 %v12525_v40, %s9329_s1  ;;  %4847 = vrot.lane.b32.xlu1 %v12484_v34, %s9329_s1 }
 0x6fb   :  { %4907 = vrot.lane.b32.xlu0 %v12525_v40, %s9325_s28  ;;  %4905 = vrot.lane.b32.xlu1 %v12484_v34, %s9325_s28 }
 0x6ff   :  { %4965 = vrot.lane.b32.xlu0 %v12525_v40, %s9326_s29  ;;  %4963 = vrot.lane.b32.xlu1 %v12484_v34, %s9326_s29 }
 0x703   :  { %5023 = vrot.lane.b32.xlu0 %v12525_v40, %s9330_s26  ;;  %5021 = vrot.lane.b32.xlu1 %v12484_v34, %s9330_s26 }
 0x705   :  { %v4548_v7 = vpop.f32.mrb[64].mxu0 }
 0x706   :  { %v4651_v41 = vmax.f32 %v4548_v7, 0.0  ;;  %v4550_v48 = vpop.f32.mrb[65].mxu0 }
 0x707   :  { %v4652_v50 = vmax.f32 %v4550_v48, 0.0  ;;  %v4552_v54 = vpop.f32.mrb[66].mxu0  ;;  %5081 = vrot.lane.b32.xlu0 %v12525_v40, %s9331_s27  ;;  %5079 = vrot.lane.b32.xlu1 %v12484_v34, %s9331_s27 }
 0x708   :  { %v4691_v22 = vmul.f32 %v12430_v33, %v4651_v41  ;;  %v4665_v56 = vmax.f32 %v4552_v54, 0.0  ;;  %v4554_v39 = vpop.f32.mrb[67].mxu0 }
 0x709   :  { %v4692_v18 = vmul.f32 %v12430_v33, %v4652_v50  ;;  %v4666_v47 = vmax.f32 %v4554_v39, 0.0 }
 0x70a   :  { %v4705_v53 = vmul.f32 %v12428_v11, %v4665_v56  ;;  %v12560_v12 = vpop.permute.xlu0 %4837  ;;  %v12562_v46 = vpop.permute.xlu1 %4779  ;;  %v4731_v43 = vadd.f32 %v12437_v4, %v4691_v22 }
 0x70b   :  { %v4706_v49 = vmul.f32 %v12428_v11, %v4666_v47  ;;  %5139 = vrot.lane.b32.xlu0 %v12525_v40, %s9332_s6  ;;  %5137 = vrot.lane.b32.xlu1 %v12484_v34, %s9332_s6  ;;  %v4732_v2 = vadd.f32 %v12437_v4, %v4692_v18 }
 0x70c   :  { %v4745_v51 = vadd.f32 %v12435_v1, %v4705_v53 }
 0x70d   :  { %v4746_v28 = vadd.f32 %v12435_v1, %v4706_v49 }
 0x70e   :  { %v12573_v59 = vpack.c.bf16 %v4745_v51, %v4731_v43  ;;  %v12575_v29 = vpop.permute.xlu0 %4953  ;;  %v12579_v26 = vpop.permute.xlu1 %4895 }
 0x70f   :  { %v12577_v6 = vpack.c.bf16 %v4746_v28, %v4732_v2  ;;  %5197 = vrot.lane.b32.xlu0 %v12525_v40, %s9333_s25  ;;  %5195 = vrot.lane.b32.xlu1 %v12484_v34, %s9333_s25 }
 0x712   :  { %v12585_v17 = vpop.permute.xlu0 %5069  ;;  %v12591_v52 = vpop.permute.xlu1 %5011 }
 0x713   :  { %4795 = vrot.lane.b32.xlu0 %v12573_v59, %s9321_s2  ;;  %4793 = vrot.lane.b32.xlu1 %v12527_v20, %s9321_s2 }
 0x716   :  { %v12597_v63 = vpop.permute.xlu0 %5185  ;;  %v12599_v16 = vpop.permute.xlu1 %5127 }
 0x717   :  { %4853 = vrot.lane.b32.xlu0 %v12573_v59, %s9329_s1  ;;  %4851 = vrot.lane.b32.xlu1 %v12527_v20, %s9329_s1 }
 0x71a   :  { %v4840_v13 = vpop.permute.xlu0 %4839  ;;  %v4782_v55 = vpop.permute.xlu1 %4781 }
 0x71b   :  { %4911 = vrot.lane.b32.xlu0 %v12573_v59, %s9325_s28  ;;  %4909 = vrot.lane.b32.xlu1 %v12527_v20, %s9325_s28  ;;  %v4807_v10 = vsel %vm15699_vm3, %v12562_v46, %v4782_v55  ;;  %v4865_v2 = vsel %vm3614_vm8, %v12560_v12, %v4840_v13  ;;  %vm15709_vm3 = vmmov %vm15692_vm6 }
 0x71e   :  { %v12613_v19 = vpop.permute.xlu0 %4955  ;;  %v12615_v45 = vpop.permute.xlu1 %4897 }
 0x71f   :  { %4969 = vrot.lane.b32.xlu0 %v12573_v59, %s9326_s29  ;;  %4967 = vrot.lane.b32.xlu1 %v12527_v20, %s9326_s29 }
 0x722   :  { %v12621_v27 = vpop.permute.xlu0 %5071  ;;  %v12627_v21 = vpop.permute.xlu1 %5013 }
 0x723   :  { %5027 = vrot.lane.b32.xlu0 %v12573_v59, %s9330_s26  ;;  %5025 = vrot.lane.b32.xlu1 %v12527_v20, %s9330_s26 }
 0x726   :  { %v12633_v24 = vpop.permute.xlu0 %5187  ;;  %v12635_v62 = vpop.permute.xlu1 %5129 }
 0x727   :  { %5085 = vrot.lane.b32.xlu0 %v12573_v59, %s9331_s27  ;;  %5083 = vrot.lane.b32.xlu1 %v12527_v20, %s9331_s27 }
 0x72b   :  { %5143 = vrot.lane.b32.xlu0 %v12573_v59, %s9332_s6  ;;  %5141 = vrot.lane.b32.xlu1 %v12527_v20, %s9332_s6 }
 0x72f   :  { %5201 = vrot.lane.b32.xlu0 %v12573_v59, %s9333_s25  ;;  %5199 = vrot.lane.b32.xlu1 %v12527_v20, %s9333_s25 }
 0x733   :  { %v4591_v42 = vpop.f32.mrb[64].mxu1  ;;  %4797 = vrot.lane.b32.xlu1 %v12577_v6, %s9321_s2 }
 0x734   :  { %v4653_v31 = vmax.f32 %v4591_v42, 0.0  ;;  %v4593_v35 = vpop.f32.mrb[65].mxu1 }
 0x735   :  { %v4654_v37 = vmax.f32 %v4593_v35, 0.0  ;;  %v4595_v38 = vpop.f32.mrb[66].mxu1  ;;  %v12639_v25 = vpop.permute.xlu0 %4783 }
 0x736   :  { %v4693_v44 = vmul.f32 %v12430_v33, %v4653_v31  ;;  %v4667_v23 = vmax.f32 %v4595_v38, 0.0  ;;  %v4597_v8 = vpop.f32.mrb[67].mxu1  ;;  %v4634_v30 = vpop.f32.mrb[68].mxu0  ;;  %v4808_v61 = vsel %vm15698_vm2, %v4782_v55, %v12639_v25  ;;  %vm15708_vm2 = vmmov %vm15700_vm0 }
 0x737   :  { %v4694_v15 = vmul.f32 %v12430_v33, %v4654_v37  ;;  %v4668_v58 = vmax.f32 %v4597_v8, 0.0  ;;  %v4655_v0 = vmax.f32 %v4634_v30, 0.0  ;;  %v4636_v32 = vpop.f32.mrb[69].mxu0  ;;  %v12645_v36 = vpop.permute.xlu1 %4841  ;;  %4855 = vrot.lane.b32.xlu1 %v12577_v6, %s9329_s1  ;;  %5259 = vmatprep.subr.bf16.mxu1 %v4808_v61 }
 0x738   :  { %v4707_v14 = vmul.f32 %v12428_v11, %v4667_v23  ;;  %v4656_v5 = vmax.f32 %v4636_v32, 0.0  ;;  %v4638_v57 = vpop.f32.mrb[70].mxu0  ;;  %5260 = vmatpush1.bf16.msra.mxu1 %v4807_v10  ;;  %v4866_v7 = vsel %vm3614_vm8, %v4840_v13, %v12645_v36  ;;  %v4733_v56 = vadd.f32 %v12437_v4, %v4693_v44 }
 0x739   :  { %v4708_v41 = vmul.f32 %v12428_v11, %v4668_v58  ;;  %v4695_v48 = vmul.f32 %v12430_v33, %v4655_v0  ;;  %v4669_v50 = vmax.f32 %v4638_v57, 0.0  ;;  %v4640_v54 = vpop.f32.mrb[71].mxu0  ;;  %v12656_v22 = vpop.permute.xlu0 %4899  ;;  %5261 = vmatprep.subr.bf16.mxu1 %v4866_v7  ;;  %v4734_v53 = vadd.f32 %v12437_v4, %v4694_v15 }
 0x73a   :  { %v4747_v39 = vadd.f32 %v12435_v1, %v4707_v14  ;;  %v4696_v18 = vmul.f32 %v12430_v33, %v4656_v5  ;;  %v4670_v47 = vmax.f32 %v4640_v54, 0.0  ;;  %v4924_v33 = vsel %vm433_vm10, %v12615_v45, %v12656_v22 }
 0x73b   :  { %v4748_v49 = vadd.f32 %v12435_v1, %v4708_v41  ;;  %v4709_v43 = vmul.f32 %v12428_v11, %v4669_v50  ;;  %v12664_v51 = vpop.permute.xlu1 %4957  ;;  %4913 = vrot.lane.b32.xlu1 %v12577_v6, %s9325_s28  ;;  %v4735_v31 = vadd.f32 %v12437_v4, %v4695_v48  ;;  %v4923_v23 = vsel %vm433_vm10, %v12579_v26, %v12615_v45  ;;  %v12760_v50 = vld [vmem:[%s15359_s11] ss:$8 sps:$4 sm:$0xff]  }
 0x73c   :  { %v12670_v28 = vpack.c.bf16 %v4747_v39, %v4733_v56  ;;  %v4710_v55 = vmul.f32 %v12428_v11, %v4670_v47  ;;  %5262 = vmatpush1.bf16.msra.mxu1 %v4865_v2  ;;  %v4736_v13 = vadd.f32 %v12437_v4, %v4696_v18  ;;  %v4981_v45 = vsel %vm525_vm13, %v12575_v29, %v12613_v19 }
 0x73d   :  { %v12676_v42 = vpack.c.bf16 %v4748_v49, %v4734_v53  ;;  %v4749_v35 = vadd.f32 %v12435_v1, %v4709_v43  ;;  %v12680_v37 = vpop.permute.xlu0 %5015  ;;  %5263 = vmatprep.subr.bf16.mxu1 %v4924_v33  ;;  %v5039_v0 = vsel %vm3748_vm14, %v12591_v52, %v12627_v21  ;;  %v5097_v14 = vsel %vm2126_vm15, %v12585_v17, %v12621_v27 }
 0x73e   :  { %v4750_v38 = vadd.f32 %v12435_v1, %v4710_v55  ;;  %4799 = vrot.lane.b32.xlu0 %v12670_v28, %s9321_s2  ;;  %v4982_v1 = vsel %vm525_vm13, %v12613_v19, %v12664_v51  ;;  %v5040_v61 = vsel %vm3748_vm14, %v12627_v21, %v12680_v37  ;;  %v5155_v7 = vsel %vm15701_vm1, %v12599_v16, %v12635_v62 }
 0x73f   :  { %v12686_v11 = vpack.c.bf16 %v4749_v35, %v4735_v31  ;;  %v12688_v44 = vpop.permute.xlu1 %5073  ;;  %4971 = vrot.lane.b32.xlu1 %v12577_v6, %s9326_s29 }
 0x740   :  { %v12695_v8 = vpack.c.bf16 %v4750_v38, %v4736_v13  ;;  %5264 = vmatpush1.bf16.msra.mxu1 %v4923_v23  ;;  %v5098_v19 = vsel %vm2126_vm15, %v12621_v27, %v12688_v44 }
 0x741   :  { %v12700_v4 = vpop.permute.xlu0 %5131  ;;  %5265 = vmatprep.subr.bf16.mxu1 %v4982_v1 }
 0x742   :  { %4803 = vrot.lane.b32.xlu0 %v12686_v11, %s9321_s2  ;;  %v5156_v21 = vsel %vm15700_vm0, %v12635_v62, %v12700_v4  ;;  %v5213_v62 = vsel %vm15692_vm6, %v12597_v63, %v12633_v24  ;;  %vm15710_vm0 = vmmov %vm15709_vm3 }
 0x743   :  { %v12704_v30 = vpop.permute.xlu1 %5189  ;;  %5029 = vrot.lane.b32.xlu1 %v12577_v6, %s9330_s26  ;;  %vm15712_vm6 = vmmov %vm15710_vm0 }
 0x744   :  { %5266 = vmatpush1.bf16.msra.mxu1 %v4981_v45  ;;  %v5214_v27 = vsel %vm15702_vm12, %v12633_v24, %v12704_v30  ;;  %vm15711_vm12 = vmmov %vm15701_vm1 }
 0x745   :  { %v4786_v15 = vpop.permute.xlu0 %4785  ;;  %5267 = vmatprep.subr.bf16.mxu1 %v5040_v61 }
 0x746   :  { %4857 = vrot.lane.b32.xlu0 %v12670_v28, %s9329_s1 }
 0x747   :  { %v4844_v58 = vpop.permute.xlu1 %4843  ;;  %5087 = vrot.lane.b32.xlu1 %v12577_v6, %s9331_s27 }
 0x748   :  { %5268 = vmatpush1.bf16.msra.mxu1 %v5039_v0 }
 0x749   :  { %v4902_v32 = vpop.permute.xlu0 %4901  ;;  %5269 = vmatprep.subr.bf16.mxu1 %v5098_v19 }
 0x74a   :  { %4861 = vrot.lane.b32.xlu0 %v12686_v11, %s9329_s1  ;;  %v4925_v43 = vsel %vm433_vm10, %v12656_v22, %v4902_v32 }
 0x74b   :  { %v4960_v10 = vpop.permute.xlu1 %4959  ;;  %5145 = vrot.lane.b32.xlu1 %v12577_v6, %s9332_s6 }
 0x74c   :  { %5270 = vmatpush1.bf16.msra.mxu1 %v5097_v14  ;;  %v4983_v33 = vsel %vm525_vm13, %v12664_v51, %v4960_v10 }
 0x74d   :  { %v5018_v5 = vpop.permute.xlu0 %5017  ;;  %5271 = vmatprep.subr.bf16.mxu1 %v5156_v21 }
 0x74e   :  { %4915 = vrot.lane.b32.xlu0 %v12670_v28, %s9325_s28  ;;  %v5041_v51 = vsel %vm3748_vm14, %v12680_v37, %v5018_v5 }
 0x74f   :  { %v12736_v57 = vpop.permute.xlu1 %5075  ;;  %5203 = vrot.lane.b32.xlu1 %v12577_v6, %s9333_s25 }
 0x750   :  { %5272 = vmatpush1.bf16.msra.mxu1 %v5155_v7 }
 0x751   :  { %v12746_v41 = vpop.permute.xlu0 %5133  ;;  %5273 = vmatprep.subr.bf16.mxu1 %v5214_v27 }
 0x752   :  { %4919 = vrot.lane.b32.xlu0 %v12686_v11, %s9325_s28 }
 0x753   :  { %v12750_v48 = vpop.permute.xlu1 %5191  ;;  %4801 = vrot.lane.b32.xlu1 %v12676_v42, %s9321_s2 }
 0x754   :  { %5274 = vmatpush1.bf16.msra.mxu1 %v5213_v62  ;;  %v5215_v7 = vsel %vm15710_vm0, %v12704_v30, %v12750_v48 }
 0x755   :  { %v4846_v54 = vpop.permute.xlu0 %4845  ;;  %5343 = vmatprep.subr.bf16.mxu1 %v12484_v34  ;;  %v4809_v34 = vsel %vm15704_vm4, %v12639_v25, %v4786_v15 }
 0x756   :  { %4973 = vrot.lane.b32.xlu0 %v12670_v28, %s9326_s29  ;;  %v4868_v18 = vsel %vm3614_vm8, %v4844_v58, %v4846_v54 }
 0x757   :  { %v4788_v56 = vpop.permute.xlu1 %4787  ;;  %4859 = vrot.lane.b32.xlu1 %v12676_v42, %s9329_s1  ;;  %5290 = vmatmul.mubr.bf16.vlgmr.msra.gmra.mrb[68].mxu1 %v12760_v50 }
 0x758   :  { %v4810_v24 = vsel %vm15703_vm11, %v4786_v15, %v4788_v56  ;;  %5344 = vmatpush1.bf16.msra.mxu1 %v12482_v9  ;;  %8528 = vmatprep.mubr.msk.bf16.mxu1 %vm2126_vm15, %v12493_v60  ;;  %v4867_v9 = vsel %vm3614_vm8, %v12645_v36, %v4844_v58  ;;  %v5099_v15 = vsel %vm2126_vm15, %v12688_v44, %v12736_v57  ;;  %vm15713_vm11 = vmmov %vm15710_vm0 }
 0x759   :  { %5302 = vmatprep.subr.bf16.mxu0 %v4810_v24  ;;  %v12774_v39 = vpop.permute.xlu0 %4961 }
 0x75a   :  { %4977 = vrot.lane.b32.xlu0 %v12686_v11, %s9326_s29  ;;  %5303 = vmatpush1.bf16.msra.mxu0 %v4809_v34  ;;  %v4984_v36 = vsel %vm525_vm13, %v4960_v10, %v12774_v39  ;;  %v5157_v10 = vsel %vm15708_vm2, %v12700_v4, %v12746_v41  ;;  %vm15717_vm2 = vmmov %vm15710_vm0 }
 0x75b   :  { %5304 = vmatprep.subr.bf16.mxu0 %v4868_v18  ;;  %v4904_v47 = vpop.permute.xlu1 %4903  ;;  %4917 = vrot.lane.b32.xlu1 %v12676_v42, %s9325_s28 }
 0x75c   :  { %v4926_v25 = vsel %vm433_vm10, %v4902_v32, %v4904_v47 }
 0x75d   :  { %v12783_v53 = vpop.permute.xlu0 %5077 }
 0x75e   :  { %5031 = vrot.lane.b32.xlu0 %v12670_v28, %s9330_s26  ;;  %5305 = vmatpush1.bf16.msra.mxu0 %v4867_v9  ;;  %v5100_v1 = vsel %vm2126_vm15, %v12736_v57, %v12783_v53 }
 0x75f   :  { %5306 = vmatprep.subr.bf16.mxu0 %v4926_v25  ;;  %v12788_v49 = vpop.permute.xlu1 %5019  ;;  %4975 = vrot.lane.b32.xlu1 %v12676_v42, %s9326_s29 }
 0x760   :  { %v5042_v22 = vsel %vm3748_vm14, %v5018_v5, %v12788_v49 }
 0x761   :  { %v12794_v2 = vpop.permute.xlu0 %5193 }
 0x762   :  { %5035 = vrot.lane.b32.xlu0 %v12686_v11, %s9330_s26  ;;  %5307 = vmatpush1.bf16.msra.mxu0 %v4925_v43  ;;  %v5216_v21 = vsel %vm15709_vm3, %v12750_v48, %v12794_v2  ;;  %v5626_v43 = vld [vmem:[%s15361_s13] sm:$0xff]  ;;  %vm15718_vm3 = vmmov %vm15710_vm0 }
 0x763   :  { %5308 = vmatprep.subr.bf16.mxu0 %v4984_v36  ;;  %v12800_v55 = vpop.permute.xlu1 %5135  ;;  %5033 = vrot.lane.b32.xlu1 %v12676_v42, %s9330_s26  ;;  %vm15719_vm0 = vmmov %vm15704_vm4 }
 0x764   :  { %v5158_v0 = vsel %vm15707_vm7, %v12746_v41, %v12800_v55  ;;  %vm15716_vm7 = vmmov %vm15701_vm1 }
 0x765   :  { %v12806_v31 = vpop.permute.xlu0 %4791 }
 0x766   :  { %5089 = vrot.lane.b32.xlu0 %v12670_v28, %s9331_s27  ;;  %5309 = vmatpush1.bf16.msra.mxu0 %v4983_v33 }
 0x767   :  { %5310 = vmatprep.subr.bf16.mxu0 %v5042_v22  ;;  %v4790_v35 = vpop.permute.xlu1 %4789  ;;  %5091 = vrot.lane.b32.xlu1 %v12676_v42, %s9331_s27 }
 0x768   :  { %v4812_v13 = vsel %vm15705_vm9, %v4790_v35, %v12806_v31  ;;  %v4811_v38 = vsel %vm15706_vm5, %v4788_v56, %v4790_v35  ;;  %vm15714_vm9 = vmmov %vm15704_vm4 }
 0x769   :  { %5345 = vmatprep.subr.bf16.mxu1 %v4812_v13  ;;  %v12819_v23 = vpop.permute.xlu0 %4849  ;;  %vm15715_vm5 = vmmov %vm15701_vm1 }
 0x76a   :  { %5093 = vrot.lane.b32.xlu0 %v12686_v11, %s9331_s27  ;;  %5311 = vmatpush1.bf16.msra.mxu0 %v5041_v51 }
 0x76b   :  { %5346 = vmatpush1.bf16.msra.mxu1 %v4811_v38  ;;  %5312 = vmatprep.subr.bf16.mxu0 %v5100_v1  ;;  %v4848_v45 = vpop.permute.xlu1 %4847  ;;  %v5627_v38 = vld [vmem:[%s15361_s13 + $0x8] sm:$0xff] }
 0x76c   :  { %5149 = vrot.lane.b32.xlu1 %v12676_v42, %s9332_s6  ;;  %v4870_v61 = vsel %vm3614_vm8, %v4848_v45, %v12819_v23  ;;  %v4869_v37 = vsel %vm3614_vm8, %v4846_v54, %v4848_v45 }
 0x76d   :  { %5347 = vmatprep.subr.bf16.mxu1 %v4870_v61  ;;  %v12834_v58 = vpop.permute.xlu0 %4907 }
 0x76e   :  { %5147 = vrot.lane.b32.xlu0 %v12670_v28, %s9332_s6  ;;  %5313 = vmatpush1.bf16.msra.mxu0 %v5099_v15 }
 0x76f   :  { %5348 = vmatpush1.bf16.msra.mxu1 %v4869_v37  ;;  %5314 = vmatprep.subr.bf16.mxu0 %v5158_v0  ;;  %v4906_v19 = vpop.permute.xlu1 %4905 }
 0x770   :  { %5207 = vrot.lane.b32.xlu1 %v12676_v42, %s9333_s25  ;;  %v4928_v32 = vsel %vm433_vm10, %v4906_v19, %v12834_v58  ;;  %v4927_v44 = vsel %vm433_vm10, %v4904_v47, %v4906_v19  ;;  %v5586_v47 = vld [vmem:[%s15360_s12] sm:$0xff] }
 0x771   :  { %5349 = vmatprep.subr.bf16.mxu1 %v4928_v32  ;;  %v12849_v14 = vpop.permute.xlu0 %4965 }
 0x772   :  { %5151 = vrot.lane.b32.xlu0 %v12686_v11, %s9332_s6  ;;  %5315 = vmatpush1.bf16.msra.mxu0 %v5157_v10 }
 0x773   :  { %5350 = vmatpush1.bf16.msra.mxu1 %v4927_v44  ;;  %5316 = vmatprep.subr.bf16.mxu0 %v5216_v21  ;;  %v4964_v5 = vpop.permute.xlu1 %4963 }
 0x774   :  { %4805 = vrot.lane.b32.xlu1 %v12695_v8, %s9321_s2  ;;  %v4986_v57 = vsel %vm525_vm13, %v4964_v5, %v12849_v14  ;;  %v4985_v4 = vsel %vm525_vm13, %v12774_v39, %v4964_v5 }
 0x775   :  { %5351 = vmatprep.subr.bf16.mxu1 %v4986_v57  ;;  %v12865_v27 = vpop.permute.xlu0 %5023 }
 0x776   :  { %5205 = vrot.lane.b32.xlu0 %v12670_v28, %s9333_s25  ;;  %5317 = vmatpush1.bf16.msra.mxu0 %v5215_v7 }
 0x777   :  { %5352 = vmatpush1.bf16.msra.mxu1 %v4985_v4  ;;  %5386 = vmatprep.subr.bf16.mxu0 %v12527_v20  ;;  %v5022_v41 = vpop.permute.xlu1 %5021 }
 0x778   :  { %4921 = vrot.lane.b32.xlu1 %v12695_v8, %s9325_s28  ;;  %v5044_v62 = vsel %vm3748_vm14, %v5022_v41, %v12865_v27  ;;  %v5043_v54 = vsel %vm3748_vm14, %v12788_v49, %v5022_v41 }
 0x779   :  { %5333 = vmatmul.mubr.bf16.vlgmr.msra.gmra.mrb[72].mxu0 %v12760_v50  ;;  %5353 = vmatprep.subr.bf16.mxu1 %v5044_v62  ;;  %v12877_v30 = vpop.permute.xlu0 %5081 }
 0x77a   :  { %5209 = vrot.lane.b32.xlu0 %v12686_v11, %s9333_s25  ;;  %5387 = vmatpush1.bf16.msra.mxu0 %v12525_v40 }
 0x77b   :  { %5354 = vmatpush1.bf16.msra.mxu1 %v5043_v54  ;;  %v5080_v20 = vpop.permute.xlu1 %5079  ;;  %8529 = vmatprep.mubr.msk.bf16.mxu0 %vm2126_vm15, %v12493_v60 }
 0x77c   :  { %5037 = vrot.lane.b32.xlu1 %v12695_v8, %s9330_s26  ;;  %v5102_v48 = vsel %vm2126_vm15, %v5080_v20, %v12877_v30  ;;  %v5101_v56 = vsel %vm2126_vm15, %v12783_v53, %v5080_v20 }
 0x77d   :  { %5355 = vmatprep.subr.bf16.mxu1 %v5102_v48  ;;  %v12890_v24 = vpop.permute.xlu0 %5139 }
 0x77e   :  { %4863 = vrot.lane.b32.xlu0 %v12695_v8, %s9329_s1 }
 0x77f   :  { %5356 = vmatpush1.bf16.msra.mxu1 %v5101_v56  ;;  %v5138_v40 = vpop.permute.xlu1 %5137 }
 0x780   :  { %5153 = vrot.lane.b32.xlu1 %v12695_v8, %s9332_s6  ;;  %v5160_v34 = vsel %vm15701_vm1, %v5138_v40, %v12890_v24  ;;  %v5159_v39 = vsel %vm15711_vm12, %v12800_v55, %v5138_v40  ;;  %vm15720_vm1 = vmmov %vm15719_vm0 }
 0x781   :  { %5357 = vmatprep.subr.bf16.mxu1 %v5160_v34  ;;  %v12900_v18 = vpop.permute.xlu0 %5197  ;;  %vm15721_vm12 = vmmov %vm15719_vm0 }
 0x782   :  { %4979 = vrot.lane.b32.xlu0 %v12695_v8, %s9326_s29 }
 0x783   :  { %5358 = vmatpush1.bf16.msra.mxu1 %v5159_v39  ;;  %v5196_v9 = vpop.permute.xlu1 %5195 }
 0x784   :  { %5590 = vperm.xlu1 %9080, %v5586_v47   ;;  %v5218_v53 = vsel %vm15712_vm6, %v5196_v9, %v12900_v18  ;;  %v5217_v25 = vsel %vm15713_vm11, %v12794_v2, %v5196_v9  ;;  %vm15722_vm6 = vmmov %vm15719_vm0 }
 0x785   :  { %5359 = vmatprep.subr.bf16.mxu1 %v5218_v53  ;;  %v12911_v49 = vpop.permute.xlu0 %4795  ;;  %vm15723_vm11 = vmmov %vm15715_vm5 }
 0x786   :  { %5095 = vrot.lane.b32.xlu0 %v12695_v8, %s9331_s27 }
 0x787   :  { %5360 = vmatpush1.bf16.msra.mxu1 %v5217_v25  ;;  %v4794_v36 = vpop.permute.xlu1 %4793 }
 0x788   :  { %5429 = vmatprep.subr.bf16.mxu1 %v12577_v6  ;;  %5630 = vperm.xlu1 %9080, %v5626_v43   ;;  %v4814_v55 = vsel %vm15704_vm4, %v4794_v36, %v12911_v49  ;;  %v4813_v2 = vsel %vm15714_vm9, %v12806_v31, %v4794_v36  ;;  %v5587_v6 = vld [vmem:[%s15360_s12 + $0x8] sm:$0xff]  ;;  %vm15724_vm4 = vmmov %vm15715_vm5 }
 0x789   :  { %5388 = vmatprep.subr.bf16.mxu0 %v4814_v55  ;;  %v12923_v33 = vpop.permute.xlu0 %4853  ;;  %vm15725_vm9 = vmmov %vm15724_vm4 }
 0x78a   :  { %5376 = vmatmul.mubr.bf16.vlgmr.msra.gmra.mrb[72].mxu1 %v12760_v50  ;;  %5211 = vrot.lane.b32.xlu0 %v12695_v8, %s9333_s25 }
 0x78b   :  { %5389 = vmatpush1.bf16.msra.mxu0 %v4813_v2  ;;  %5430 = vmatpush1.bf16.msra.mxu1 %v12573_v59  ;;  %v4852_v22 = vpop.permute.xlu1 %4851 }
 0x78c   :  { %v4872_v35 = vsel %vm3614_vm8, %v4852_v22, %v12923_v33  ;;  %v4871_v31 = vsel %vm3614_vm8, %v12819_v23, %v4852_v22  ;;  %8530 = vmatprep.mubr.msk.bf16.mxu1 %vm2126_vm15, %v12493_v60 }
 0x78d   :  { %5390 = vmatprep.subr.bf16.mxu0 %v4872_v35  ;;  %v12938_v13 = vpop.permute.xlu0 %4911 }
 0x78e   :  { %5595 = vperm.xlu0 %9079, %v5587_v6  }
 0x78f   :  { %5391 = vmatpush1.bf16.msra.mxu0 %v4871_v31  ;;  %v4910_v59 = vpop.permute.xlu1 %4909 }
 0x790   :  { %v4930_v51 = vsel %vm433_vm10, %v4910_v59, %v12938_v13  ;;  %v4929_v1 = vsel %vm433_vm10, %v12834_v58, %v4910_v59 }
 0x791   :  { %5392 = vmatprep.subr.bf16.mxu0 %v4930_v51  ;;  %v12947_v23 = vpop.permute.xlu0 %4969 }
 0x792   :  { %5635 = vperm.xlu0 %9079, %v5627_v38  }
 0x793   :  { %5393 = vmatpush1.bf16.msra.mxu0 %v4929_v1  ;;  %v4968_v45 = vpop.permute.xlu1 %4967 }
 0x794   :  { %v4988_v61 = vsel %vm525_vm13, %v4968_v45, %v12947_v23  ;;  %v4987_v37 = vsel %vm525_vm13, %v12849_v14, %v4968_v45 }
 0x795   :  { %5394 = vmatprep.subr.bf16.mxu0 %v4988_v61  ;;  %v12953_v15 = vpop.permute.xlu0 %5027 }
 0x797   :  { %5395 = vmatpush1.bf16.msra.mxu0 %v4987_v37  ;;  %v5026_v0 = vpop.permute.xlu1 %5025 }
 0x798   :  { %v5046_v58 = vsel %vm3748_vm14, %v5026_v0, %v12953_v15  ;;  %v5045_v19 = vsel %vm3748_vm14, %v12865_v27, %v5026_v0 }
 0x799   :  { %5396 = vmatprep.subr.bf16.mxu0 %v5046_v58  ;;  %v12959_v32 = vpop.permute.xlu0 %5085 }
 0x79b   :  { %5397 = vmatpush1.bf16.msra.mxu0 %v5045_v19  ;;  %v5084_v44 = vpop.permute.xlu1 %5083 }
 0x79c   :  { %v5104_v10 = vsel %vm2126_vm15, %v5084_v44, %v12959_v32  ;;  %v5103_v14 = vsel %vm2126_vm15, %v12877_v30, %v5084_v44 }
 0x79d   :  { %5398 = vmatprep.subr.bf16.mxu0 %v5104_v10  ;;  %v12965_v21 = vpop.permute.xlu0 %5143 }
 0x79f   :  { %5399 = vmatpush1.bf16.msra.mxu0 %v5103_v14  ;;  %v5142_v5 = vpop.permute.xlu1 %5141 }
 0x7a0   :  { %v5162_v57 = vsel %vm15715_vm5, %v5142_v5, %v12965_v21  ;;  %v5161_v4 = vsel %vm15716_vm7, %v12890_v24, %v5142_v5  ;;  %vm15726_vm5 = vmmov %vm15724_vm4 }
 0x7a1   :  { %5400 = vmatprep.subr.bf16.mxu0 %v5162_v57  ;;  %v12971_v7 = vpop.permute.xlu0 %5201  ;;  %vm15727_vm7 = vmmov %vm15717_vm2 }
 0x7a3   :  { %5401 = vmatpush1.bf16.msra.mxu0 %v5161_v4  ;;  %v5200_v27 = vpop.permute.xlu1 %5199 }
 0x7a4   :  { %v5220_v41 = vsel %vm15717_vm2, %v5200_v27, %v12971_v7  ;;  %v5219_v62 = vsel %vm15718_vm3, %v12900_v18, %v5200_v27  ;;  %vm15728_vm3 = vmmov %vm15717_vm2 }
 0x7a5   :  { %5402 = vmatprep.subr.bf16.mxu0 %v5220_v41 }
 0x7a7   :  { %5403 = vmatpush1.bf16.msra.mxu0 %v5219_v62  ;;  %v4798_v54 = vpop.permute.xlu1 %4797 }
 0x7a8   :  { %5472 = vmatprep.subr.bf16.mxu0 %v12676_v42  ;;  %v4815_v24 = vsel %vm15720_vm1, %v12911_v49, %v4798_v54 }
 0x7aa   :  { %5419 = vmatmul.mubr.bf16.vlgmr.msra.gmra.mrb[76].mxu0 %v12760_v50 }
 0x7ab   :  { %5473 = vmatpush1.bf16.msra.mxu0 %v12670_v28  ;;  %v4856_v30 = vpop.permute.xlu1 %4855  ;;  %8531 = vmatprep.mubr.msk.bf16.mxu0 %vm2126_vm15, %v12493_v60 }
 0x7ac   :  { %v4873_v18 = vsel %vm3614_vm8, %v12923_v33, %v4856_v30 }
 0x7af   :  { %v4914_v20 = vpop.permute.xlu1 %4913 }
 0x7b0   :  { %v4800_v48 = vpop.permute.xlu0 %4799  ;;  %v4931_v43 = vsel %vm433_vm10, %v12938_v13, %v4914_v20 }
 0x7b1   :  { %v4816_v56 = vsel %vm15719_vm0, %v4798_v54, %v4800_v48  ;;  %vm15729_vm0 = vmmov %vm15717_vm2 }
 0x7b2   :  { %5431 = vmatprep.subr.bf16.mxu1 %v4816_v56 }
 0x7b3   :  { %v4972_v40 = vpop.permute.xlu1 %4971  ;;  %5432 = vmatpush1.bf16.msra.mxu1 %v4815_v24 }
 0x7b4   :  { %v12985_v34 = vpop.permute.xlu0 %4803  ;;  %v4989_v31 = vsel %vm525_vm13, %v12947_v23, %v4972_v40 }
 0x7b7   :  { %v5030_v42 = vpop.permute.xlu1 %5029 }
 0x7b8   :  { %v4858_v39 = vpop.permute.xlu0 %4857  ;;  %v5047_v0 = vsel %vm3748_vm14, %v12953_v15, %v5030_v42 }
 0x7b9   :  { %v4874_v28 = vsel %vm3614_vm8, %v4856_v30, %v4858_v39 }
 0x7ba   :  { %5433 = vmatprep.subr.bf16.mxu1 %v4874_v28 }
 0x7bb   :  { %v5088_v47 = vpop.permute.xlu1 %5087  ;;  %5434 = vmatpush1.bf16.msra.mxu1 %v4873_v18 }
 0x7bc   :  { %v12990_v9 = vpop.permute.xlu0 %4861  ;;  %v5105_v27 = vsel %vm2126_vm15, %v12959_v32, %v5088_v47 }
 0x7bf   :  { %v5146_v53 = vpop.permute.xlu1 %5145 }
 0x7c0   :  { %v4916_v25 = vpop.permute.xlu0 %4915  ;;  %v5163_v24 = vsel %vm15724_vm4, %v12965_v21, %v5146_v53 }
 0x7c1   :  { %v4932_v49 = vsel %vm433_vm10, %v4914_v20, %v4916_v25 }
 0x7c2   :  { %5435 = vmatprep.subr.bf16.mxu1 %v4932_v49 }
 0x7c3   :  { %v12995_v36 = vpop.permute.xlu1 %5203  ;;  %5436 = vmatpush1.bf16.msra.mxu1 %v4931_v43 }
 0x7c4   :  { %v12997_v55 = vpop.permute.xlu0 %4919 }
 0x7c7   :  { %v4802_v2 = vpop.permute.xlu1 %4801 }
 0x7c8   :  { %v4974_v22 = vpop.permute.xlu0 %4973  ;;  %v4818_v33 = vsel %vm15721_vm12, %v4802_v2, %v12985_v34  ;;  %v4817_v6 = vsel %vm15722_vm6, %v4800_v48, %v4802_v2  ;;  %vm15730_vm12 = vmmov %vm15720_vm1 }
 0x7c9   :  { %5474 = vmatprep.subr.bf16.mxu0 %v4818_v33  ;;  %v4990_v35 = vsel %vm525_vm13, %v4972_v40, %v4974_v22  ;;  %vm15731_vm6 = vmmov %vm15724_vm4 }
 0x7ca   :  { %5437 = vmatprep.subr.bf16.mxu1 %v4990_v35  ;;  %5475 = vmatpush1.bf16.msra.mxu0 %v4817_v6 }
 0x7cb   :  { %v4860_v13 = vpop.permute.xlu1 %4859  ;;  %5438 = vmatpush1.bf16.msra.mxu1 %v4989_v31 }
 0x7cc   :  { %v13005_v59 = vpop.permute.xlu0 %4977  ;;  %v4876_v38 = vsel %vm3614_vm8, %v4860_v13, %v12990_v9  ;;  %v4875_v51 = vsel %vm3614_vm8, %v4858_v39, %v4860_v13 }
 0x7cd   :  { %5476 = vmatprep.subr.bf16.mxu0 %v4876_v38 }
 0x7ce   :  { %5477 = vmatpush1.bf16.msra.mxu0 %v4875_v51 }
 0x7cf   :  { %v4918_v1 = vpop.permute.xlu1 %4917 }
 0x7d0   :  { %v5032_v45 = vpop.permute.xlu0 %5031  ;;  %v4934_v61 = vsel %vm433_vm10, %v4918_v1, %v12997_v55  ;;  %v4933_v37 = vsel %vm433_vm10, %v4916_v25, %v4918_v1 }
 0x7d1   :  { %5478 = vmatprep.subr.bf16.mxu0 %v4934_v61  ;;  %v5048_v23 = vsel %vm3748_vm14, %v5030_v42, %v5032_v45 }
 0x7d2   :  { %5439 = vmatprep.subr.bf16.mxu1 %v5048_v23  ;;  %5479 = vmatpush1.bf16.msra.mxu0 %v4933_v37 }
 0x7d3   :  { %v4976_v58 = vpop.permute.xlu1 %4975  ;;  %5440 = vmatpush1.bf16.msra.mxu1 %v5047_v0 }
 0x7d4   :  { %v13016_v19 = vpop.permute.xlu0 %5035  ;;  %v4992_v44 = vsel %vm525_vm13, %v4976_v58, %v13005_v59  ;;  %v4991_v10 = vsel %vm525_vm13, %v4974_v22, %v4976_v58 }
 0x7d5   :  { %5480 = vmatprep.subr.bf16.mxu0 %v4992_v44 }
 0x7d6   :  { %5481 = vmatpush1.bf16.msra.mxu0 %v4991_v10 }
 0x7d7   :  { %v5034_v14 = vpop.permute.xlu1 %5033 }
 0x7d8   :  { %v5090_v5 = vpop.permute.xlu0 %5089  ;;  %v5050_v57 = vsel %vm3748_vm14, %v5034_v14, %v13016_v19  ;;  %v5049_v4 = vsel %vm3748_vm14, %v5032_v45, %v5034_v14 }
 0x7d9   :  { %5482 = vmatprep.subr.bf16.mxu0 %v5050_v57  ;;  %v5106_v15 = vsel %vm2126_vm15, %v5088_v47, %v5090_v5  ;;  %v5221_v47 = vsel %vm15717_vm2, %v12971_v7, %v12995_v36  ;;  %vm15737_vm2 = vmmov %vm15731_vm6 }
 0x7da   :  { %5441 = vmatprep.subr.bf16.mxu1 %v5106_v15  ;;  %5483 = vmatpush1.bf16.msra.mxu0 %v5049_v4 }
 0x7db   :  { %v5092_v41 = vpop.permute.xlu1 %5091  ;;  %5442 = vmatpush1.bf16.msra.mxu1 %v5105_v27 }
 0x7dc   :  { %v5094_v62 = vpop.permute.xlu0 %5093  ;;  %v5107_v30 = vsel %vm2126_vm15, %v5090_v5, %v5092_v41 }
 0x7dd   :  { %v5108_v54 = vsel %vm2126_vm15, %v5092_v41, %v5094_v62 }
 0x7de   :  { %5484 = vmatprep.subr.bf16.mxu0 %v5108_v54 }
 0x7df   :  { %5485 = vmatpush1.bf16.msra.mxu0 %v5107_v30  ;;  %v5150_v20 = vpop.permute.xlu1 %5149 }
 0x7e0   :  { %v5148_v48 = vpop.permute.xlu0 %5147 }
 0x7e1   :  { %v5164_v56 = vsel %vm15723_vm11, %v5146_v53, %v5148_v48  ;;  %v5165_v39 = vsel %vm15726_vm5, %v5148_v48, %v5150_v20  ;;  %vm15732_vm11 = vmmov %vm15724_vm4 }
 0x7e2   :  { %5443 = vmatprep.subr.bf16.mxu1 %v5164_v56  ;;  %vm15733_vm4 = vmmov %vm15729_vm0 }
 0x7e3   :  { %5444 = vmatpush1.bf16.msra.mxu1 %v5163_v24  ;;  %v5208_v42 = vpop.permute.xlu1 %5207  ;;  %vm15735_vm5 = vmmov %vm15720_vm1 }
 0x7e4   :  { %v5152_v40 = vpop.permute.xlu0 %5151 }
 0x7e5   :  { %v5166_v32 = vsel %vm15725_vm9, %v5150_v20, %v5152_v40  ;;  %vm15734_vm9 = vmmov %vm15729_vm0 }
 0x7e6   :  { %5486 = vmatprep.subr.bf16.mxu0 %v5166_v32 }
 0x7e7   :  { %5487 = vmatpush1.bf16.msra.mxu0 %v5165_v39  ;;  %v4806_v21 = vpop.permute.xlu1 %4805 }
 0x7e8   :  { %v5206_v28 = vpop.permute.xlu0 %5205  ;;  %v4835_v43 = vsel %vm15720_vm1, %v4806_v21, %v12562_v46 }
 0x7e9   :  { %v5222_v18 = vsel %vm15727_vm7, %v12995_v36, %v5206_v28  ;;  %v5223_v49 = vsel %vm15729_vm0, %v5206_v28, %v5208_v42  ;;  %vm15736_vm7 = vmmov %vm15720_vm1 }
 0x7ea   :  { %5445 = vmatprep.subr.bf16.mxu1 %v5222_v18  ;;  %vm15739_vm1 = vmmov %vm15729_vm0 }
 0x7eb   :  { %5446 = vmatpush1.bf16.msra.mxu1 %v5221_v47  ;;  %v4922_v36 = vpop.permute.xlu1 %4921 }
 0x7ec   :  { %v5210_v53 = vpop.permute.xlu0 %5209  ;;  %5515 = vmatprep.subr.bf16.mxu1 %v12695_v8  ;;  %v4819_v8 = vsel %vm15730_vm12, %v12985_v34, %v4806_v21  ;;  %v4951_v46 = vsel %vm433_vm10, %v4922_v36, %v12579_v26  ;;  %vm15740_vm12 = vmmov %vm15735_vm5 }
 0x7ed   :  { %v5224_v25 = vsel %vm15728_vm3, %v5208_v42, %v5210_v53  ;;  %vm15738_vm3 = vmmov %vm15737_vm2 }
 0x7ee   :  { %5462 = vmatmul.mubr.bf16.vlgmr.msra.gmra.mrb[76].mxu1 %v12760_v50  ;;  %5488 = vmatprep.subr.bf16.mxu0 %v5224_v25 }
 0x7ef   :  { %5489 = vmatpush1.bf16.msra.mxu0 %v5223_v49  ;;  %5516 = vmatpush1.bf16.msra.mxu1 %v12686_v11  ;;  %v5038_v33 = vpop.permute.xlu1 %5037 }
 0x7f0   :  { %v4864_v2 = vpop.permute.xlu0 %4863  ;;  %5517 = vmatprep.subr.bf16.mxu1 %v4835_v43  ;;  %8532 = vmatprep.mubr.msk.bf16.mxu1 %vm2126_vm15, %v12493_v60  ;;  %v4935_v60 = vsel %vm433_vm10, %v12997_v55, %v4922_v36  ;;  %v5051_v26 = vsel %vm3748_vm14, %v13016_v19, %v5038_v33 }
 0x7f1   :  { %v4893_v7 = vsel %vm3614_vm8, %v4864_v2, %v12560_v12  ;;  %v4877_v11 = vsel %vm3614_vm8, %v12990_v9, %v4864_v2  ;;  %v5067_v9 = vsel %vm3748_vm14, %v5038_v33, %v12591_v52 }
 0x7f2   :  { %5505 = vmatmul.mubr.bf16.vlgmr.msra.gmra.mrb[80].mxu0 %v12760_v50 }
 0x7f3   :  { %5518 = vmatpush1.bf16.msra.mxu1 %v4819_v8  ;;  %v5154_v35 = vpop.permute.xlu1 %5153 }
 0x7f4   :  { %5519 = vmatprep.subr.bf16.mxu1 %v4893_v7  ;;  %v4980_v22 = vpop.permute.xlu0 %4979  ;;  %v5183_v31 = vsel %vm15731_vm6, %v5154_v35, %v12599_v16  ;;  %v5167_v52 = vsel %vm15732_vm11, %v5152_v40, %v5154_v35  ;;  %vm15741_vm6 = vmmov %vm15735_vm5 }
 0x7f5   :  { %v5009_v34 = vsel %vm525_vm13, %v4980_v22, %v12575_v29  ;;  %v4993_v12 = vsel %vm525_vm13, %v13005_v59, %v4980_v22  ;;  %vm15742_vm11 = vmmov %vm15737_vm2 }
 0x7f7   :  { %5520 = vmatpush1.bf16.msra.mxu1 %v4877_v11 }
 0x7f8   :  { %5521 = vmatprep.subr.bf16.mxu1 %v4951_v46  ;;  %v5096_v6 = vpop.permute.xlu0 %5095 }
 0x7f9   :  { %v5125_v55 = vsel %vm2126_vm15, %v5096_v6, %v12585_v17  ;;  %v5109_v29 = vsel %vm2126_vm15, %v5094_v62, %v5096_v6 }
 0x7fb   :  { %5522 = vmatpush1.bf16.msra.mxu1 %v4935_v60 }
 0x7fc   :  { %5523 = vmatprep.subr.bf16.mxu1 %v5009_v34  ;;  %v5212_v13 = vpop.permute.xlu0 %5211 }
 0x7fd   :  { %v5241_v59 = vsel %vm15733_vm4, %v5212_v13, %v12597_v63  ;;  %v5225_v38 = vsel %vm15734_vm9, %v5210_v53, %v5212_v13  ;;  %vm15743_vm4 = vmmov %vm15737_vm2 }
 0x7fe   :  { %vm15744_vm9 = vmmov %vm15729_vm0 }
 0x7ff   :  { %5524 = vmatpush1.bf16.msra.mxu1 %v4993_v12 }
 0x800   :  { %5525 = vmatprep.subr.bf16.mxu1 %v5067_v9 }
 0x803   :  { %5526 = vmatpush1.bf16.msra.mxu1 %v5051_v26  ;;  %v13077_v17 = vpop.permute.xlu1 %5590 }
 0x804   :  { %5527 = vmatprep.subr.bf16.mxu1 %v5125_v55 }
 0x807   :  { %5528 = vmatpush1.bf16.msra.mxu1 %v5109_v29  ;;  %v13084_v10 = vpop.permute.xlu1 %5630 }
 0x808   :  { %5529 = vmatprep.subr.bf16.mxu1 %v5183_v31  ;;  %v13147_v31 = vld [vmem:[%s15362_s14 + $0x4] ss:$8 sps:$4 sm:$0xff]  }
 0x809   :  { %8535 = vmatprep.mubr.msk.bf16.mxu0 %vm2126_vm15, %v13147_v31 }
 0x80b   :  { %5530 = vmatpush1.bf16.msra.mxu1 %v5167_v52 }
 0x80c   :  { %5531 = vmatprep.subr.bf16.mxu1 %v5241_v59 }
 0x80d   :  { %v13079_v51 = vpop.permute.xlu0 %5595 }
 0x80f   :  { %5532 = vmatpush1.bf16.msra.mxu1 %v5225_v38 }
 0x812   :  { %5548 = vmatmul.mubr.bf16.vlgmr.msra.gmra.mrb[80].mxu1 %v12760_v50  ;;  %v13086_v50 = vpop.permute.xlu0 %5635 }
 0x813   :  { %8536 = vmatprep.mubr.msk.bf16.mxu1 %vm2126_vm15, %v13147_v31 }
 0x82a   :  { %v5291_v1 = vpop.f32.mrb[68].mxu1 }
 0x82b   :  { %v5558_v16 = vmax.f32 %v5291_v1, 0.0  ;;  %v5293_v45 = vpop.f32.mrb[69].mxu1 }
 0x82c   :  { %v5559_v61 = vmax.f32 %v5293_v45, 0.0  ;;  %v5295_v37 = vpop.f32.mrb[70].mxu1 }
 0x82d   :  { %v5598_v23 = vmul.f32 %v13077_v17, %v5558_v16  ;;  %v5572_v0 = vmax.f32 %v5295_v37, 0.0  ;;  %v5297_v58 = vpop.f32.mrb[71].mxu1 }
 0x82e   :  { %v5599_v63 = vmul.f32 %v13077_v17, %v5559_v61  ;;  %v5573_v19 = vmax.f32 %v5297_v58, 0.0 }
 0x82f   :  { %v5612_v44 = vmul.f32 %v13079_v51, %v5572_v0  ;;  %v5638_v5 = vadd.f32 %v13084_v10, %v5598_v23 }
 0x830   :  { %v5613_v14 = vmul.f32 %v13079_v51, %v5573_v19  ;;  %v5639_v4 = vadd.f32 %v13084_v10, %v5599_v63 }
 0x831   :  { %v5652_v57 = vadd.f32 %v13086_v50, %v5612_v44 }
 0x832   :  { %v5653_v15 = vadd.f32 %v13086_v50, %v5613_v14 }
 0x833   :  { %v5666_v27 = vpack.c.bf16 %v5652_v57, %v5638_v5 }
 0x834   :  { %v5667_v41 = vpack.c.bf16 %v5653_v15, %v5639_v4 }
 0x835   :  { %5752 = vrot.lane.b32.xlu0 %v5666_v27, %s9329_s1  ;;  %5694 = vrot.lane.b32.xlu1 %v5666_v27, %s9321_s2 }
 0x836   :  { %6172 = vmatprep.subr.bf16.mxu0 %v5667_v41 }
 0x837   :  { %6173 = vmatpush1.bf16.msra.mxu0 %v5666_v27 }
 0x839   :  { %5868 = vrot.lane.b32.xlu0 %v5666_v27, %s9326_s29  ;;  %5810 = vrot.lane.b32.xlu1 %v5666_v27, %s9325_s28 }
 0x83d   :  { %5984 = vrot.lane.b32.xlu0 %v5666_v27, %s9331_s27  ;;  %5926 = vrot.lane.b32.xlu1 %v5666_v27, %s9330_s26 }
 0x841   :  { %6100 = vrot.lane.b32.xlu0 %v5666_v27, %s9333_s25  ;;  %6042 = vrot.lane.b32.xlu1 %v5666_v27, %s9332_s6 }
 0x845   :  { %5754 = vrot.lane.b32.xlu0 %v5667_v41, %s9329_s1  ;;  %5696 = vrot.lane.b32.xlu1 %v5667_v41, %s9321_s2 }
 0x849   :  { %5870 = vrot.lane.b32.xlu0 %v5667_v41, %s9326_s29  ;;  %5812 = vrot.lane.b32.xlu1 %v5667_v41, %s9325_s28 }
 0x84c   :  { %v5334_v62 = vpop.f32.mrb[72].mxu0 }
 0x84d   :  { %v5560_v54 = vmax.f32 %v5334_v62, 0.0  ;;  %v5336_v30 = vpop.f32.mrb[73].mxu0  ;;  %5986 = vrot.lane.b32.xlu0 %v5667_v41, %s9331_s27  ;;  %5928 = vrot.lane.b32.xlu1 %v5667_v41, %s9330_s26 }
 0x84e   :  { %v5561_v20 = vmax.f32 %v5336_v30, 0.0  ;;  %v5338_v48 = vpop.f32.mrb[74].mxu0 }
 0x84f   :  { %v5600_v56 = vmul.f32 %v13077_v17, %v5560_v54  ;;  %v5574_v24 = vmax.f32 %v5338_v48, 0.0  ;;  %v5340_v40 = vpop.f32.mrb[75].mxu0 }
 0x850   :  { %v5601_v32 = vmul.f32 %v13077_v17, %v5561_v20  ;;  %v5575_v42 = vmax.f32 %v5340_v40, 0.0 }
 0x851   :  { %v5614_v39 = vmul.f32 %v13079_v51, %v5574_v24  ;;  %6102 = vrot.lane.b32.xlu0 %v5667_v41, %s9333_s25  ;;  %6044 = vrot.lane.b32.xlu1 %v5667_v41, %s9332_s6  ;;  %v5640_v18 = vadd.f32 %v13084_v10, %v5600_v56 }
 0x852   :  { %v5615_v28 = vmul.f32 %v13079_v51, %v5575_v42  ;;  %v5641_v21 = vadd.f32 %v13084_v10, %v5601_v32 }
 0x853   :  { %v5654_v47 = vadd.f32 %v13086_v50, %v5614_v39 }
 0x854   :  { %v5655_v53 = vadd.f32 %v13086_v50, %v5615_v28 }
 0x855   :  { %v5668_v25 = vpack.c.bf16 %v5654_v47, %v5640_v18 }
 0x856   :  { %v13117_v49 = vpack.c.bf16 %v5655_v53, %v5641_v21 }
 0x857   :  { %5698 = vrot.lane.b32.xlu0 %v5668_v25, %s9321_s2  ;;  %5756 = vrot.lane.b32.xlu1 %v5668_v25, %s9329_s1 }
 0x858   :  { %6215 = vmatprep.subr.bf16.mxu1 %v13117_v49 }
 0x859   :  { %6216 = vmatpush1.bf16.msra.mxu1 %v5668_v25 }
 0x85b   :  { %5814 = vrot.lane.b32.xlu0 %v5668_v25, %s9325_s28  ;;  %5872 = vrot.lane.b32.xlu1 %v5668_v25, %s9326_s29 }
 0x85d   :  { %v5377_v43 = vpop.f32.mrb[72].mxu1 }
 0x85e   :  { %v5562_v2 = vmax.f32 %v5377_v43, 0.0  ;;  %v5379_v8 = vpop.f32.mrb[73].mxu1 }
 0x85f   :  { %v5563_v7 = vmax.f32 %v5379_v8, 0.0  ;;  %v5381_v36 = vpop.f32.mrb[74].mxu1  ;;  %5930 = vrot.lane.b32.xlu0 %v5668_v25, %s9330_s26  ;;  %5988 = vrot.lane.b32.xlu1 %v5668_v25, %s9331_s27 }
 0x860   :  { %v5602_v11 = vmul.f32 %v13077_v17, %v5562_v2  ;;  %v5576_v46 = vmax.f32 %v5381_v36, 0.0  ;;  %v5383_v22 = vpop.f32.mrb[75].mxu1 }
 0x861   :  { %v5603_v60 = vmul.f32 %v13077_v17, %v5563_v7  ;;  %v5577_v34 = vmax.f32 %v5383_v22, 0.0 }
 0x862   :  { %v5616_v33 = vmul.f32 %v13079_v51, %v5576_v46  ;;  %v5642_v9 = vadd.f32 %v13084_v10, %v5602_v11 }
 0x863   :  { %v5617_v12 = vmul.f32 %v13079_v51, %v5577_v34  ;;  %6046 = vrot.lane.b32.xlu0 %v5668_v25, %s9332_s6  ;;  %6104 = vrot.lane.b32.xlu1 %v5668_v25, %s9333_s25  ;;  %v5643_v26 = vadd.f32 %v13084_v10, %v5603_v60 }
 0x864   :  { %v5656_v6 = vadd.f32 %v13086_v50, %v5616_v33 }
 0x865   :  { %v5657_v55 = vadd.f32 %v13086_v50, %v5617_v12 }
 0x866   :  { %v13136_v35 = vpack.c.bf16 %v5656_v6, %v5642_v9 }
 0x867   :  { %v13138_v29 = vpack.c.bf16 %v5657_v55, %v5643_v26 }
 0x868   :  { %5760 = vrot.lane.b32.xlu0 %v13136_v35, %s9329_s1  ;;  %5702 = vrot.lane.b32.xlu1 %v13136_v35, %s9321_s2 }
 0x86c   :  { %5876 = vrot.lane.b32.xlu0 %v13136_v35, %s9326_s29  ;;  %5818 = vrot.lane.b32.xlu1 %v13136_v35, %s9325_s28 }
 0x870   :  { %5992 = vrot.lane.b32.xlu0 %v13136_v35, %s9331_s27  ;;  %5934 = vrot.lane.b32.xlu1 %v13136_v35, %s9330_s26 }
 0x874   :  { %6050 = vrot.lane.b32.xlu1 %v13136_v35, %s9332_s6  ;;  %5762 = vrot.lane.b32.xlu0 %v13138_v29, %s9329_s1 }
 0x878   :  { %5878 = vrot.lane.b32.xlu0 %v13138_v29, %s9326_s29  ;;  %5704 = vrot.lane.b32.xlu1 %v13138_v29, %s9321_s2 }
 0x87c   :  { %5994 = vrot.lane.b32.xlu0 %v13138_v29, %s9331_s27  ;;  %5820 = vrot.lane.b32.xlu1 %v13138_v29, %s9325_s28 }
 0x87d   :  { %v5420_v13 = vpop.f32.mrb[76].mxu0 }
 0x87e   :  { %v5564_v52 = vmax.f32 %v5420_v13, 0.0  ;;  %v5422_v59 = vpop.f32.mrb[77].mxu0 }
 0x87f   :  { %v5565_v38 = vmax.f32 %v5422_v59, 0.0  ;;  %v5424_v1 = vpop.f32.mrb[78].mxu0 }
 0x880   :  { %v5604_v16 = vmul.f32 %v13077_v17, %v5564_v52  ;;  %v5578_v45 = vmax.f32 %v5424_v1, 0.0  ;;  %v5426_v61 = vpop.f32.mrb[79].mxu0  ;;  %6110 = vrot.lane.b32.xlu0 %v13138_v29, %s9333_s25  ;;  %5936 = vrot.lane.b32.xlu1 %v13138_v29, %s9330_s26 }
 0x881   :  { %v5605_v37 = vmul.f32 %v13077_v17, %v5565_v38  ;;  %v5579_v23 = vmax.f32 %v5426_v61, 0.0 }
 0x882   :  { %v5618_v0 = vmul.f32 %v13079_v51, %v5578_v45  ;;  %v5644_v63 = vadd.f32 %v13084_v10, %v5604_v16 }
 0x883   :  { %v5619_v58 = vmul.f32 %v13079_v51, %v5579_v23  ;;  %v5645_v44 = vadd.f32 %v13084_v10, %v5605_v37 }
 0x884   :  { %v5658_v19 = vadd.f32 %v13086_v50, %v5618_v0  ;;  %6052 = vrot.lane.b32.xlu1 %v13138_v29, %s9332_s6 }
 0x885   :  { %v5659_v14 = vadd.f32 %v13086_v50, %v5619_v58 }
 0x886   :  { %v13187_v5 = vpack.c.bf16 %v5658_v19, %v5644_v63 }
 0x887   :  { %v13189_v57 = vpack.c.bf16 %v5659_v14, %v5645_v44 }
 0x888   :  { %5706 = vrot.lane.b32.xlu0 %v13187_v5, %s9321_s2  ;;  %5764 = vrot.lane.b32.xlu1 %v13187_v5, %s9329_s1 }
 0x88c   :  { %6108 = vrot.lane.b32.xlu0 %v13136_v35, %s9333_s25  ;;  %5880 = vrot.lane.b32.xlu1 %v13187_v5, %s9326_s29 }
 0x890   :  { %5822 = vrot.lane.b32.xlu0 %v13187_v5, %s9325_s28  ;;  %5996 = vrot.lane.b32.xlu1 %v13187_v5, %s9331_s27 }
 0x894   :  { %5938 = vrot.lane.b32.xlu0 %v13187_v5, %s9330_s26  ;;  %6112 = vrot.lane.b32.xlu1 %v13187_v5, %s9333_s25 }
 0x898   :  { %6054 = vrot.lane.b32.xlu0 %v13187_v5, %s9332_s6 }
 0x8a7   :  { %v13209_v4 = vpop.permute.xlu0 %5752  ;;  %v13211_v15 = vpop.permute.xlu1 %5694 }
 0x8ab   :  { %v13213_v27 = vpop.permute.xlu0 %5868  ;;  %v13215_v41 = vpop.permute.xlu1 %5810 }
 0x8af   :  { %v13217_v62 = vpop.permute.xlu0 %5984  ;;  %v13219_v54 = vpop.permute.xlu1 %5926 }
 0x8b3   :  { %v13221_v30 = vpop.permute.xlu0 %6100  ;;  %v13223_v20 = vpop.permute.xlu1 %6042 }
 0x8b7   :  { %v5755_v48 = vpop.permute.xlu0 %5754  ;;  %v5697_v56 = vpop.permute.xlu1 %5696 }
 0x8b8   :  { %v5722_v63 = vsel %vm15736_vm7, %v13211_v15, %v5697_v56  ;;  %vm15746_vm7 = vmmov %vm15741_vm6 }
 0x8bb   :  { %v13225_v24 = vpop.permute.xlu0 %5870  ;;  %v5813_v40 = vpop.permute.xlu1 %5812 }
 0x8bf   :  { %v13227_v32 = vpop.permute.xlu0 %5986  ;;  %v13229_v42 = vpop.permute.xlu1 %5928 }
 0x8c1   :  { %v5463_v39 = vpop.f32.mrb[76].mxu1 }
 0x8c2   :  { %v5566_v28 = vmax.f32 %v5463_v39, 0.0  ;;  %v5465_v18 = vpop.f32.mrb[77].mxu1 }
 0x8c3   :  { %v5567_v47 = vmax.f32 %v5465_v18, 0.0  ;;  %v5467_v21 = vpop.f32.mrb[78].mxu1  ;;  %v13231_v53 = vpop.permute.xlu0 %6102 }
 0x8c4   :  { %v5606_v25 = vmul.f32 %v13077_v17, %v5566_v28  ;;  %v5580_v43 = vmax.f32 %v5467_v21, 0.0  ;;  %v5469_v2 = vpop.f32.mrb[79].mxu1  ;;  %v13234_v8 = vpop.permute.xlu1 %6044 }
 0x8c5   :  { %v5607_v7 = vmul.f32 %v13077_v17, %v5567_v47  ;;  %v5581_v36 = vmax.f32 %v5469_v2, 0.0  ;;  %v5506_v11 = vpop.f32.mrb[80].mxu0 }
 0x8c6   :  { %v5620_v46 = vmul.f32 %v13079_v51, %v5580_v43  ;;  %v5568_v22 = vmax.f32 %v5506_v11, 0.0  ;;  %v5508_v60 = vpop.f32.mrb[81].mxu0  ;;  %v5646_v9 = vadd.f32 %v13084_v10, %v5606_v25  ;;  %v5780_v25 = vsel %vm3614_vm8, %v13209_v4, %v5755_v48 }
 0x8c7   :  { %v5621_v34 = vmul.f32 %v13079_v51, %v5581_v36  ;;  %v5569_v33 = vmax.f32 %v5508_v60, 0.0  ;;  %v5510_v12 = vpop.f32.mrb[82].mxu0  ;;  %v5647_v52 = vadd.f32 %v13084_v10, %v5607_v7  ;;  %v5838_v36 = vsel %vm433_vm10, %v13215_v41, %v5813_v40 }
 0x8c8   :  { %v5660_v6 = vadd.f32 %v13086_v50, %v5620_v46  ;;  %v5608_v26 = vmul.f32 %v13077_v17, %v5568_v22  ;;  %v5582_v55 = vmax.f32 %v5510_v12, 0.0  ;;  %v5512_v13 = vpop.f32.mrb[83].mxu0 }
 0x8c9   :  { %v5661_v59 = vadd.f32 %v13086_v50, %v5621_v34  ;;  %v5609_v38 = vmul.f32 %v13077_v17, %v5569_v33  ;;  %v5583_v1 = vmax.f32 %v5512_v13, 0.0  ;;  %v13245_v16 = vpop.permute.xlu0 %5698  ;;  %v13247_v45 = vpop.permute.xlu1 %5756 }
 0x8ca   :  { %v13249_v61 = vpack.c.bf16 %v5660_v6, %v5646_v9  ;;  %v5622_v37 = vmul.f32 %v13079_v51, %v5582_v55  ;;  %v5723_v23 = vsel %vm15735_vm5, %v5697_v56, %v13245_v16  ;;  %v5648_v19 = vadd.f32 %v13084_v10, %v5608_v26  ;;  %vm15745_vm5 = vmmov %vm15729_vm0 }
 0x8cb   :  { %v13254_v0 = vpack.c.bf16 %v5661_v59, %v5647_v52  ;;  %v5623_v58 = vmul.f32 %v13079_v51, %v5583_v1  ;;  %6174 = vmatprep.subr.bf16.mxu0 %v5723_v23  ;;  %v5781_v14 = vsel %vm3614_vm8, %v5755_v48, %v13247_v45  ;;  %v5649_v39 = vadd.f32 %v13084_v10, %v5609_v38  ;;  %v13362_v23 = vld [vmem:[%s15362_s14] ss:$8 sps:$4 sm:$0xff]  }
 0x8cc   :  { %v5662_v44 = vadd.f32 %v13086_v50, %v5622_v37  ;;  %6175 = vmatpush1.bf16.msra.mxu0 %v5722_v63  ;;  %5768 = vrot.lane.b32.xlu0 %v13249_v61, %s9329_s1 }
 0x8cd   :  { %v5663_v28 = vadd.f32 %v13086_v50, %v5623_v58  ;;  %5710 = vrot.lane.b32.xlu1 %v13249_v61, %s9321_s2  ;;  %v13269_v18 = vpop.permute.xlu0 %5814  ;;  %v13271_v56 = vpop.permute.xlu1 %5872  ;;  %6176 = vmatprep.subr.bf16.mxu0 %v5781_v14 }
 0x8ce   :  { %v13273_v47 = vpack.c.bf16 %v5662_v44, %v5648_v19  ;;  %v5839_v43 = vsel %vm433_vm10, %v5813_v40, %v13269_v18  ;;  %v5897_v48 = vsel %vm525_vm13, %v13225_v24, %v13271_v56  ;;  %v5896_v40 = vsel %vm525_vm13, %v13213_v27, %v13225_v24 }
 0x8cf   :  { %v13275_v21 = vpack.c.bf16 %v5663_v28, %v5649_v39  ;;  %v5954_v24 = vsel %vm3748_vm14, %v13219_v54, %v13229_v42 }
 0x8d0   :  { %6177 = vmatpush1.bf16.msra.mxu0 %v5780_v25  ;;  %5884 = vrot.lane.b32.xlu0 %v13249_v61, %s9326_s29 }
 0x8d1   :  { %5826 = vrot.lane.b32.xlu1 %v13249_v61, %s9325_s28  ;;  %v13285_v2 = vpop.permute.xlu0 %5930  ;;  %v13287_v7 = vpop.permute.xlu1 %5988  ;;  %6178 = vmatprep.subr.bf16.mxu0 %v5839_v43 }
 0x8d2   :  { %v5955_v22 = vsel %vm3748_vm14, %v13229_v42, %v13285_v2  ;;  %v6013_v33 = vsel %vm2126_vm15, %v13227_v32, %v13287_v7  ;;  %v6012_v42 = vsel %vm2126_vm15, %v13217_v62, %v13227_v32  ;;  %v6070_v32 = vsel %vm15738_vm3, %v13223_v20, %v13234_v8 }
 0x8d4   :  { %6179 = vmatpush1.bf16.msra.mxu0 %v5838_v36  ;;  %5770 = vrot.lane.b32.xlu0 %v13254_v0, %s9329_s1 }
 0x8d5   :  { %5712 = vrot.lane.b32.xlu1 %v13254_v0, %s9321_s2  ;;  %v13298_v11 = vpop.permute.xlu0 %6046  ;;  %v13300_v46 = vpop.permute.xlu1 %6104  ;;  %6180 = vmatprep.subr.bf16.mxu0 %v5897_v48 }
 0x8d6   :  { %v6071_v6 = vsel %vm15737_vm2, %v13234_v8, %v13298_v11  ;;  %v6129_v13 = vsel %vm15729_vm0, %v13231_v53, %v13300_v46  ;;  %v6128_v8 = vsel %vm15739_vm1, %v13221_v30, %v13231_v53  ;;  %vm15747_vm2 = vmmov %vm15741_vm6 }
 0x8d7   :  { %vm15749_vm0 = vmmov %vm15738_vm3 }
 0x8d8   :  { %6181 = vmatpush1.bf16.msra.mxu0 %v5896_v40  ;;  %5886 = vrot.lane.b32.xlu0 %v13254_v0, %s9326_s29 }
 0x8d9   :  { %5828 = vrot.lane.b32.xlu1 %v13254_v0, %s9325_s28  ;;  %6182 = vmatprep.subr.bf16.mxu0 %v5955_v22 }
 0x8da   :  { %v13312_v60 = vpop.permute.xlu0 %5760  ;;  %v13314_v34 = vpop.permute.xlu1 %5702 }
 0x8dc   :  { %6183 = vmatpush1.bf16.msra.mxu0 %v5954_v24  ;;  %5714 = vrot.lane.b32.xlu0 %v13273_v47, %s9321_s2 }
 0x8dd   :  { %5944 = vrot.lane.b32.xlu1 %v13254_v0, %s9330_s26  ;;  %6184 = vmatprep.subr.bf16.mxu0 %v6013_v33 }
 0x8de   :  { %v13326_v12 = vpop.permute.xlu0 %5876  ;;  %v13328_v9 = vpop.permute.xlu1 %5818 }
 0x8e0   :  { %6185 = vmatpush1.bf16.msra.mxu0 %v6012_v42  ;;  %6002 = vrot.lane.b32.xlu0 %v13254_v0, %s9331_s27 }
 0x8e1   :  { %5772 = vrot.lane.b32.xlu1 %v13273_v47, %s9329_s1  ;;  %6186 = vmatprep.subr.bf16.mxu0 %v6071_v6 }
 0x8e2   :  { %v13340_v26 = vpop.permute.xlu0 %5992  ;;  %v13342_v55 = vpop.permute.xlu1 %5934 }
 0x8e4   :  { %6187 = vmatpush1.bf16.msra.mxu0 %v6070_v32  ;;  %5830 = vrot.lane.b32.xlu0 %v13273_v47, %s9325_s28 }
 0x8e5   :  { %5942 = vrot.lane.b32.xlu1 %v13249_v61, %s9330_s26  ;;  %6188 = vmatprep.subr.bf16.mxu0 %v6129_v13  ;;  %v5549_v52 = vpop.f32.mrb[80].mxu1 }
 0x8e6   :  { %v13354_v59 = vpop.permute.xlu1 %6050  ;;  %v5763_v38 = vpop.permute.xlu0 %5762  ;;  %v5570_v1 = vmax.f32 %v5549_v52, 0.0 }
 0x8e7   :  { %v5551_v37 = vpop.f32.mrb[81].mxu1 }
 0x8e8   :  { %v5571_v58 = vmax.f32 %v5551_v37, 0.0  ;;  %v5553_v63 = vpop.f32.mrb[82].mxu1  ;;  %6189 = vmatpush1.bf16.msra.mxu0 %v6128_v8  ;;  %6000 = vrot.lane.b32.xlu0 %v13249_v61, %s9331_s27  ;;  %v5610_v19 = vmul.f32 %v13077_v17, %v5570_v1  ;;  %v5784_v37 = vsel %vm3614_vm8, %v13312_v60, %v5763_v38 }
 0x8e9   :  { %v5584_v44 = vmax.f32 %v5553_v63, 0.0  ;;  %5888 = vrot.lane.b32.xlu1 %v13273_v47, %s9326_s29  ;;  %v5555_v14 = vpop.f32.mrb[83].mxu1  ;;  %6258 = vmatprep.subr.bf16.mxu0 %v13138_v29 }
 0x8ea   :  { %v5611_v53 = vmul.f32 %v13077_v17, %v5571_v58  ;;  %v5585_v39 = vmax.f32 %v5555_v14, 0.0  ;;  %v5879_v28 = vpop.permute.xlu0 %5878  ;;  %v5705_v25 = vpop.permute.xlu1 %5704  ;;  %v5650_v48 = vadd.f32 %v13084_v10, %v5610_v19 }
 0x8eb   :  { %v5624_v43 = vmul.f32 %v13079_v51, %v5584_v44  ;;  %6205 = vmatmul.mubr.bf16.vlgmr.msra.gmra.mrb[84].mxu0 %v13362_v23  ;;  %v5726_v13 = vsel %vm15741_vm6, %v13314_v34, %v5705_v25  ;;  %v5900_v14 = vsel %vm525_vm13, %v13326_v12, %v5879_v28  ;;  %vm15751_vm6 = vmmov %vm15747_vm2 }
 0x8ec   :  { %v5625_v36 = vmul.f32 %v13079_v51, %v5585_v39  ;;  %6259 = vmatpush1.bf16.msra.mxu0 %v13136_v35  ;;  %5946 = vrot.lane.b32.xlu0 %v13273_v47, %s9330_s26  ;;  %v5651_v17 = vadd.f32 %v13084_v10, %v5611_v53 }
 0x8ed   :  { %v5664_v29 = vadd.f32 %v13086_v50, %v5624_v43  ;;  %6060 = vrot.lane.b32.xlu1 %v13254_v0, %s9332_s6  ;;  %8537 = vmatprep.mubr.msk.bf16.mxu0 %vm2126_vm15, %v13147_v31 }
 0x8ee   :  { %v5665_v40 = vadd.f32 %v13086_v50, %v5625_v36  ;;  %v5821_v51 = vpop.permute.xlu1 %5820  ;;  %v5995_v24 = vpop.permute.xlu0 %5994 }
 0x8ef   :  { %v13385_v22 = vpack.c.bf16 %v5664_v29, %v5650_v48  ;;  %v5842_v19 = vsel %vm433_vm10, %v13328_v9, %v5821_v51  ;;  %v6016_v36 = vsel %vm2126_vm15, %v13340_v26, %v5995_v24 }
 0x8f0   :  { %v13387_v35 = vpack.c.bf16 %v5665_v40, %v5651_v17  ;;  %6118 = vrot.lane.b32.xlu0 %v13254_v0, %s9333_s25 }
 0x8f1   :  { %6004 = vrot.lane.b32.xlu1 %v13273_v47, %s9331_s27 }
 0x8f2   :  { %v5937_v33 = vpop.permute.xlu1 %5936  ;;  %v6111_v10 = vpop.permute.xlu0 %6110 }
 0x8f4   :  { %6062 = vrot.lane.b32.xlu0 %v13273_v47, %s9332_s6 }
 0x8f5   :  { %6058 = vrot.lane.b32.xlu1 %v13249_v61, %s9332_s6 }
 0x8f6   :  { %v6053_v50 = vpop.permute.xlu1 %6052 }
 0x8f7   :  { %v6074_v17 = vsel %vm15743_vm4, %v13354_v59, %v6053_v50  ;;  %vm15753_vm4 = vmmov %vm15747_vm2 }
 0x8f8   :  { %6116 = vrot.lane.b32.xlu0 %v13249_v61, %s9333_s25 }
 0x8f9   :  { %6120 = vrot.lane.b32.xlu1 %v13273_v47, %s9333_s25 }
 0x8fa   :  { %v13401_v42 = vpop.permute.xlu0 %5706  ;;  %v13403_v6 = vpop.permute.xlu1 %5764 }
 0x8fb   :  { %v5727_v32 = vsel %vm15740_vm12, %v5705_v25, %v13401_v42  ;;  %v5785_v52 = vsel %vm3614_vm8, %v5763_v38, %v13403_v6  ;;  %v5958_v25 = vsel %vm3748_vm14, %v13342_v55, %v5937_v33  ;;  %vm15750_vm12 = vmmov %vm15739_vm1 }
 0x8fc   :  { %6260 = vmatprep.subr.bf16.mxu0 %v5727_v32  ;;  %5718 = vrot.lane.b32.xlu0 %v13385_v22, %s9321_s2 }
 0x8fd   :  { %6261 = vmatpush1.bf16.msra.mxu0 %v5726_v13  ;;  %5700 = vrot.lane.b32.xlu1 %v13117_v49, %s9321_s2  ;;  %v6501_v13 = vld [vmem:[%s15363_s15] sm:$0xff] }
 0x8fe   :  { %v13415_v1 = vpop.permute.xlu0 %6108  ;;  %6262 = vmatprep.subr.bf16.mxu0 %v5785_v52  ;;  %v13423_v8 = vpop.permute.xlu1 %5880 }
 0x8ff   :  { %v5901_v38 = vsel %vm525_vm13, %v5879_v28, %v13423_v8 }
 0x900   :  { %5776 = vrot.lane.b32.xlu0 %v13385_v22, %s9329_s1 }
 0x901   :  { %6263 = vmatpush1.bf16.msra.mxu0 %v5784_v37  ;;  %5720 = vrot.lane.b32.xlu1 %v13387_v35, %s9321_s2  ;;  %v6542_v37 = vld [vmem:[%s15364_s16 + $0x8] sm:$0xff] }
 0x902   :  { %v13425_v58 = vpop.permute.xlu0 %5822  ;;  %v13447_v39 = vpop.permute.xlu1 %5996 }
 0x903   :  { %v5843_v63 = vsel %vm433_vm10, %v5821_v51, %v13425_v58  ;;  %v6017_v28 = vsel %vm2126_vm15, %v5995_v24, %v13447_v39  ;;  %v6132_v51 = vsel %vm15745_vm5, %v13415_v1, %v6111_v10  ;;  %vm15755_vm5 = vmmov %vm15749_vm0 }
 0x904   :  { %6264 = vmatprep.subr.bf16.mxu0 %v5843_v63  ;;  %5834 = vrot.lane.b32.xlu0 %v13385_v22, %s9325_s28 }
 0x905   :  { %6265 = vmatpush1.bf16.msra.mxu0 %v5842_v19  ;;  %5778 = vrot.lane.b32.xlu1 %v13387_v35, %s9329_s1  ;;  %v6541_v19 = vld [vmem:[%s15364_s16] sm:$0xff] }
 0x906   :  { %v13437_v44 = vpop.permute.xlu0 %5938  ;;  %6266 = vmatprep.subr.bf16.mxu0 %v5901_v38  ;;  %v13467_v29 = vpop.permute.xlu1 %6112 }
 0x907   :  { %v5959_v53 = vsel %vm3748_vm14, %v5937_v33, %v13437_v44  ;;  %v6133_v40 = vsel %vm15744_vm9, %v6111_v10, %v13467_v29  ;;  %vm15754_vm9 = vmmov %vm15747_vm2 }
 0x908   :  { %5892 = vrot.lane.b32.xlu0 %v13385_v22, %s9326_s29 }
 0x909   :  { %6267 = vmatpush1.bf16.msra.mxu0 %v5900_v14  ;;  %5836 = vrot.lane.b32.xlu1 %v13387_v35, %s9325_s28 }
 0x90a   :  { %6268 = vmatprep.subr.bf16.mxu0 %v5959_v53  ;;  %v13457_v43 = vpop.permute.xlu0 %6054 }
 0x90b   :  { %v6075_v48 = vsel %vm15742_vm11, %v6053_v50, %v13457_v43  ;;  %v6502_v50 = vld [vmem:[%s15363_s15 + $0x8] sm:$0xff]  ;;  %vm15752_vm11 = vmmov %vm15747_vm2 }
 0x90c   :  { %5950 = vrot.lane.b32.xlu0 %v13385_v22, %s9330_s26 }
 0x90d   :  { %6269 = vmatpush1.bf16.msra.mxu0 %v5958_v25  ;;  %5894 = vrot.lane.b32.xlu1 %v13387_v35, %s9326_s29 }
 0x90e   :  { %6270 = vmatprep.subr.bf16.mxu0 %v6017_v28 }
 0x910   :  { %5758 = vrot.lane.b32.xlu0 %v13117_v49, %s9329_s1 }
 0x911   :  { %6271 = vmatpush1.bf16.msra.mxu0 %v6016_v36  ;;  %5952 = vrot.lane.b32.xlu1 %v13387_v35, %s9330_s26 }
 0x912   :  { %6272 = vmatprep.subr.bf16.mxu0 %v6075_v48 }
 0x914   :  { %6010 = vrot.lane.b32.xlu0 %v13387_v35, %s9331_s27 }
 0x915   :  { %6273 = vmatpush1.bf16.msra.mxu0 %v6074_v17  ;;  %6008 = vrot.lane.b32.xlu1 %v13385_v22, %s9331_s27 }
 0x916   :  { %6274 = vmatprep.subr.bf16.mxu0 %v6133_v40 }
 0x918   :  { %6066 = vrot.lane.b32.xlu0 %v13385_v22, %s9332_s6 }
 0x919   :  { %6275 = vmatpush1.bf16.msra.mxu0 %v6132_v51  ;;  %6068 = vrot.lane.b32.xlu1 %v13387_v35, %s9332_s6 }
 0x91a   :  { %6344 = vmatprep.subr.bf16.mxu0 %v13254_v0 }
 0x91c   :  { %6291 = vmatmul.mubr.bf16.vlgmr.msra.gmra.mrb[88].mxu0 %v13362_v23  ;;  %6126 = vrot.lane.b32.xlu0 %v13387_v35, %s9333_s25 }
 0x91d   :  { %6345 = vmatpush1.bf16.msra.mxu0 %v13249_v61  ;;  %5816 = vrot.lane.b32.xlu1 %v13117_v49, %s9325_s28 }
 0x91e   :  { %8539 = vmatprep.mubr.msk.bf16.mxu0 %vm2126_vm15, %v13147_v31 }
 0x920   :  { %5874 = vrot.lane.b32.xlu0 %v13117_v49, %s9326_s29 }
 0x921   :  { %6124 = vrot.lane.b32.xlu1 %v13385_v22, %s9333_s25 }
 0x924   :  { %5990 = vrot.lane.b32.xlu0 %v13117_v49, %s9331_s27 }
 0x925   :  { %5932 = vrot.lane.b32.xlu1 %v13117_v49, %s9330_s26 }
 0x928   :  { %6106 = vrot.lane.b32.xlu0 %v13117_v49, %s9333_s25 }
 0x929   :  { %6048 = vrot.lane.b32.xlu1 %v13117_v49, %s9332_s6 }
 0x92c   :  { %5766 = vrot.lane.b32.xlu0 %v13189_v57, %s9329_s1 }
 0x92d   :  { %5708 = vrot.lane.b32.xlu1 %v13189_v57, %s9321_s2 }
 0x930   :  { %5882 = vrot.lane.b32.xlu0 %v13189_v57, %s9326_s29 }
 0x931   :  { %5824 = vrot.lane.b32.xlu1 %v13189_v57, %s9325_s28 }
 0x934   :  { %5998 = vrot.lane.b32.xlu0 %v13189_v57, %s9331_s27 }
 0x935   :  { %5940 = vrot.lane.b32.xlu1 %v13189_v57, %s9330_s26 }
 0x938   :  { %6114 = vrot.lane.b32.xlu0 %v13189_v57, %s9333_s25 }
 0x939   :  { %6056 = vrot.lane.b32.xlu1 %v13189_v57, %s9332_s6 }
 0x93c   :  { %5774 = vrot.lane.b32.xlu0 %v13275_v21, %s9329_s1 }
 0x93d   :  { %5716 = vrot.lane.b32.xlu1 %v13275_v21, %s9321_s2 }
 0x93e   :  { %v13524_v49 = vpop.permute.xlu0 %5768 }
 0x93f   :  { %v13526_v61 = vpop.permute.xlu1 %5710 }
 0x940   :  { %5890 = vrot.lane.b32.xlu0 %v13275_v21, %s9326_s29 }
 0x941   :  { %5832 = vrot.lane.b32.xlu1 %v13275_v21, %s9325_s28 }
 0x942   :  { %v13532_v0 = vpop.permute.xlu0 %5884 }
 0x943   :  { %v13534_v24 = vpop.permute.xlu1 %5826 }
 0x944   :  { %6006 = vrot.lane.b32.xlu0 %v13275_v21, %s9331_s27 }
 0x945   :  { %5948 = vrot.lane.b32.xlu1 %v13275_v21, %s9330_s26 }
 0x946   :  { %v5771_v33 = vpop.permute.xlu0 %5770 }
 0x947   :  { %v5713_v10 = vpop.permute.xlu1 %5712  ;;  %v5788_v48 = vsel %vm3614_vm8, %v13524_v49, %v5771_v33 }
 0x948   :  { %6122 = vrot.lane.b32.xlu0 %v13275_v21, %s9333_s25  ;;  %v5730_v53 = vsel %vm15747_vm2, %v13526_v61, %v5713_v10  ;;  %vm15757_vm2 = vmmov %vm15739_vm1 }
 0x949   :  { %6064 = vrot.lane.b32.xlu1 %v13275_v21, %s9332_s6 }
 0x94a   :  { %v5887_v32 = vpop.permute.xlu0 %5886 }
 0x94b   :  { %v5829_v52 = vpop.permute.xlu1 %5828 }
 0x94c   :  { %6510 = vperm.xlu0 %9079, %v6502_v50  }
 0x94d   :  { %6505 = vperm.xlu1 %9080, %v6501_v13  }
 0x94e   :  { %v13553_v63 = vpop.permute.xlu0 %5714 }
 0x94f   :  { %v5945_v38 = vpop.permute.xlu1 %5944  ;;  %v5731_v14 = vsel %vm15746_vm7, %v5713_v10, %v13553_v63  ;;  %v5846_v10 = vsel %vm433_vm10, %v13534_v24, %v5829_v52  ;;  %vm15756_vm7 = vmmov %vm15749_vm0 }
 0x950   :  { %6346 = vmatprep.subr.bf16.mxu0 %v5731_v14  ;;  %6550 = vperm.xlu0 %9079, %v6542_v37   ;;  %v5904_v37 = vsel %vm525_vm13, %v13532_v0, %v5887_v32 }
 0x951   :  { %6545 = vperm.xlu1 %9080, %v6541_v19   ;;  %6347 = vmatpush1.bf16.msra.mxu0 %v5730_v53 }
 0x952   :  { %v6003_v25 = vpop.permute.xlu0 %6002 }
 0x953   :  { %v13562_v28 = vpop.permute.xlu1 %5772 }
 0x954   :  { %v5789_v36 = vsel %vm3614_vm8, %v5771_v33, %v13562_v28 }
 0x955   :  { %6348 = vmatprep.subr.bf16.mxu0 %v5789_v36 }
 0x956   :  { %6349 = vmatpush1.bf16.msra.mxu0 %v5788_v48  ;;  %v13568_v17 = vpop.permute.xlu0 %5830 }
 0x957   :  { %v13570_v40 = vpop.permute.xlu1 %5942  ;;  %v5847_v51 = vsel %vm433_vm10, %v5829_v52, %v13568_v17 }
 0x958   :  { %6350 = vmatprep.subr.bf16.mxu0 %v5847_v51  ;;  %v5962_v52 = vsel %vm3748_vm14, %v13570_v40, %v5945_v38 }
 0x95a   :  { %6351 = vmatpush1.bf16.msra.mxu0 %v5846_v10  ;;  %v13576_v50 = vpop.permute.xlu0 %6000 }
 0x95b   :  { %v13578_v13 = vpop.permute.xlu1 %5888 }
 0x95c   :  { %v5905_v33 = vsel %vm525_vm13, %v5887_v32, %v13578_v13  ;;  %v6020_v32 = vsel %vm2126_vm15, %v13576_v50, %v6003_v25 }
 0x95d   :  { %6352 = vmatprep.subr.bf16.mxu0 %v5905_v33 }
 0x95e   :  { %6353 = vmatpush1.bf16.msra.mxu0 %v5904_v37  ;;  %v13584_v19 = vpop.permute.xlu0 %5946 }
 0x95f   :  { %v6061_v14 = vpop.permute.xlu1 %6060  ;;  %v5963_v53 = vsel %vm3748_vm14, %v5945_v38, %v13584_v19 }
 0x960   :  { %6354 = vmatprep.subr.bf16.mxu0 %v5963_v53 }
 0x962   :  { %6355 = vmatpush1.bf16.msra.mxu0 %v5962_v52  ;;  %v6119_v36 = vpop.permute.xlu0 %6118 }
 0x963   :  { %v13590_v48 = vpop.permute.xlu1 %6004 }
 0x964   :  { %v6021_v51 = vsel %vm2126_vm15, %v6003_v25, %v13590_v48 }
 0x965   :  { %6356 = vmatprep.subr.bf16.mxu0 %v6021_v51 }
 0x966   :  { %6357 = vmatpush1.bf16.msra.mxu0 %v6020_v32  ;;  %v13596_v10 = vpop.permute.xlu0 %6062 }
 0x967   :  { %15748 = vst [vmem:[#allocation2_spill] sm:$0xff] %v13596_v10  ;;  %v13598_v33 = vpop.permute.xlu1 %6058  ;;  %v6079_v37 = vsel %vm15738_vm3, %v6061_v14, %v13596_v10  ;;  %vm15758_vm3 = vmmov %vm15739_vm1 }
 0x968   :  { %6358 = vmatprep.subr.bf16.mxu0 %v6079_v37  ;;  %v6078_v38 = vsel %vm15749_vm0, %v13598_v33, %v6061_v14 }
 0x96a   :  { %6359 = vmatpush1.bf16.msra.mxu0 %v6078_v38  ;;  %v13604_v53 = vpop.permute.xlu0 %6116 }
 0x96b   :  { %v13606_v52 = vpop.permute.xlu1 %6120  ;;  %v6136_v25 = vsel %vm15739_vm1, %v13604_v53, %v6119_v36  ;;  %vm15759_vm1 = vmmov %vm15749_vm0 }
 0x96c   :  { %v6137_v51 = vsel %vm15750_vm12, %v6119_v36, %v13606_v52  ;;  %vm15760_vm12 = vmmov %vm15757_vm2 }
 0x96d   :  { %6360 = vmatprep.subr.bf16.mxu0 %v6137_v51 }
 0x96e   :  { %6361 = vmatpush1.bf16.msra.mxu0 %v6136_v25  ;;  %v13612_v32 = vpop.permute.xlu0 %5718 }
 0x96f   :  { %v5701_v10 = vpop.permute.xlu1 %5700  ;;  %6430 = vmatprep.subr.bf16.mxu0 %v13387_v35 }
 0x970   :  { %v5725_v14 = vsel %vm15751_vm6, %v5701_v10, %v13314_v34  ;;  %v5724_v37 = vsel %vm15752_vm11, %v13245_v16, %v5701_v10  ;;  %vm15761_vm6 = vmmov %vm15757_vm2 }
 0x971   :  { %6217 = vmatprep.subr.bf16.mxu1 %v5725_v14  ;;  %6377 = vmatmul.mubr.bf16.vlgmr.msra.gmra.mrb[92].mxu0 %v13362_v23  ;;  %vm15762_vm11 = vmmov %vm15753_vm4 }
 0x972   :  { %6218 = vmatpush1.bf16.msra.mxu1 %v5724_v37  ;;  %6431 = vmatpush1.bf16.msra.mxu0 %v13385_v22  ;;  %v13621_v36 = vpop.permute.xlu0 %5776 }
 0x973   :  { %v5721_v38 = vpop.permute.xlu1 %5720  ;;  %8541 = vmatprep.mubr.msk.bf16.mxu0 %vm2126_vm15, %v13147_v31 }
 0x974   :  { %v5750_v35 = vsel %vm15753_vm4, %v5721_v38, %v13211_v15  ;;  %v5734_v34 = vsel %vm15754_vm9, %v13612_v32, %v5721_v38  ;;  %vm15763_vm9 = vmmov %vm15749_vm0 }
 0x975   :  { %6432 = vmatprep.subr.bf16.mxu0 %v5750_v35 }
 0x976   :  { %6433 = vmatpush1.bf16.msra.mxu0 %v5734_v34  ;;  %v13629_v16 = vpop.permute.xlu0 %5834 }
 0x977   :  { %v5779_v10 = vpop.permute.xlu1 %5778 }
 0x978   :  { %v5808_v22 = vsel %vm3614_vm8, %v5779_v10, %v13209_v4  ;;  %v5792_v25 = vsel %vm3614_vm8, %v13621_v36, %v5779_v10 }
 0x979   :  { %6434 = vmatprep.subr.bf16.mxu0 %v5808_v22 }
 0x97a   :  { %6435 = vmatpush1.bf16.msra.mxu0 %v5792_v25  ;;  %v13635_v51 = vpop.permute.xlu0 %5892 }
 0x97b   :  { %v5837_v14 = vpop.permute.xlu1 %5836 }
 0x97c   :  { %v5866_v15 = vsel %vm433_vm10, %v5837_v14, %v13215_v41  ;;  %v5850_v37 = vsel %vm433_vm10, %v13629_v16, %v5837_v14 }
 0x97d   :  { %6436 = vmatprep.subr.bf16.mxu0 %v5866_v15 }
 0x97e   :  { %6437 = vmatpush1.bf16.msra.mxu0 %v5850_v37  ;;  %v13641_v38 = vpop.permute.xlu0 %5950 }
 0x97f   :  { %v5895_v35 = vpop.permute.xlu1 %5894 }
 0x980   :  { %v5924_v4 = vsel %vm525_vm13, %v5895_v35, %v13213_v27  ;;  %v5908_v34 = vsel %vm525_vm13, %v13635_v51, %v5895_v35 }
 0x981   :  { %6438 = vmatprep.subr.bf16.mxu0 %v5924_v4 }
 0x982   :  { %6439 = vmatpush1.bf16.msra.mxu0 %v5908_v34  ;;  %v5759_v10 = vpop.permute.xlu0 %5758 }
 0x983   :  { %v5953_v22 = vpop.permute.xlu1 %5952  ;;  %v5783_v41 = vsel %vm3614_vm8, %v5759_v10, %v13312_v60  ;;  %v5782_v25 = vsel %vm3614_vm8, %v13247_v45, %v5759_v10 }
 0x984   :  { %6219 = vmatprep.subr.bf16.mxu1 %v5783_v41  ;;  %v5982_v14 = vsel %vm3748_vm14, %v5953_v22, %v13219_v54  ;;  %v5966_v27 = vsel %vm3748_vm14, %v13641_v38, %v5953_v22 }
 0x985   :  { %6440 = vmatprep.subr.bf16.mxu0 %v5982_v14  ;;  %6220 = vmatpush1.bf16.msra.mxu1 %v5782_v25 }
 0x986   :  { %6441 = vmatpush1.bf16.msra.mxu0 %v5966_v27  ;;  %v6011_v15 = vpop.permute.xlu0 %6010 }
 0x987   :  { %v13655_v37 = vpop.permute.xlu1 %6008  ;;  %v6040_v35 = vsel %vm2126_vm15, %v6011_v15, %v13217_v62 }
 0x988   :  { %6442 = vmatprep.subr.bf16.mxu0 %v6040_v35  ;;  %v6024_v45 = vsel %vm2126_vm15, %v13655_v37, %v6011_v15 }
 0x98a   :  { %6443 = vmatpush1.bf16.msra.mxu0 %v6024_v45  ;;  %v13661_v60 = vpop.permute.xlu0 %6066 }
 0x98b   :  { %v6069_v54 = vpop.permute.xlu1 %6068 }
 0x98c   :  { %v6098_v4 = vsel %vm15755_vm5, %v6069_v54, %v13223_v20  ;;  %v6082_v34 = vsel %vm15756_vm7, %v13661_v60, %v6069_v54  ;;  %vm15764_vm5 = vmmov %vm15749_vm0 }
 0x98d   :  { %6444 = vmatprep.subr.bf16.mxu0 %v6098_v4  ;;  %vm15765_vm7 = vmmov %vm15757_vm2 }
 0x98e   :  { %6445 = vmatpush1.bf16.msra.mxu0 %v6082_v34  ;;  %v6127_v10 = vpop.permute.xlu0 %6126 }
 0x98f   :  { %v5817_v22 = vpop.permute.xlu1 %5816  ;;  %v6156_v62 = vsel %vm15757_vm2, %v6127_v10, %v13221_v30 }
 0x990   :  { %v5841_v41 = vsel %vm433_vm10, %v5817_v22, %v13328_v9  ;;  %6446 = vmatprep.subr.bf16.mxu0 %v6156_v62  ;;  %v5840_v25 = vsel %vm433_vm10, %v13269_v18, %v5817_v22 }
 0x991   :  { %6221 = vmatprep.subr.bf16.mxu1 %v5841_v41 }
 0x992   :  { %6222 = vmatpush1.bf16.msra.mxu1 %v5840_v25  ;;  %v5875_v20 = vpop.permute.xlu0 %5874 }
 0x993   :  { %v13673_v14 = vpop.permute.xlu1 %6124  ;;  %v5899_v27 = vsel %vm525_vm13, %v5875_v20, %v13326_v12  ;;  %v5898_v15 = vsel %vm525_vm13, %v13271_v56, %v5875_v20 }
 0x994   :  { %6223 = vmatprep.subr.bf16.mxu1 %v5899_v27  ;;  %v6140_v30 = vsel %vm15758_vm3, %v13673_v14, %v6127_v10  ;;  %vm15766_vm3 = vmmov %vm15753_vm4 }
 0x995   :  { %6447 = vmatpush1.bf16.msra.mxu0 %v6140_v30 }
 0x996   :  { %6224 = vmatpush1.bf16.msra.mxu1 %v5898_v15  ;;  %v5991_v9 = vpop.permute.xlu0 %5990 }
 0x997   :  { %v5933_v35 = vpop.permute.xlu1 %5932  ;;  %v6015_v56 = vsel %vm2126_vm15, %v5991_v9, %v13340_v26  ;;  %v6014_v4 = vsel %vm2126_vm15, %v13287_v7, %v5991_v9 }
 0x998   :  { %6463 = vmatmul.mubr.bf16.vlgmr.msra.gmra.mrb[96].mxu0 %v13362_v23  ;;  %v5957_v18 = vsel %vm3748_vm14, %v5933_v35, %v13342_v55  ;;  %v5956_v45 = vsel %vm3748_vm14, %v13285_v2, %v5933_v35 }
 0x999   :  { %6225 = vmatprep.subr.bf16.mxu1 %v5957_v18 }
 0x99a   :  { %6226 = vmatpush1.bf16.msra.mxu1 %v5956_v45  ;;  %v6107_v12 = vpop.permute.xlu0 %6106 }
 0x99b   :  { %6227 = vmatprep.subr.bf16.mxu1 %v6015_v56  ;;  %v6049_v54 = vpop.permute.xlu1 %6048  ;;  %v6131_v22 = vsel %vm15760_vm12, %v6107_v12, %v13415_v1  ;;  %v6130_v7 = vsel %vm15761_vm6, %v13300_v46, %v6107_v12  ;;  %vm6739_vm6 = vcmask 474112  }
 0x99c   :  { %v6073_v10 = vsel %vm15749_vm0, %v6049_v54, %v13354_v59  ;;  %v6072_v2 = vsel %vm15759_vm1, %v13298_v11, %v6049_v54  ;;  %vm15767_vm0 = vmmov %vm15766_vm3 }
 0x99e   :  { %6228 = vmatpush1.bf16.msra.mxu1 %v6014_v4  ;;  %v5767_v34 = vpop.permute.xlu0 %5766  ;;  %v6587_v4 = vsub.s32 0, %v9459_v3 }
 0x99f   :  { %6229 = vmatprep.subr.bf16.mxu1 %v6073_v10  ;;  %v5709_v55 = vpop.permute.xlu1 %5708 }
 0x9a0   :  { %v5729_v11 = vsel %vm15762_vm11, %v5709_v55, %v13526_v61  ;;  %v5728_v1 = vsel %vm15753_vm4, %v13401_v42, %v5709_v55  ;;  %vm6799_vm11 = vcmask 457728   ;;  %vm6859_vm4 = vcmask 441344  }
 0x9a2   :  { %6230 = vmatpush1.bf16.msra.mxu1 %v6072_v2  ;;  %v5883_v26 = vpop.permute.xlu0 %5882 }
 0x9a3   :  { %6231 = vmatprep.subr.bf16.mxu1 %v6131_v22  ;;  %v5825_v62 = vpop.permute.xlu1 %5824  ;;  %v5902_v27 = vsel %vm525_vm13, %v13423_v8, %v5883_v26 }
 0x9a4   :  { %v5845_v61 = vsel %vm433_vm10, %v5825_v62, %v13534_v24  ;;  %v5844_v42 = vsel %vm433_vm10, %v13425_v58, %v5825_v62 }
 0x9a6   :  { %6232 = vmatpush1.bf16.msra.mxu1 %v6130_v7  ;;  %v5999_v41 = vpop.permute.xlu0 %5998 }
 0x9a7   :  { %6301 = vmatprep.subr.bf16.mxu1 %v13189_v57  ;;  %v5941_v59 = vpop.permute.xlu1 %5940  ;;  %v5787_v57 = vsel %vm3614_vm8, %v5767_v34, %v13524_v49  ;;  %v5903_v49 = vsel %vm525_vm13, %v5883_v26, %v13532_v0  ;;  %v6019_v0 = vsel %vm2126_vm15, %v5999_v41, %v13576_v50 }
 0x9a8   :  { %v5960_v58 = vsel %vm3748_vm14, %v13437_v44, %v5941_v59 }
 0x9a9   :  { %6248 = vmatmul.mubr.bf16.vlgmr.msra.gmra.mrb[84].mxu1 %v13362_v23 }
 0x9aa   :  { %6302 = vmatpush1.bf16.msra.mxu1 %v13187_v5  ;;  %8538 = vmatprep.mubr.msk.bf16.mxu1 %vm2126_vm15, %v13147_v31  ;;  %v6115_v46 = vpop.permute.xlu0 %6114  ;;  %v5786_v5 = vsel %vm3614_vm8, %v13403_v6, %v5767_v34  ;;  %v5961_v6 = vsel %vm3748_vm14, %v5941_v59, %v13570_v40  ;;  %v6018_v40 = vsel %vm2126_vm15, %v13447_v39, %v5999_v41  ;;  %v9317_v41 = vld [vmem:[%s15362_s14 + $0x4] ss:$8 sps:$4 sm:$0xff]   ;;  %s9334_s14 = smov 56  }
 0x9ab   :  { %6303 = vmatprep.subr.bf16.mxu1 %v5729_v11  ;;  %v6057_v25 = vpop.permute.xlu1 %6056  ;;  %v6135_v12 = vsel %vm15765_vm7, %v6115_v46, %v13604_v53  ;;  %v6134_v39 = vsel %vm15757_vm2, %v13467_v29, %v6115_v46  ;;  %vm15774_vm7 = vmmov %vm15767_vm0 }
 0x9ac   :  { %v6077_v44 = vsel %vm15763_vm9, %v6057_v25, %v13598_v33  ;;  %v6076_v50 = vsel %vm15764_vm5, %v13457_v43, %v6057_v25  ;;  %v6591_v33 = vsub.s32 1, %v9459_v3  ;;  %v13754_v43 = vld [vmem:[%s15365_s17] sm:$0xff]  ;;  %vm6919_vm9 = vcmask 15360   ;;  %vm15773_vm5 = vmmov %vm15767_vm0 }
 0x9ad   :  { %v6588_v29 = vrot.slane %v13754_v43, %v6587_v4 }
 0x9ae   :  { %6304 = vmatpush1.bf16.msra.mxu1 %v5728_v1  ;;  %v13713_v31 = vpop.permute.xlu0 %5774  ;;  %v6592_v26 = vrot.slane %v13754_v43, %v6591_v33 }
 0x9af   :  { %6305 = vmatprep.subr.bf16.mxu1 %v5787_v57  ;;  %v5717_v20 = vpop.permute.xlu1 %5716 }
 0x9b0   :  { %v5733_v62 = vsel %vm15766_vm3, %v5717_v20, %v13612_v32  ;;  %v5732_v46 = vsel %vm15767_vm0, %v13553_v63, %v5717_v20  ;;  %vm15775_vm3 = vmmov %vm15767_vm0 }
 0x9b2   :  { %6306 = vmatpush1.bf16.msra.mxu1 %v5786_v5  ;;  %v13723_v24 = vpop.permute.xlu0 %5890 }
 0x9b3   :  { %6307 = vmatprep.subr.bf16.mxu1 %v5845_v61  ;;  %v13725_v15 = vpop.permute.xlu1 %5832  ;;  %v5791_v61 = vsel %vm3614_vm8, %v13713_v31, %v13621_v36  ;;  %v5907_v36 = vsel %vm525_vm13, %v13723_v24, %v13635_v51 }
 0x9b4   :  { %v5849_v20 = vsel %vm433_vm10, %v13725_v15, %v13629_v16  ;;  %v5906_v16 = vsel %vm525_vm13, %v13578_v13, %v13723_v24 }
 0x9b6   :  { %6308 = vmatpush1.bf16.msra.mxu1 %v5844_v42  ;;  %v13731_v35 = vpop.permute.xlu0 %6006 }
 0x9b7   :  { %6309 = vmatprep.subr.bf16.mxu1 %v5903_v49  ;;  %v13735_v45 = vpop.permute.xlu1 %5948  ;;  %v6023_v13 = vsel %vm2126_vm15, %v13731_v35, %v13655_v37  ;;  %v15769_v37 = vld [vmem:[#allocation2_spill] sm:$0xff] }
 0x9b8   :  { %v5964_v51 = vsel %vm3748_vm14, %v13584_v19, %v13735_v45 }
 0x9ba   :  { %6310 = vmatpush1.bf16.msra.mxu1 %v5902_v27  ;;  %v13743_v56 = vpop.permute.xlu0 %6122 }
 0x9bb   :  { %6311 = vmatprep.subr.bf16.mxu1 %v5961_v6  ;;  %v13745_v54 = vpop.permute.xlu1 %6064 }
 0x9be   :  { %6312 = vmatpush1.bf16.msra.mxu1 %v5960_v58  ;;  %v6206_v30 = vpop.f32.mrb[84].mxu0  ;;  %v5790_v58 = vsel %vm3614_vm8, %v13562_v28, %v13713_v31  ;;  %v5848_v28 = vsel %vm433_vm10, %v13568_v17, %v13725_v15  ;;  %v5965_v17 = vsel %vm3748_vm14, %v13735_v45, %v13641_v38  ;;  %v6022_v38 = vsel %vm2126_vm15, %v13590_v48, %v13731_v35  ;;  %vm15768_vm8 = vmmov %vm15759_vm1 }
 0x9bf   :  { %6313 = vmatprep.subr.bf16.mxu1 %v6019_v0  ;;  %v6208_v9 = vpop.f32.mrb[85].mxu0  ;;  %v6473_v53 = vmax.f32 %v6206_v30, 0.0  ;;  %v6081_v19 = vsel %vm15768_vm8, %v13745_v54, %v13661_v60  ;;  %vm15770_vm14 = vmmov %vm15759_vm1  ;;  %v6603_v30 = vsub.s32 4, %v9459_v3 }
 0x9c0   :  { %v6210_v8 = vpop.f32.mrb[86].mxu0  ;;  %v6474_v55 = vmax.f32 %v6208_v9, 0.0  ;;  %v6080_v31 = vsel %vm15770_vm14, %v15769_v37, %v13745_v54  ;;  %vm15771_vm1 = vmmov %vm15757_vm2  ;;  %vm7037_vm2 = vcmask 605184  }
 0x9c1   :  { %v6212_v18 = vpop.f32.mrb[87].mxu0  ;;  %v6487_v34 = vmax.f32 %v6210_v8, 0.0  ;;  %v6139_v48 = vsel %vm15771_vm1, %v13743_v56, %v13673_v14  ;;  %vm15772_vm12 = vmmov %vm15771_vm1  ;;  %v6607_v8 = vsub.s32 5, %v9459_v3 }
 0x9c2   :  { %6314 = vmatpush1.bf16.msra.mxu1 %v6018_v40  ;;  %v6488_v10 = vmax.f32 %v6212_v18, 0.0  ;;  %v6138_v60 = vsel %vm15772_vm12, %v13606_v52, %v13743_v56  ;;  %vm15776_vm8 = vmmov %vm15767_vm0 }
 0x9c3   :  { %6315 = vmatprep.subr.bf16.mxu1 %v6077_v44  ;;  %v6608_v54 = vrot.slane %v13754_v43, %v6607_v8  ;;  %vm15777_vm14 = vmmov %vm15767_vm0 }
 0x9c4   :  { %vm15778_vm1 = vmmov %vm15767_vm0 }
 0x9c5   :  { %vm15779_vm12 = vmmov %vm15767_vm0 }
 0x9c6   :  { %6316 = vmatpush1.bf16.msra.mxu1 %v6076_v50 }
 0x9c7   :  { %6317 = vmatprep.subr.bf16.mxu1 %v6135_v12  ;;  %v6604_v12 = vrot.slane %v13754_v43, %v6603_v30 }
 0x9ca   :  { %6318 = vmatpush1.bf16.msra.mxu1 %v6134_v39 }
 0x9cb   :  { %6387 = vmatprep.subr.bf16.mxu1 %v13275_v21  ;;  %v13757_v2 = vpop.permute.xlu0 %6510 }
 0x9cc   :  { %v13759_v22 = vpop.permute.xlu1 %6505  ;;  %v6527_v21 = vmul.f32 %v13757_v2, %v6487_v34  ;;  %v6528_v7 = vmul.f32 %v13757_v2, %v6488_v10 }
 0x9cd   :  { %6334 = vmatmul.mubr.bf16.vlgmr.msra.gmra.mrb[88].mxu1 %v13362_v23  ;;  %v6513_v11 = vmul.f32 %v13759_v22, %v6473_v53 }
 0x9ce   :  { %6388 = vmatpush1.bf16.msra.mxu1 %v13273_v47  ;;  %8540 = vmatprep.mubr.msk.bf16.mxu1 %vm2126_vm15, %v9317_v41  ;;  %v6514_v47 = vmul.f32 %v13759_v22, %v6474_v55 }
 0x9cf   :  { %6389 = vmatprep.subr.bf16.mxu1 %v5733_v62  ;;  %v13777_v59 = vpop.permute.xlu0 %6550 }
 0x9d0   :  { %v13781_v1 = vpop.permute.xlu1 %6545  ;;  %v6567_v32 = vadd.f32 %v13777_v59, %v6527_v21  ;;  %v6568_v57 = vadd.f32 %v13777_v59, %v6528_v7 }
 0x9d1   :  { %v6553_v25 = vadd.f32 %v13781_v1, %v6513_v11  ;;  %v6554_v5 = vadd.f32 %v13781_v1, %v6514_v47  ;;  %v13891_v47 = vld [vmem:[%s15365_s17 + $0x8] sm:$0x3f] }
 0x9d2   :  { %6390 = vmatpush1.bf16.msra.mxu1 %v5732_v46  ;;  %v6669_v42 = vmul.f32 %v6588_v29, %v6567_v32  ;;  %v6670_v49 = vmul.f32 %v6592_v26, %v6568_v57 }
 0x9d3   :  { %6391 = vmatprep.subr.bf16.mxu1 %v5791_v61  ;;  %v6655_v27 = vmul.f32 %v6588_v29, %v6553_v25  ;;  %v6656_v6 = vmul.f32 %v6592_v26, %v6554_v5 }
 0x9d5   :  { %v13795_v0 = vpack.c.bf16 %v6669_v42, %v6655_v27  ;;  %v13797_v63 = vpack.c.bf16 %v6670_v49, %v6656_v6  ;;  %v6620_v27 = vrot.slane %v13891_v47, %v6587_v4 }
 0x9d6   :  { %6392 = vmatpush1.bf16.msra.mxu1 %v5790_v58 }
 0x9d7   :  { %6393 = vmatprep.subr.bf16.mxu1 %v5849_v20  ;;  %6773 = vrot.lane.b32.xlu0 %v13795_v0, %s9334_s14 }
 0x9d8   :  { %6713 = vrot.lane.b32.xlu1 %v13795_v0, %s9335_s30 }
 0x9da   :  { %6394 = vmatpush1.bf16.msra.mxu1 %v5848_v28  ;;  %v6624_v28 = vrot.slane %v13891_v47, %v6591_v33 }
 0x9db   :  { %6395 = vmatprep.subr.bf16.mxu1 %v5907_v36  ;;  %6893 = vrot.lane.b32.xlu0 %v13795_v0, %s9336_s9 }
 0x9dc   :  { %6833 = vrot.lane.b32.xlu1 %v13795_v0, %s9337_s5 }
 0x9de   :  { %6396 = vmatpush1.bf16.msra.mxu1 %v5906_v16 }
 0x9df   :  { %6397 = vmatprep.subr.bf16.mxu1 %v5965_v17  ;;  %7009 = vrot.lane.b32.xlu0 %v13795_v0, %s9338_s10 }
 0x9e0   :  { %6951 = vrot.lane.b32.xlu1 %v13795_v0, %s9321_s2 }
 0x9e2   :  { %6398 = vmatpush1.bf16.msra.mxu1 %v5964_v51 }
 0x9e3   :  { %6399 = vmatprep.subr.bf16.mxu1 %v6023_v13  ;;  %7127 = vrot.lane.b32.xlu0 %v13795_v0, %s9326_s29 }
 0x9e4   :  { %7069 = vrot.lane.b32.xlu1 %v13795_v0, %s9325_s28 }
 0x9e6   :  { %6400 = vmatpush1.bf16.msra.mxu1 %v6022_v38 }
 0x9e7   :  { %6401 = vmatprep.subr.bf16.mxu1 %v6081_v19  ;;  %6715 = vrot.lane.b32.xlu0 %v13797_v63, %s9335_s30 }
 0x9e8   :  { %6775 = vrot.lane.b32.xlu1 %v13797_v63, %s9334_s14 }
 0x9ea   :  { %6402 = vmatpush1.bf16.msra.mxu1 %v6080_v31 }
 0x9eb   :  { %6403 = vmatprep.subr.bf16.mxu1 %v6139_v48  ;;  %6835 = vrot.lane.b32.xlu0 %v13797_v63, %s9337_s5 }
 0x9ec   :  { %6895 = vrot.lane.b32.xlu1 %v13797_v63, %s9336_s9 }
 0x9ee   :  { %6404 = vmatpush1.bf16.msra.mxu1 %v6138_v60 }
 0x9ef   :  { %v6292_v24 = vpop.f32.mrb[88].mxu0  ;;  %7011 = vrot.lane.b32.xlu0 %v13797_v63, %s9338_s10 }
 0x9f0   :  { %v6477_v15 = vmax.f32 %v6292_v24, 0.0  ;;  %6953 = vrot.lane.b32.xlu1 %v13797_v63, %s9321_s2  ;;  %v6294_v14 = vpop.f32.mrb[89].mxu0 }
 0x9f1   :  { %v6478_v9 = vmax.f32 %v6294_v14, 0.0  ;;  %v6296_v35 = vpop.f32.mrb[90].mxu0  ;;  %6420 = vmatmul.mubr.bf16.vlgmr.msra.gmra.mrb[92].mxu1 %v13362_v23 }
 0x9f2   :  { %v6517_v52 = vmul.f32 %v13759_v22, %v6477_v15  ;;  %v6491_v40 = vmax.f32 %v6296_v35, 0.0  ;;  %v6298_v18 = vpop.f32.mrb[91].mxu0 }
 0x9f3   :  { %v6518_v45 = vmul.f32 %v13759_v22, %v6478_v9  ;;  %v6492_v44 = vmax.f32 %v6298_v18, 0.0  ;;  %7129 = vrot.lane.b32.xlu0 %v13797_v63, %s9326_s29 }
 0x9f4   :  { %v6557_v50 = vadd.f32 %v13781_v1, %v6517_v52  ;;  %v6531_v56 = vmul.f32 %v13757_v2, %v6491_v40  ;;  %7071 = vrot.lane.b32.xlu1 %v13797_v63, %s9325_s28 }
 0x9f5   :  { %v6558_v23 = vadd.f32 %v13781_v1, %v6518_v45  ;;  %v6532_v39 = vmul.f32 %v13757_v2, %v6492_v44 }
 0x9f6   :  { %v6571_v34 = vadd.f32 %v13777_v59, %v6531_v56  ;;  %v6659_v53 = vmul.f32 %v6604_v12, %v6557_v50 }
 0x9f7   :  { %v6572_v10 = vadd.f32 %v13777_v59, %v6532_v39  ;;  %v6660_v29 = vmul.f32 %v6608_v54, %v6558_v23  ;;  %v6636_v23 = vrot.slane %v13891_v47, %v6603_v30 }
 0x9f8   :  { %v6673_v55 = vmul.f32 %v6604_v12, %v6571_v34  ;;  %v6640_v34 = vrot.slane %v13891_v47, %v6607_v8 }
 0x9f9   :  { %v6674_v26 = vmul.f32 %v6608_v54, %v6572_v10 }
 0x9fa   :  { %v13884_v62 = vpack.c.bf16 %v6673_v55, %v6659_v53 }
 0x9fb   :  { %v13886_v21 = vpack.c.bf16 %v6674_v26, %v6660_v29 }
 0xa44   :  { %v6378_v7 = vpop.f32.mrb[92].mxu0 }
 0xa45   :  { %v6481_v41 = vmax.f32 %v6378_v7, 0.0  ;;  %v6380_v11 = vpop.f32.mrb[93].mxu0 }
 0xa46   :  { %v6482_v32 = vmax.f32 %v6380_v11, 0.0  ;;  %v6382_v57 = vpop.f32.mrb[94].mxu0 }
 0xa47   :  { %v6521_v46 = vmul.f32 %v13759_v22, %v6481_v41  ;;  %v6495_v25 = vmax.f32 %v6382_v57, 0.0  ;;  %v6384_v5 = vpop.f32.mrb[95].mxu0 }
 0xa48   :  { %v6522_v61 = vmul.f32 %v13759_v22, %v6482_v32  ;;  %v6496_v42 = vmax.f32 %v6384_v5, 0.0  ;;  %v6599_v5 = vsub.s32 3, %v9459_v3 }
 0xa49   :  { %v6561_v49 = vadd.f32 %v13781_v1, %v6521_v46  ;;  %v6535_v6 = vmul.f32 %v13757_v2, %v6495_v25  ;;  %v13900_v58 = vpop.permute.xlu0 %6773  ;;  %v6595_v46 = vsub.s32 2, %v9459_v3 }
 0xa4a   :  { %v6562_v20 = vadd.f32 %v13781_v1, %v6522_v61  ;;  %v6536_v36 = vmul.f32 %v13757_v2, %v6496_v42  ;;  %v13919_v33 = vpop.permute.xlu1 %6713 }
 0xa4b   :  { %v6575_v16 = vadd.f32 %v13777_v59, %v6535_v6  ;;  %v6663_v51 = vmul.f32 %v6620_v27, %v6561_v49 }
 0xa4c   :  { %v6576_v17 = vadd.f32 %v13777_v59, %v6536_v36  ;;  %v6664_v4 = vmul.f32 %v6624_v28, %v6562_v20  ;;  %v6596_v36 = vrot.slane %v13754_v43, %v6595_v46 }
 0xa4d   :  { %v6677_v13 = vmul.f32 %v6620_v27, %v6575_v16  ;;  %v13909_v38 = vpop.permute.xlu0 %6893 }
 0xa4e   :  { %v6678_v19 = vmul.f32 %v6624_v28, %v6576_v17 }
 0xa4f   :  { %v13911_v37 = vpack.c.bf16 %v6677_v13, %v6663_v51  ;;  %v6600_v51 = vrot.slane %v13754_v43, %v6599_v5 }
 0xa50   :  { %v13913_v31 = vpack.c.bf16 %v6678_v19, %v6664_v4 }
 0xa51   :  { %v13915_v48 = vpop.permute.xlu0 %7009 }
 0xa55   :  { %v13917_v60 = vpop.permute.xlu0 %7127 }
 0xa59   :  { %v13921_v24 = vpop.permute.xlu0 %6715 }
 0xa5a   :  { %v6740_v15 = vsel %vm6739_vm6, %v13919_v33, %v13921_v24 }
 0xa5b   :  { %7199 = vmatprep.subr.bf16.mxu1 %v6740_v15 }
 0xa6b   :  { %v6464_v14 = vpop.f32.mrb[96].mxu0 }
 0xa6c   :  { %v6485_v9 = vmax.f32 %v6464_v14, 0.0  ;;  %v6466_v35 = vpop.f32.mrb[97].mxu0 }
 0xa6d   :  { %v6486_v52 = vmax.f32 %v6466_v35, 0.0  ;;  %v6468_v40 = vpop.f32.mrb[98].mxu0 }
 0xa6e   :  { %v6525_v18 = vmul.f32 %v13759_v22, %v6485_v9  ;;  %v6499_v45 = vmax.f32 %v6468_v40, 0.0  ;;  %v6470_v44 = vpop.f32.mrb[99].mxu0 }
 0xa6f   :  { %v6526_v50 = vmul.f32 %v13759_v22, %v6486_v52  ;;  %v6500_v12 = vmax.f32 %v6470_v44, 0.0  ;;  %v6611_v44 = vsub.s32 6, %v9459_v3 }
 0xa70   :  { %v6565_v56 = vadd.f32 %v13781_v1, %v6525_v18  ;;  %v6539_v54 = vmul.f32 %v13757_v2, %v6499_v45 }
 0xa71   :  { %v6566_v39 = vadd.f32 %v13781_v1, %v6526_v50  ;;  %v6540_v10 = vmul.f32 %v13757_v2, %v6500_v12 }
 0xa72   :  { %v6579_v53 = vadd.f32 %v13777_v59, %v6539_v54  ;;  %v6667_v29 = vmul.f32 %v6636_v23, %v6565_v56  ;;  %v6615_v56 = vsub.s32 7, %v9459_v3 }
 0xa73   :  { %v6580_v55 = vadd.f32 %v13777_v59, %v6540_v10  ;;  %v6668_v7 = vmul.f32 %v6640_v34, %v6566_v39 }
 0xa74   :  { %v6681_v26 = vmul.f32 %v6636_v23, %v6579_v53 }
 0xa75   :  { %v6682_v41 = vmul.f32 %v6640_v34, %v6580_v55 }
 0xa76   :  { %v13940_v11 = vpack.c.bf16 %v6681_v26, %v6667_v29  ;;  %v6612_v29 = vrot.slane %v13754_v43, %v6611_v44 }
 0xa77   :  { %v13942_v30 = vpack.c.bf16 %v6682_v41, %v6668_v7  ;;  %v6616_v41 = vrot.slane %v13754_v43, %v6615_v56 }
 0xa7c   :  { %v6249_v32 = vpop.f32.mrb[84].mxu1 }
 0xa7d   :  { %v6475_v57 = vmax.f32 %v6249_v32, 0.0  ;;  %v6251_v25 = vpop.f32.mrb[85].mxu1 }
 0xa7e   :  { %v6476_v8 = vmax.f32 %v6251_v25, 0.0  ;;  %v6253_v61 = vpop.f32.mrb[86].mxu1 }
 0xa7f   :  { %v6515_v42 = vmul.f32 %v13759_v22, %v6475_v57  ;;  %v6489_v49 = vmax.f32 %v6253_v61, 0.0  ;;  %v6255_v27 = vpop.f32.mrb[87].mxu1 }
 0xa80   :  { %v6516_v6 = vmul.f32 %v13759_v22, %v6476_v8  ;;  %v6490_v20 = vmax.f32 %v6255_v27, 0.0 }
 0xa81   :  { %v6555_v28 = vadd.f32 %v13781_v1, %v6515_v42  ;;  %v6529_v16 = vmul.f32 %v13757_v2, %v6489_v49 }
 0xa82   :  { %v6556_v17 = vadd.f32 %v13781_v1, %v6516_v6  ;;  %v6530_v13 = vmul.f32 %v13757_v2, %v6490_v20 }
 0xa83   :  { %v6569_v4 = vadd.f32 %v13777_v59, %v6529_v16  ;;  %v6657_v15 = vmul.f32 %v6596_v36, %v6555_v28 }
 0xa84   :  { %v6570_v19 = vadd.f32 %v13777_v59, %v6530_v13  ;;  %v6658_v9 = vmul.f32 %v6600_v51, %v6556_v17 }
 0xa85   :  { %v6671_v14 = vmul.f32 %v6596_v36, %v6569_v4  ;;  %v14048_v4 = vld [vmem:[%s15366_s18 + $0x4] ss:$8 sps:$4 sm:$0xff]  }
 0xa86   :  { %v6672_v35 = vmul.f32 %v6600_v51, %v6570_v19  ;;  %8545 = vmatprep.mubr.msk.bf16.mxu0 %vm2126_vm15, %v14048_v4  ;;  %8544 = vmatprep.mubr.msk.bf16.mxu1 %vm2126_vm15, %v14048_v4 }
 0xa87   :  { %v13960_v52 = vpack.c.bf16 %v6671_v14, %v6657_v15 }
 0xa88   :  { %v13962_v40 = vpack.c.bf16 %v6672_v35, %v6658_v9  ;;  %v6628_v9 = vrot.slane %v13891_v47, %v6595_v46 }
 0xa89   :  { %6955 = vrot.lane.b32.xlu0 %v13960_v52, %s9321_s2  ;;  %7013 = vrot.lane.b32.xlu1 %v13960_v52, %s9338_s10 }
 0xa8d   :  { %7073 = vrot.lane.b32.xlu0 %v13960_v52, %s9325_s28  ;;  %7131 = vrot.lane.b32.xlu1 %v13960_v52, %s9326_s29 }
 0xa91   :  { %6719 = vrot.lane.b32.xlu0 %v13962_v40, %s9335_s30  ;;  %6717 = vrot.lane.b32.xlu1 %v13960_v52, %s9335_s30 }
 0xa95   :  { %6779 = vrot.lane.b32.xlu0 %v13962_v40, %s9334_s14  ;;  %6777 = vrot.lane.b32.xlu1 %v13960_v52, %s9334_s14 }
 0xa99   :  { %6839 = vrot.lane.b32.xlu0 %v13962_v40, %s9337_s5  ;;  %6837 = vrot.lane.b32.xlu1 %v13960_v52, %s9337_s5 }
 0xa9d   :  { %6899 = vrot.lane.b32.xlu0 %v13962_v40, %s9336_s9  ;;  %6897 = vrot.lane.b32.xlu1 %v13960_v52, %s9336_s9 }
 0xaa0   :  { %v6335_v18 = vpop.f32.mrb[88].mxu1 }
 0xaa1   :  { %v6479_v45 = vmax.f32 %v6335_v18, 0.0  ;;  %v6337_v50 = vpop.f32.mrb[89].mxu1  ;;  %6959 = vrot.lane.b32.xlu0 %v13884_v62, %s9321_s2  ;;  %6957 = vrot.lane.b32.xlu1 %v13962_v40, %s9321_s2 }
 0xaa2   :  { %v6480_v12 = vmax.f32 %v6337_v50, 0.0  ;;  %v6339_v23 = vpop.f32.mrb[90].mxu1 }
 0xaa3   :  { %v6519_v54 = vmul.f32 %v13759_v22, %v6479_v45  ;;  %v6493_v39 = vmax.f32 %v6339_v23, 0.0  ;;  %v6341_v34 = vpop.f32.mrb[91].mxu1 }
 0xaa4   :  { %v6520_v10 = vmul.f32 %v13759_v22, %v6480_v12  ;;  %v6494_v53 = vmax.f32 %v6341_v34, 0.0 }
 0xaa5   :  { %v6559_v55 = vadd.f32 %v13781_v1, %v6519_v54  ;;  %v6533_v26 = vmul.f32 %v13757_v2, %v6493_v39  ;;  %6723 = vrot.lane.b32.xlu0 %v13886_v21, %s9335_s30  ;;  %6721 = vrot.lane.b32.xlu1 %v13884_v62, %s9335_s30  ;;  %v14115_v54 = vpop.permute.xlu0 %6835 }
 0xaa6   :  { %v6560_v7 = vadd.f32 %v13781_v1, %v6520_v10  ;;  %v6534_v32 = vmul.f32 %v13757_v2, %v6494_v53 }
 0xaa7   :  { %v6573_v57 = vadd.f32 %v13777_v59, %v6533_v26  ;;  %v6661_v8 = vmul.f32 %v6612_v29, %v6559_v55 }
 0xaa8   :  { %v6574_v25 = vadd.f32 %v13777_v59, %v6534_v32  ;;  %v6662_v42 = vmul.f32 %v6616_v41, %v6560_v7 }
 0xaa9   :  { %v6675_v61 = vmul.f32 %v6612_v29, %v6573_v57  ;;  %6783 = vrot.lane.b32.xlu0 %v13886_v21, %s9334_s14  ;;  %6781 = vrot.lane.b32.xlu1 %v13884_v62, %s9334_s14  ;;  %v14123_v34 = vpop.permute.xlu0 %7011 }
 0xaaa   :  { %v6676_v49 = vmul.f32 %v6616_v41, %v6574_v25 }
 0xaab   :  { %v14012_v27 = vpack.c.bf16 %v6675_v61, %v6661_v8 }
 0xaac   :  { %v14014_v6 = vpack.c.bf16 %v6676_v49, %v6662_v42 }
 0xaad   :  { %6843 = vrot.lane.b32.xlu0 %v13886_v21, %s9337_s5  ;;  %6841 = vrot.lane.b32.xlu1 %v13884_v62, %s9337_s5  ;;  %v14135_v53 = vpop.permute.xlu0 %7129 }
 0xab1   :  { %6903 = vrot.lane.b32.xlu0 %v13886_v21, %s9336_s9  ;;  %6901 = vrot.lane.b32.xlu1 %v13884_v62, %s9336_s9 }
 0xab5   :  { %6963 = vrot.lane.b32.xlu0 %v14012_v27, %s9321_s2  ;;  %6961 = vrot.lane.b32.xlu1 %v13886_v21, %s9321_s2 }
 0xab9   :  { %7017 = vrot.lane.b32.xlu0 %v13884_v62, %s9338_s10  ;;  %6698 = vrot.lane.b32.xlu1 %v13942_v30, %s9335_s30 }
 0xabd   :  { %6771 = vrot.lane.b32.xlu0 %v13942_v30, %s9334_s14  ;;  %7015 = vrot.lane.b32.xlu1 %v13962_v40, %s9338_s10 }
 0xac1   :  { %7021 = vrot.lane.b32.xlu0 %v14012_v27, %s9338_s10  ;;  %6831 = vrot.lane.b32.xlu1 %v13942_v30, %s9337_s5 }
 0xac4   :  { %v6421_v43 = vpop.f32.mrb[92].mxu1 }
 0xac5   :  { %v6483_v20 = vmax.f32 %v6421_v43, 0.0  ;;  %v6423_v28 = vpop.f32.mrb[93].mxu1  ;;  %6891 = vrot.lane.b32.xlu0 %v13942_v30, %s9336_s9  ;;  %7019 = vrot.lane.b32.xlu1 %v13886_v21, %s9338_s10 }
 0xac6   :  { %v6484_v36 = vmax.f32 %v6423_v28, 0.0  ;;  %v6425_v16 = vpop.f32.mrb[94].mxu1 }
 0xac7   :  { %v6523_v17 = vmul.f32 %v13759_v22, %v6483_v20  ;;  %v6497_v51 = vmax.f32 %v6425_v16, 0.0  ;;  %v6427_v13 = vpop.f32.mrb[95].mxu1 }
 0xac8   :  { %v6524_v19 = vmul.f32 %v13759_v22, %v6484_v36  ;;  %v6498_v15 = vmax.f32 %v6427_v13, 0.0  ;;  %v6632_v22 = vrot.slane %v13891_v47, %v6599_v5 }
 0xac9   :  { %v6563_v14 = vadd.f32 %v13781_v1, %v6523_v17  ;;  %v6537_v35 = vmul.f32 %v13757_v2, %v6497_v51  ;;  %7077 = vrot.lane.b32.xlu0 %v13884_v62, %s9325_s28  ;;  %7075 = vrot.lane.b32.xlu1 %v13962_v40, %s9325_s28 }
 0xaca   :  { %v6564_v18 = vadd.f32 %v13781_v1, %v6524_v19  ;;  %v6538_v45 = vmul.f32 %v13757_v2, %v6498_v15 }
 0xacb   :  { %v6577_v46 = vadd.f32 %v13777_v59, %v6537_v35  ;;  %v6665_v50 = vmul.f32 %v6628_v9, %v6563_v14 }
 0xacc   :  { %v6578_v44 = vadd.f32 %v13777_v59, %v6538_v45  ;;  %v6666_v3 = vmul.f32 %v6632_v22, %v6564_v18  ;;  %v14083_v59 = vpop.permute.xlu1 %6833 }
 0xacd   :  { %v6679_v12 = vmul.f32 %v6628_v9, %v6577_v46  ;;  %7081 = vrot.lane.b32.xlu0 %v14012_v27, %s9325_s28  ;;  %7079 = vrot.lane.b32.xlu1 %v13886_v21, %s9325_s28 }
 0xace   :  { %v6680_v2 = vmul.f32 %v6632_v22, %v6578_v44 }
 0xacf   :  { %v14075_v1 = vpack.c.bf16 %v6679_v12, %v6665_v50 }
 0xad0   :  { %v14077_v47 = vpack.c.bf16 %v6680_v2, %v6666_v3  ;;  %v14089_v5 = vpop.permute.xlu1 %6951 }
 0xad1   :  { %7135 = vrot.lane.b32.xlu0 %v13884_v62, %s9326_s29  ;;  %7133 = vrot.lane.b32.xlu1 %v13962_v40, %s9326_s29 }
 0xad4   :  { %v14099_v56 = vpop.permute.xlu1 %7069 }
 0xad5   :  { %7139 = vrot.lane.b32.xlu0 %v14012_v27, %s9326_s29  ;;  %7137 = vrot.lane.b32.xlu1 %v13886_v21, %s9326_s29 }
 0xad8   :  { %v14105_v23 = vpop.permute.xlu1 %6775 }
 0xad9   :  { %6727 = vrot.lane.b32.xlu0 %v14014_v6, %s9335_s30  ;;  %6725 = vrot.lane.b32.xlu1 %v14012_v27, %s9335_s30 }
 0xadc   :  { %v14117_v39 = vpop.permute.xlu1 %6895 }
 0xadd   :  { %6731 = vrot.lane.b32.xlu0 %v13913_v31, %s9335_s30  ;;  %6729 = vrot.lane.b32.xlu1 %v13911_v37, %s9335_s30 }
 0xae0   :  { %v14125_v10 = vpop.permute.xlu1 %6953 }
 0xae1   :  { %6787 = vrot.lane.b32.xlu0 %v14014_v6, %s9334_s14  ;;  %6785 = vrot.lane.b32.xlu1 %v14012_v27, %s9334_s14 }
 0xae4   :  { %v14137_v55 = vpop.permute.xlu1 %7071 }
 0xae5   :  { %6791 = vrot.lane.b32.xlu0 %v13913_v31, %s9334_s14  ;;  %6789 = vrot.lane.b32.xlu1 %v13911_v37, %s9334_s14 }
 0xae9   :  { %6847 = vrot.lane.b32.xlu0 %v14014_v6, %s9337_s5  ;;  %6845 = vrot.lane.b32.xlu1 %v14012_v27, %s9337_s5 }
 0xaed   :  { %6851 = vrot.lane.b32.xlu0 %v13913_v31, %s9337_s5  ;;  %6849 = vrot.lane.b32.xlu1 %v13911_v37, %s9337_s5 }
 0xaf1   :  { %6907 = vrot.lane.b32.xlu0 %v14014_v6, %s9336_s9  ;;  %6905 = vrot.lane.b32.xlu1 %v14012_v27, %s9336_s9 }
 0xaf5   :  { %6911 = vrot.lane.b32.xlu0 %v13913_v31, %s9336_s9  ;;  %6909 = vrot.lane.b32.xlu1 %v13911_v37, %s9336_s9 }
 0xaf9   :  { %6967 = vrot.lane.b32.xlu0 %v13911_v37, %s9321_s2  ;;  %6965 = vrot.lane.b32.xlu1 %v14014_v6, %s9321_s2 }
 0xafb   :  { %v14143_v29 = vpop.permute.xlu0 %6955  ;;  %v14145_v26 = vpop.permute.xlu1 %7013 }
 0xafd   :  { %6971 = vrot.lane.b32.xlu0 %v14075_v1, %s9321_s2  ;;  %6969 = vrot.lane.b32.xlu1 %v13913_v31, %s9321_s2 }
 0xaff   :  { %v14151_v7 = vpop.permute.xlu0 %7073  ;;  %v14153_v41 = vpop.permute.xlu1 %7131 }
 0xb01   :  { %7025 = vrot.lane.b32.xlu0 %v13911_v37, %s9338_s10  ;;  %7023 = vrot.lane.b32.xlu1 %v14014_v6, %s9338_s10 }
 0xb03   :  { %v14159_v32 = vpop.permute.xlu0 %6719  ;;  %v6718_v57 = vpop.permute.xlu1 %6717 }
 0xb04   :  { %v6741_v25 = vsel %vm6739_vm6, %v13921_v24, %v6718_v57  ;;  %v6742_v8 = vsel %vm6739_vm6, %v6718_v57, %v14159_v32 }
 0xb05   :  { %7242 = vmatprep.subr.bf16.mxu0 %v6742_v8  ;;  %7029 = vrot.lane.b32.xlu0 %v14075_v1, %s9338_s10 }
 0xb06   :  { %7027 = vrot.lane.b32.xlu1 %v13913_v31, %s9338_s10  ;;  %7243 = vmatpush1.bf16.msra.mxu0 %v6741_v25  ;;  %v6800_v25 = vsel %vm6799_vm11, %v13900_v58, %v14105_v23 }
 0xb07   :  { %v14169_v61 = vpop.permute.xlu0 %6779  ;;  %v6778_v42 = vpop.permute.xlu1 %6777 }
 0xb08   :  { %v6801_v49 = vsel %vm6799_vm11, %v14105_v23, %v6778_v42  ;;  %v6802_v24 = vsel %vm6799_vm11, %v6778_v42, %v14169_v61  ;;  %v6860_v23 = vsel %vm6859_vm4, %v14083_v59, %v14115_v54 }
 0xb09   :  { %7244 = vmatprep.subr.bf16.mxu0 %v6802_v24  ;;  %7085 = vrot.lane.b32.xlu0 %v13911_v37, %s9325_s28 }
 0xb0a   :  { %7083 = vrot.lane.b32.xlu1 %v14014_v6, %s9325_s28  ;;  %7245 = vmatpush1.bf16.msra.mxu0 %v6801_v49 }
 0xb0b   :  { %v14179_v43 = vpop.permute.xlu0 %6839  ;;  %v6838_v20 = vpop.permute.xlu1 %6837 }
 0xb0c   :  { %v6861_v28 = vsel %vm6859_vm4, %v14115_v54, %v6838_v20  ;;  %v6862_v36 = vsel %vm6859_vm4, %v6838_v20, %v14179_v43 }
 0xb0d   :  { %7246 = vmatprep.subr.bf16.mxu0 %v6862_v36  ;;  %7089 = vrot.lane.b32.xlu0 %v14075_v1, %s9325_s28  ;;  %v6920_v36 = vsel %vm6919_vm9, %v13909_v38, %v14117_v39 }
 0xb0e   :  { %7087 = vrot.lane.b32.xlu1 %v13913_v31, %s9325_s28  ;;  %7247 = vmatpush1.bf16.msra.mxu0 %v6861_v28 }
 0xb0f   :  { %v14189_v16 = vpop.permute.xlu0 %6899  ;;  %v6898_v17 = vpop.permute.xlu1 %6897 }
 0xb10   :  { %v6921_v51 = vsel %vm6919_vm9, %v14117_v39, %v6898_v17  ;;  %v6922_v13 = vsel %vm6919_vm9, %v6898_v17, %v14189_v16 }
 0xb11   :  { %7248 = vmatprep.subr.bf16.mxu0 %v6922_v13  ;;  %7143 = vrot.lane.b32.xlu0 %v13911_v37, %s9326_s29 }
 0xb12   :  { %7141 = vrot.lane.b32.xlu1 %v14014_v6, %s9326_s29  ;;  %7249 = vmatpush1.bf16.msra.mxu0 %v6921_v51 }
 0xb13   :  { %v14199_v19 = vpop.permute.xlu0 %6959  ;;  %v6958_v15 = vpop.permute.xlu1 %6957  ;;  %7250 = vmatprep.subr.bf16.mxu0 %v13962_v40 }
 0xb14   :  { %v6982_v14 = vsel %vm15773_vm5, %v6958_v15, %v14199_v19  ;;  %v6981_v18 = vsel %vm15774_vm7, %v14143_v29, %v6958_v15  ;;  %vm15780_vm5 = vmmov %vm15767_vm0 }
 0xb15   :  { %7147 = vrot.lane.b32.xlu0 %v14075_v1, %s9326_s29  ;;  %vm15781_vm7 = vmmov %vm15767_vm0 }
 0xb16   :  { %7145 = vrot.lane.b32.xlu1 %v13913_v31, %s9326_s29  ;;  %7251 = vmatpush1.bf16.msra.mxu0 %v13960_v52 }
 0xb17   :  { %v14209_v9 = vpop.permute.xlu0 %6723  ;;  %v14211_v35 = vpop.permute.xlu1 %6721  ;;  %7252 = vmatprep.subr.bf16.mxu0 %v6982_v14 }
 0xb19   :  { %6735 = vrot.lane.b32.xlu0 %v14077_v47, %s9335_s30 }
 0xb1a   :  { %6733 = vrot.lane.b32.xlu1 %v14075_v1, %s9335_s30  ;;  %7253 = vmatpush1.bf16.msra.mxu0 %v6981_v18  ;;  %v6979_v18 = vsel %vm15767_vm0, %v14089_v5, %v14125_v10 }
 0xb1b   :  { %v14219_v40 = vpop.permute.xlu0 %6783  ;;  %v14221_v52 = vpop.permute.xlu1 %6781 }
 0xb1d   :  { %6793 = vrot.lane.b32.xlu0 %v14075_v1, %s9334_s14 }
 0xb1e   :  { %6737 = vrot.lane.b32.xlu1 %v13940_v11, %s9335_s30 }
 0xb1f   :  { %v14227_v22 = vpop.permute.xlu0 %6843  ;;  %v14229_v45 = vpop.permute.xlu1 %6841 }
 0xb21   :  { %6797 = vrot.lane.b32.xlu0 %v13940_v11, %s9334_s14 }
 0xb22   :  { %6795 = vrot.lane.b32.xlu1 %v14077_v47, %s9334_s14 }
 0xb23   :  { %v14235_v46 = vpop.permute.xlu0 %6903  ;;  %v14237_v44 = vpop.permute.xlu1 %6901 }
 0xb25   :  { %6855 = vrot.lane.b32.xlu0 %v14077_v47, %s9337_s5 }
 0xb26   :  { %6853 = vrot.lane.b32.xlu1 %v14075_v1, %s9337_s5 }
 0xb27   :  { %v14243_v50 = vpop.permute.xlu0 %6963  ;;  %v14245_v12 = vpop.permute.xlu1 %6961 }
 0xb29   :  { %6913 = vrot.lane.b32.xlu0 %v14075_v1, %s9336_s9 }
 0xb2a   :  { %6857 = vrot.lane.b32.xlu1 %v13940_v11, %s9337_s5 }
 0xb2b   :  { %v14251_v3 = vpop.permute.xlu0 %7017  ;;  %v14253_v2 = vpop.permute.xlu1 %6698 }
 0xb2c   :  { %v6769_v57 = vsel %vm6739_vm6, %v14253_v2, %v13919_v33 }
 0xb2d   :  { %6917 = vrot.lane.b32.xlu0 %v13940_v11, %s9336_s9  ;;  %7200 = vmatpush1.bf16.msra.mxu1 %v6769_v57 }
 0xb2e   :  { %6915 = vrot.lane.b32.xlu1 %v14077_v47, %s9336_s9  ;;  %7201 = vmatprep.subr.bf16.mxu1 %v6800_v25 }
 0xb2f   :  { %v14265_v8 = vpop.permute.xlu0 %6771  ;;  %v7016_v42 = vpop.permute.xlu1 %7015 }
 0xb30   :  { %v6829_v33 = vsel %vm6799_vm11, %v14265_v8, %v13900_v58  ;;  %v7040_v49 = vsel %vm7037_vm2, %v14145_v26, %v7016_v42  ;;  %v7041_v24 = vsel %vm7037_vm2, %v7016_v42, %v14251_v3 }
 0xb31   :  { %6975 = vrot.lane.b32.xlu0 %v13940_v11, %s9321_s2  ;;  %7202 = vmatpush1.bf16.msra.mxu1 %v6829_v33  ;;  %v7568_v33 = vld [vmem:[%s15367_s20] sm:$0xff] }
 0xb32   :  { %6973 = vrot.lane.b32.xlu1 %v14077_v47, %s9321_s2  ;;  %7254 = vmatprep.subr.bf16.mxu0 %v7041_v24 }
 0xb33   :  { %7203 = vmatprep.subr.bf16.mxu1 %v6860_v23  ;;  %7255 = vmatpush1.bf16.msra.mxu0 %v7040_v49  ;;  %v14281_v58 = vpop.permute.xlu0 %7021  ;;  %v14283_v20 = vpop.permute.xlu1 %6831  ;;  %v7528_v23 = vld [vmem:[%s15368_s19] sm:$0xff] }
 0xb34   :  { %v6889_v28 = vsel %vm6859_vm4, %v14283_v20, %v14083_v59 }
 0xb35   :  { %7031 = vrot.lane.b32.xlu0 %v14077_v47, %s9338_s10  ;;  %7204 = vmatpush1.bf16.msra.mxu1 %v6889_v28  ;;  %v7156_v28 = vsel %vm525_vm13, %v14135_v53, %v14153_v41 }
 0xb36   :  { %7033 = vrot.lane.b32.xlu1 %v13940_v11, %s9338_s10  ;;  %7205 = vmatprep.subr.bf16.mxu1 %v6920_v36  ;;  %v7569_v36 = vld [vmem:[%s15367_s20 + $0x8] sm:$0xff] }
 0xb37   :  { %v14295_v54 = vpop.permute.xlu0 %6891  ;;  %v14297_v17 = vpop.permute.xlu1 %7019 }
 0xb38   :  { %v6949_v59 = vsel %vm6919_vm9, %v14295_v54, %v13909_v38 }
 0xb39   :  { %7093 = vrot.lane.b32.xlu0 %v13940_v11, %s9325_s28  ;;  %7206 = vmatpush1.bf16.msra.mxu1 %v6949_v59 }
 0xb3a   :  { %6977 = vrot.lane.b32.xlu1 %v13942_v30, %s9321_s2  ;;  %7207 = vmatprep.subr.bf16.mxu1 %v13797_v63  ;;  %v6980_v63 = vsel %vm15775_vm3, %v14125_v10, %v14143_v29  ;;  %v7038_v10 = vsel %vm7037_vm2, %v13915_v48, %v14123_v34  ;;  %vm15785_vm3 = vmmov %vm15767_vm0 }
 0xb3b   :  { %v14307_v39 = vpop.permute.xlu0 %7077  ;;  %v7076_v51 = vpop.permute.xlu1 %7075 }
 0xb3c   :  { %v7099_v13 = vsel %vm433_vm10, %v14151_v7, %v7076_v51  ;;  %v7100_v15 = vsel %vm433_vm10, %v7076_v51, %v14307_v39 }
 0xb3d   :  { %7035 = vrot.lane.b32.xlu0 %v13942_v30, %s9338_s10  ;;  %7208 = vmatpush1.bf16.msra.mxu1 %v13795_v0  ;;  %v7039_v0 = vsel %vm7037_vm2, %v14123_v34, %v14145_v26  ;;  %v7098_v26 = vsel %vm433_vm10, %v14137_v55, %v14151_v7  ;;  %v14357_v34 = vld [vmem:[%s15366_s18] ss:$8 sps:$4 sm:$0xff]   ;;  %v7097_v7 = vsel %vm433_vm10, %v14099_v56, %v14137_v55 }
 0xb3e   :  { %7091 = vrot.lane.b32.xlu1 %v14077_v47, %s9325_s28  ;;  %7256 = vmatprep.subr.bf16.mxu0 %v7100_v15  ;;  %v7529_v55 = vld [vmem:[%s15368_s19 + $0x8] sm:$0xff] }
 0xb3f   :  { %7209 = vmatprep.subr.bf16.mxu1 %v6980_v63  ;;  %7257 = vmatpush1.bf16.msra.mxu0 %v7099_v13  ;;  %v14321_v38 = vpop.permute.xlu0 %7081  ;;  %v14323_v14 = vpop.permute.xlu1 %7079  ;;  %v6744_v63 = vsel %vm6739_vm6, %v14211_v35, %v14209_v9 }
 0xb41   :  { %7149 = vrot.lane.b32.xlu0 %v14077_v47, %s9326_s29  ;;  %7210 = vmatpush1.bf16.msra.mxu1 %v6979_v18 }
 0xb42   :  { %7095 = vrot.lane.b32.xlu1 %v13942_v30, %s9325_s28  ;;  %7211 = vmatprep.subr.bf16.mxu1 %v7039_v0 }
 0xb43   :  { %v14335_v29 = vpop.permute.xlu0 %7135  ;;  %v7134_v57 = vpop.permute.xlu1 %7133 }
 0xb44   :  { %v7157_v25 = vsel %vm525_vm13, %v14153_v41, %v7134_v57  ;;  %v7158_v42 = vsel %vm525_vm13, %v7134_v57, %v14335_v29  ;;  %v7155_v41 = vsel %vm525_vm13, %v13917_v60, %v14135_v53  ;;  %v6743_v53 = vsel %vm6739_vm6, %v14159_v32, %v14211_v35 }
 0xb45   :  { %7153 = vrot.lane.b32.xlu0 %v13942_v30, %s9326_s29  ;;  %7212 = vmatpush1.bf16.msra.mxu1 %v7038_v10  ;;  %v6804_v57 = vsel %vm6799_vm11, %v14221_v52, %v14219_v40  ;;  %v6803_v10 = vsel %vm6799_vm11, %v14169_v61, %v14221_v52  ;;  %v6863_v61 = vsel %vm6859_vm4, %v14179_v43, %v14229_v45 }
 0xb46   :  { %7151 = vrot.lane.b32.xlu1 %v13940_v11, %s9326_s29  ;;  %7258 = vmatprep.subr.bf16.mxu0 %v7158_v42  ;;  %v6864_v42 = vsel %vm6859_vm4, %v14229_v45, %v14227_v22 }
 0xb47   :  { %7213 = vmatprep.subr.bf16.mxu1 %v7098_v26  ;;  %7259 = vmatpush1.bf16.msra.mxu0 %v7157_v25  ;;  %v14359_v49 = vpop.permute.xlu0 %7139  ;;  %v14361_v24 = vpop.permute.xlu1 %7137 }
 0xb49   :  { %7572 = vperm.xlu0 %9079, %v7568_v33   ;;  %7214 = vmatpush1.bf16.msra.mxu1 %v7097_v7  ;;  %v6923_v7 = vsel %vm6919_vm9, %v14189_v16, %v14237_v44  ;;  %v6984_v16 = vsel %vm15776_vm8, %v14245_v12, %v14243_v50 }
 0xb4a   :  { %7532 = vperm.xlu1 %9080, %v7528_v23   ;;  %7275 = vmatmul.mubr.bf16.vlgmr.msra.gmra.mrb[100].mxu0 %v14357_v34 }
 0xb4b   :  { %7215 = vmatprep.subr.bf16.mxu1 %v7156_v28  ;;  %v14376_v59 = vpop.permute.xlu0 %6727  ;;  %v6726_v51 = vpop.permute.xlu1 %6725  ;;  %8547 = vmatprep.mubr.msk.bf16.mxu0 %vm2126_vm15, %v14048_v4 }
 0xb4c   :  { %v6745_v13 = vsel %vm6739_vm6, %v14209_v9, %v6726_v51  ;;  %v6746_v15 = vsel %vm6739_vm6, %v6726_v51, %v14376_v59  ;;  %v6983_v51 = vsel %vm15777_vm14, %v14199_v19, %v14245_v12  ;;  %v7042_v19 = vsel %vm7037_vm2, %v14251_v3, %v14297_v17 }
 0xb4d   :  { %7577 = vperm.xlu0 %9079, %v7569_v36   ;;  %7216 = vmatpush1.bf16.msra.mxu1 %v7155_v41  ;;  %v7160_v3 = vsel %vm525_vm13, %v14361_v24, %v14359_v49 }
 0xb4e   :  { %7537 = vperm.xlu1 %9080, %v7529_v55   ;;  %7328 = vmatprep.subr.bf16.mxu0 %v6746_v15 }
 0xb4f   :  { %7285 = vmatprep.subr.bf16.mxu1 %v6744_v63  ;;  %7329 = vmatpush1.bf16.msra.mxu0 %v6745_v13  ;;  %v14393_v18 = vpop.permute.xlu0 %6731  ;;  %v14395_v0 = vpop.permute.xlu1 %6729  ;;  %v7101_v63 = vsel %vm433_vm10, %v14307_v39, %v14323_v14  ;;  %v7159_v39 = vsel %vm525_vm13, %v14335_v29, %v14361_v24 }
 0xb50   :  { %7232 = vmatmul.mubr.bf16.vlgmr.msra.gmra.mrb[96].mxu1 %v14357_v34 }
 0xb51   :  { %7286 = vmatpush1.bf16.msra.mxu1 %v6743_v53  ;;  %8546 = vmatprep.mubr.msk.bf16.mxu1 %vm2126_vm15, %v14048_v4 }
 0xb52   :  { %7287 = vmatprep.subr.bf16.mxu1 %v6804_v57 }
 0xb53   :  { %v14406_v9 = vpop.permute.xlu0 %6787  ;;  %v6786_v25 = vpop.permute.xlu1 %6785 }
 0xb54   :  { %v6805_v32 = vsel %vm6799_vm11, %v14219_v40, %v6786_v25  ;;  %v6806_v35 = vsel %vm6799_vm11, %v6786_v25, %v14406_v9  ;;  %v6924_v40 = vsel %vm6919_vm9, %v14237_v44, %v14235_v46  ;;  %v6747_v25 = vsel %vm6739_vm6, %v14376_v59, %v14395_v0 }
 0xb55   :  { %7288 = vmatpush1.bf16.msra.mxu1 %v6803_v10  ;;  %7330 = vmatprep.subr.bf16.mxu0 %v6806_v35 }
 0xb56   :  { %7289 = vmatprep.subr.bf16.mxu1 %v6864_v42  ;;  %7331 = vmatpush1.bf16.msra.mxu0 %v6805_v32 }
 0xb57   :  { %v14418_v26 = vpop.permute.xlu0 %6791  ;;  %v14420_v33 = vpop.permute.xlu1 %6789 }
 0xb58   :  { %v6808_v29 = vsel %vm6799_vm11, %v14420_v33, %v14418_v26 }
 0xb59   :  { %7290 = vmatpush1.bf16.msra.mxu1 %v6863_v61 }
 0xb5a   :  { %7291 = vmatprep.subr.bf16.mxu1 %v6924_v40 }
 0xb5b   :  { %v14428_v52 = vpop.permute.xlu0 %6847  ;;  %v6846_v23 = vpop.permute.xlu1 %6845 }
 0xb5c   :  { %v6865_v28 = vsel %vm6859_vm4, %v14227_v22, %v6846_v23  ;;  %v6866_v36 = vsel %vm6859_vm4, %v6846_v23, %v14428_v52 }
 0xb5d   :  { %7292 = vmatpush1.bf16.msra.mxu1 %v6923_v7  ;;  %7332 = vmatprep.subr.bf16.mxu0 %v6866_v36 }
 0xb5e   :  { %7293 = vmatprep.subr.bf16.mxu1 %v13886_v21  ;;  %7333 = vmatpush1.bf16.msra.mxu0 %v6865_v28 }
 0xb5f   :  { %v14438_v43 = vpop.permute.xlu0 %6851  ;;  %v6850_v45 = vpop.permute.xlu1 %6849 }
 0xb60   :  { %v6867_v42 = vsel %vm6859_vm4, %v14428_v52, %v6850_v45 }
 0xb61   :  { %7294 = vmatpush1.bf16.msra.mxu1 %v13884_v62  ;;  %v7043_v62 = vsel %vm7037_vm2, %v14297_v17, %v14281_v58 }
 0xb62   :  { %7295 = vmatprep.subr.bf16.mxu1 %v6984_v16 }
 0xb63   :  { %v14444_v44 = vpop.permute.xlu0 %6907  ;;  %v6906_v22 = vpop.permute.xlu1 %6905 }
 0xb64   :  { %v6925_v21 = vsel %vm6919_vm9, %v14235_v46, %v6906_v22  ;;  %v6926_v55 = vsel %vm6919_vm9, %v6906_v22, %v14444_v44  ;;  %v7102_v46 = vsel %vm433_vm10, %v14323_v14, %v14321_v38 }
 0xb65   :  { %7296 = vmatpush1.bf16.msra.mxu1 %v6983_v51  ;;  %7334 = vmatprep.subr.bf16.mxu0 %v6926_v55 }
 0xb66   :  { %7297 = vmatprep.subr.bf16.mxu1 %v7043_v62  ;;  %7335 = vmatpush1.bf16.msra.mxu0 %v6925_v21 }
 0xb67   :  { %v14456_v13 = vpop.permute.xlu0 %6911  ;;  %7336 = vmatprep.subr.bf16.mxu0 %v14014_v6  ;;  %v6910_v41 = vpop.permute.xlu1 %6909 }
 0xb68   :  { %v6927_v7 = vsel %vm6919_vm9, %v14444_v44, %v6910_v41 }
 0xb69   :  { %7298 = vmatpush1.bf16.msra.mxu1 %v7042_v19 }
 0xb6a   :  { %7299 = vmatprep.subr.bf16.mxu1 %v7102_v46  ;;  %7337 = vmatpush1.bf16.msra.mxu0 %v14012_v27 }
 0xb6b   :  { %v6968_v12 = vpop.permute.xlu0 %6967  ;;  %v6966_v15 = vpop.permute.xlu1 %6965 }
 0xb6c   :  { %v6985_v6 = vsel %vm15778_vm1, %v14243_v50, %v6966_v15  ;;  %v6986_v53 = vsel %vm15779_vm12, %v6966_v15, %v6968_v12  ;;  %v6748_v50 = vsel %vm6739_vm6, %v14395_v0, %v14393_v18  ;;  %v6868_v0 = vsel %vm6859_vm4, %v6850_v45, %v14438_v43 }
 0xb6d   :  { %7300 = vmatpush1.bf16.msra.mxu1 %v7101_v63  ;;  %7338 = vmatprep.subr.bf16.mxu0 %v6986_v53 }
 0xb6e   :  { %7301 = vmatprep.subr.bf16.mxu1 %v7160_v3  ;;  %7339 = vmatpush1.bf16.msra.mxu0 %v6985_v6 }
 0xb6f   :  { %v14475_v27 = vpop.permute.xlu0 %6971  ;;  %v6970_v17 = vpop.permute.xlu1 %6969 }
 0xb70   :  { %v6988_v16 = vsel %vm15780_vm5, %v6970_v17, %v14475_v27  ;;  %v6987_v22 = vsel %vm15781_vm7, %v6968_v12, %v6970_v17 }
 0xb71   :  { %7302 = vmatpush1.bf16.msra.mxu1 %v7159_v39 }
 0xb72   :  { %7371 = vmatprep.subr.bf16.mxu1 %v6748_v50 }
 0xb73   :  { %v7026_v14 = vpop.permute.xlu0 %7025  ;;  %v7024_v57 = vpop.permute.xlu1 %7023 }
 0xb74   :  { %v7044_v10 = vsel %vm7037_vm2, %v14281_v58, %v7024_v57  ;;  %7318 = vmatmul.mubr.bf16.vlgmr.msra.gmra.mrb[100].mxu1 %v14357_v34  ;;  %v7045_v32 = vsel %vm7037_vm2, %v7024_v57, %v7026_v14  ;;  %v6807_v58 = vsel %vm6799_vm11, %v14406_v9, %v14420_v33  ;;  %v6928_v9 = vsel %vm6919_vm9, %v6910_v41, %v14456_v13 }
 0xb75   :  { %7340 = vmatprep.subr.bf16.mxu0 %v7045_v32  ;;  %7372 = vmatpush1.bf16.msra.mxu1 %v6747_v25 }
 0xb76   :  { %7341 = vmatpush1.bf16.msra.mxu0 %v7044_v10  ;;  %7373 = vmatprep.subr.bf16.mxu1 %v6808_v29 }
 0xb77   :  { %v14493_v24 = vpop.permute.xlu0 %7029  ;;  %8548 = vmatprep.mubr.msk.bf16.mxu1 %vm2126_vm15, %v14048_v4 }
 0xb78   :  { %v7028_v59 = vpop.permute.xlu1 %7027 }
 0xb79   :  { %7374 = vmatpush1.bf16.msra.mxu1 %v6807_v58  ;;  %v7047_v51 = vsel %vm7037_vm2, %v7028_v59, %v14493_v24 }
 0xb7a   :  { %7375 = vmatprep.subr.bf16.mxu1 %v6868_v0 }
 0xb7b   :  { %v7086_v35 = vpop.permute.xlu0 %7085 }
 0xb7c   :  { %v7084_v61 = vpop.permute.xlu1 %7083 }
 0xb7d   :  { %v7103_v40 = vsel %vm433_vm10, %v14321_v38, %v7084_v61  ;;  %v7104_v23 = vsel %vm433_vm10, %v7084_v61, %v7086_v35  ;;  %7376 = vmatpush1.bf16.msra.mxu1 %v6867_v42 }
 0xb7e   :  { %7342 = vmatprep.subr.bf16.mxu0 %v7104_v23  ;;  %7377 = vmatprep.subr.bf16.mxu1 %v6928_v9 }
 0xb7f   :  { %7343 = vmatpush1.bf16.msra.mxu0 %v7103_v40  ;;  %v14509_v33 = vpop.permute.xlu0 %7089 }
 0xb80   :  { %v7088_v28 = vpop.permute.xlu1 %7087 }
 0xb81   :  { %7378 = vmatpush1.bf16.msra.mxu1 %v6927_v7  ;;  %v7106_v41 = vsel %vm433_vm10, %v7088_v28, %v14509_v33  ;;  %v7105_v46 = vsel %vm433_vm10, %v7086_v35, %v7088_v28 }
 0xb82   :  { %7379 = vmatprep.subr.bf16.mxu1 %v13913_v31 }
 0xb83   :  { %v7144_v52 = vpop.permute.xlu0 %7143 }
 0xb84   :  { %v7142_v38 = vpop.permute.xlu1 %7141 }
 0xb85   :  { %v7161_v36 = vsel %vm525_vm13, %v14359_v49, %v7142_v38  ;;  %v7162_v45 = vsel %vm525_vm13, %v7142_v38, %v7144_v52  ;;  %7380 = vmatpush1.bf16.msra.mxu1 %v13911_v37  ;;  %v7046_v37 = vsel %vm7037_vm2, %v7026_v14, %v7028_v59 }
 0xb86   :  { %7344 = vmatprep.subr.bf16.mxu0 %v7162_v45  ;;  %7381 = vmatprep.subr.bf16.mxu1 %v6988_v16  ;;  %v7656_v45 = vld [vmem:[%s15369_s21 + $0x180] sm:$0xff] }
 0xb87   :  { %7345 = vmatpush1.bf16.msra.mxu0 %v7161_v36  ;;  %v14520_v44 = vpop.permute.xlu0 %7147 }
 0xb88   :  { %v7146_v31 = vpop.permute.xlu1 %7145 }
 0xb89   :  { %7382 = vmatpush1.bf16.msra.mxu1 %v6987_v22  ;;  %v7164_v15 = vsel %vm525_vm13, %v7146_v31, %v14520_v44  ;;  %v7624_v22 = vld [vmem:[%s15369_s21 + $0x80] sm:$0xff] }
 0xb8a   :  { %7361 = vmatmul.mubr.bf16.vlgmr.msra.gmra.mrb[104].mxu0 %v14357_v34  ;;  %7383 = vmatprep.subr.bf16.mxu1 %v7047_v51 }
 0xb8b   :  { %v6736_v49 = vpop.permute.xlu0 %6735  ;;  %8549 = vmatprep.mubr.msk.bf16.mxu0 %vm2126_vm15, %v14048_v4 }
 0xb8c   :  { %v6734_v21 = vpop.permute.xlu1 %6733 }
 0xb8d   :  { %v6749_v55 = vsel %vm6739_vm6, %v14393_v18, %v6734_v21  ;;  %7384 = vmatpush1.bf16.msra.mxu1 %v7046_v37  ;;  %v6750_v62 = vsel %vm6739_vm6, %v6734_v21, %v6736_v49  ;;  %v7163_v18 = vsel %vm525_vm13, %v7144_v52, %v7146_v31  ;;  %v7625_v31 = vld [vmem:[%s15369_s21 + $0x88] sm:$0xff] }
 0xb8e   :  { %7414 = vmatprep.subr.bf16.mxu0 %v6750_v62  ;;  %7385 = vmatprep.subr.bf16.mxu1 %v7106_v41  ;;  %v7658_v62 = vld [vmem:[%s15369_s21 + $0x190] sm:$0xff]  ;;  %v8830_v41 = vpack.c.bf16 %v7625_v31, %v7624_v22  ;;  %v7635_v31 = vld [vmem:[%s15369_s21 + $0xd8] sm:$0xff] }
 0xb8f   :  { %7415 = vmatpush1.bf16.msra.mxu0 %v6749_v55  ;;  %v6794_v19 = vpop.permute.xlu0 %6793  ;;  %v7634_v22 = vld [vmem:[%s15369_s21 + $0xd0] sm:$0xff] }
 0xb90   :  { %v6738_v12 = vpop.permute.xlu1 %6737  ;;  %v6809_v17 = vsel %vm6799_vm11, %v14418_v26, %v6794_v19 }
 0xb91   :  { %7386 = vmatpush1.bf16.msra.mxu1 %v7105_v46  ;;  %v6752_v3 = vsel %vm6739_vm6, %v6738_v12, %v14253_v2  ;;  %v6751_v50 = vsel %vm6739_vm6, %v6736_v49, %v6738_v12  ;;  %vm15782_vm6 = vmmov %vm15767_vm0  ;;  %v7640_v49 = vld [vmem:[%s15369_s21 + $0x100] sm:$0xff]  ;;  %v7609_v46 = vld [vmem:[%s15369_s21 + $0x8] sm:$0xff] }
 0xb92   :  { %7387 = vmatprep.subr.bf16.mxu1 %v7164_v15 }
 0xb93   :  { %v6798_v63 = vpop.permute.xlu0 %6797 }
 0xb94   :  { %v6796_v6 = vpop.permute.xlu1 %6795  ;;  %v6812_v2 = vsel %vm6799_vm11, %v6798_v63, %v14265_v8 }
 0xb95   :  { %7388 = vmatpush1.bf16.msra.mxu1 %v7163_v18  ;;  %v6810_v53 = vsel %vm6799_vm11, %v6794_v19, %v6796_v6  ;;  %v6811_v10 = vsel %vm6799_vm11, %v6796_v6, %v6798_v63  ;;  %vm15783_vm11 = vmmov %vm15767_vm0  ;;  %v7608_v19 = vld [vmem:[%s15369_s21] sm:$0xff]  ;;  %v7626_v63 = vld [vmem:[%s15369_s21 + $0x90] sm:$0xff] }
 0xb96   :  { %7416 = vmatprep.subr.bf16.mxu0 %v6810_v53  ;;  %7457 = vmatprep.subr.bf16.mxu1 %v6752_v3  ;;  %v7627_v18 = vld [vmem:[%s15369_s21 + $0x98] sm:$0xff]  ;;  %v7642_v3 = vld [vmem:[%s15369_s21 + $0x110] sm:$0xff] }
 0xb97   :  { %7417 = vmatpush1.bf16.msra.mxu0 %v6809_v17  ;;  %v6856_v39 = vpop.permute.xlu0 %6855  ;;  %v7643_v17 = vld [vmem:[%s15369_s21 + $0x118] sm:$0xff] }
 0xb98   :  { %v6854_v14 = vpop.permute.xlu1 %6853  ;;  %7404 = vmatmul.mubr.bf16.vlgmr.msra.gmra.mrb[104].mxu1 %v14357_v34 }
 0xb99   :  { %v6869_v57 = vsel %vm6859_vm4, %v14438_v43, %v6854_v14  ;;  %v6870_v25 = vsel %vm6859_vm4, %v6854_v14, %v6856_v39  ;;  %7458 = vmatpush1.bf16.msra.mxu1 %v6751_v50  ;;  %8550 = vmatprep.mubr.msk.bf16.mxu1 %vm2126_vm15, %v14048_v4  ;;  %v8834_v14 = vpack.c.bf16 %v7627_v18, %v7626_v63  ;;  %v7652_v63 = vld [vmem:[%s15369_s21 + $0x160] sm:$0xff]  ;;  %v7653_v18 = vld [vmem:[%s15369_s21 + $0x168] sm:$0xff] }
 0xb9a   :  { %7418 = vmatprep.subr.bf16.mxu0 %v6870_v25  ;;  %7459 = vmatprep.subr.bf16.mxu1 %v6812_v2  ;;  %v7611_v25 = vld [vmem:[%s15369_s21 + $0x18] sm:$0xff]  ;;  %v7661_v2 = vld [vmem:[%s15369_s21 + $0x1a8] sm:$0xff] }
 0xb9b   :  { %7419 = vmatpush1.bf16.msra.mxu0 %v6869_v57  ;;  %v6914_v26 = vpop.permute.xlu0 %6913  ;;  %v7610_v57 = vld [vmem:[%s15369_s21 + $0x10] sm:$0xff] }
 0xb9c   :  { %v6858_v32 = vpop.permute.xlu1 %6857  ;;  %v6929_v0 = vsel %vm6919_vm9, %v14456_v13, %v6914_v26 }
 0xb9d   :  { %7460 = vmatpush1.bf16.msra.mxu1 %v6811_v10  ;;  %v6872_v43 = vsel %vm6859_vm4, %v6858_v32, %v14283_v20  ;;  %v6871_v58 = vsel %vm6859_vm4, %v6856_v39, %v6858_v32  ;;  %vm15784_vm4 = vmmov %vm15767_vm0  ;;  %v8832_v39 = vpack.c.bf16 %v7609_v46, %v7608_v19  ;;  %v7629_v10 = vld [vmem:[%s15369_s21 + $0xa8] sm:$0xff]  ;;  %v8868_v32 = vpack.c.bf16 %v7643_v17, %v7642_v3  ;;  %v7619_v19 = vld [vmem:[%s15369_s21 + $0x58] sm:$0xff] }
 0xb9e   :  { %7461 = vmatprep.subr.bf16.mxu1 %v6872_v43  ;;  %v7644_v43 = vld [vmem:[%s15369_s21 + $0x120] sm:$0xff]  ;;  %v7669_v46 = vld [vmem:[%s15369_s21 + $0x1e8] sm:$0xff]  ;;  %v7670_v3 = vld [vmem:[%s15369_s21 + $0x1f0] sm:$0xff] }
 0xb9f   :  { %v6918_v29 = vpop.permute.xlu0 %6917 }
 0xba0   :  { %v6916_v59 = vpop.permute.xlu1 %6915  ;;  %v6932_v8 = vsel %vm6919_vm9, %v6918_v29, %v14295_v54 }
 0xba1   :  { %v6930_v4 = vsel %vm6919_vm9, %v6914_v26, %v6916_v59  ;;  %7462 = vmatpush1.bf16.msra.mxu1 %v6871_v58  ;;  %v6931_v20 = vsel %vm6919_vm9, %v6916_v59, %v6918_v29  ;;  %v7628_v26 = vld [vmem:[%s15369_s21 + $0xa0] sm:$0xff]  ;;  %v7645_v29 = vld [vmem:[%s15369_s21 + $0x128] sm:$0xff]  ;;  %v8836_v58 = vpack.c.bf16 %v7611_v25, %v7610_v57  ;;  %v7639_v57 = vld [vmem:[%s15369_s21 + $0xf8] sm:$0xff]  ;;  %v8888_v25 = vpack.c.bf16 %v7653_v18, %v7652_v63 }
 0xba2   :  { %7420 = vmatprep.subr.bf16.mxu0 %v6930_v4  ;;  %7463 = vmatprep.subr.bf16.mxu1 %v6932_v8  ;;  %v7662_v8 = vld [vmem:[%s15369_s21 + $0x1b0] sm:$0xff]  ;;  %v7612_v4 = vld [vmem:[%s15369_s21 + $0x20] sm:$0xff]  ;;  %v7673_v18 = vld [vmem:[%s15369_s21 + $0x208] sm:$0xff] }
 0xba3   :  { %7421 = vmatpush1.bf16.msra.mxu0 %v6929_v0  ;;  %v6976_v35 = vpop.permute.xlu0 %6975  ;;  %v7613_v0 = vld [vmem:[%s15369_s21 + $0x28] sm:$0xff]  ;;  %v7672_v63 = vld [vmem:[%s15369_s21 + $0x200] sm:$0xff] }
 0xba4   :  { %7422 = vmatprep.subr.bf16.mxu0 %v14077_v47  ;;  %v6974_v42 = vpop.permute.xlu1 %6973 }
 0xba5   :  { %7464 = vmatpush1.bf16.msra.mxu1 %v6931_v20  ;;  %v6990_v61 = vsel %vm15782_vm6, %v6974_v42, %v6976_v35  ;;  %v6989_v13 = vsel %vm15783_vm11, %v14475_v27, %v6974_v42  ;;  %v7630_v20 = vld [vmem:[%s15369_s21 + $0xb0] sm:$0xff]  ;;  %v7631_v42 = vld [vmem:[%s15369_s21 + $0xb8] sm:$0xff] }
 0xba6   :  { %7465 = vmatprep.subr.bf16.mxu1 %v13942_v30 }
 0xba7   :  { %7423 = vmatpush1.bf16.msra.mxu0 %v14075_v1  ;;  %v7032_v54 = vpop.permute.xlu0 %7031 }
 0xba8   :  { %7424 = vmatprep.subr.bf16.mxu0 %v6990_v61  ;;  %v7034_v40 = vpop.permute.xlu1 %7033  ;;  %v7048_v7 = vsel %vm7037_vm2, %v14493_v24, %v7032_v54  ;;  %v7646_v61 = vld [vmem:[%s15369_s21 + $0x130] sm:$0xff] }
 0xba9   :  { %7466 = vmatpush1.bf16.msra.mxu1 %v13940_v11  ;;  %v7049_v47 = vsel %vm7037_vm2, %v7032_v54, %v7034_v40  ;;  %v8872_v54 = vpack.c.bf16 %v7645_v29, %v7644_v43  ;;  %v7622_v29 = vld [vmem:[%s15369_s21 + $0x70] sm:$0xff] }
 0xbab   :  { %7425 = vmatpush1.bf16.msra.mxu0 %v6989_v13  ;;  %v7094_v23 = vpop.permute.xlu0 %7093  ;;  %v8840_v13 = vpack.c.bf16 %v7613_v0, %v7612_v4  ;;  %v7721_v4 = vld [vmem:[%s15369_s21 + $0x388] sm:$0xff] }
 0xbac   :  { %7426 = vmatprep.subr.bf16.mxu0 %v7049_v47  ;;  %v6978_v9 = vpop.permute.xlu1 %6977  ;;  %v7664_v47 = vld [vmem:[%s15369_s21 + $0x1c0] sm:$0xff] }
 0xbad   :  { %v6991_v30 = vsel %vm15784_vm4, %v6976_v35, %v6978_v9  ;;  %v7007_v1 = vsel %vm15785_vm3, %v6978_v9, %v14089_v5  ;;  %v7663_v35 = vld [vmem:[%s15369_s21 + $0x1b8] sm:$0xff]  ;;  %v8842_v9 = vpack.c.bf16 %v7631_v42, %v7630_v20 }
 0xbae   :  { %7467 = vmatprep.subr.bf16.mxu1 %v7007_v1  ;;  %v7615_v1 = vld [vmem:[%s15369_s21 + $0x38] sm:$0xff] }
 0xbaf   :  { %7427 = vmatpush1.bf16.msra.mxu0 %v7048_v7  ;;  %7468 = vmatpush1.bf16.msra.mxu1 %v6991_v30  ;;  %v7036_v11 = vpop.permute.xlu0 %7035  ;;  %v7614_v30 = vld [vmem:[%s15369_s21 + $0x30] sm:$0xff]  ;;  %v7665_v7 = vld [vmem:[%s15369_s21 + $0x1c8] sm:$0xff] }
 0xbb0   :  { %v7050_v27 = vsel %vm7037_vm2, %v7034_v40, %v7036_v11  ;;  %v7092_v28 = vpop.permute.xlu1 %7091  ;;  %v7067_v52 = vsel %vm7037_vm2, %v7036_v11, %v13915_v48  ;;  %v7647_v40 = vld [vmem:[%s15369_s21 + $0x138] sm:$0xff]  ;;  %v7632_v11 = vld [vmem:[%s15369_s21 + $0xc0] sm:$0xff] }
 0xbb1   :  { %v7107_v38 = vsel %vm433_vm10, %v14509_v33, %v7092_v28  ;;  %v7108_v36 = vsel %vm433_vm10, %v7092_v28, %v7094_v23  ;;  %7469 = vmatprep.subr.bf16.mxu1 %v7067_v52  ;;  %v7657_v33 = vld [vmem:[%s15369_s21 + $0x188] sm:$0xff]  ;;  %v8876_v28 = vpack.c.bf16 %v7647_v40, %v7646_v61  ;;  %v7648_v52 = vld [vmem:[%s15369_s21 + $0x140] sm:$0xff] }
 0xbb2   :  { %7428 = vmatprep.subr.bf16.mxu0 %v7108_v36  ;;  %v8862_v55 = vpack.c.bf16 %v7657_v33, %v7656_v45  ;;  %v8844_v36 = vpack.c.bf16 %v7615_v1, %v7614_v30  ;;  %v7667_v33 = vld [vmem:[%s15369_s21 + $0x1d8] sm:$0xff] }
 0xbb3   :  { %7429 = vmatpush1.bf16.msra.mxu0 %v7107_v38  ;;  %7470 = vmatpush1.bf16.msra.mxu1 %v7050_v27  ;;  %v7150_v5 = vpop.permute.xlu0 %7149  ;;  %v7633_v27 = vld [vmem:[%s15369_s21 + $0xc8] sm:$0xff] }
 0xbb4   :  { %v7096_v24 = vpop.permute.xlu1 %7095  ;;  %v7165_v6 = vsel %vm525_vm13, %v14520_v44, %v7150_v5  ;;  %v7660_v44 = vld [vmem:[%s15369_s21 + $0x1a0] sm:$0xff]  ;;  %v7649_v38 = vld [vmem:[%s15369_s21 + $0x148] sm:$0xff]  ;;  %v8846_v45 = vpack.c.bf16 %v7633_v27, %v7632_v11 }
 0xbb5   :  { %v7109_v16 = vsel %vm433_vm10, %v7094_v23, %v7096_v24  ;;  %v7125_v48 = vsel %vm433_vm10, %v7096_v24, %v14099_v56  ;;  %v7641_v56 = vld [vmem:[%s15369_s21 + $0x108] sm:$0xff]  ;;  %v8870_v59 = vpack.c.bf16 %v7661_v2, %v7660_v44  ;;  %v8874_v23 = vpack.c.bf16 %v7663_v35, %v7662_v8  ;;  %v7666_v24 = vld [vmem:[%s15369_s21 + $0x1d0] sm:$0xff]  ;;  %v7671_v44 = vld [vmem:[%s15369_s21 + $0x1f8] sm:$0xff] }
 0xbb6   :  { %7471 = vmatprep.subr.bf16.mxu1 %v7125_v48  ;;  %v8864_v53 = vpack.c.bf16 %v7641_v56, %v7640_v49  ;;  %v7617_v48 = vld [vmem:[%s15369_s21 + $0x48] sm:$0xff]  ;;  %v7650_v49 = vld [vmem:[%s15369_s21 + $0x150] sm:$0xff]  ;;  %v7651_v56 = vld [vmem:[%s15369_s21 + $0x158] sm:$0xff]  ;;  %vm8441_vm10 = vcmask 9216  }
 0xbb7   :  { %7472 = vmatpush1.bf16.msra.mxu1 %v7109_v16  ;;  %v7154_v51 = vpop.permute.xlu0 %7153  ;;  %v7616_v16 = vld [vmem:[%s15369_s21 + $0x40] sm:$0xff]  ;;  %v7654_v2 = vld [vmem:[%s15369_s21 + $0x170] sm:$0xff]  ;;  %v7689_v8 = vld [vmem:[%s15369_s21 + $0x288] sm:$0xff] }
 0xbb8   :  { %v7152_v37 = vpop.permute.xlu1 %7151  ;;  %v7183_v21 = vsel %vm525_vm13, %v7154_v51, %v13917_v60  ;;  %v7659_v60 = vld [vmem:[%s15369_s21 + $0x198] sm:$0xff]  ;;  %v7704_v11 = vld [vmem:[%s15369_s21 + $0x300] sm:$0xff]  ;;  %v7705_v27 = vld [vmem:[%s15369_s21 + $0x308] sm:$0xff] }
 0xbb9   :  { %v7167_v12 = vsel %vm525_vm13, %v7152_v37, %v7154_v51  ;;  %v7166_v15 = vsel %vm525_vm13, %v7150_v5, %v7152_v37  ;;  %7473 = vmatprep.subr.bf16.mxu1 %v7183_v21  ;;  %v8866_v50 = vpack.c.bf16 %v7659_v60, %v7658_v62  ;;  %v8878_v5 = vpack.c.bf16 %v7665_v7, %v7664_v47 }
 0xbba   :  { %7430 = vmatprep.subr.bf16.mxu0 %v7166_v15  ;;  %v8880_v51 = vpack.c.bf16 %v7649_v38, %v7648_v52  ;;  %v8848_v37 = vpack.c.bf16 %v7617_v48, %v7616_v16  ;;  %v8882_v21 = vpack.c.bf16 %v7667_v33, %v7666_v24  ;;  %v8850_v62 = vpack.c.bf16 %v7635_v31, %v7634_v22  ;;  %v7637_v15 = vld [vmem:[%s15369_s21 + $0xe8] sm:$0xff]  ;;  %v7722_v38 = vld [vmem:[%s15369_s21 + $0x390] sm:$0xff] }
 0xbbb   :  { %7431 = vmatpush1.bf16.msra.mxu0 %v7165_v6  ;;  %7474 = vmatpush1.bf16.msra.mxu1 %v7167_v12  ;;  %v7636_v12 = vld [vmem:[%s15369_s21 + $0xe0] sm:$0xff]  ;;  %v8884_v60 = vpack.c.bf16 %v7651_v56, %v7650_v49  ;;  %v8928_v48 = vpack.c.bf16 %v7705_v27, %v7704_v11  ;;  %v7694_v11 = vld [vmem:[%s15369_s21 + $0x2b0] sm:$0xff]  ;;  %v7695_v27 = vld [vmem:[%s15369_s21 + $0x2b8] sm:$0xff] }
 0xbbc   :  { %8863 = vmatprep.subr.bf16.mxu1 %v8862_v55  ;;  %8831 = vmatprep.subr.bf16.mxu0 %v8830_v41  ;;  %v7668_v55 = vld [vmem:[%s15369_s21 + $0x1e0] sm:$0xff]  ;;  %v7618_v41 = vld [vmem:[%s15369_s21 + $0x50] sm:$0xff]  ;;  %v8854_v17 = vpack.c.bf16 %v7637_v15, %v7636_v12 }
 0xbbd   :  { %v8852_v6 = vpack.c.bf16 %v7619_v19, %v7618_v41  ;;  %v7724_v19 = vld [vmem:[%s15369_s21 + $0x3a0] sm:$0xff] }
 0xbbe   :  { %7447 = vmatmul.mubr.bf16.vlgmr.msra.gmra.mrb[108].mxu0 %v14357_v34  ;;  %7490 = vmatmul.mubr.bf16.vlgmr.msra.gmra.mrb[108].mxu1 %v14357_v34  ;;  %v8838_v34 = vpack.c.bf16 %v7629_v10, %v7628_v26  ;;  %v7655_v26 = vld [vmem:[%s15369_s21 + $0x178] sm:$0xff] }
 0xbbf   :  { %8865 = vmatpush3.bf16.msra.mxu1 %v8864_v53  ;;  %8833 = vmatpush3.bf16.msra.mxu0 %v8832_v39  ;;  %v8886_v53 = vpack.c.bf16 %v7669_v46, %v7668_v55  ;;  %v7620_v39 = vld [vmem:[%s15369_s21 + $0x60] sm:$0xff]  ;;  %v8892_v0 = vpack.c.bf16 %v7655_v26, %v7654_v2  ;;  %v7725_v46 = vld [vmem:[%s15369_s21 + $0x3a8] sm:$0xff]  ;;  %v8896_v26 = vpack.c.bf16 %v7673_v18, %v7672_v63  ;;  %v7699_v63 = vld [vmem:[%s15369_s21 + $0x2d8] sm:$0xff] }
 0xbc0   :  { %8867 = vmatprep.subr.bf16.mxu1 %v8866_v50  ;;  %8835 = vmatprep.subr.bf16.mxu0 %v8834_v14  ;;  %v7621_v50 = vld [vmem:[%s15369_s21 + $0x68] sm:$0xff]  ;;  %v7638_v14 = vld [vmem:[%s15369_s21 + $0xf0] sm:$0xff] }
 0xbc1   :  { %v8856_v10 = vpack.c.bf16 %v7621_v50, %v7620_v39  ;;  %v8858_v43 = vpack.c.bf16 %v7639_v57, %v7638_v14  ;;  %v7708_v14 = vld [vmem:[%s15369_s21 + $0x320] sm:$0xff]  ;;  %v7709_v57 = vld [vmem:[%s15369_s21 + $0x328] sm:$0xff] }
 0xbc3   :  { %8869 = vmatpush3.bf16.msra.mxu1 %v8868_v32  ;;  %8837 = vmatpush3.bf16.msra.mxu0 %v8836_v58  ;;  %v8890_v32 = vpack.c.bf16 %v7671_v44, %v7670_v3  ;;  %v7623_v58 = vld [vmem:[%s15369_s21 + $0x78] sm:$0xff]  ;;  %v7690_v3 = vld [vmem:[%s15369_s21 + $0x290] sm:$0xff]  ;;  %v8934_v44 = vpack.c.bf16 %v7725_v46, %v7724_v19  ;;  %v7733_v19 = vld [vmem:[%s15369_s21 + $0x3e8] sm:$0xff] }
 0xbc4   :  { %8871 = vmatprep.subr.bf16.mxu1 %v8870_v59  ;;  %8839 = vmatprep.subr.bf16.mxu0 %v8838_v34  ;;  %v7688_v59 = vld [vmem:[%s15369_s21 + $0x280] sm:$0xff]  ;;  %v8860_v35 = vpack.c.bf16 %v7623_v58, %v7622_v29 }
 0xbc5   :  { %v7720_v34 = vld [vmem:[%s15369_s21 + $0x380] sm:$0xff]  ;;  %v8894_v20 = vpack.c.bf16 %v7689_v8, %v7688_v59  ;;  %v7674_v59 = vld [vmem:[%s15369_s21 + $0x210] sm:$0xff]  ;;  %v7675_v8 = vld [vmem:[%s15369_s21 + $0x218] sm:$0xff] }
 0xbc6   :  { %v8926_v42 = vpack.c.bf16 %v7721_v4, %v7720_v34  ;;  %v7692_v4 = vld [vmem:[%s15369_s21 + $0x2a0] sm:$0xff] }
 0xbc7   :  { %8873 = vmatpush3.bf16.msra.mxu1 %v8872_v54  ;;  %8841 = vmatpush3.bf16.msra.mxu0 %v8840_v13 }
 0xbc8   :  { %8875 = vmatprep.subr.bf16.mxu1 %v8874_v23  ;;  %8843 = vmatprep.subr.bf16.mxu0 %v8842_v9  ;;  %v14798_v40 = vpop.permute.xlu0 %7572 }
 0xbc9   :  { %v14796_v54 = vpop.permute.xlu1 %7532 }
 0xbcb   :  { %8877 = vmatpush3.bf16.msra.mxu1 %v8876_v28  ;;  %8845 = vmatpush3.bf16.msra.mxu0 %v8844_v36  ;;  %v7723_v36 = vld [vmem:[%s15369_s21 + $0x398] sm:$0xff] }
 0xbcc   :  { %8879 = vmatprep.subr.bf16.mxu1 %v8878_v5  ;;  %8847 = vmatprep.subr.bf16.mxu0 %v8846_v45  ;;  %v14818_v33 = vpop.permute.xlu0 %7577  ;;  %v8930_v56 = vpack.c.bf16 %v7723_v36, %v7722_v38  ;;  %v7712_v38 = vld [vmem:[%s15369_s21 + $0x340] sm:$0xff]  ;;  %v7713_v36 = vld [vmem:[%s15369_s21 + $0x348] sm:$0xff] }
 0xbcd   :  { %v14814_v5 = vpop.permute.xlu1 %7537 }
 0xbcf   :  { %8881 = vmatpush3.bf16.msra.mxu1 %v8880_v51  ;;  %8849 = vmatpush3.bf16.msra.mxu0 %v8848_v37  ;;  %v7706_v37 = vld [vmem:[%s15369_s21 + $0x310] sm:$0xff] }
 0xbd0   :  { %8883 = vmatprep.subr.bf16.mxu1 %v8882_v21  ;;  %8851 = vmatprep.subr.bf16.mxu0 %v8850_v62  ;;  %v7707_v21 = vld [vmem:[%s15369_s21 + $0x318] sm:$0xff] }
 0xbd1   :  { %v8932_v39 = vpack.c.bf16 %v7707_v21, %v7706_v37  ;;  %v7714_v21 = vld [vmem:[%s15369_s21 + $0x350] sm:$0xff] }
 0xbd3   :  { %8885 = vmatpush3.bf16.msra.mxu1 %v8884_v60  ;;  %8853 = vmatpush3.bf16.msra.mxu0 %v8852_v6 }
 0xbd4   :  { %8887 = vmatprep.subr.bf16.mxu1 %v8886_v53  ;;  %8855 = vmatprep.subr.bf16.mxu0 %v8854_v17  ;;  %v7691_v17 = vld [vmem:[%s15369_s21 + $0x298] sm:$0xff] }
 0xbd5   :  { %v8898_v58 = vpack.c.bf16 %v7691_v17, %v7690_v3  ;;  %v7717_v3 = vld [vmem:[%s15369_s21 + $0x368] sm:$0xff] }
 0xbd7   :  { %8889 = vmatpush3.bf16.msra.mxu1 %v8888_v25  ;;  %8857 = vmatpush3.bf16.msra.mxu0 %v8856_v10  ;;  %v7726_v10 = vld [vmem:[%s15369_s21 + $0x3b0] sm:$0xff] }
 0xbd8   :  { %8891 = vmatprep.subr.bf16.mxu1 %v8890_v32  ;;  %8859 = vmatprep.subr.bf16.mxu0 %v8858_v43  ;;  %v7727_v32 = vld [vmem:[%s15369_s21 + $0x3b8] sm:$0xff] }
 0xbdb   :  { %8893 = vmatpush3.bf16.msra.mxu1 %v8892_v0  ;;  %8861 = vmatpush3.bf16.msra.mxu0 %v8860_v35  ;;  %v7693_v0 = vld [vmem:[%s15369_s21 + $0x2a8] sm:$0xff]  ;;  %v8936_v35 = vpack.c.bf16 %v7709_v57, %v7708_v14  ;;  %v7682_v14 = vld [vmem:[%s15369_s21 + $0x250] sm:$0xff]  ;;  %v7683_v57 = vld [vmem:[%s15369_s21 + $0x258] sm:$0xff] }
 0xbdc   :  { %8895 = vmatprep.subr.bf16.mxu0 %v8894_v20  ;;  %8927 = vmatprep.subr.bf16.mxu1 %v8926_v42  ;;  %v8938_v20 = vpack.c.bf16 %v7727_v32, %v7726_v10  ;;  %v7710_v42 = vld [vmem:[%s15369_s21 + $0x330] sm:$0xff] }
 0xbdd   :  { %v7718_v32 = vld [vmem:[%s15369_s21 + $0x370] sm:$0xff] }
 0xc1d   :  { %v7276_v61 = vpop.f32.mrb[100].mxu0 }
 0xc1e   :  { %v7502_v13 = vmax.f32 %v7276_v61, 0.0  ;;  %v7278_v23 = vpop.f32.mrb[101].mxu0  ;;  %v7711_v61 = vld [vmem:[%s15369_s21 + $0x338] sm:$0xff] }
 0xc1f   :  { %v7503_v47 = vmax.f32 %v7278_v23, 0.0  ;;  %v7280_v9 = vpop.f32.mrb[102].mxu0  ;;  %v7728_v23 = vld [vmem:[%s15369_s21 + $0x3c0] sm:$0xff] }
 0xc20   :  { %v7542_v30 = vmul.f32 %v14796_v54, %v7502_v13  ;;  %v7516_v1 = vmax.f32 %v7280_v9, 0.0  ;;  %v7282_v7 = vpop.f32.mrb[103].mxu0  ;;  %v8900_v13 = vpack.c.bf16 %v7675_v8, %v7674_v59  ;;  %v7785_v59 = vld [vmem:[%s15369_s21 + $0x588] sm:$0xff] }
 0xc21   :  { %v7543_v28 = vmul.f32 %v14796_v54, %v7503_v47  ;;  %v7517_v52 = vmax.f32 %v7282_v7, 0.0  ;;  %v7729_v47 = vld [vmem:[%s15369_s21 + $0x3c8] sm:$0xff] }
 0xc22   :  { %v7582_v22 = vadd.f32 %v14798_v40, %v7542_v30  ;;  %v7556_v31 = vmul.f32 %v14814_v5, %v7516_v1  ;;  %v8902_v30 = vpack.c.bf16 %v7693_v0, %v7692_v4  ;;  %v7676_v1 = vld [vmem:[%s15369_s21 + $0x220] sm:$0xff]  ;;  %v7677_v7 = vld [vmem:[%s15369_s21 + $0x228] sm:$0xff]  ;;  %v7702_v0 = vld [vmem:[%s15369_s21 + $0x2f0] sm:$0xff] }
 0xc23   :  { %v7557_v24 = vmul.f32 %v14814_v5, %v7517_v52  ;;  %v7233_v45 = vpop.f32.mrb[96].mxu1  ;;  %v7583_v16 = vadd.f32 %v14798_v40, %v7543_v28  ;;  %v8940_v28 = vpack.c.bf16 %v7711_v61, %v7710_v42  ;;  %v8942_v52 = vpack.c.bf16 %v7729_v47, %v7728_v23  ;;  %v7685_v4 = vld [vmem:[%s15369_s21 + $0x268] sm:$0xff]  ;;  %v7686_v23 = vld [vmem:[%s15369_s21 + $0x270] sm:$0xff]  ;;  %v7687_v47 = vld [vmem:[%s15369_s21 + $0x278] sm:$0xff] }
 0xc24   :  { %v7500_v51 = vmax.f32 %v7233_v45, 0.0  ;;  %v7235_v49 = vpop.f32.mrb[97].mxu1  ;;  %v7596_v50 = vadd.f32 %v14818_v33, %v7556_v31  ;;  %v7730_v45 = vld [vmem:[%s15369_s21 + $0x3d0] sm:$0xff]  ;;  %v7679_v31 = vld [vmem:[%s15369_s21 + $0x238] sm:$0xff] }
 0xc25   :  { %v7501_v55 = vmax.f32 %v7235_v49, 0.0  ;;  %7971 = vmatprep.mubr.f32.mxu1 %v7583_v16  ;;  %v7237_v62 = vpop.f32.mrb[98].mxu1  ;;  %v7597_v41 = vadd.f32 %v14818_v33, %v7557_v24  ;;  %v8904_v24 = vpack.c.bf16 %v7677_v7, %v7676_v1  ;;  %v7731_v16 = vld [vmem:[%s15369_s21 + $0x3d8] sm:$0xff]  ;;  %v7697_v49 = vld [vmem:[%s15369_s21 + $0x2c8] sm:$0xff]  ;;  %v8924_v1 = vpack.c.bf16 %v7687_v47, %v7686_v23 }
 0xc26   :  { %v7540_v12 = vmul.f32 %v14796_v54, %v7500_v51  ;;  %v7514_v15 = vmax.f32 %v7237_v62, 0.0  ;;  %7972 = vmatmul.mubr.f32.vlgmr.msra.gmra.mrb[112].mxu1 %v7582_v22  ;;  %v7239_v60 = vpop.f32.mrb[99].mxu1  ;;  %v7678_v22 = vld [vmem:[%s15369_s21 + $0x230] sm:$0xff]  ;;  %v7696_v51 = vld [vmem:[%s15369_s21 + $0x2c0] sm:$0xff]  ;;  %v8946_v37 = vpack.c.bf16 %v7731_v16, %v7730_v45  ;;  %v7765_v23 = vld [vmem:[%s15369_s21 + $0x4e8] sm:$0xff] }
 0xc27   :  { %v7541_v6 = vmul.f32 %v14796_v54, %v7501_v55  ;;  %v7515_v53 = vmax.f32 %v7239_v60, 0.0  ;;  %7976 = vmatprep.mubr.f32.mxu1 %v7597_v41  ;;  %8929 = vmatpush3.bf16.msra.mxu1 %v8928_v48  ;;  %v8906_v48 = vpack.c.bf16 %v7695_v27, %v7694_v11  ;;  %v7715_v55 = vld [vmem:[%s15369_s21 + $0x358] sm:$0xff]  ;;  %v8908_v62 = vpack.c.bf16 %v7679_v31, %v7678_v22  ;;  %v7732_v41 = vld [vmem:[%s15369_s21 + $0x3e0] sm:$0xff]  ;;  %v7698_v60 = vld [vmem:[%s15369_s21 + $0x2d0] sm:$0xff] }
 0xc28   :  { %8931 = vmatprep.subr.bf16.mxu1 %v8930_v56  ;;  %v7580_v43 = vadd.f32 %v14798_v40, %v7540_v12  ;;  %v7554_v29 = vmul.f32 %v14814_v5, %v7514_v15  ;;  %v8944_v56 = vpack.c.bf16 %v7713_v36, %v7712_v38  ;;  %v8910_v46 = vpack.c.bf16 %v7697_v49, %v7696_v51  ;;  %v7680_v12 = vld [vmem:[%s15369_s21 + $0x240] sm:$0xff]  ;;  %v7681_v15 = vld [vmem:[%s15369_s21 + $0x248] sm:$0xff]  ;;  %v7754_v51 = vld [vmem:[%s15369_s21 + $0x490] sm:$0xff] }
 0xc29   :  { %v7555_v25 = vmul.f32 %v14814_v5, %v7515_v53  ;;  %v7581_v2 = vadd.f32 %v14798_v40, %v7541_v6  ;;  %v8948_v18 = vpack.c.bf16 %v7715_v55, %v7714_v21  ;;  %v8950_v6 = vpack.c.bf16 %v7733_v19, %v7732_v41  ;;  %v7716_v53 = vld [vmem:[%s15369_s21 + $0x360] sm:$0xff]  ;;  %v7755_v49 = vld [vmem:[%s15369_s21 + $0x498] sm:$0xff]  ;;  %v7738_v19 = vld [vmem:[%s15369_s21 + $0x410] sm:$0xff] }
 0xc2a   :  { %7977 = vmatmul.mubr.f32.gmra.mrb[114].mxu1 %v7596_v50  ;;  %v7594_v9 = vadd.f32 %v14818_v33, %v7554_v29  ;;  %v8912_v17 = vpack.c.bf16 %v7681_v15, %v7680_v12  ;;  %v7735_v50 = vld [vmem:[%s15369_s21 + $0x3f8] sm:$0xff]  ;;  %v8916_v29 = vpack.c.bf16 %v7683_v57, %v7682_v14  ;;  %v7736_v16 = vld [vmem:[%s15369_s21 + $0x400] sm:$0xff]  ;;  %v8962_v41 = vpack.c.bf16 %v7755_v49, %v7754_v51  ;;  %v7742_v14 = vld [vmem:[%s15369_s21 + $0x430] sm:$0xff] }
 0xc2b   :  { %7896 = vmatprep.mubr.f32.mxu0 %v7581_v2  ;;  %v7595_v34 = vadd.f32 %v14818_v33, %v7555_v25  ;;  %8933 = vmatpush3.bf16.msra.mxu1 %v8932_v39  ;;  %v7734_v39 = vld [vmem:[%s15369_s21 + $0x3f0] sm:$0xff]  ;;  %v7700_v25 = vld [vmem:[%s15369_s21 + $0x2e0] sm:$0xff]  ;;  %v7701_v2 = vld [vmem:[%s15369_s21 + $0x2e8] sm:$0xff] }
 0xc2c   :  { %7897 = vmatmul.mubr.f32.vlgmr.msra.gmra.mrb[112].mxu0 %v7580_v43  ;;  %8935 = vmatprep.subr.bf16.mxu1 %v8934_v44  ;;  %v8914_v44 = vpack.c.bf16 %v7699_v63, %v7698_v60  ;;  %v8954_v10 = vpack.c.bf16 %v7735_v50, %v7734_v39  ;;  %v7719_v43 = vld [vmem:[%s15369_s21 + $0x378] sm:$0xff]  ;;  %v8918_v8 = vpack.c.bf16 %v7701_v2, %v7700_v25  ;;  %v7756_v15 = vld [vmem:[%s15369_s21 + $0x4a0] sm:$0xff]  ;;  %v7757_v60 = vld [vmem:[%s15369_s21 + $0x4a8] sm:$0xff] }
 0xc2d   :  { %7901 = vmatprep.mubr.f32.mxu0 %v7595_v34  ;;  %8897 = vmatpush3.bf16.msra.mxu0 %v8896_v26  ;;  %v8952_v26 = vpack.c.bf16 %v7717_v3, %v7716_v53  ;;  %v7684_v34 = vld [vmem:[%s15369_s21 + $0x260] sm:$0xff]  ;;  %v7741_v3 = vld [vmem:[%s15369_s21 + $0x428] sm:$0xff]  ;;  %v7759_v39 = vld [vmem:[%s15369_s21 + $0x4b8] sm:$0xff] }
 0xc2e   :  { %8899 = vmatprep.subr.bf16.mxu0 %v8898_v58  ;;  %v7784_v58 = vld [vmem:[%s15369_s21 + $0x580] sm:$0xff]  ;;  %v8920_v61 = vpack.c.bf16 %v7685_v4, %v7684_v34  ;;  %v7743_v57 = vld [vmem:[%s15369_s21 + $0x438] sm:$0xff]  ;;  %v7761_v2 = vld [vmem:[%s15369_s21 + $0x4c8] sm:$0xff] }
 0xc2f   :  { %8937 = vmatpush3.bf16.msra.mxu1 %v8936_v35  ;;  %v7703_v35 = vld [vmem:[%s15369_s21 + $0x2f8] sm:$0xff]  ;;  %v8990_v42 = vpack.c.bf16 %v7785_v59, %v7784_v58  ;;  %v7740_v53 = vld [vmem:[%s15369_s21 + $0x420] sm:$0xff] }
 0xc30   :  { %7902 = vmatmul.mubr.f32.gmra.mrb[114].mxu0 %v7594_v9  ;;  %8939 = vmatprep.subr.bf16.mxu1 %v8938_v20  ;;  %v8956_v20 = vpack.c.bf16 %v7719_v43, %v7718_v32  ;;  %v7752_v9 = vld [vmem:[%s15369_s21 + $0x480] sm:$0xff]  ;;  %v8968_v50 = vpack.c.bf16 %v7741_v3, %v7740_v53  ;;  %v7745_v43 = vld [vmem:[%s15369_s21 + $0x448] sm:$0xff]  ;;  %v7763_v58 = vld [vmem:[%s15369_s21 + $0x4d8] sm:$0xff] }
 0xc31   :  { %8901 = vmatpush3.bf16.msra.mxu0 %v8900_v13  ;;  %v8922_v13 = vpack.c.bf16 %v7703_v35, %v7702_v0  ;;  %v7760_v25 = vld [vmem:[%s15369_s21 + $0x4c0] sm:$0xff]  ;;  %v7746_v35 = vld [vmem:[%s15369_s21 + $0x450] sm:$0xff] }
 0xc32   :  { %8903 = vmatprep.subr.bf16.mxu0 %v8902_v30  ;;  %v7753_v30 = vld [vmem:[%s15369_s21 + $0x488] sm:$0xff]  ;;  %v7744_v32 = vld [vmem:[%s15369_s21 + $0x440] sm:$0xff] }
 0xc33   :  { %8941 = vmatpush3.bf16.msra.mxu1 %v8940_v28  ;;  %v8958_v7 = vpack.c.bf16 %v7753_v30, %v7752_v9 }
 0xc34   :  { %8943 = vmatprep.subr.bf16.mxu1 %v8942_v52 }
 0xc35   :  { %8905 = vmatpush3.bf16.msra.mxu0 %v8904_v24 }
 0xc36   :  { %8907 = vmatprep.subr.bf16.mxu0 %v8906_v48  ;;  %v7737_v48 = vld [vmem:[%s15369_s21 + $0x408] sm:$0xff] }
 0xc37   :  { %8945 = vmatpush3.bf16.msra.mxu1 %v8944_v56  ;;  %v8960_v21 = vpack.c.bf16 %v7737_v48, %v7736_v16 }
 0xc38   :  { %8947 = vmatprep.subr.bf16.mxu1 %v8946_v37 }
 0xc39   :  { %8909 = vmatpush3.bf16.msra.mxu0 %v8908_v62 }
 0xc3a   :  { %8911 = vmatprep.subr.bf16.mxu0 %v8910_v46  ;;  %v7739_v46 = vld [vmem:[%s15369_s21 + $0x418] sm:$0xff] }
 0xc3b   :  { %8949 = vmatpush3.bf16.msra.mxu1 %v8948_v18  ;;  %v8964_v63 = vpack.c.bf16 %v7739_v46, %v7738_v19  ;;  %v7788_v19 = vld [vmem:[%s15369_s21 + $0x5a0] sm:$0xff]  ;;  %v7789_v46 = vld [vmem:[%s15369_s21 + $0x5a8] sm:$0xff] }
 0xc3c   :  { %8951 = vmatprep.subr.bf16.mxu1 %v8950_v6  ;;  %v8966_v6 = vpack.c.bf16 %v7757_v60, %v7756_v15  ;;  %v7750_v15 = vld [vmem:[%s15369_s21 + $0x470] sm:$0xff]  ;;  %v7751_v60 = vld [vmem:[%s15369_s21 + $0x478] sm:$0xff]  ;;  %v8998_v3 = vpack.c.bf16 %v7789_v46, %v7788_v19 }
 0xc3d   :  { %8913 = vmatpush3.bf16.msra.mxu0 %v8912_v17  ;;  %v7758_v17 = vld [vmem:[%s15369_s21 + $0x4b0] sm:$0xff] }
 0xc3e   :  { %8915 = vmatprep.subr.bf16.mxu0 %v8914_v44  ;;  %v8970_v44 = vpack.c.bf16 %v7759_v39, %v7758_v17  ;;  %v7772_v17 = vld [vmem:[%s15369_s21 + $0x520] sm:$0xff]  ;;  %v7773_v39 = vld [vmem:[%s15369_s21 + $0x528] sm:$0xff] }
 0xc3f   :  { %8953 = vmatpush3.bf16.msra.mxu1 %v8952_v26  ;;  %v8972_v26 = vpack.c.bf16 %v7743_v57, %v7742_v14  ;;  %v7791_v14 = vld [vmem:[%s15369_s21 + $0x5b8] sm:$0xff] }
 0xc40   :  { %8955 = vmatprep.subr.bf16.mxu1 %v8954_v10  ;;  %v8974_v10 = vpack.c.bf16 %v7761_v2, %v7760_v25  ;;  %v9000_v2 = vpack.c.bf16 %v7773_v39, %v7772_v17  ;;  %v7798_v39 = vld [vmem:[%s15369_s21 + $0x5f0] sm:$0xff] }
 0xc41   :  { %8917 = vmatpush3.bf16.msra.mxu0 %v8916_v29  ;;  %v7762_v29 = vld [vmem:[%s15369_s21 + $0x4d0] sm:$0xff] }
 0xc42   :  { %8919 = vmatprep.subr.bf16.mxu0 %v8918_v8  ;;  %v8976_v8 = vpack.c.bf16 %v7745_v43, %v7744_v32  ;;  %v8978_v0 = vpack.c.bf16 %v7763_v58, %v7762_v29  ;;  %v7774_v43 = vld [vmem:[%s15369_s21 + $0x530] sm:$0xff]  ;;  %v7775_v29 = vld [vmem:[%s15369_s21 + $0x538] sm:$0xff] }
 0xc43   :  { %8957 = vmatpush3.bf16.msra.mxu1 %v8956_v20  ;;  %v7747_v20 = vld [vmem:[%s15369_s21 + $0x458] sm:$0xff] }
 0xc44   :  { %8991 = vmatprep.subr.bf16.mxu1 %v8990_v42 }
 0xc45   :  { %8921 = vmatpush3.bf16.msra.mxu0 %v8920_v61 }
 0xc46   :  { %8923 = vmatprep.subr.bf16.mxu0 %v8922_v13  ;;  %v7764_v13 = vld [vmem:[%s15369_s21 + $0x4e0] sm:$0xff] }
 0xc47   :  { %v7319_v11 = vpop.f32.mrb[100].mxu1 }
 0xc48   :  { %v7504_v27 = vmax.f32 %v7319_v11, 0.0  ;;  %v7321_v28 = vpop.f32.mrb[101].mxu1 }
 0xc49   :  { %v7505_v52 = vmax.f32 %v7321_v28, 0.0  ;;  %v7323_v38 = vpop.f32.mrb[102].mxu1  ;;  %8925 = vmatpush3.bf16.msra.mxu0 %v8924_v1  ;;  %v7768_v1 = vld [vmem:[%s15369_s21 + $0x500] sm:$0xff]  ;;  %v8980_v28 = vpack.c.bf16 %v7747_v20, %v7746_v35 }
 0xc4a   :  { %v7544_v36 = vmul.f32 %v14796_v54, %v7504_v27  ;;  %v7518_v24 = vmax.f32 %v7323_v38, 0.0  ;;  %v7325_v45 = vpop.f32.mrb[103].mxu1  ;;  %8959 = vmatprep.subr.bf16.mxu0 %v8958_v7  ;;  %v7769_v7 = vld [vmem:[%s15369_s21 + $0x508] sm:$0xff]  ;;  %v7787_v38 = vld [vmem:[%s15369_s21 + $0x598] sm:$0xff]  ;;  %v7800_v20 = vld [vmem:[%s15369_s21 + $0x600] sm:$0xff] }
 0xc4b   :  { %v7545_v22 = vmul.f32 %v14796_v54, %v7505_v52  ;;  %v7519_v31 = vmax.f32 %v7325_v45, 0.0  ;;  %v7786_v52 = vld [vmem:[%s15369_s21 + $0x590] sm:$0xff]  ;;  %v7749_v45 = vld [vmem:[%s15369_s21 + $0x468] sm:$0xff]  ;;  %v8992_v51 = vpack.c.bf16 %v7769_v7, %v7768_v1  ;;  %v7776_v1 = vld [vmem:[%s15369_s21 + $0x540] sm:$0xff] }
 0xc4c   :  { %v7584_v55 = vadd.f32 %v14798_v40, %v7544_v36  ;;  %v7558_v62 = vmul.f32 %v14814_v5, %v7518_v24  ;;  %v8982_v36 = vpack.c.bf16 %v7765_v23, %v7764_v13  ;;  %v7748_v24 = vld [vmem:[%s15369_s21 + $0x460] sm:$0xff]  ;;  %v7818_v23 = vld [vmem:[%s15369_s21 + $0x690] sm:$0xff]  ;;  %v7777_v7 = vld [vmem:[%s15369_s21 + $0x548] sm:$0xff] }
 0xc4d   :  { %v7559_v56 = vmul.f32 %v14814_v5, %v7519_v31  ;;  %v7585_v37 = vadd.f32 %v14798_v40, %v7545_v22  ;;  %v7766_v22 = vld [vmem:[%s15369_s21 + $0x4f0] sm:$0xff]  ;;  %v7767_v31 = vld [vmem:[%s15369_s21 + $0x4f8] sm:$0xff] }
 0xc4e   :  { %v7598_v18 = vadd.f32 %v14818_v33, %v7558_v62 }
 0xc4f   :  { %8046 = vmatprep.mubr.f32.mxu0 %v7585_v37  ;;  %v7599_v12 = vadd.f32 %v14818_v33, %v7559_v56  ;;  %v8994_v37 = vpack.c.bf16 %v7787_v38, %v7786_v52  ;;  %v7794_v52 = vld [vmem:[%s15369_s21 + $0x5d0] sm:$0xff]  ;;  %v7795_v38 = vld [vmem:[%s15369_s21 + $0x5d8] sm:$0xff] }
 0xc50   :  { %8047 = vmatmul.mubr.f32.vlgmr.msra.gmra.mrb[116].mxu0 %v7584_v55  ;;  %v7771_v55 = vld [vmem:[%s15369_s21 + $0x518] sm:$0xff] }
 0xc51   :  { %8051 = vmatprep.mubr.f32.mxu0 %v7599_v12  ;;  %8961 = vmatpush3.bf16.msra.mxu0 %v8960_v21  ;;  %v7770_v21 = vld [vmem:[%s15369_s21 + $0x510] sm:$0xff]  ;;  %v8986_v12 = vpack.c.bf16 %v7767_v31, %v7766_v22  ;;  %v7820_v31 = vld [vmem:[%s15369_s21 + $0x6a0] sm:$0xff] }
 0xc52   :  { %8963 = vmatprep.subr.bf16.mxu0 %v8962_v41  ;;  %v8984_v41 = vpack.c.bf16 %v7749_v45, %v7748_v24 }
 0xc54   :  { %8052 = vmatmul.mubr.f32.gmra.mrb[118].mxu0 %v7598_v18  ;;  %v7817_v18 = vld [vmem:[%s15369_s21 + $0x688] sm:$0xff] }
 0xc55   :  { %8965 = vmatpush3.bf16.msra.mxu0 %v8964_v63  ;;  %v7816_v63 = vld [vmem:[%s15369_s21 + $0x680] sm:$0xff] }
 0xc56   :  { %8967 = vmatprep.subr.bf16.mxu0 %v8966_v6  ;;  %v8996_v6 = vpack.c.bf16 %v7771_v55, %v7770_v21  ;;  %v9022_v57 = vpack.c.bf16 %v7817_v18, %v7816_v63  ;;  %v7779_v21 = vld [vmem:[%s15369_s21 + $0x558] sm:$0xff] }
 0xc57   :  { %v7823_v63 = vld [vmem:[%s15369_s21 + $0x6b8] sm:$0xff] }
 0xc59   :  { %8969 = vmatpush3.bf16.msra.mxu0 %v8968_v50  ;;  %v8988_v50 = vpack.c.bf16 %v7751_v60, %v7750_v15  ;;  %v7805_v15 = vld [vmem:[%s15369_s21 + $0x628] sm:$0xff]  ;;  %v7822_v60 = vld [vmem:[%s15369_s21 + $0x6b0] sm:$0xff] }
 0xc5a   :  { %8971 = vmatprep.subr.bf16.mxu0 %v8970_v44  ;;  %v7790_v44 = vld [vmem:[%s15369_s21 + $0x5b0] sm:$0xff] }
 0xc5b   :  { %v9002_v32 = vpack.c.bf16 %v7791_v14, %v7790_v44  ;;  %v9034_v44 = vpack.c.bf16 %v7823_v63, %v7822_v60  ;;  %v7806_v14 = vld [vmem:[%s15369_s21 + $0x630] sm:$0xff] }
 0xc5d   :  { %v7362_v59 = vpop.f32.mrb[104].mxu0  ;;  %8973 = vmatpush3.bf16.msra.mxu0 %v8972_v26 }
 0xc5e   :  { %v7506_v34 = vmax.f32 %v7362_v59, 0.0  ;;  %v7364_v4 = vpop.f32.mrb[105].mxu0  ;;  %8975 = vmatprep.subr.bf16.mxu0 %v8974_v10 }
 0xc5f   :  { %v7507_v42 = vmax.f32 %v7364_v4, 0.0  ;;  %v7366_v61 = vpop.f32.mrb[106].mxu0 }
 0xc60   :  { %v7546_v47 = vmul.f32 %v14796_v54, %v7506_v34  ;;  %v7520_v9 = vmax.f32 %v7366_v61, 0.0  ;;  %v7368_v30 = vpop.f32.mrb[107].mxu0  ;;  %v7793_v34 = vld [vmem:[%s15369_s21 + $0x5c8] sm:$0xff] }
 0xc61   :  { %v7547_v11 = vmul.f32 %v14796_v54, %v7507_v42  ;;  %v7521_v27 = vmax.f32 %v7368_v30, 0.0  ;;  %8977 = vmatpush3.bf16.msra.mxu0 %v8976_v8  ;;  %v7792_v8 = vld [vmem:[%s15369_s21 + $0x5c0] sm:$0xff]  ;;  %v7801_v42 = vld [vmem:[%s15369_s21 + $0x608] sm:$0xff] }
 0xc62   :  { %8979 = vmatprep.subr.bf16.mxu0 %v8978_v0  ;;  %v7586_v49 = vadd.f32 %v14798_v40, %v7546_v47  ;;  %v7560_v56 = vmul.f32 %v14814_v5, %v7520_v9  ;;  %v7819_v47 = vld [vmem:[%s15369_s21 + $0x698] sm:$0xff]  ;;  %v9004_v9 = vpack.c.bf16 %v7775_v29, %v7774_v43  ;;  %v9006_v30 = vpack.c.bf16 %v7793_v34, %v7792_v8  ;;  %v7809_v8 = vld [vmem:[%s15369_s21 + $0x648] sm:$0xff]  ;;  %v7826_v34 = vld [vmem:[%s15369_s21 + $0x6d0] sm:$0xff] }
 0xc63   :  { %v7561_v16 = vmul.f32 %v14814_v5, %v7521_v27  ;;  %v7587_v48 = vadd.f32 %v14798_v40, %v7547_v11  ;;  %v9026_v45 = vpack.c.bf16 %v7819_v47, %v7818_v23  ;;  %v7783_v43 = vld [vmem:[%s15369_s21 + $0x578] sm:$0xff]  ;;  %v7829_v23 = vld [vmem:[%s15369_s21 + $0x6e8] sm:$0xff] }
 0xc64   :  { %v7600_v53 = vadd.f32 %v14818_v33, %v7560_v56  ;;  %v9010_v56 = vpack.c.bf16 %v7795_v38, %v7794_v52  ;;  %v7814_v52 = vld [vmem:[%s15369_s21 + $0x670] sm:$0xff]  ;;  %v7815_v38 = vld [vmem:[%s15369_s21 + $0x678] sm:$0xff] }
 0xc65   :  { %8121 = vmatprep.mubr.f32.mxu1 %v7587_v48  ;;  %v7601_v62 = vadd.f32 %v14818_v33, %v7561_v16  ;;  %8981 = vmatpush3.bf16.msra.mxu0 %v8980_v28  ;;  %v9024_v28 = vpack.c.bf16 %v7801_v42, %v7800_v20  ;;  %v7802_v16 = vld [vmem:[%s15369_s21 + $0x610] sm:$0xff]  ;;  %v7803_v48 = vld [vmem:[%s15369_s21 + $0x618] sm:$0xff] }
 0xc66   :  { %8122 = vmatmul.mubr.f32.vlgmr.msra.gmra.mrb[116].mxu1 %v7586_v49  ;;  %8983 = vmatprep.subr.bf16.mxu0 %v8982_v36  ;;  %v9008_v49 = vpack.c.bf16 %v7777_v7, %v7776_v1  ;;  %v9028_v55 = vpack.c.bf16 %v7803_v48, %v7802_v16  ;;  %v7810_v42 = vld [vmem:[%s15369_s21 + $0x650] sm:$0xff]  ;;  %v7813_v1 = vld [vmem:[%s15369_s21 + $0x668] sm:$0xff] }
 0xc67   :  { %8126 = vmatprep.mubr.f32.mxu1 %v7601_v62  ;;  %8993 = vmatpush3.bf16.msra.mxu1 %v8992_v51  ;;  %v7821_v51 = vld [vmem:[%s15369_s21 + $0x6a8] sm:$0xff]  ;;  %v7796_v62 = vld [vmem:[%s15369_s21 + $0x5e0] sm:$0xff]  ;;  %v7830_v7 = vld [vmem:[%s15369_s21 + $0x6f0] sm:$0xff] }
 0xc68   :  { %8995 = vmatprep.subr.bf16.mxu1 %v8994_v37  ;;  %v7778_v37 = vld [vmem:[%s15369_s21 + $0x550] sm:$0xff]  ;;  %v9030_v46 = vpack.c.bf16 %v7821_v51, %v7820_v31 }
 0xc69   :  { %8985 = vmatpush3.bf16.msra.mxu0 %v8984_v41  ;;  %v7797_v41 = vld [vmem:[%s15369_s21 + $0x5e8] sm:$0xff]  ;;  %v9012_v18 = vpack.c.bf16 %v7779_v21, %v7778_v37 }
 0xc6a   :  { %8127 = vmatmul.mubr.f32.gmra.mrb[118].mxu1 %v7600_v53  ;;  %8987 = vmatprep.subr.bf16.mxu0 %v8986_v12  ;;  %v7804_v12 = vld [vmem:[%s15369_s21 + $0x620] sm:$0xff] }
 0xc6b   :  { %v7405_v25 = vpop.f32.mrb[104].mxu1  ;;  %8997 = vmatpush3.bf16.msra.mxu1 %v8996_v6  ;;  %v9014_v6 = vpack.c.bf16 %v7797_v41, %v7796_v62  ;;  %v7780_v53 = vld [vmem:[%s15369_s21 + $0x560] sm:$0xff]  ;;  %v9032_v17 = vpack.c.bf16 %v7805_v15, %v7804_v12 }
 0xc6c   :  { %v7508_v26 = vmax.f32 %v7405_v25, 0.0  ;;  %v7407_v10 = vpop.f32.mrb[105].mxu1  ;;  %8999 = vmatprep.subr.bf16.mxu1 %v8998_v3  ;;  %v7781_v3 = vld [vmem:[%s15369_s21 + $0x568] sm:$0xff]  ;;  %v7824_v25 = vld [vmem:[%s15369_s21 + $0x6c0] sm:$0xff] }
 0xc6d   :  { %v7509_v58 = vmax.f32 %v7407_v10, 0.0  ;;  %v7409_v59 = vpop.f32.mrb[106].mxu1  ;;  %8989 = vmatpush3.bf16.msra.mxu0 %v8988_v50  ;;  %v7799_v50 = vld [vmem:[%s15369_s21 + $0x5f8] sm:$0xff] }
 0xc6e   :  { %v7548_v4 = vmul.f32 %v14796_v54, %v7508_v26  ;;  %v7522_v0 = vmax.f32 %v7409_v59, 0.0  ;;  %v7411_v35 = vpop.f32.mrb[107].mxu1  ;;  %9023 = vmatprep.subr.bf16.mxu0 %v9022_v57  ;;  %v7807_v57 = vld [vmem:[%s15369_s21 + $0x638] sm:$0xff]  ;;  %v9016_v26 = vpack.c.bf16 %v7781_v3, %v7780_v53  ;;  %v9018_v10 = vpack.c.bf16 %v7799_v50, %v7798_v39  ;;  %v7808_v59 = vld [vmem:[%s15369_s21 + $0x640] sm:$0xff] }
 0xc6f   :  { %v7549_v61 = vmul.f32 %v14796_v54, %v7509_v58  ;;  %v7523_v13 = vmax.f32 %v7411_v35, 0.0  ;;  %9001 = vmatpush3.bf16.msra.mxu1 %v9000_v2  ;;  %v7825_v2 = vld [vmem:[%s15369_s21 + $0x6c8] sm:$0xff]  ;;  %v9036_v29 = vpack.c.bf16 %v7807_v57, %v7806_v14  ;;  %v9040_v35 = vpack.c.bf16 %v7809_v8, %v7808_v59 }
 0xc70   :  { %9003 = vmatprep.subr.bf16.mxu1 %v9002_v32  ;;  %v7588_v36 = vadd.f32 %v14798_v40, %v7548_v4  ;;  %v7562_v24 = vmul.f32 %v14814_v5, %v7522_v0  ;;  %v7782_v32 = vld [vmem:[%s15369_s21 + $0x570] sm:$0xff]  ;;  %v9038_v58 = vpack.c.bf16 %v7825_v2, %v7824_v25  ;;  %v7827_v4 = vld [vmem:[%s15369_s21 + $0x6d8] sm:$0xff] }
 0xc71   :  { %v7563_v11 = vmul.f32 %v14814_v5, %v7523_v13  ;;  %v7589_v27 = vadd.f32 %v14798_v40, %v7549_v61  ;;  %v9020_v0 = vpack.c.bf16 %v7783_v43, %v7782_v32  ;;  %v9042_v20 = vpack.c.bf16 %v7827_v4, %v7826_v34  ;;  %v7811_v61 = vld [vmem:[%s15369_s21 + $0x658] sm:$0xff]  ;;  %v7828_v13 = vld [vmem:[%s15369_s21 + $0x6e0] sm:$0xff] }
 0xc72   :  { %v7602_v19 = vadd.f32 %v14818_v33, %v7562_v24  ;;  %v9044_v47 = vpack.c.bf16 %v7811_v61, %v7810_v42 }
 0xc73   :  { %8196 = vmatprep.mubr.f32.mxu0 %v7589_v27  ;;  %v7603_v22 = vadd.f32 %v14818_v33, %v7563_v11  ;;  %9005 = vmatpush3.bf16.msra.mxu1 %v9004_v9  ;;  %v9046_v9 = vpack.c.bf16 %v7829_v23, %v7828_v13  ;;  %v7831_v11 = vld [vmem:[%s15369_s21 + $0x6f8] sm:$0xff] }
 0xc74   :  { %8197 = vmatmul.mubr.f32.vlgmr.msra.gmra.mrb[120].mxu0 %v7588_v36  ;;  %9007 = vmatprep.subr.bf16.mxu1 %v9006_v30  ;;  %v7812_v30 = vld [vmem:[%s15369_s21 + $0x660] sm:$0xff]  ;;  %v9052_v36 = vpack.c.bf16 %v7815_v38, %v7814_v52 }
 0xc75   :  { %8201 = vmatprep.mubr.f32.mxu0 %v7603_v22  ;;  %9025 = vmatpush3.bf16.msra.mxu0 %v9024_v28  ;;  %v9048_v27 = vpack.c.bf16 %v7813_v1, %v7812_v30  ;;  %v9050_v28 = vpack.c.bf16 %v7831_v11, %v7830_v7 }
 0xc76   :  { %9027 = vmatprep.subr.bf16.mxu0 %v9026_v45 }
 0xc77   :  { %9009 = vmatpush3.bf16.msra.mxu1 %v9008_v49 }
 0xc78   :  { %8202 = vmatmul.mubr.f32.gmra.mrb[122].mxu0 %v7602_v19  ;;  %9011 = vmatprep.subr.bf16.mxu1 %v9010_v56 }
 0xc79   :  { %9029 = vmatpush3.bf16.msra.mxu0 %v9028_v55 }
 0xc7a   :  { %9031 = vmatprep.subr.bf16.mxu0 %v9030_v46 }
 0xc7b   :  { %9013 = vmatpush3.bf16.msra.mxu1 %v9012_v18 }
 0xc7c   :  { %9015 = vmatprep.subr.bf16.mxu1 %v9014_v6 }
 0xc7d   :  { %9033 = vmatpush3.bf16.msra.mxu0 %v9032_v17 }
 0xc7e   :  { %9035 = vmatprep.subr.bf16.mxu0 %v9034_v44 }
 0xc7f   :  { %9017 = vmatpush3.bf16.msra.mxu1 %v9016_v26 }
 0xc80   :  { %9019 = vmatprep.subr.bf16.mxu1 %v9018_v10  ;;  %v8357_v10 = vld [vmem:[%s15370_s22] sm:$0xff] }
 0xc81   :  { %9037 = vmatpush3.bf16.msra.mxu0 %v9036_v29 }
 0xc82   :  { %9039 = vmatprep.subr.bf16.mxu0 %v9038_v58 }
 0xc83   :  { %9021 = vmatpush3.bf16.msra.mxu1 %v9020_v0 }
 0xc85   :  { %9041 = vmatpush3.bf16.msra.mxu0 %v9040_v35 }
 0xc86   :  { %9043 = vmatprep.subr.bf16.mxu0 %v9042_v20 }
 0xc89   :  { %9045 = vmatpush3.bf16.msra.mxu0 %v9044_v47 }
 0xc8a   :  { %9047 = vmatprep.subr.bf16.mxu0 %v9046_v9 }
 0xc8d   :  { %9049 = vmatpush3.bf16.msra.mxu0 %v9048_v27 }
 0xc8e   :  { %9051 = vmatprep.subr.bf16.mxu0 %v9050_v28 }
 0xc91   :  { %v7448_v24 = vpop.f32.mrb[108].mxu0  ;;  %v7491_v45 = vpop.f32.mrb[108].mxu1  ;;  %9053 = vmatpush3.bf16.msra.mxu0 %v9052_v36 }
 0xc92   :  { %v7510_v16 = vmax.f32 %v7448_v24, 0.0  ;;  %v7512_v48 = vmax.f32 %v7491_v45, 0.0  ;;  %v7450_v22 = vpop.f32.mrb[109].mxu0  ;;  %v7493_v31 = vpop.f32.mrb[109].mxu1 }
 0xc93   :  { %v7511_v51 = vmax.f32 %v7450_v22, 0.0  ;;  %v7513_v49 = vmax.f32 %v7493_v31, 0.0  ;;  %v7452_v56 = vpop.f32.mrb[110].mxu0  ;;  %v7495_v37 = vpop.f32.mrb[110].mxu1 }
 0xc94   :  { %v7550_v21 = vmul.f32 %v14796_v54, %v7510_v16  ;;  %v7552_v55 = vmul.f32 %v14796_v54, %v7512_v48  ;;  %v7524_v62 = vmax.f32 %v7452_v56, 0.0  ;;  %v7526_v41 = vmax.f32 %v7495_v37, 0.0  ;;  %v7454_v19 = vpop.f32.mrb[111].mxu0  ;;  %v7497_v46 = vpop.f32.mrb[111].mxu1 }
 0xc95   :  { %v7551_v12 = vmul.f32 %v14796_v54, %v7511_v51  ;;  %v7553_v15 = vmul.f32 %v14796_v54, %v7513_v49  ;;  %v7525_v60 = vmax.f32 %v7454_v19, 0.0  ;;  %v7527_v63 = vmax.f32 %v7497_v46, 0.0 }
 0xc96   :  { %v7590_v17 = vadd.f32 %v14798_v40, %v7550_v21  ;;  %v7592_v39 = vadd.f32 %v14798_v40, %v7552_v55  ;;  %v7564_v50 = vmul.f32 %v14814_v5, %v7524_v62  ;;  %v7566_v44 = vmul.f32 %v14814_v5, %v7526_v41 }
 0xc97   :  { %v7565_v18 = vmul.f32 %v14814_v5, %v7525_v60  ;;  %v7567_v6 = vmul.f32 %v14814_v5, %v7527_v63  ;;  %v7591_v53 = vadd.f32 %v14798_v40, %v7551_v12  ;;  %v7593_v3 = vadd.f32 %v14798_v40, %v7553_v15 }
 0xc98   :  { %v7604_v57 = vadd.f32 %v14818_v33, %v7564_v50  ;;  %v7606_v25 = vadd.f32 %v14818_v33, %v7566_v44 }
 0xc99   :  { %8271 = vmatprep.mubr.f32.mxu1 %v7591_v53  ;;  %8346 = vmatprep.mubr.f32.mxu0 %v7593_v3  ;;  %v7605_v54 = vadd.f32 %v14818_v33, %v7565_v18  ;;  %v7607_v14 = vadd.f32 %v14818_v33, %v7567_v6 }
 0xc9a   :  { %8272 = vmatmul.mubr.f32.vlgmr.msra.gmra.mrb[120].mxu1 %v7590_v17  ;;  %8347 = vmatmul.mubr.f32.vlgmr.msra.gmra.mrb[124].mxu0 %v7592_v39  ;;  %v8358_v17 = vld [vmem:[%s15370_s22 + $0x8] sm:$0x3] }
 0xc9b   :  { %8276 = vmatprep.mubr.f32.mxu1 %v7605_v54  ;;  %8351 = vmatprep.mubr.f32.mxu0 %v7607_v14 }
 0xc9e   :  { %8277 = vmatmul.mubr.f32.gmra.mrb[122].mxu1 %v7604_v57  ;;  %8352 = vmatmul.mubr.f32.gmra.mrb[126].mxu0 %v7606_v25 }
 0xc9f   :  { %8827 = vmatprep.mubr.msk.f32.mxu1 %vm2126_vm15, %v8357_v10 }
 0xcf9   :  { %v8623_v40 = vpop.f32.mrb[112].mxu1 }
 0xcfa   :  { %v8624_v2 = vpop.f32.mrb[113].mxu1 }
 0xcfb   :  { %v8625_v26 = vadd.f32 %v8624_v2, %v8623_v40 }
 0xcfd   :  { %v8626_v5 = vpop.f32.mrb[114].mxu1 }
 0xcfe   :  { %v8627_v32 = vpop.f32.mrb[115].mxu1 }
 0xcff   :  { %v8628_v43 = vadd.f32 %v8627_v32, %v8626_v5  ;;  %v8585_v29 = vpop.f32.mrb[112].mxu0 }
 0xd00   :  { %v8586_v58 = vpop.f32.mrb[113].mxu0 }
 0xd01   :  { %v8587_v59 = vadd.f32 %v8586_v58, %v8585_v29 }
 0xd03   :  { %v7974_v8 = vadd.f32 %v8625_v26, %v8587_v59  ;;  %v8588_v34 = vpop.f32.mrb[114].mxu0 }
 0xd04   :  { %v8589_v33 = vpop.f32.mrb[115].mxu0 }
 0xd05   :  { %v8590_v4 = vadd.f32 %v8589_v33, %v8588_v34 }
 0xd07   :  { %v7979_v0 = vadd.f32 %v8628_v43, %v8590_v4 }
 0xd23   :  { %v8661_v35 = vpop.f32.mrb[116].mxu0 }
 0xd24   :  { %v8662_v20 = vpop.f32.mrb[117].mxu0 }
 0xd25   :  { %v8663_v42 = vadd.f32 %v8662_v20, %v8661_v35 }
 0xd27   :  { %v8049_v61 = vadd.f32 %v8663_v42, %v7974_v8  ;;  %v8664_v13 = vpop.f32.mrb[118].mxu0 }
 0xd28   :  { %v8665_v23 = vpop.f32.mrb[119].mxu0 }
 0xd29   :  { %v8666_v47 = vadd.f32 %v8665_v23, %v8664_v13 }
 0xd2b   :  { %v8054_v9 = vadd.f32 %v8666_v47, %v7979_v0 }
 0xd39   :  { %v8699_v30 = vpop.f32.mrb[116].mxu1 }
 0xd3a   :  { %v8700_v1 = vpop.f32.mrb[117].mxu1 }
 0xd3b   :  { %v8701_v7 = vadd.f32 %v8700_v1, %v8699_v30 }
 0xd3d   :  { %v8124_v11 = vadd.f32 %v8701_v7, %v8049_v61  ;;  %v8702_v27 = vpop.f32.mrb[118].mxu1 }
 0xd3e   :  { %v8703_v28 = vpop.f32.mrb[119].mxu1 }
 0xd3f   :  { %v8704_v52 = vadd.f32 %v8703_v28, %v8702_v27 }
 0xd41   :  { %v8129_v38 = vadd.f32 %v8704_v52, %v8054_v9 }
 0xd47   :  { %v8737_v36 = vpop.f32.mrb[120].mxu0 }
 0xd48   :  { %v8738_v24 = vpop.f32.mrb[121].mxu0 }
 0xd49   :  { %v8739_v45 = vadd.f32 %v8738_v24, %v8737_v36 }
 0xd4b   :  { %v8199_v16 = vadd.f32 %v8739_v45, %v8124_v11  ;;  %v8740_v48 = vpop.f32.mrb[122].mxu0 }
 0xd4c   :  { %v8741_v22 = vpop.f32.mrb[123].mxu0 }
 0xd4d   :  { %v8742_v31 = vadd.f32 %v8741_v22, %v8740_v48 }
 0xd4f   :  { %v8204_v51 = vadd.f32 %v8742_v31, %v8129_v38 }
 0xd6d   :  { %v8775_v49 = vpop.f32.mrb[120].mxu1  ;;  %v8813_v56 = vpop.f32.mrb[124].mxu0 }
 0xd6e   :  { %v8776_v37 = vpop.f32.mrb[121].mxu1  ;;  %v8814_v21 = vpop.f32.mrb[125].mxu0 }
 0xd6f   :  { %v8777_v55 = vadd.f32 %v8776_v37, %v8775_v49  ;;  %v8815_v62 = vadd.f32 %v8814_v21, %v8813_v56 }
 0xd71   :  { %v8274_v41 = vadd.f32 %v8777_v55, %v8199_v16  ;;  %v8778_v19 = vpop.f32.mrb[122].mxu1  ;;  %v8816_v46 = vpop.f32.mrb[126].mxu0 }
 0xd72   :  { %v8779_v12 = vpop.f32.mrb[123].mxu1  ;;  %v8817_v15 = vpop.f32.mrb[127].mxu0 }
 0xd73   :  { %v8349_v60 = vadd.f32 %v8815_v62, %v8274_v41  ;;  %v8780_v63 = vadd.f32 %v8779_v12, %v8778_v19  ;;  %v8818_v18 = vadd.f32 %v8817_v15, %v8816_v46 }
 0xd75   :  { %v8279_v6 = vadd.f32 %v8780_v63, %v8204_v51 }
 0xd77   :  { %v8354_v53 = vadd.f32 %v8818_v18, %v8279_v6 }
 0xd79   :  { %v9054_v3 = vpack.c.bf16 %v8354_v53, %v8349_v60 }
 0xd7b   :  { %9055 = vmatprep.subr.bf16.mxu1 %v9054_v3 }
 0xd7c   :  { %9057 = vmatpush3.bf16.msra.mxu1 %v9054_v3 }
 0xd7f   :  { %8828 = vmatmul.mubr.msk.f32.vlgmr.msra.gmra.mrb[124].mxu1 %vm2126_vm15, %v8358_v17 }
 0xe52   :  { %v8829_v39 = vpop.f32.mrb[124].mxu1 }
 0xe53   :  { %v8442_v50 = vsel %vm8441_vm10, %v8829_v39, -inf  ;;  %v8431_v44 = vpop.f32.mrb[125].mxu1 }
 0xe54   :  { %v8440_v54 = vsel %vm6919_vm9, %v8431_v44, -inf }
 0xe55   :  { %v8443_v14 = vmax.f32 %v8440_v54, %v8442_v50 }
 0xe57   :  { %v8444_v57 = vrot.slane %v8443_v14, 4 }
 0xe59   :  { %v8445_v25 = vmax.f32 %v8443_v14, %v8444_v57 }
 0xe5b   :  { %v8446_v40 = vrot.slane %v8445_v25, 2 }
 0xe5d   :  { %v8447_v2 = vmax.f32 %v8445_v25, %v8446_v40 }
 0xe5f   :  { %v8448_v26 = vrot.slane %v8447_v2, 1 }
 0xe61   :  { %v8449_v5 = vmax.f32 %v8447_v2, %v8448_v26 }
 0xe63   :  { %v8450_v10 = vsub.f32 %v8431_v44, %v8449_v5  ;;  %v8451_v32 = vsub.f32 %v8829_v39, %v8449_v5 }
 0xe65   :  { %v8452_v43 = vmul.f32 1.442695, %v8450_v10  ;;  %v8454_v29 = vmul.f32 1.442695, %v8451_v32 }
 0xe67   :  { %9311 = vpow2.f32 %v8452_v43 }
 0xe68   :  { %9313 = vpow2.f32 %v8454_v29 }
 0xe71   :  { %v9312_v58 = vpop.eup %9311 }
 0xe72   :  { %v9314_v59 = vpop.eup %9313  ;;  %v8456_v8 = vsel %vm6919_vm9, %v9312_v58, 0.0 }
 0xe73   :  { %v8457_v34 = vsel %vm8441_vm10, %v9314_v59, 0.0 }
 0xe74   :  { %v8458_v33 = vadd.f32 %v8457_v34, %v8456_v8 }
 0xe76   :  { %v8459_v4 = vrot.slane %v8458_v33, 4 }
 0xe78   :  { %v8460_v0 = vadd.f32 %v8459_v4, %v8458_v33 }
 0xe7a   :  { %v8461_v35 = vrot.slane %v8460_v0, 2 }
 0xe7c   :  { %v8462_v20 = vadd.f32 %v8461_v35, %v8460_v0 }
 0xe7e   :  { %v8463_v42 = vrot.slane %v8462_v20, 1 }
 0xe80   :  { %v8464_v61 = vadd.f32 %v8463_v42, %v8462_v20 }
 0xe82   :  { %9315 = vlog2.f32 %v8464_v61 }
 0xe8c   :  { %v9316_v13 = vpop.eup %9315 }
 0xe8d   :  { %v8466_v23 = vmul.f32 0.6931472, %v9316_v13 }
 0xe8f   :  { %v8467_v47 = vsub.f32 %v8450_v10, %v8466_v23  ;;  %v8468_v9 = vsub.f32 %v8451_v32, %v8466_v23 }
 0xe91   :  { %8469 = vst.msk [vmem:[%s15371_s23] sm:$0xff] %vm6919_vm9, %v8467_v47 }
 0xe92   :  { %8470 = vst.msk [vmem:[%s15371_s23 + $0x8] sm:$0x3] %vm8441_vm10, %v8468_v9 }

</bundles_post_ra>
